<compile_context>
chip_gen: v5e
topology: v5e:2x2
jax: 0.10.0
libtpu: 0.0.40
codegen_flags: <defaults>
</compile_context>

<pallas_src>
import math

import jax
import jax.numpy as jnp
from jax.experimental import pallas as pl
from jax.experimental.pallas import tpu as pltpu


def _soft_sign(v, k):
    # e2efold soft_sign: 1 / (1 + exp(-2*k*v)) == sigmoid(2*k*v)
    return jax.nn.sigmoid(2.0 * k * v)


def _make_lag_pp_zero_kernel(steps, k, s, rho, alpha0, beta0, lr_decay):
    """Build the kernel with all hyper-parameters baked in as compile-time constants."""

    def kernel(u_ref, x_ref, xT_ref, o_ref):
        L = u_ref.shape[1]
        u0 = u_ref[0]                                        # (L, L) f32

        # ---- constraint matrix m(x): AU + UA + CG + GC + UG + GU outer products ----
        a_c = x_ref[0, :, 0:1]; u_c = x_ref[0, :, 1:2]       # (L, 1) base columns
        c_c = x_ref[0, :, 2:3]; g_c = x_ref[0, :, 3:4]
        a_r = xT_ref[0, 0:1, :]; u_r = xT_ref[0, 1:2, :]     # (1, L) base rows
        c_r = xT_ref[0, 2:3, :]; g_r = xT_ref[0, 3:4, :]
        m = (a_c * u_r + u_c * a_r
             + c_c * g_r + g_c * c_r
             + u_c * g_r + g_c * u_r)
        # zero the 7-diagonal band |i - j| <= 3 (scipy.sparse.diags mask equivalent)
        row = jax.lax.broadcasted_iota(jnp.int32, (L, L), 0)
        col = jax.lax.broadcasted_iota(jnp.int32, (L, L), 1)
        m = jnp.where(jnp.abs(row - col) <= 3, 0.0, m)

        # ---- initialization (pre-loop part of the PyTorch forward) ----
        uu = _soft_sign(u0 - s, k) * u0
        a_hat = jax.nn.sigmoid(uu) * _soft_sign(uu - s, k)   # .detach() is a no-op in fwd
        ah2 = a_hat * a_hat
        a = 0.5 * (ah2 + ah2.T) * m
        lmbd = jnp.maximum(jnp.sum(a, axis=-1, keepdims=True) - 1.0, 0.0)   # (L, 1)

        # ---- unrolled Lagrangian update steps ----
        alpha = alpha0
        beta = beta0
        for t in range(steps):
            row_sum = jnp.sum(a, axis=-1, keepdims=True)
            grad_a = -0.5 * uu + lmbd * _soft_sign(row_sum - 1.0, k)
            grad = a_hat * m * (grad_a + grad_a.T)
            a_hat = a_hat - alpha * grad
            alpha = alpha * lr_decay                 # decayed BEFORE the soft-threshold,
            a_hat = jnp.maximum(jnp.abs(a_hat) - rho * alpha, 0.0)   # exactly as in PyTorch
            a_hat = jnp.clip(a_hat, -1.0, 1.0)
            ah2 = a_hat * a_hat
            a = 0.5 * (ah2 + ah2.T) * m
            lmbd_grad = jnp.maximum(jnp.sum(a, axis=-1, keepdims=True) - 1.0, 0.0)
            lmbd = lmbd + beta * lmbd_grad
            beta = beta * lr_decay
            o_ref[0, t] = a.astype(o_ref.dtype)

    return kernel


def lag_pp_zero_pallas(u, x, *, steps, k, s=math.log(9.0), rho=1.0,
                       alpha0=0.01, beta0=0.1, lr_decay=0.99):
    """Pallas implementation of Lag_PP_zero.forward (single forward pass).

    u: (B, L, L) utility matrix, x: (B, L, 4) base encoding.
    Returns a list of `steps` contact maps, each (B, L, L)  == a_t_list[1:].
    """
    B, L, _ = u.shape
    u = u.astype(jnp.float32)
    x = x.astype(jnp.float32)
    xT = jnp.transpose(x, (0, 2, 1))                 # (B, 4, L): lane-dense base rows

    kernel = _make_lag_pp_zero_kernel(int(steps), float(k), float(s), float(rho),
                                      float(alpha0), float(beta0), float(lr_decay))

    out = pl.pallas_call(
        kernel,
        out_shape=jax.ShapeDtypeStruct((B, steps, L, L), jnp.float32),
        grid=(B,),
        in_specs=[
            pl.BlockSpec((1, L, L), lambda b: (b, 0, 0)),      # u
            pl.BlockSpec((1, L, 4), lambda b: (b, 0, 0)),      # x  (base columns)
            pl.BlockSpec((1, 4, L), lambda b: (b, 0, 0)),      # x^T (base rows)
        ],
        out_specs=pl.BlockSpec((1, steps, L, L), lambda b: (b, 0, 0, 0)),
        compiler_params=pltpu.CompilerParams(
            dimension_semantics=("parallel",)),                # batch across TCs on v7x
    )(u, x, xT)

    return [out[:, t] for t in range(steps)]


def lag_pp_zero_reference(u, x, *, steps, k, s=math.log(9.0), rho=1.0,
                          alpha0=0.01, beta0=0.1, lr_decay=0.99):
    """Pure-JAX reference matching the PyTorch forward."""
    def soft_sign(v):
        return jax.nn.sigmoid(2.0 * k * v)

    def contact_a(a_hat, m):
        a2 = a_hat * a_hat
        a2 = 0.5 * (a2 + jnp.swapaxes(a2, -1, -2))
        return a2 * m

    B, L, _ = u.shape
    ba, bu, bc, bg = x[..., 0], x[..., 1], x[..., 2], x[..., 3]

    def outer(p, q):
        return p[:, :, None] * q[:, None, :]

    au = outer(ba, bu); cg = outer(bc, bg); ug = outer(bu, bg)
    m = (au + jnp.swapaxes(au, -1, -2)
         + cg + jnp.swapaxes(cg, -1, -2)
         + ug + jnp.swapaxes(ug, -1, -2))
    idx = jnp.arange(L)
    band = jnp.abs(idx[:, None] - idx[None, :]) <= 3
    m = jnp.where(band[None], 0.0, m)

    uu = soft_sign(u - s) * u
    a_hat = jax.nn.sigmoid(uu) * soft_sign(uu - s)
    a = contact_a(a_hat, m)
    lmbd = jnp.maximum(jnp.sum(a, -1) - 1.0, 0.0)

    alpha, beta = alpha0, beta0
    outs = []
    for _ in range(steps):
        grad_a = -0.5 * uu + (lmbd * soft_sign(jnp.sum(a, -1) - 1.0))[..., None]
        grad = a_hat * m * (grad_a + jnp.swapaxes(grad_a, -1, -2))
        a_hat = a_hat - alpha * grad
        alpha *= lr_decay
        a_hat = jnp.maximum(jnp.abs(a_hat) - rho * alpha, 0.0)
        a_hat = jnp.clip(a_hat, -1.0, 1.0)
        a = contact_a(a_hat, m)
        lmbd = lmbd + beta * jnp.maximum(jnp.sum(a, -1) - 1.0, 0.0)
        beta *= lr_decay
        outs.append(a)
    return outs


if __name__ == "__main__":
    key = jax.random.PRNGKey(0)
    ku, kx = jax.random.split(key)

    B, L, STEPS, K = 2, 128, 4, 1.0       # small shapes; L lane-aligned (multiple of 128)
    u = 3.0 * jax.random.normal(ku, (B, L, L), jnp.float32)
    base_idx = jax.random.randint(kx, (B, L), 0, 4)
    x = jax.nn.one_hot(base_idx, 4, dtype=jnp.float32)   # (B, L, 4) one-hot sequence

    outs = lag_pp_zero_pallas(u, x, steps=STEPS, k=K)
    outs = [jax.block_until_ready(o) for o in outs]
    refs = lag_pp_zero_reference(u, x, steps=STEPS, k=K)

    assert len(outs) == STEPS
    for t, (o, r) in enumerate(zip(outs, refs)):
        assert o.shape == (B, L, L)
        max_err = float(jnp.max(jnp.abs(o - r)))
        assert max_err < 1e-4, f"step {t}: mismatch vs reference, max abs err = {max_err}"
    print("KERNEL_OK")
</pallas_src>

<mosaic_0001>
module attributes {stable_mosaic.version = 11 : i64} {
  func.func @kernel(%arg0: i32, %arg1: memref<1x128x128xf32, #tpu.memory_space<vmem>>, %arg2: memref<1x128x4xf32, #tpu.memory_space<vmem>>, %arg3: memref<1x4x128xf32, #tpu.memory_space<vmem>>, %arg4: memref<1x4x128x128xf32, #tpu.memory_space<vmem>>) attributes {dimension_semantics = [#tpu.dimension_semantics<parallel>], iteration_bounds = array<i64: 2>, scalar_prefetch = 0 : i64, scratch_operands = 0 : i64, tpu.core_type = #tpu.core_type<tc>, window_params = [{transform_indices = @transform_0, window_bounds = array<i64: 1, 128, 128>}, {transform_indices = @transform_1, window_bounds = array<i64: 1, 128, 4>}, {transform_indices = @transform_2, window_bounds = array<i64: 1, 4, 128>}, {transform_indices = @transform_3, window_bounds = array<i64: 1, 4, 128, 128>}]} {
    %c0 = arith.constant 0 : index
    %c0_0 = arith.constant 0 : index
    %c0_1 = arith.constant 0 : index
    %0 = vector.load %arg1[%c0, %c0_0, %c0_1] : memref<1x128x128xf32, #tpu.memory_space<vmem>>, vector<1x128x128xf32>
    %1 = vector.shape_cast %0 : vector<1x128x128xf32> to vector<128x128xf32>
    %c0_2 = arith.constant 0 : index
    %c0_3 = arith.constant 0 : index
    %c0_4 = arith.constant 0 : index
    %2 = vector.load %arg2[%c0_2, %c0_3, %c0_4] : memref<1x128x4xf32, #tpu.memory_space<vmem>>, vector<1x128x1xf32>
    %3 = vector.shape_cast %2 : vector<1x128x1xf32> to vector<128x1xf32>
    %c0_5 = arith.constant 0 : index
    %c0_6 = arith.constant 0 : index
    %c1 = arith.constant 1 : index
    %4 = vector.load %arg2[%c0_5, %c0_6, %c1] : memref<1x128x4xf32, #tpu.memory_space<vmem>>, vector<1x128x1xf32>
    %5 = vector.shape_cast %4 : vector<1x128x1xf32> to vector<128x1xf32>
    %c0_7 = arith.constant 0 : index
    %c0_8 = arith.constant 0 : index
    %c2 = arith.constant 2 : index
    %6 = vector.load %arg2[%c0_7, %c0_8, %c2] : memref<1x128x4xf32, #tpu.memory_space<vmem>>, vector<1x128x1xf32>
    %7 = vector.shape_cast %6 : vector<1x128x1xf32> to vector<128x1xf32>
    %c0_9 = arith.constant 0 : index
    %c0_10 = arith.constant 0 : index
    %c3 = arith.constant 3 : index
    %8 = vector.load %arg2[%c0_9, %c0_10, %c3] : memref<1x128x4xf32, #tpu.memory_space<vmem>>, vector<1x128x1xf32>
    %9 = vector.shape_cast %8 : vector<1x128x1xf32> to vector<128x1xf32>
    %c0_11 = arith.constant 0 : index
    %c0_12 = arith.constant 0 : index
    %c0_13 = arith.constant 0 : index
    %10 = vector.load %arg3[%c0_11, %c0_12, %c0_13] : memref<1x4x128xf32, #tpu.memory_space<vmem>>, vector<1x1x128xf32>
    %11 = vector.shape_cast %10 : vector<1x1x128xf32> to vector<1x128xf32>
    %c0_14 = arith.constant 0 : index
    %c1_15 = arith.constant 1 : index
    %c0_16 = arith.constant 0 : index
    %12 = vector.load %arg3[%c0_14, %c1_15, %c0_16] : memref<1x4x128xf32, #tpu.memory_space<vmem>>, vector<1x1x128xf32>
    %13 = vector.shape_cast %12 : vector<1x1x128xf32> to vector<1x128xf32>
    %c0_17 = arith.constant 0 : index
    %c2_18 = arith.constant 2 : index
    %c0_19 = arith.constant 0 : index
    %14 = vector.load %arg3[%c0_17, %c2_18, %c0_19] : memref<1x4x128xf32, #tpu.memory_space<vmem>>, vector<1x1x128xf32>
    %15 = vector.shape_cast %14 : vector<1x1x128xf32> to vector<1x128xf32>
    %c0_20 = arith.constant 0 : index
    %c3_21 = arith.constant 3 : index
    %c0_22 = arith.constant 0 : index
    %16 = vector.load %arg3[%c0_20, %c3_21, %c0_22] : memref<1x4x128xf32, #tpu.memory_space<vmem>>, vector<1x1x128xf32>
    %17 = vector.shape_cast %16 : vector<1x1x128xf32> to vector<1x128xf32>
    %18 = vector.broadcast %3 : vector<128x1xf32> to vector<128x128xf32>
    %19 = vector.broadcast %13 : vector<1x128xf32> to vector<128x128xf32>
    %20 = arith.mulf %18, %19 : vector<128x128xf32>
    %21 = vector.broadcast %5 : vector<128x1xf32> to vector<128x128xf32>
    %22 = vector.broadcast %11 : vector<1x128xf32> to vector<128x128xf32>
    %23 = arith.mulf %21, %22 : vector<128x128xf32>
    %24 = arith.addf %20, %23 : vector<128x128xf32>
    %25 = vector.broadcast %7 : vector<128x1xf32> to vector<128x128xf32>
    %26 = vector.broadcast %17 : vector<1x128xf32> to vector<128x128xf32>
    %27 = arith.mulf %25, %26 : vector<128x128xf32>
    %28 = arith.addf %24, %27 : vector<128x128xf32>
    %29 = vector.broadcast %9 : vector<128x1xf32> to vector<128x128xf32>
    %30 = vector.broadcast %15 : vector<1x128xf32> to vector<128x128xf32>
    %31 = arith.mulf %29, %30 : vector<128x128xf32>
    %32 = arith.addf %28, %31 : vector<128x128xf32>
    %33 = vector.broadcast %5 : vector<128x1xf32> to vector<128x128xf32>
    %34 = vector.broadcast %17 : vector<1x128xf32> to vector<128x128xf32>
    %35 = arith.mulf %33, %34 : vector<128x128xf32>
    %36 = arith.addf %32, %35 : vector<128x128xf32>
    %37 = vector.broadcast %9 : vector<128x1xf32> to vector<128x128xf32>
    %38 = vector.broadcast %13 : vector<1x128xf32> to vector<128x128xf32>
    %39 = arith.mulf %37, %38 : vector<128x128xf32>
    %40 = arith.addf %36, %39 : vector<128x128xf32>
    %41 = tpu.iota {dimensions = array<i32: 0>} : vector<128x128xi32>
    %42 = tpu.iota {dimensions = array<i32: 1>} : vector<128x128xi32>
    %43 = arith.subi %41, %42 : vector<128x128xi32>
    %44 = math.absi %43 : vector<128x128xi32>
    %c3_i32 = arith.constant 3 : i32
    %45 = vector.broadcast %c3_i32 : i32 to vector<128x128xi32>
    %46 = arith.cmpi sle, %44, %45 : vector<128x128xi32>
    %cst = arith.constant 0.000000e+00 : f32
    %47 = vector.broadcast %cst : f32 to vector<128x128xf32>
    %48 = arith.select %46, %47, %40 : vector<128x128xi1>, vector<128x128xf32>
    %cst_23 = arith.constant 2.19722462 : f32
    %49 = vector.broadcast %cst_23 : f32 to vector<128x128xf32>
    %50 = arith.subf %1, %49 : vector<128x128xf32>
    %cst_24 = arith.constant 2.000000e+00 : f32
    %51 = vector.broadcast %cst_24 : f32 to vector<128x128xf32>
    %52 = arith.mulf %51, %50 : vector<128x128xf32>
    %53 = arith.negf %52 : vector<128x128xf32>
    %54 = math.exp %53 : vector<128x128xf32>
    %cst_25 = arith.constant 1.000000e+00 : f32
    %55 = vector.broadcast %cst_25 : f32 to vector<128x128xf32>
    %56 = arith.addf %55, %54 : vector<128x128xf32>
    %57 = arith.divf %55, %56 : vector<128x128xf32>
    %58 = arith.mulf %57, %1 : vector<128x128xf32>
    %59 = arith.negf %58 : vector<128x128xf32>
    %60 = math.exp %59 : vector<128x128xf32>
    %cst_26 = arith.constant 1.000000e+00 : f32
    %61 = vector.broadcast %cst_26 : f32 to vector<128x128xf32>
    %62 = arith.addf %61, %60 : vector<128x128xf32>
    %63 = arith.divf %61, %62 : vector<128x128xf32>
    %cst_27 = arith.constant 2.19722462 : f32
    %64 = vector.broadcast %cst_27 : f32 to vector<128x128xf32>
    %65 = arith.subf %58, %64 : vector<128x128xf32>
    %cst_28 = arith.constant 2.000000e+00 : f32
    %66 = vector.broadcast %cst_28 : f32 to vector<128x128xf32>
    %67 = arith.mulf %66, %65 : vector<128x128xf32>
    %68 = arith.negf %67 : vector<128x128xf32>
    %69 = math.exp %68 : vector<128x128xf32>
    %cst_29 = arith.constant 1.000000e+00 : f32
    %70 = vector.broadcast %cst_29 : f32 to vector<128x128xf32>
    %71 = arith.addf %70, %69 : vector<128x128xf32>
    %72 = arith.divf %70, %71 : vector<128x128xf32>
    %73 = arith.mulf %63, %72 : vector<128x128xf32>
    %74 = arith.mulf %73, %73 : vector<128x128xf32>
    %75 = tpu.transpose %74, [1, 0] : vector<128x128xf32> -> vector<128x128xf32>
    %76 = arith.addf %74, %75 : vector<128x128xf32>
    %cst_30 = arith.constant 5.000000e-01 : f32
    %77 = vector.broadcast %cst_30 : f32 to vector<128x128xf32>
    %78 = arith.mulf %77, %76 : vector<128x128xf32>
    %79 = arith.mulf %78, %48 : vector<128x128xf32>
    %cst_31 = arith.constant dense<0.000000e+00> : vector<128xf32>
    %80 = vector.multi_reduction <add>, %79, %cst_31 [1] : vector<128x128xf32> to vector<128xf32>
    %81 = vector.shape_cast %80 : vector<128xf32> to vector<128x1xf32>
    %cst_32 = arith.constant 1.000000e+00 : f32
    %82 = vector.broadcast %cst_32 : f32 to vector<128x1xf32>
    %83 = arith.subf %81, %82 : vector<128x1xf32>
    %cst_33 = arith.constant 0.000000e+00 : f32
    %84 = vector.broadcast %cst_33 : f32 to vector<128x1xf32>
    %85 = arith.maximumf %83, %84 : vector<128x1xf32>
    %cst_34 = arith.constant dense<0.000000e+00> : vector<128xf32>
    %86 = vector.multi_reduction <add>, %79, %cst_34 [1] : vector<128x128xf32> to vector<128xf32>
    %87 = vector.shape_cast %86 : vector<128xf32> to vector<128x1xf32>
    %cst_35 = arith.constant -5.000000e-01 : f32
    %88 = vector.broadcast %cst_35 : f32 to vector<128x128xf32>
    %89 = arith.mulf %88, %58 : vector<128x128xf32>
    %cst_36 = arith.constant 1.000000e+00 : f32
    %90 = vector.broadcast %cst_36 : f32 to vector<128x1xf32>
    %91 = arith.subf %87, %90 : vector<128x1xf32>
    %cst_37 = arith.constant 2.000000e+00 : f32
    %92 = vector.broadcast %cst_37 : f32 to vector<128x1xf32>
    %93 = arith.mulf %92, %91 : vector<128x1xf32>
    %94 = arith.negf %93 : vector<128x1xf32>
    %95 = math.exp %94 : vector<128x1xf32>
    %cst_38 = arith.constant 1.000000e+00 : f32
    %96 = vector.broadcast %cst_38 : f32 to vector<128x1xf32>
    %97 = arith.addf %96, %95 : vector<128x1xf32>
    %98 = arith.divf %96, %97 : vector<128x1xf32>
    %99 = arith.mulf %85, %98 : vector<128x1xf32>
    %100 = vector.broadcast %99 : vector<128x1xf32> to vector<128x128xf32>
    %101 = arith.addf %89, %100 : vector<128x128xf32>
    %102 = arith.mulf %73, %48 : vector<128x128xf32>
    %103 = tpu.transpose %101, [1, 0] : vector<128x128xf32> -> vector<128x128xf32>
    %104 = arith.addf %101, %103 : vector<128x128xf32>
    %105 = arith.mulf %102, %104 : vector<128x128xf32>
    %cst_39 = arith.constant 0.00999999977 : f32
    %106 = vector.broadcast %cst_39 : f32 to vector<128x128xf32>
    %107 = arith.mulf %106, %105 : vector<128x128xf32>
    %108 = arith.subf %73, %107 : vector<128x128xf32>
    %109 = math.absf %108 : vector<128x128xf32>
    %cst_40 = arith.constant 0.00989999994 : f32
    %110 = vector.broadcast %cst_40 : f32 to vector<128x128xf32>
    %111 = arith.subf %109, %110 : vector<128x128xf32>
    %cst_41 = arith.constant 0.000000e+00 : f32
    %112 = vector.broadcast %cst_41 : f32 to vector<128x128xf32>
    %113 = arith.maximumf %111, %112 : vector<128x128xf32>
    %cst_42 = arith.constant -1.000000e+00 : f32
    %cst_43 = arith.constant 1.000000e+00 : f32
    %114 = vector.broadcast %cst_42 : f32 to vector<128x128xf32>
    %115 = arith.maximumf %114, %113 : vector<128x128xf32>
    %116 = vector.broadcast %cst_43 : f32 to vector<128x128xf32>
    %117 = arith.minimumf %116, %115 : vector<128x128xf32>
    %118 = arith.mulf %117, %117 : vector<128x128xf32>
    %119 = tpu.transpose %118, [1, 0] : vector<128x128xf32> -> vector<128x128xf32>
    %120 = arith.addf %118, %119 : vector<128x128xf32>
    %cst_44 = arith.constant 5.000000e-01 : f32
    %121 = vector.broadcast %cst_44 : f32 to vector<128x128xf32>
    %122 = arith.mulf %121, %120 : vector<128x128xf32>
    %123 = arith.mulf %122, %48 : vector<128x128xf32>
    %cst_45 = arith.constant dense<0.000000e+00> : vector<128xf32>
    %124 = vector.multi_reduction <add>, %123, %cst_45 [1] : vector<128x128xf32> to vector<128xf32>
    %125 = vector.shape_cast %124 : vector<128xf32> to vector<128x1xf32>
    %cst_46 = arith.constant 1.000000e+00 : f32
    %126 = vector.broadcast %cst_46 : f32 to vector<128x1xf32>
    %127 = arith.subf %125, %126 : vector<128x1xf32>
    %cst_47 = arith.constant 0.000000e+00 : f32
    %128 = vector.broadcast %cst_47 : f32 to vector<128x1xf32>
    %129 = arith.maximumf %127, %128 : vector<128x1xf32>
    %cst_48 = arith.constant 1.000000e-01 : f32
    %130 = vector.broadcast %cst_48 : f32 to vector<128x1xf32>
    %131 = arith.mulf %130, %129 : vector<128x1xf32>
    %132 = arith.addf %85, %131 : vector<128x1xf32>
    %c0_49 = arith.constant 0 : index
    %c0_50 = arith.constant 0 : index
    %c0_51 = arith.constant 0 : index
    %c0_52 = arith.constant 0 : index
    %133 = vector.load %arg4[%c0_49, %c0_50, %c0_51, %c0_52] : memref<1x4x128x128xf32, #tpu.memory_space<vmem>>, vector<1x1x128x128xf32>
    %134 = vector.shape_cast %133 : vector<1x1x128x128xf32> to vector<128x128xf32>
    %135 = vector.shape_cast %123 : vector<128x128xf32> to vector<1x1x128x128xf32>
    tpu.vector_store %arg4[%c0_49, %c0_50, %c0_51, %c0_52], %135 {strides = array<i32>} : memref<1x4x128x128xf32, #tpu.memory_space<vmem>>, vector<1x1x128x128xf32>,
    %cst_53 = arith.constant dense<0.000000e+00> : vector<128xf32>
    %136 = vector.multi_reduction <add>, %123, %cst_53 [1] : vector<128x128xf32> to vector<128xf32>
    %137 = vector.shape_cast %136 : vector<128xf32> to vector<128x1xf32>
    %cst_54 = arith.constant -5.000000e-01 : f32
    %138 = vector.broadcast %cst_54 : f32 to vector<128x128xf32>
    %139 = arith.mulf %138, %58 : vector<128x128xf32>
    %cst_55 = arith.constant 1.000000e+00 : f32
    %140 = vector.broadcast %cst_55 : f32 to vector<128x1xf32>
    %141 = arith.subf %137, %140 : vector<128x1xf32>
    %cst_56 = arith.constant 2.000000e+00 : f32
    %142 = vector.broadcast %cst_56 : f32 to vector<128x1xf32>
    %143 = arith.mulf %142, %141 : vector<128x1xf32>
    %144 = arith.negf %143 : vector<128x1xf32>
    %145 = math.exp %144 : vector<128x1xf32>
    %cst_57 = arith.constant 1.000000e+00 : f32
    %146 = vector.broadcast %cst_57 : f32 to vector<128x1xf32>
    %147 = arith.addf %146, %145 : vector<128x1xf32>
    %148 = arith.divf %146, %147 : vector<128x1xf32>
    %149 = arith.mulf %132, %148 : vector<128x1xf32>
    %150 = vector.broadcast %149 : vector<128x1xf32> to vector<128x128xf32>
    %151 = arith.addf %139, %150 : vector<128x128xf32>
    %152 = arith.mulf %117, %48 : vector<128x128xf32>
    %153 = tpu.transpose %151, [1, 0] : vector<128x128xf32> -> vector<128x128xf32>
    %154 = arith.addf %151, %153 : vector<128x128xf32>
    %155 = arith.mulf %152, %154 : vector<128x128xf32>
    %cst_58 = arith.constant 0.00989999994 : f32
    %156 = vector.broadcast %cst_58 : f32 to vector<128x128xf32>
    %157 = arith.mulf %156, %155 : vector<128x128xf32>
    %158 = arith.subf %117, %157 : vector<128x128xf32>
    %159 = math.absf %158 : vector<128x128xf32>
    %cst_59 = arith.constant 9.801000e-03 : f32
    %160 = vector.broadcast %cst_59 : f32 to vector<128x128xf32>
    %161 = arith.subf %159, %160 : vector<128x128xf32>
    %cst_60 = arith.constant 0.000000e+00 : f32
    %162 = vector.broadcast %cst_60 : f32 to vector<128x128xf32>
    %163 = arith.maximumf %161, %162 : vector<128x128xf32>
    %cst_61 = arith.constant -1.000000e+00 : f32
    %cst_62 = arith.constant 1.000000e+00 : f32
    %164 = vector.broadcast %cst_61 : f32 to vector<128x128xf32>
    %165 = arith.maximumf %164, %163 : vector<128x128xf32>
    %166 = vector.broadcast %cst_62 : f32 to vector<128x128xf32>
    %167 = arith.minimumf %166, %165 : vector<128x128xf32>
    %168 = arith.mulf %167, %167 : vector<128x128xf32>
    %169 = tpu.transpose %168, [1, 0] : vector<128x128xf32> -> vector<128x128xf32>
    %170 = arith.addf %168, %169 : vector<128x128xf32>
    %cst_63 = arith.constant 5.000000e-01 : f32
    %171 = vector.broadcast %cst_63 : f32 to vector<128x128xf32>
    %172 = arith.mulf %171, %170 : vector<128x128xf32>
    %173 = arith.mulf %172, %48 : vector<128x128xf32>
    %cst_64 = arith.constant dense<0.000000e+00> : vector<128xf32>
    %174 = vector.multi_reduction <add>, %173, %cst_64 [1] : vector<128x128xf32> to vector<128xf32>
    %175 = vector.shape_cast %174 : vector<128xf32> to vector<128x1xf32>
    %cst_65 = arith.constant 1.000000e+00 : f32
    %176 = vector.broadcast %cst_65 : f32 to vector<128x1xf32>
    %177 = arith.subf %175, %176 : vector<128x1xf32>
    %cst_66 = arith.constant 0.000000e+00 : f32
    %178 = vector.broadcast %cst_66 : f32 to vector<128x1xf32>
    %179 = arith.maximumf %177, %178 : vector<128x1xf32>
    %cst_67 = arith.constant 0.0989999994 : f32
    %180 = vector.broadcast %cst_67 : f32 to vector<128x1xf32>
    %181 = arith.mulf %180, %179 : vector<128x1xf32>
    %182 = arith.addf %132, %181 : vector<128x1xf32>
    %c0_68 = arith.constant 0 : index
    %c1_69 = arith.constant 1 : index
    %c0_70 = arith.constant 0 : index
    %c0_71 = arith.constant 0 : index
    %183 = vector.load %arg4[%c0_68, %c1_69, %c0_70, %c0_71] : memref<1x4x128x128xf32, #tpu.memory_space<vmem>>, vector<1x1x128x128xf32>
    %184 = vector.shape_cast %183 : vector<1x1x128x128xf32> to vector<128x128xf32>
    %185 = vector.shape_cast %173 : vector<128x128xf32> to vector<1x1x128x128xf32>
    tpu.vector_store %arg4[%c0_68, %c1_69, %c0_70, %c0_71], %185 {strides = array<i32>} : memref<1x4x128x128xf32, #tpu.memory_space<vmem>>, vector<1x1x128x128xf32>,
    %cst_72 = arith.constant dense<0.000000e+00> : vector<128xf32>
    %186 = vector.multi_reduction <add>, %173, %cst_72 [1] : vector<128x128xf32> to vector<128xf32>
    %187 = vector.shape_cast %186 : vector<128xf32> to vector<128x1xf32>
    %cst_73 = arith.constant -5.000000e-01 : f32
    %188 = vector.broadcast %cst_73 : f32 to vector<128x128xf32>
    %189 = arith.mulf %188, %58 : vector<128x128xf32>
    %cst_74 = arith.constant 1.000000e+00 : f32
    %190 = vector.broadcast %cst_74 : f32 to vector<128x1xf32>
    %191 = arith.subf %187, %190 : vector<128x1xf32>
    %cst_75 = arith.constant 2.000000e+00 : f32
    %192 = vector.broadcast %cst_75 : f32 to vector<128x1xf32>
    %193 = arith.mulf %192, %191 : vector<128x1xf32>
    %194 = arith.negf %193 : vector<128x1xf32>
    %195 = math.exp %194 : vector<128x1xf32>
    %cst_76 = arith.constant 1.000000e+00 : f32
    %196 = vector.broadcast %cst_76 : f32 to vector<128x1xf32>
    %197 = arith.addf %196, %195 : vector<128x1xf32>
    %198 = arith.divf %196, %197 : vector<128x1xf32>
    %199 = arith.mulf %182, %198 : vector<128x1xf32>
    %200 = vector.broadcast %199 : vector<128x1xf32> to vector<128x128xf32>
    %201 = arith.addf %189, %200 : vector<128x128xf32>
    %202 = arith.mulf %167, %48 : vector<128x128xf32>
    %203 = tpu.transpose %201, [1, 0] : vector<128x128xf32> -> vector<128x128xf32>
    %204 = arith.addf %201, %203 : vector<128x128xf32>
    %205 = arith.mulf %202, %204 : vector<128x128xf32>
    %cst_77 = arith.constant 9.801000e-03 : f32
    %206 = vector.broadcast %cst_77 : f32 to vector<128x128xf32>
    %207 = arith.mulf %206, %205 : vector<128x128xf32>
    %208 = arith.subf %167, %207 : vector<128x128xf32>
    %209 = math.absf %208 : vector<128x128xf32>
    %cst_78 = arith.constant 0.00970298983 : f32
    %210 = vector.broadcast %cst_78 : f32 to vector<128x128xf32>
    %211 = arith.subf %209, %210 : vector<128x128xf32>
    %cst_79 = arith.constant 0.000000e+00 : f32
    %212 = vector.broadcast %cst_79 : f32 to vector<128x128xf32>
    %213 = arith.maximumf %211, %212 : vector<128x128xf32>
    %cst_80 = arith.constant -1.000000e+00 : f32
    %cst_81 = arith.constant 1.000000e+00 : f32
    %214 = vector.broadcast %cst_80 : f32 to vector<128x128xf32>
    %215 = arith.maximumf %214, %213 : vector<128x128xf32>
    %216 = vector.broadcast %cst_81 : f32 to vector<128x128xf32>
    %217 = arith.minimumf %216, %215 : vector<128x128xf32>
    %218 = arith.mulf %217, %217 : vector<128x128xf32>
    %219 = tpu.transpose %218, [1, 0] : vector<128x128xf32> -> vector<128x128xf32>
    %220 = arith.addf %218, %219 : vector<128x128xf32>
    %cst_82 = arith.constant 5.000000e-01 : f32
    %221 = vector.broadcast %cst_82 : f32 to vector<128x128xf32>
    %222 = arith.mulf %221, %220 : vector<128x128xf32>
    %223 = arith.mulf %222, %48 : vector<128x128xf32>
    %cst_83 = arith.constant dense<0.000000e+00> : vector<128xf32>
    %224 = vector.multi_reduction <add>, %223, %cst_83 [1] : vector<128x128xf32> to vector<128xf32>
    %225 = vector.shape_cast %224 : vector<128xf32> to vector<128x1xf32>
    %cst_84 = arith.constant 1.000000e+00 : f32
    %226 = vector.broadcast %cst_84 : f32 to vector<128x1xf32>
    %227 = arith.subf %225, %226 : vector<128x1xf32>
    %cst_85 = arith.constant 0.000000e+00 : f32
    %228 = vector.broadcast %cst_85 : f32 to vector<128x1xf32>
    %229 = arith.maximumf %227, %228 : vector<128x1xf32>
    %cst_86 = arith.constant 9.801000e-02 : f32
    %230 = vector.broadcast %cst_86 : f32 to vector<128x1xf32>
    %231 = arith.mulf %230, %229 : vector<128x1xf32>
    %232 = arith.addf %182, %231 : vector<128x1xf32>
    %c0_87 = arith.constant 0 : index
    %c2_88 = arith.constant 2 : index
    %c0_89 = arith.constant 0 : index
    %c0_90 = arith.constant 0 : index
    %233 = vector.load %arg4[%c0_87, %c2_88, %c0_89, %c0_90] : memref<1x4x128x128xf32, #tpu.memory_space<vmem>>, vector<1x1x128x128xf32>
    %234 = vector.shape_cast %233 : vector<1x1x128x128xf32> to vector<128x128xf32>
    %235 = vector.shape_cast %223 : vector<128x128xf32> to vector<1x1x128x128xf32>
    tpu.vector_store %arg4[%c0_87, %c2_88, %c0_89, %c0_90], %235 {strides = array<i32>} : memref<1x4x128x128xf32, #tpu.memory_space<vmem>>, vector<1x1x128x128xf32>,
    %cst_91 = arith.constant dense<0.000000e+00> : vector<128xf32>
    %236 = vector.multi_reduction <add>, %223, %cst_91 [1] : vector<128x128xf32> to vector<128xf32>
    %237 = vector.shape_cast %236 : vector<128xf32> to vector<128x1xf32>
    %cst_92 = arith.constant -5.000000e-01 : f32
    %238 = vector.broadcast %cst_92 : f32 to vector<128x128xf32>
    %239 = arith.mulf %238, %58 : vector<128x128xf32>
    %cst_93 = arith.constant 1.000000e+00 : f32
    %240 = vector.broadcast %cst_93 : f32 to vector<128x1xf32>
    %241 = arith.subf %237, %240 : vector<128x1xf32>
    %cst_94 = arith.constant 2.000000e+00 : f32
    %242 = vector.broadcast %cst_94 : f32 to vector<128x1xf32>
    %243 = arith.mulf %242, %241 : vector<128x1xf32>
    %244 = arith.negf %243 : vector<128x1xf32>
    %245 = math.exp %244 : vector<128x1xf32>
    %cst_95 = arith.constant 1.000000e+00 : f32
    %246 = vector.broadcast %cst_95 : f32 to vector<128x1xf32>
    %247 = arith.addf %246, %245 : vector<128x1xf32>
    %248 = arith.divf %246, %247 : vector<128x1xf32>
    %249 = arith.mulf %232, %248 : vector<128x1xf32>
    %250 = vector.broadcast %249 : vector<128x1xf32> to vector<128x128xf32>
    %251 = arith.addf %239, %250 : vector<128x128xf32>
    %252 = arith.mulf %217, %48 : vector<128x128xf32>
    %253 = tpu.transpose %251, [1, 0] : vector<128x128xf32> -> vector<128x128xf32>
    %254 = arith.addf %251, %253 : vector<128x128xf32>
    %255 = arith.mulf %252, %254 : vector<128x128xf32>
    %cst_96 = arith.constant 0.00970298983 : f32
    %256 = vector.broadcast %cst_96 : f32 to vector<128x128xf32>
    %257 = arith.mulf %256, %255 : vector<128x128xf32>
    %258 = arith.subf %217, %257 : vector<128x128xf32>
    %259 = math.absf %258 : vector<128x128xf32>
    %cst_97 = arith.constant 9.605960e-03 : f32
    %260 = vector.broadcast %cst_97 : f32 to vector<128x128xf32>
    %261 = arith.subf %259, %260 : vector<128x128xf32>
    %cst_98 = arith.constant 0.000000e+00 : f32
    %262 = vector.broadcast %cst_98 : f32 to vector<128x128xf32>
    %263 = arith.maximumf %261, %262 : vector<128x128xf32>
    %cst_99 = arith.constant -1.000000e+00 : f32
    %cst_100 = arith.constant 1.000000e+00 : f32
    %264 = vector.broadcast %cst_99 : f32 to vector<128x128xf32>
    %265 = arith.maximumf %264, %263 : vector<128x128xf32>
    %266 = vector.broadcast %cst_100 : f32 to vector<128x128xf32>
    %267 = arith.minimumf %266, %265 : vector<128x128xf32>
    %268 = arith.mulf %267, %267 : vector<128x128xf32>
    %269 = tpu.transpose %268, [1, 0] : vector<128x128xf32> -> vector<128x128xf32>
    %270 = arith.addf %268, %269 : vector<128x128xf32>
    %cst_101 = arith.constant 5.000000e-01 : f32
    %271 = vector.broadcast %cst_101 : f32 to vector<128x128xf32>
    %272 = arith.mulf %271, %270 : vector<128x128xf32>
    %273 = arith.mulf %272, %48 : vector<128x128xf32>
    %c0_102 = arith.constant 0 : index
    %c3_103 = arith.constant 3 : index
    %c0_104 = arith.constant 0 : index
    %c0_105 = arith.constant 0 : index
    %274 = vector.load %arg4[%c0_102, %c3_103, %c0_104, %c0_105] : memref<1x4x128x128xf32, #tpu.memory_space<vmem>>, vector<1x1x128x128xf32>
    %275 = vector.shape_cast %274 : vector<1x1x128x128xf32> to vector<128x128xf32>
    %276 = vector.shape_cast %273 : vector<128x128xf32> to vector<1x1x128x128xf32>
    tpu.vector_store %arg4[%c0_102, %c3_103, %c0_104, %c0_105], %276 {strides = array<i32>} : memref<1x4x128x128xf32, #tpu.memory_space<vmem>>, vector<1x1x128x128xf32>,
    return
  }
  func.func @transform_0(%arg0: i32) -> (i32, i32, i32) {
    %c0_i32 = arith.constant 0 : i32
    %c0_i32_0 = arith.constant 0 : i32
    %c0_i32_1 = arith.constant 0 : i32
    return %arg0, %c0_i32, %c0_i32_0 : i32, i32, i32
  }
  func.func @transform_1(%arg0: i32) -> (i32, i32, i32) {
    %c0_i32 = arith.constant 0 : i32
    %c0_i32_0 = arith.constant 0 : i32
    %c0_i32_1 = arith.constant 0 : i32
    return %arg0, %c0_i32, %c0_i32_0 : i32, i32, i32
  }
  func.func @transform_2(%arg0: i32) -> (i32, i32, i32) {
    %c0_i32 = arith.constant 0 : i32
    %c0_i32_0 = arith.constant 0 : i32
    %c0_i32_1 = arith.constant 0 : i32
    return %arg0, %c0_i32, %c0_i32_0 : i32, i32, i32
  }
  func.func @transform_3(%arg0: i32) -> (i32, i32, i32, i32) {
    %c0_i32 = arith.constant 0 : i32
    %c0_i32_0 = arith.constant 0 : i32
    %c0_i32_1 = arith.constant 0 : i32
    %c0_i32_2 = arith.constant 0 : i32
    return %arg0, %c0_i32, %c0_i32_0, %c0_i32_1 : i32, i32, i32, i32
  }
}

</mosaic_0001>

<bundles_post_ra>
// kernel: tpu_custom_call.1
= control target key start
LH: loop header
LB: loop body
LE: loop exit
PB: predicated region body
PF: predicated region fallthrough
CT: control target
= control target key end

     0   :  { %8 = vsyncpa [#allocation3], 0  ;;  %s9584_s0 = inlined_call_operand.vmem [shape: f32[2,128,128], index: 0, kind: input, shape index: {}]   ;;  %s9585_s1 = inlined_call_operand.vmem [shape: f32[2,128,4], index: 1, kind: input, shape index: {}]   ;;  %s9586_s2 = inlined_call_operand.vmem [shape: f32[2,4,128], index: 2, kind: input, shape index: {}]   ;;  %s9587_s3 = inlined_call_operand.hbm [shape: f32[2,4,128,128], index: 3, kind: output, shape index: {}]  }
   0x1   :  { %10 = vsyncpa [#allocation3 + $0x1], 0  ;;  %s6024_s12 = smov 0   ;;  %s6026_s13 = smov 0  }
   0x2   :  { %s6028_s14 = smov 0   ;;  %s6030_s15 = smov 0  }
   0x3 LB: > { %s6045_s16 = sadd.s32 4294967295, %s5996_s15   ;;  %s5010_s17 = sadd.s32 4294967294, %s5996_s15   ;;  %s5996_s15 = sphi %s6030_s15, %s10221_s15   ;;  %s5992_s14 = sphi %s6028_s14, %s10220_s14   ;;  %s5988_s13 = sphi %s6026_s13, %s10219_s13   ;;  %s5984_s12 = sphi %s6024_s12, %s10218_s12  }
   0x4   : > { %s6049_s18 = sadd.s32 1, %s5996_s15   ;;  %s101_s19 = sadd.s32 1, %s5992_s14 }
   0x5   : > { %s98_s20 = ssub.s32 %s5996_s15, %s6049_s18  ;;  %p111_p0 = scmp.ne.s32.totalorder %s5992_s14, %s5988_s13 }
   0x6   : > { %p99_p1 = scmp.eq.s32.totalorder %s98_s20, 0  ;;  %p112_p2 = scmp.eq.s32.totalorder %s6045_s16, 1 }
   0x7   : > { %p117_p3 = scmp.ne.s32.totalorder %s5988_s13, %s5984_s12  ;;  %p118_p4 = scmp.eq.s32.totalorder %s5010_s17, 1 }
   0x8   : > { %s6060_s21 = scalar_select %p99_p1, %s5992_s14, %s101_s19  }
   0x9   : > { %p6062_p5 = por %p112_p2, %p111_p0  ;;  %p6066_p6 = por %p118_p4, %p117_p3 }
   0xa   : > { %p5013_p7 = scmp.ge.s32.totalorder %s5996_s15, 1  ;;  %p159_p8 = scmp.lt.s32.totalorder %s5996_s15, 3 }
   0xc   : > { %p160_p9 = pnand %p5013_p7, %p159_p8 }
   0xe   : > { %163 = sbr.rel (%p160_p9) target bundleno = 2683 (0xa7b), region = 32 }
  0x13   : > { %p192_p10 = scmp.lt.s32.totalorder %s6045_s16, 1  ;;  %v5998_v0 = vmov 0   ;;  %v5999_v16 = vmov 1   ;;  %v9588_v18 = vmov 2   ;;  %v9589_v24 = vmov 3   ;;  %s189_s9 = sand.u32 1, %s5988_s13  }
  0x14   : > { %5459 = vset.pattern.permute.xlu2 %v5998_v0  ;;  %5458 = vset.pattern.permute.xlu1 %v5998_v0  ;;  %s5014_s10 = sshll.u32 %s189_s9, 9  ;;  %s5411_s17 = sshll.u32 %s6045_s16, 9 }
  0x15   : > { %5457 = vset.pattern.permute.xlu0 %v5998_v0  ;;  %s6074_s24 = scalar_select %p192_p10, %s6045_s16, 1 }
  0x16   : > { %s7988_s11 = scalar_lea.vmem [#allocation2], %s5014_s10  ;;  %s4909_s16 = scalar_lea.sflag [#allocation3], %s189_s9 }
  0x17   : > { %s5409_s25 = sshll.u32 %s6074_s24, 7  ;;  %s5019_s26 = sshll.u32 %s6074_s24, 2 }
  0x18   : > { %s6083_s29 = scalar_lea.vmem %s9585_s1, %s5409_s25  ;;  %s6088_s5 = scalar_lea.vmem %s9586_s2, %s5019_s26 }
  0x19   : > { %v6091_v1 = vld [vmem:[%s6083_s29 + $0x20] sm:$0xff]  ;;  %v6095_v2 = vld [vmem:[%s6083_s29 + $0x10] sm:$0xff]  ;;  %v6103_v4 = vld [vmem:[%s6083_s29 + $0x28] sm:$0xff]  ;;  %s6184_s8 = scalar_lea.vmem %s9584_s0, %s5409_s25  ;;  %s4920_s24 = scalar_lea.hbm %s9587_s3, %s5411_s17 }
  0x1a   : > { %264 = vperm.xlu2 %5459, %v6091_v1   ;;  %v6098_v3 = vld [vmem:[%s6083_s29] sm:$0xff]  ;;  %254 = vperm.xlu1 %5458, %v6095_v2   ;;  %v6107_v5 = vld [vmem:[%s6083_s29 + $0x18] sm:$0xff]  ;;  %v6110_v6 = vld [vmem:[%s6083_s29 + $0x8] sm:$0xff]  ;;  %s4921_s25 = sshll.u32 %s7988_s11, 4  ;;  %s4923_s26 = sshll.u32 %s4920_s24, 4  ;;  %s4922_s25 = int_to_ptr.vmem [resolvable:$true] %s4921_s25  ;;  %s4924_s26 = int_to_ptr.hbm [resolvable:$true] %s4923_s26 }
  0x1b   : > { %244 = vperm.xlu0 %5457, %v6098_v3   ;;  %v6115_v7 = vld [vmem:[%s6083_s29 + $0x40] sm:$0xff]  ;;  %v6119_v8 = vld [vmem:[%s6083_s29 + $0x38] sm:$0xff]  ;;  %v6122_v9 = vld [vmem:[%s6083_s29 + $0x30] sm:$0xff]  ;;  %s5948_s27 = sshra.s32 %s4924_s26, 4  ;;  %s5954_s4 = scalar_lea.hbm %s9587_s3, 1024  ;;  %s5949_s27 = int_to_ptr.hbm [resolvable:$true] %s5948_s27 }
  0x1c   : > { %v6127_v10 = vld [vmem:[%s6083_s29 + $0x58] sm:$0xff]  ;;  %v6131_v11 = vld [vmem:[%s6083_s29 + $0x50] sm:$0xff]  ;;  %v6134_v12 = vld [vmem:[%s6083_s29 + $0x48] sm:$0xff]  ;;  %s5950_s28 = scalar_lea.hbm %s5949_s27, 512  ;;  %p5955_p0 = scmp.lt.s32.totalorder %s5949_s27, %s9587_s3 }
  0x1d   : > { %v6139_v13 = vld [vmem:[%s6083_s29 + $0x70] sm:$0xff]  ;;  %v6143_v14 = vld [vmem:[%s6083_s29 + $0x68] sm:$0xff]  ;;  %v6146_v15 = vld [vmem:[%s6083_s29 + $0x60] sm:$0xff]  ;;  %p5951_p11 = scmp.ne.s32.totalorder %s5949_s27, %s5950_s28  ;;  %p5956_p1 = scmp.lt.s32.totalorder %s5954_s4, %s5950_s28 }
  0x1e   : > { %v6151_v17 = vld [vmem:[%s6083_s29 + $0x78] sm:$0xff]  ;;  %v6192_v21 = vld [vmem:[%s6184_s8] sm:$0xff]  ;;  %v6202_v27 = vld [vmem:[%s6184_s8 + $0x8] sm:$0xff] }
  0x1f   : > { %v5020_v22 = vadd.f32 -2.1972246, %v6192_v21  ;;  %v6205_v28 = vld [vmem:[%s6184_s8 + $0x10] sm:$0xff]  ;;  %v5021_v29 = vadd.f32 -2.1972246, %v6202_v27  ;;  %p5952_p12 = pnand %p5951_p11, %p6062_p5  ;;  %p5957_p2 = por %p5956_p1, %p5955_p0 }
  0x20   : > { %v5022_v30 = vadd.f32 -2.1972246, %v6205_v28 }
  0x21   : > { %v5036_v23 = vmul.f32 -2.0, %v5020_v22  ;;  %v5037_v31 = vmul.f32 -2.0, %v5021_v29  ;;  %p5953_p13 = pneg %p5952_p12 }
  0x22   : > { %269 = vperm.xlu2 %5459, %v6103_v4   ;;  %259 = vperm.xlu1 %5458, %v6107_v5   ;;  %v5038_v32 = vmul.f32 -2.0, %v5022_v30 }
  0x23   : > { %249 = vperm.xlu0 %5457, %v6110_v6   ;;  %v857_v26 = vmul.f32 1.442695, %v5036_v23  ;;  %v859_v35 = vmul.f32 1.442695, %v5037_v31  ;;  %p5958_p3 = pnand %p5957_p2, %p5953_p13 }
  0x24   : > { %v861_v36 = vmul.f32 1.442695, %v5038_v32 }
  0x25   : > { %5480 = vpow2.f32 %v857_v26 }
  0x26   : > { %5482 = vpow2.f32 %v859_v35 }
  0x2a   : > { %284 = vperm.xlu2 %5459, %v6115_v7   ;;  %279 = vperm.xlu1 %5458, %v6119_v8  }
  0x2b   : > { %274 = vperm.xlu0 %5457, %v6122_v9   ;;  %v5481_v33 = vpop.eup %5480 }
  0x2c   : > { %v889_v37 = vadd.f32 1.0, %v5481_v33  ;;  %v5483_v40 = vpop.eup %5482 }
  0x2d   : > { %v890_v43 = vadd.f32 1.0, %v5483_v40 }
  0x2e   : > { %5484 = vrcp.f32 %v889_v37  ;;  %v916_v51 = vand.u32 2147483648, %v889_v37  ;;  %vm910_vm0 = vweird.f32 %v889_v37  ;;  %v914_v53 = vand.u32 2147483647, %v889_v37 }
  0x2f   : > { %5486 = vpow2.f32 %v861_v36  ;;  %vm925_vm4 = vweird.f32 %v890_v43 }
  0x30   : > { %5488 = vrcp.f32 %v890_v43  ;;  %v917_v56 = vor.u32 1.1754944e-38, %v916_v51  ;;  %vm915_vm3 = vcmp.eq.f32.partialorder %v914_v53, 8.507059e+37 }
  0x32   : > { %299 = vperm.xlu2 %5459, %v6127_v10   ;;  %294 = vperm.xlu1 %5458, %v6131_v11  }
  0x33   : > { %289 = vperm.xlu0 %5457, %v6134_v12  }
  0x34   : > { %v5485_v42 = vpop.eup %5484 }
  0x35   : > { %v5487_v44 = vpop.eup %5486  ;;  %v906_v45 = vmul.f32 %v5485_v42, %v889_v37  ;;  %vm911_vm1 = vweird.f32 %v5485_v42 }
  0x36   : > { %v6228_v48 = vadd.f32 1.0, %v5487_v44  ;;  %v5489_v54 = vpop.eup %5488  ;;  %vm912_vm2 = vmor %vm910_vm0, %vm911_vm1 }
  0x37   : > { %v907_v49 = vsub.f32 1.0, %v906_v45  ;;  %v921_v61 = vmul.f32 %v5489_v54, %v890_v43  ;;  %vm926_vm5 = vweird.f32 %v5489_v54  ;;  %v6290_v45 = vld [vmem:[%s6184_s8 + $0x18] sm:$0xff] }
  0x38   : > { %5490 = vrcp.f32 %v6228_v48  ;;  %vm6260_vm6 = vmor %vm925_vm4, %vm926_vm5  ;;  %vm940_vm8 = vweird.f32 %v6228_v48  ;;  %v946_v51 = vand.u32 2147483648, %v6228_v48 }
  0x39   : > { %v908_v50 = vmul.f32 %v5485_v42, %v907_v49  ;;  %v922_v0 = vsub.f32 1.0, %v921_v61 }
  0x3a   : > { %314 = vperm.xlu2 %5459, %v6139_v13   ;;  %309 = vperm.xlu1 %5458, %v6143_v14  }
  0x3b   : > { %304 = vperm.xlu0 %5457, %v6146_v15   ;;  %v909_v52 = vadd.f32 %v5485_v42, %v908_v50 }
  0x3d   : > { %v913_v57 = vsel %vm912_vm2, %v5485_v42, %v909_v52 }
  0x3e   : > { %v918_v60 = vsel %vm915_vm3, %v917_v56, %v913_v57  ;;  %v6240_v62 = vpop.eup %5490  ;;  %v944_v56 = vand.u32 2147483647, %v6228_v48  ;;  %v5023_v57 = vadd.f32 -2.1972246, %v6290_v45 }
  0x3f   : > { %v6245_v63 = vmul.f32 %v918_v60, %v6192_v21  ;;  %vm941_vm9 = vweird.f32 %v6240_v62 }
  0x40   : > { %vm6300_vm10 = vmor %vm940_vm8, %vm941_vm9  ;;  %vm945_vm11 = vcmp.eq.f32.partialorder %v944_v56, 8.507059e+37 }
  0x41   : > { %9805 = vst [vmem:[#allocation7_spill] sm:$0xff] %v6245_v63  ;;  %v5052_v30 = vmul.f32 -1.442695, %v6245_v63 }
  0x42   : > { %5461 = vset.pattern.permute.xlu2 %v5999_v16  ;;  %5460 = vset.pattern.permute.xlu1 %v5999_v16 }
  0x43   : > { %344 = vperm.xlu2 %5461, %v6110_v6   ;;  %319 = vperm.xlu0 %5457, %v6151_v17   ;;  %5492 = vpow2.f32 %v5052_v30 }
  0x44   : > { %340 = vperm.xlu1 %5460, %v6098_v3  }
  0x49   : > { %v5493_v52 = vpop.eup %5492 }
  0x4b   : > { %356 = vperm.xlu2 %5461, %v6091_v1   ;;  %5462 = vset.pattern.permute.xlu0 %v5999_v16 }
  0x4c   : > { %352 = vperm.xlu1 %5460, %v6107_v5   ;;  %348 = vperm.xlu0 %5462, %v6095_v2  }
  0x53   : > { %364 = vperm.xlu2 %5461, %v6122_v9  }
  0x54   : > { %360 = vperm.xlu1 %5460, %v6103_v4   ;;  %368 = vperm.xlu0 %5462, %v6119_v8  }
  0x5b   : > { %376 = vperm.xlu2 %5461, %v6134_v12  }
  0x5c   : > { %372 = vperm.xlu1 %5460, %v6115_v7   ;;  %380 = vperm.xlu0 %5462, %v6131_v11  }
  0x63   : > { %388 = vperm.xlu2 %5461, %v6146_v15  }
  0x64   : > { %384 = vperm.xlu1 %5460, %v6127_v10   ;;  %392 = vperm.xlu0 %5462, %v6143_v14  }
  0x6b   : > { %400 = vperm.xlu2 %5461, %v6151_v17  }
  0x6c   : > { %396 = vperm.xlu1 %5460, %v6139_v13   ;;  %5463 = vset.pattern.permute.xlu0 %v9588_v18 }
  0x6d   : > { %437 = vperm.xlu0 %5463, %v6098_v3  }
  0x73   : > { %5465 = vset.pattern.permute.xlu2 %v9588_v18 }
  0x74   : > { %445 = vperm.xlu2 %5465, %v6095_v2   ;;  %v6174_v19 = vpop.permute.xlu2 %264  ;;  %5464 = vset.pattern.permute.xlu1 %v9588_v18 }
  0x75   : > { %441 = vperm.xlu1 %5464, %v6110_v6   ;;  %457 = vperm.xlu0 %5463, %v6103_v4  }
  0x7c   : > { %453 = vperm.xlu2 %5465, %v6091_v1   ;;  %v6187_v20 = vpop.permute.xlu2 %269 }
  0x7d   : > { %449 = vperm.xlu1 %5464, %v6107_v5   ;;  %477 = vperm.xlu0 %5463, %v6131_v11  }
  0x84   : > { %5467 = vset.pattern.permute.xlu2 %v9589_v24  ;;  %v6196_v25 = vpop.permute.xlu2 %284 }
  0x85   : > { %9803 = vst [vmem:[#allocation5_spill] sm:$0xff] %v6196_v25  ;;  %542 = vperm.xlu2 %5467, %v6095_v2   ;;  %5466 = vset.pattern.permute.xlu1 %v9589_v24  ;;  %v5068_v2 = vadd.f32 -2.1972246, %v6245_v63 }
  0x86   : > { %489 = vperm.xlu0 %5463, %v6143_v14   ;;  %538 = vperm.xlu1 %5466, %v6110_v6   ;;  %v6254_v6 = vld [vmem:[%s6088_s5] ss:$0 sm:$0xff] }
  0x87   : > { %v5084_v21 = vmul.f32 -2.0, %v5068_v2 }
  0x89   : > { %v1513_v32 = vmul.f32 1.442695, %v5084_v21 }
  0x8b   : > { %5494 = vpow2.f32 %v1513_v32 }
  0x8c   : > { %v6210_v34 = vpop.permute.xlu2 %299  ;;  %v6213_v38 = vpop.permute.xlu1 %254 }
  0x8d   : > { %550 = vperm.xlu2 %5467, %v6091_v1   ;;  %v6216_v39 = vpop.permute.xlu0 %244  ;;  %v6248_v1 = vld [vmem:[%s6088_s5 + $0x1] ss:$0 sm:$0xff] }
  0x8e   : > { %5473 = vset.pattern.permute.xlu0 %v9589_v24  ;;  %546 = vperm.xlu1 %5466, %v6107_v5   ;;  %v936_v5 = vmul.f32 %v6240_v62, %v6228_v48 }
  0x8f   : > { %534 = vperm.xlu0 %5473, %v6098_v3   ;;  %v923_v3 = vmul.f32 %v5489_v54, %v922_v0  ;;  %v6307_v0 = vadd.f32 1.0, %v5493_v52  ;;  %v6354_v52 = vld [vmem:[%s6184_s8 + $0x20] sm:$0xff] }
  0x90   : > { %v937_v35 = vsub.f32 1.0, %v936_v5  ;;  %v5039_v5 = vmul.f32 -2.0, %v5023_v57 }
  0x91   : > { %v924_v22 = vadd.f32 %v5489_v54, %v923_v3  ;;  %v5495_v60 = vpop.eup %5494  ;;  %v947_v3 = vor.u32 1.1754944e-38, %v946_v51  ;;  %vm1230_vm12 = vweird.f32 %v6307_v0 }
  0x92   : > { %v938_v42 = vmul.f32 %v6240_v62, %v937_v35 }
  0x93   : > { %v928_v33 = vsel %vm6260_vm6, %v5489_v54, %v924_v22 }
  0x94   : > { %v6220_v41 = vpop.permute.xlu2 %314  ;;  %v6224_v46 = vpop.permute.xlu1 %259 }
  0x95   : > { %5468 = vset.pattern.permute.xlu2 %v9588_v18  ;;  %v6226_v47 = vpop.permute.xlu0 %249 }
  0x96   : > { %461 = vperm.xlu2 %5468, %v6122_v9   ;;  %554 = vperm.xlu1 %5466, %v6103_v4   ;;  %v931_v4 = vand.u32 2147483648, %v890_v43 }
  0x97   : > { %562 = vperm.xlu0 %5473, %v6119_v8  }
  0x98   : > { %v932_v26 = vor.u32 1.1754944e-38, %v931_v4  ;;  %v6312_v4 = vadd.f32 1.0, %v5495_v60  ;;  %v5024_v60 = vadd.f32 -2.1972246, %v6354_v52 }
  0x9a   : > { %vm1566_vm14 = vweird.f32 %v6312_v4 }
  0x9c   : > { %v6236_v58 = vpop.permute.xlu1 %279 }
  0x9d   : > { %v6233_v55 = vpop.permute.xlu2 %344  ;;  %9804 = vst [vmem:[#allocation6_spill] sm:$0xff] %v6236_v58  ;;  %v6238_v59 = vpop.permute.xlu0 %274 }
  0x9e   : > { %465 = vperm.xlu2 %5468, %v6119_v8   ;;  %558 = vperm.xlu1 %5466, %v6122_v9   ;;  %v327_v8 = vmul.f32 %v6248_v1, %v6174_v19  ;;  %v929_v9 = vand.u32 2147483647, %v890_v43 }
  0x9f   : > { %578 = vperm.xlu0 %5473, %v6127_v10  }
  0xa0   : > { %vm930_vm7 = vcmp.eq.f32.partialorder %v929_v9, 8.507059e+37 }
  0xa1   : > { %v933_v37 = vsel %vm930_vm7, %v932_v26, %v928_v33 }
  0xa2   : > { %v6281_v40 = vmul.f32 %v933_v37, %v6202_v27  ;;  %v939_v27 = vadd.f32 %v6240_v62, %v938_v42 }
  0xa4   : > { %v6268_v19 = vpop.permute.xlu1 %294  ;;  %9809 = vst [vmem:[#allocation9_spill] sm:$0xff] %v6281_v40  ;;  %v5069_v43 = vadd.f32 -2.1972246, %v6281_v40  ;;  %v5053_v53 = vmul.f32 -1.442695, %v6281_v40  ;;  %v943_v2 = vsel %vm6300_vm10, %v6240_v62, %v939_v27 }
  0xa5   : > { %v6258_v16 = vpop.permute.xlu2 %356  ;;  %v6270_v31 = vpop.permute.xlu0 %289  ;;  %v863_v62 = vmul.f32 1.442695, %v5039_v5 }
  0xa6   : > { %5470 = vset.pattern.permute.xlu2 %v9589_v24  ;;  %v408_v29 = vmul.f32 %v6254_v6, %v6258_v16  ;;  %9808 = vst [vmem:[#allocation8_spill] sm:$0xff] %v6270_v31  ;;  %5469 = vset.pattern.permute.xlu1 %v9588_v18  ;;  %v5085_v49 = vmul.f32 -2.0, %v5069_v43  ;;  %5496 = vpow2.f32 %v5053_v53  ;;  %v326_v43 = vmul.f32 %v6248_v1, %v6224_v46 }
  0xa7   : > { %566 = vperm.xlu2 %5470, %v6115_v7   ;;  %590 = vperm.xlu0 %5473, %v6139_v13  }
  0xa8   : > { %v6276_v36 = vadd.f32 %v408_v29, %v327_v8  ;;  %469 = vperm.xlu1 %5469, %v6115_v7   ;;  %v1515_v61 = vmul.f32 1.442695, %v5085_v49 }
  0xaa   : > { %5498 = vpow2.f32 %v1515_v61 }
  0xab   : > { %5500 = vrcp.f32 %v6307_v0 }
  0xac   : > { %v6292_v7 = vpop.permute.xlu1 %309  ;;  %5502 = vrcp.f32 %v6312_v4  ;;  %v5497_v21 = vpop.eup %5496 }
  0xad   : > { %v6285_v44 = vpop.permute.xlu2 %364  ;;  %v6294_v50 = vpop.permute.xlu0 %304  ;;  %5504 = vpow2.f32 %v863_v62 }
  0xae   : > { %9810 = vst [vmem:[#allocation10_spill] sm:$0xff] %v6294_v50 }
  0xaf   : > { %570 = vperm.xlu2 %5470, %v6134_v12  }
  0xb0   : > { %473 = vperm.xlu1 %5469, %v6134_v12   ;;  %v948_v12 = vsel %vm945_vm11, %v947_v3, %v943_v2  ;;  %v5499_v23 = vpop.eup %5498 }
  0xb1   : > { %v6324_v22 = vmul.f32 %v948_v12, %v6205_v28  ;;  %v6327_v29 = vpop.eup %5500  ;;  %v6336_v33 = vadd.f32 1.0, %v5499_v23 }
  0xb2   : > { %v6333_v32 = vpop.eup %5502  ;;  %v1226_v42 = vmul.f32 %v6327_v29, %v6307_v0  ;;  %vm1231_vm13 = vweird.f32 %v6327_v29 }
  0xb3   : > { %9815 = vst [vmem:[#allocation13_spill] sm:$0xff] %v6324_v22  ;;  %v5054_v26 = vmul.f32 -1.442695, %v6324_v22  ;;  %v5070_v28 = vadd.f32 -2.1972246, %v6324_v22  ;;  %v1562_v27 = vmul.f32 %v6333_v32, %v6312_v4  ;;  %v5505_v51 = vpop.eup %5504  ;;  %vm1567_vm15 = vweird.f32 %v6333_v32  ;;  %vm6390_vm0 = vmor %vm1230_vm12, %vm1231_vm13 }
  0xb4   : > { %v1227_v54 = vsub.f32 1.0, %v1226_v42  ;;  %v6361_v57 = vadd.f32 1.0, %v5505_v51  ;;  %v1572_v51 = vand.u32 2147483648, %v6312_v4  ;;  %vm6398_vm1 = vmor %vm1566_vm14, %vm1567_vm15  ;;  %vm1581_vm6 = vweird.f32 %v6336_v33 }
  0xb5   : > { %v6314_v8 = vpop.permute.xlu2 %376  ;;  %v6316_v48 = vpop.permute.xlu0 %319  ;;  %5506 = vpow2.f32 %v5054_v26  ;;  %v1563_v46 = vsub.f32 1.0, %v1562_v27  ;;  %v5040_v26 = vmul.f32 -2.0, %v5024_v60  ;;  %v1234_v27 = vand.u32 2147483647, %v6307_v0 }
  0xb6   : > { %9813 = vst [vmem:[#allocation11_spill] sm:$0xff] %v6314_v8  ;;  %v6320_v9 = vpop.permute.xlu1 %340  ;;  %v1228_v62 = vmul.f32 %v6327_v29, %v1227_v54  ;;  %v1570_v60 = vand.u32 2147483647, %v6312_v4  ;;  %v1573_v63 = vor.u32 1.1754944e-38, %v1572_v51  ;;  %vm955_vm9 = vweird.f32 %v6361_v57 }
  0xb7   : > { %9814 = vst [vmem:[#allocation12_spill] sm:$0xff] %v6316_v48  ;;  %574 = vperm.xlu2 %5470, %v6131_v11   ;;  %v6331_v11 = vadd.f32 1.0, %v5497_v21  ;;  %v1564_v23 = vmul.f32 %v6333_v32, %v1563_v46  ;;  %v865_v24 = vmul.f32 1.442695, %v5040_v26  ;;  %vm1235_vm2 = vcmp.eq.f32.partialorder %v1234_v27, 8.507059e+37 }
  0xb8   : > { %vm1571_vm3 = vcmp.eq.f32.partialorder %v1570_v60, 8.507059e+37  ;;  %v334_v48 = vmul.f32 %v6248_v1, %v6210_v34  ;;  %v1587_v27 = vand.u32 2147483648, %v6336_v33 }
  0xb9   : > { %5508 = vrcp.f32 %v6331_v11  ;;  %v1565_v46 = vadd.f32 %v6333_v32, %v1564_v23  ;;  %v9825_v23 = vmov 3   ;;  %v1251_v54 = vand.u32 2147483648, %v6331_v11 }
  0xba   : > { %5510 = vrcp.f32 %v6336_v33  ;;  %vm1245_vm4 = vweird.f32 %v6331_v11 }
  0xbb   : > { %v5507_v61 = vpop.eup %5506  ;;  %5512 = vrcp.f32 %v6361_v57  ;;  %v1569_v26 = vsel %vm6398_vm1, %v6333_v32, %v1565_v46  ;;  %v1249_v32 = vand.u32 2147483647, %v6331_v11 }
  0xbc   : > { %v6380_v42 = vadd.f32 1.0, %v5507_v61 }
  0xbd   : > { %v6329_v30 = vpop.permute.xlu2 %388  ;;  %vm6459_vm11 = vcmp.eq.f32.partialorder %v1249_v32, 8.507059e+37 }
  0xbe   : > { %9816 = vst [vmem:[#allocation14_spill] sm:$0xff] %v6329_v30  ;;  %v6339_v35 = vpop.permute.xlu1 %352  ;;  %v6341_v37 = vpop.permute.xlu0 %348 }
  0xbf   : > { %5471 = vset.pattern.permute.xlu2 %v9588_v18  ;;  %v407_v49 = vmul.f32 %v6254_v6, %v6339_v35  ;;  %v6364_v2 = vpop.eup %5508 }
  0xc0   : > { %481 = vperm.xlu2 %5471, %v6127_v10   ;;  %v5086_v10 = vmul.f32 -2.0, %v5070_v28  ;;  %v6372_v21 = vpop.eup %5510  ;;  %v1241_v28 = vmul.f32 %v6364_v2, %v6331_v11  ;;  %vm1246_vm5 = vweird.f32 %v6364_v2 }
  0xc1   : > { %v6356_v53 = vadd.f32 %v407_v49, %v326_v43  ;;  %v1236_v43 = vand.u32 2147483648, %v6307_v0  ;;  %v1229_v49 = vadd.f32 %v6327_v29, %v1228_v62  ;;  %v6403_v62 = vpop.eup %5512  ;;  %vm1582_vm7 = vweird.f32 %v6372_v21  ;;  %vm6440_vm8 = vmor %vm1245_vm4, %vm1246_vm5 }
  0xc2   : > { %v1517_v3 = vmul.f32 1.442695, %v5086_v10  ;;  %v1577_v10 = vmul.f32 %v6372_v21, %v6336_v33  ;;  %v1242_v0 = vsub.f32 1.0, %v1241_v28  ;;  %vm956_vm10 = vweird.f32 %v6403_v62  ;;  %vm6467_vm12 = vmor %vm1581_vm6, %vm1582_vm7 }
  0xc3   : > { %v1237_v18 = vor.u32 1.1754944e-38, %v1236_v43  ;;  %v1233_v4 = vsel %vm6390_vm0, %v6327_v29, %v1229_v49  ;;  %v1574_v49 = vsel %vm1571_vm3, %v1573_v63, %v1569_v26  ;;  %v1585_v63 = vand.u32 2147483647, %v6336_v33  ;;  %vm6487_vm14 = vmor %vm955_vm9, %vm956_vm10 }
  0xc4   : > { %5514 = vpow2.f32 %v1517_v3  ;;  %v1243_v43 = vmul.f32 %v6364_v2, %v1242_v0  ;;  %vm1260_vm0 = vweird.f32 %v6380_v42 }
  0xc5   : > { %v6359_v56 = vpop.permute.xlu2 %400  ;;  %5516 = vrcp.f32 %v6380_v42  ;;  %v1238_v30 = vsel %vm1235_vm2, %v1237_v18, %v1233_v4  ;;  %v951_v18 = vmul.f32 %v6403_v62, %v6361_v57  ;;  %vm6474_vm13 = vcmp.eq.f32.partialorder %v1585_v63, 8.507059e+37 }
  0xc6   : > { %9817 = vst [vmem:[#allocation15_spill] sm:$0xff] %v6359_v56  ;;  %v6366_v5 = vpop.permute.xlu1 %360  ;;  %v6368_v12 = vpop.permute.xlu0 %368  ;;  %v1578_v56 = vsub.f32 1.0, %v1577_v10  ;;  %5518 = vpow2.f32 %v865_v24  ;;  %v1244_v24 = vadd.f32 %v6364_v2, %v1243_v43  ;;  %v6438_v11 = vmul.f32 %v1574_v49, %v1238_v30  ;;  %v6520_v49 = vld [vmem:[%s6088_s5 + $0x3] ss:$0 sm:$0xff] }
  0xc7   : > { %9818 = vst [vmem:[#allocation16_spill] sm:$0xff] %v6368_v12  ;;  %v952_v4 = vsub.f32 1.0, %v951_v18  ;;  %v1252_v43 = vor.u32 1.1754944e-38, %v1251_v54 }
  0xc8   : > { %485 = vperm.xlu2 %5471, %v6146_v15   ;;  %9826 = vst [vmem:[#allocation19_spill] sm:$0xff] %v6438_v11 }
  0xc9   : > { %v953_v32 = vmul.f32 %v6403_v62, %v952_v4 }
  0xca   : > { %v5515_v28 = vpop.eup %5514 }
  0xcb   : > { %v6421_v29 = vpop.eup %5516  ;;  %v6428_v51 = vadd.f32 1.0, %v5515_v28 }
  0xcc   : > { %v1256_v46 = vmul.f32 %v6421_v29, %v6380_v42  ;;  %vm1261_vm1 = vweird.f32 %v6421_v29 }
  0xcd   : > { %5520 = vrcp.f32 %v6428_v51  ;;  %vm1596_vm2 = vweird.f32 %v6428_v51  ;;  %vm6557_vm4 = vmor %vm1260_vm0, %vm1261_vm1 }
  0xce   : > { %v6396_v61 = vpop.permute.xlu2 %445  ;;  %v6405_v22 = vpop.permute.xlu1 %372  ;;  %v1257_v33 = vsub.f32 1.0, %v1256_v46  ;;  %v337_v46 = vmul.f32 %v6248_v1, %v6220_v41 }
  0xcf   : > { %9823 = vst [vmem:[#allocation17_spill] sm:$0xff] %v6405_v22  ;;  %v6407_v40 = vpop.permute.xlu0 %380 }
  0xd0   : > { %9824 = vst [vmem:[#allocation18_spill] sm:$0xff] %v6407_v40  ;;  %5472 = vset.pattern.permute.xlu2 %v9825_v23  ;;  %v1258_v41 = vmul.f32 %v6421_v29, %v1257_v33 }
  0xd1   : > { %582 = vperm.xlu2 %5472, %v6146_v15   ;;  %v1579_v15 = vmul.f32 %v6372_v21, %v1578_v56  ;;  %v336_v56 = vmul.f32 %v6248_v1, %v6292_v7  ;;  %v5519_v7 = vpop.eup %5518 }
  0xd2   : > { %v6497_v63 = vadd.f32 1.0, %v5519_v7 }
  0xd3   : > { %v1580_v0 = vadd.f32 %v6372_v21, %v1579_v15  ;;  %v1248_v15 = vsel %vm6440_vm8, %v6364_v2, %v1244_v24  ;;  %v959_v2 = vand.u32 2147483647, %v6361_v57  ;;  %v961_v24 = vand.u32 2147483648, %v6361_v57 }
  0xd4   : > { %v1253_v57 = vsel %vm6459_vm11, %v1252_v43, %v1248_v15  ;;  %5522 = vrcp.f32 %v6497_v63  ;;  %v9837_v15 = vmov 2   ;;  %vm970_vm8 = vweird.f32 %v6497_v63 }
  0xd5   : > { %vm960_vm15 = vcmp.eq.f32.partialorder %v959_v2, 8.507059e+37 }
  0xd6   : > { %v454_v34 = vpop.permute.xlu2 %453  ;;  %v6447_v60 = vpop.permute.xlu1 %384 }
  0xd7   : > { %v6449_v3 = vpop.permute.xlu0 %392  ;;  %v415_v30 = vmul.f32 %v6254_v6, %v6447_v60  ;;  %v505_v33 = vmul.f32 %v6520_v49, %v454_v34  ;;  %v1266_v34 = vand.u32 2147483648, %v6380_v42 }
  0xd8   : > { %v417_v28 = vmul.f32 %v6254_v6, %v6449_v3 }
  0xd9   : > { %586 = vperm.xlu2 %5472, %v6143_v14   ;;  %v1588_v14 = vor.u32 1.1754944e-38, %v1587_v27  ;;  %v6479_v54 = vadd.f32 %v415_v30, %v334_v48  ;;  %v1584_v27 = vsel %vm6467_vm12, %v6372_v21, %v1580_v0  ;;  %v954_v48 = vadd.f32 %v6403_v62, %v953_v32  ;;  %v6509_v30 = vld [vmem:[%s6184_s8 + $0x28] sm:$0xff] }
  0xda   : > { %v6481_v50 = vadd.f32 %v417_v28, %v336_v56  ;;  %v6499_v56 = vpop.eup %5520  ;;  %v962_v0 = vor.u32 1.1754944e-38, %v961_v24 }
  0xdb   : > { %v1592_v4 = vmul.f32 %v6499_v56, %v6428_v51  ;;  %v958_v21 = vsel %vm6487_vm14, %v6403_v62, %v954_v48  ;;  %v1589_v7 = vsel %vm6474_vm13, %v1588_v14, %v1584_v27  ;;  %v6526_v62 = vmul.f32 %v6438_v11, %v6438_v11 }
  0xdc   : > { %v963_v2 = vsel %vm960_vm15, %v962_v0, %v958_v21  ;;  %v5025_v14 = vadd.f32 -2.1972246, %v6509_v30  ;;  %v6540_v27 = vmul.f32 %v1589_v7, %v1253_v57  ;;  %v1264_v0 = vand.u32 2147483647, %v6380_v42 }
  0xdd   : > { %v1593_v10 = vsub.f32 1.0, %v1592_v4  ;;  %v6535_v18 = vmul.f32 %v963_v2, %v6290_v45  ;;  %v1259_v4 = vadd.f32 %v6421_v29, %v1258_v41  ;;  %vm1597_vm3 = vweird.f32 %v6499_v56 }
  0xde   : > { %v6522_v32 = vpop.permute.xlu1 %396  ;;  %9839 = vst [vmem:[#allocation21_spill] sm:$0xff] %v6540_v27  ;;  %v1602_v57 = vand.u32 2147483648, %v6428_v51  ;;  %v5041_v41 = vmul.f32 -2.0, %v5025_v14  ;;  %v521_v2 = vadd.f32 %v505_v33, %v6276_v36  ;;  %v634_v11 = vmul.f32 %v6520_v49, %v6258_v16  ;;  %vm6579_vm5 = vmor %vm1596_vm2, %vm1597_vm3 }
  0xdf   : > { %v6511_v28 = vpop.permute.xlu2 %542  ;;  %v418_v26 = vmul.f32 %v6254_v6, %v6522_v32  ;;  %v6530_v43 = vpop.permute.xlu0 %437  ;;  %9838 = vst [vmem:[#allocation20_spill] sm:$0xff] %v6535_v18  ;;  %v1594_v48 = vmul.f32 %v6499_v56, %v1593_v10  ;;  %v5055_v45 = vmul.f32 -1.442695, %v6535_v18  ;;  %v5071_v21 = vadd.f32 -2.1972246, %v6535_v18 }
  0xe0   : > { %v6563_v10 = vld [vmem:[%s6088_s5 + $0x2] ss:$0 sm:$0xff]  ;;  %v867_v33 = vmul.f32 1.442695, %v5041_v41  ;;  %v1263_v16 = vsel %vm6557_vm4, %v6421_v29, %v1259_v4  ;;  %vm6592_vm6 = vcmp.eq.f32.partialorder %v1264_v0, 8.507059e+37  ;;  %v1603_v41 = vor.u32 1.1754944e-38, %v1602_v57 }
  0xe1   : > { %5474 = vset.pattern.permute.xlu2 %v9837_v15  ;;  %v6544_v24 = vadd.f32 %v418_v26, %v337_v46  ;;  %5524 = vpow2.f32 %v5055_v45  ;;  %v5087_v7 = vmul.f32 -2.0, %v5071_v21  ;;  %v1595_v26 = vadd.f32 %v6499_v56, %v1594_v48 }
  0xe2   : > { %493 = vperm.xlu2 %5474, %v6139_v13   ;;  %v6553_v13 = vpop.eup %5522  ;;  %v1600_v15 = vand.u32 2147483647, %v6428_v51  ;;  %v6587_v45 = vmul.f32 %v6540_v27, %v6540_v27  ;;  %v976_v0 = vand.u32 2147483648, %v6497_v63 }
  0xe3   : > { %v966_v42 = vmul.f32 %v6553_v13, %v6497_v63  ;;  %v1519_v14 = vmul.f32 1.442695, %v5087_v7  ;;  %v1267_v7 = vor.u32 1.1754944e-38, %v1266_v34  ;;  %v1599_v46 = vsel %vm6579_vm5, %v6499_v56, %v1595_v26 }
  0xe4   : > { %vm1601_vm7 = vcmp.eq.f32.partialorder %v1600_v15, 8.507059e+37  ;;  %vm971_vm9 = vweird.f32 %v6553_v13  ;;  %v414_v56 = vmul.f32 %v6254_v6, %v6407_v40 }
  0xe5   : > { %1833 = vxpose.xlu1.b32.start [1/16] %v6526_v62, 128  ;;  %5526 = vpow2.f32 %v1519_v14  ;;  %v967_v31 = vsub.f32 1.0, %v966_v42  ;;  %v1268_v26 = vsel %vm6592_vm6, %v1267_v7, %v1263_v16  ;;  %v1604_v15 = vsel %vm1601_vm7, %v1603_v41, %v1599_v46  ;;  %vm6619_vm10 = vmor %vm970_vm8, %vm971_vm9 }
  0xe6   : > { %5528 = vpow2.f32 %v867_v33  ;;  %v977_v42 = vor.u32 1.1754944e-38, %v976_v0  ;;  %v6626_v6 = vmul.f32 %v1604_v15, %v1268_v26  ;;  %v6653_v26 = vld [vmem:[%s6184_s8 + $0x30] sm:$0xff] }
  0xe7   : > { %v6573_v18 = vpop.permute.xlu2 %550  ;;  %v6596_v51 = vpop.permute.xlu1 %441  ;;  %v968_v4 = vmul.f32 %v6553_v13, %v967_v31 }
  0xe8   : > { %v602_v48 = vmul.f32 %v6563_v10, %v6573_v18  ;;  %v6598_v8 = vpop.permute.xlu0 %457  ;;  %v5525_v29 = vpop.eup %5524  ;;  %9848 = vst [vmem:[#allocation22_spill] sm:$0xff] %v6626_v6 }
  0xe9   : > { %v6610_v57 = vadd.f32 1.0, %v5525_v29 }
  0xea   : > { %v618_v22 = vadd.f32 %v602_v48, %v521_v2  ;;  %497 = vperm.xlu2 %5474, %v6151_v17   ;;  %v974_v2 = vand.u32 2147483647, %v6497_v63  ;;  %v969_v63 = vadd.f32 %v6553_v13, %v968_v4 }
  0xeb   : > { %5530 = vrcp.f32 %v6610_v57  ;;  %vm1275_vm12 = vweird.f32 %v6610_v57 }
  0xec   : > { %v6608_v34 = vadd.f32 %v634_v11, %v618_v22  ;;  %v5527_v22 = vpop.eup %5526  ;;  %v333_v11 = vmul.f32 %v6248_v1, %v6268_v19  ;;  %vm975_vm11 = vcmp.eq.f32.partialorder %v974_v2, 8.507059e+37  ;;  %v973_v21 = vsel %vm6619_vm10, %v6553_v13, %v969_v63 }
  0xed   : > { %1834 = vxpose.xlu1.b32.cont [2/16] %v6587_v45, 128  ;;  %v1548_v36 = vadd.f32 1.0, %v5527_v22  ;;  %v5529_v14 = vpop.eup %5528  ;;  %v6636_v1 = vmul.f32 %v6626_v6, %v6626_v6  ;;  %v978_v19 = vsel %vm975_vm11, %v977_v42, %v973_v21  ;;  %v1281_v22 = vand.u32 2147483648, %v6610_v57 }
  0xee   : > { %v430_v48 = vadd.f32 %v414_v56, %v333_v11  ;;  %v6643_v13 = vmul.f32 %v978_v19, %v6354_v52  ;;  %v6645_v0 = vadd.f32 1.0, %v5529_v14  ;;  %v1279_v14 = vand.u32 2147483647, %v6610_v57 }
  0xef   : > { %v450_v33 = vpop.permute.xlu1 %449  ;;  %5532 = vrcp.f32 %v1548_v36  ;;  %vm1611_vm15 = vweird.f32 %v1548_v36  ;;  %v633_v21 = vmul.f32 %v6520_v49, %v6339_v35 }
  0xf0   : > { %v478_v16 = vpop.permute.xlu0 %477  ;;  %v504_v7 = vmul.f32 %v6520_v49, %v450_v33  ;;  %9850 = vst [vmem:[#allocation24_spill] sm:$0xff] %v6643_v13  ;;  %v5056_v2 = vmul.f32 -1.442695, %v6643_v13  ;;  %v5072_v56 = vadd.f32 -2.1972246, %v6643_v13  ;;  %5534 = vrcp.f32 %v6645_v0 }
  0xf1   : > { %v511_v41 = vmul.f32 %v6520_v49, %v478_v16  ;;  %v5531_v46 = vpop.eup %5530  ;;  %vm1280_vm1 = vcmp.eq.f32.partialorder %v1279_v14, 8.507059e+37  ;;  %vm985_vm4 = vweird.f32 %v6645_v0 }
  0xf2   : > { %5475 = vset.pattern.permute.xlu2 %v9825_v23  ;;  %v520_v29 = vadd.f32 %v504_v7, %v6356_v53  ;;  %v1271_v23 = vmul.f32 %v5531_v46, %v6610_v57  ;;  %vm1276_vm13 = vweird.f32 %v5531_v46  ;;  %5536 = vpow2.f32 %v5056_v2 }
  0xf3   : > { %594 = vperm.xlu2 %5475, %v6151_v17   ;;  %v6640_v4 = vadd.f32 %v511_v41, %v430_v48  ;;  %v5088_v52 = vmul.f32 -2.0, %v5072_v56  ;;  %v5026_v48 = vadd.f32 -2.1972246, %v6653_v26  ;;  %vm6662_vm14 = vmor %vm1275_vm12, %vm1276_vm13  ;;  %v1615_v7 = vand.u32 2147483647, %v1548_v36 }
  0xf4   : > { %v1272_v17 = vsub.f32 1.0, %v1271_v23  ;;  %v1617_v41 = vand.u32 2147483648, %v1548_v36  ;;  %v1282_v57 = vor.u32 1.1754944e-38, %v1281_v22 }
  0xf5   : > { %9849 = vst [vmem:[#allocation23_spill] sm:$0xff] %v6640_v4  ;;  %1835 = vxpose.xlu1.b32.cont [3/16] %v6636_v1, 128  ;;  %v5533_v53 = vpop.eup %5532  ;;  %v1521_v33 = vmul.f32 1.442695, %v5088_v52  ;;  %vm1616_vm3 = vcmp.eq.f32.partialorder %v1615_v7, 8.507059e+37 }
  0xf6   : > { %v1273_v31 = vmul.f32 %v5531_v46, %v1272_v17  ;;  %v1607_v11 = vmul.f32 %v5533_v53, %v1548_v36  ;;  %vm1612_vm0 = vweird.f32 %v5533_v53  ;;  %v6669_v2 = vpop.eup %5534 }
  0xf7   : > { %5538 = vpow2.f32 %v1521_v33  ;;  %vm1613_vm2 = vmor %vm1611_vm15, %vm1612_vm0  ;;  %vm986_vm5 = vweird.f32 %v6669_v2 }
  0xf8   : > { %v490_v15 = vpop.permute.xlu0 %489  ;;  %v6658_v42 = vpop.permute.xlu1 %538  ;;  %v1274_v16 = vadd.f32 %v5531_v46, %v1273_v31  ;;  %v1608_v23 = vsub.f32 1.0, %v1607_v11  ;;  %v1618_v31 = vor.u32 1.1754944e-38, %v1617_v41  ;;  %vm6703_vm8 = vmor %vm985_vm4, %vm986_vm5 }
  0xf9   : > { %v514_v63 = vmul.f32 %v6520_v49, %v490_v15  ;;  %v5537_v56 = vpop.eup %5536  ;;  %v5042_v15 = vmul.f32 -2.0, %v5026_v48 }
  0xfa   : > { %v1278_v17 = vsel %vm6662_vm14, %v5531_v46, %v1274_v16  ;;  %v1609_v52 = vmul.f32 %v5533_v53, %v1608_v23  ;;  %v1213_v6 = vadd.f32 1.0, %v5537_v56 }
  0xfb   : > { %v6667_v19 = vadd.f32 %v514_v63, %v6481_v50  ;;  %v6673_v50 = vpop.permute.xlu2 %461  ;;  %v1283_v11 = vsel %vm1280_vm1, %v1282_v57, %v1278_v17  ;;  %v981_v63 = vmul.f32 %v6669_v2, %v6645_v0  ;;  %v869_v46 = vmul.f32 1.442695, %v5042_v15  ;;  %v6694_v15 = vld [vmem:[%s6184_s8 + $0x38] sm:$0xff] }
  0xfc   : > { %v1610_v36 = vadd.f32 %v5533_v53, %v1609_v52  ;;  %9853 = vst [vmem:[#allocation25_spill] sm:$0xff] %v6673_v50  ;;  %5540 = vrcp.f32 %v1213_v6  ;;  %v991_v52 = vand.u32 2147483648, %v6645_v0  ;;  %vm1290_vm6 = vweird.f32 %v1213_v6 }
  0xfd   : > { %v5539_v22 = vpop.eup %5538  ;;  %v982_v23 = vsub.f32 1.0, %v981_v63  ;;  %5542 = vpow2.f32 %v869_v46 }
  0xfe   : > { %v1614_v33 = vsel %vm1613_vm2, %v5533_v53, %v1610_v36  ;;  %v1549_v41 = vadd.f32 1.0, %v5539_v22  ;;  %v992_v46 = vor.u32 1.1754944e-38, %v991_v52 }
  0xff   : > { %v1619_v14 = vsel %vm1616_vm3, %v1618_v31, %v1614_v33  ;;  %v983_v35 = vmul.f32 %v6669_v2, %v982_v23 }
 0x100   : > { %v6677_v27 = vpop.permute.xlu1 %546  ;;  %v6681_v16 = vmul.f32 %v1619_v14, %v1283_v11  ;;  %5544 = vrcp.f32 %v1549_v41  ;;  %v5027_v11 = vadd.f32 -2.1972246, %v6694_v15  ;;  %vm1626_vm10 = vweird.f32 %v1549_v41 }
 0x101   : > { %v601_v48 = vmul.f32 %v6563_v10, %v6677_v27 }
 0x102   : > { %9854 = vst [vmem:[#allocation26_spill] sm:$0xff] %v6681_v16  ;;  %v6687_v57 = vmul.f32 %v6681_v16, %v6681_v16  ;;  %v5541_v53 = vpop.eup %5540  ;;  %v1632_v16 = vand.u32 2147483648, %v1549_v41 }
 0x103   : > { %v617_v7 = vadd.f32 %v601_v48, %v520_v29  ;;  %v1286_v17 = vmul.f32 %v5541_v53, %v1213_v6  ;;  %v989_v29 = vand.u32 2147483647, %v6645_v0  ;;  %v6700_v36 = vpop.permute.xlu2 %465  ;;  %v5543_v63 = vpop.eup %5542  ;;  %vm1291_vm7 = vweird.f32 %v5541_v53 }
 0x104   : > { %1836 = vxpose.xlu1.b32.cont [4/16] %v6687_v57, 128  ;;  %9855 = vst [vmem:[#allocation27_spill] sm:$0xff] %v6700_v36  ;;  %v1296_v48 = vand.u32 2147483648, %v1213_v6  ;;  %vm6708_vm11 = vmor %vm1290_vm6, %vm1291_vm7  ;;  %v895_v52 = vadd.f32 1.0, %v5543_v63  ;;  %v1633_v36 = vor.u32 1.1754944e-38, %v1632_v16 }
 0x105   : > { %v6689_v56 = vadd.f32 %v633_v21, %v617_v7  ;;  %v1287_v31 = vsub.f32 1.0, %v1286_v17  ;;  %v984_v21 = vadd.f32 %v6669_v2, %v983_v35  ;;  %vm990_vm9 = vcmp.eq.f32.partialorder %v989_v29, 8.507059e+37 }
 0x106   : > { %v5545_v14 = vpop.eup %5544  ;;  %v1294_v7 = vand.u32 2147483647, %v1213_v6  ;;  %v5043_v35 = vmul.f32 -2.0, %v5027_v11  ;;  %v1297_v29 = vor.u32 1.1754944e-38, %v1296_v48  ;;  %5546 = vrcp.f32 %v895_v52 }
 0x107   : > { %v1288_v22 = vmul.f32 %v5541_v53, %v1287_v31  ;;  %v1622_v23 = vmul.f32 %v5545_v14, %v1549_v41  ;;  %v1630_v31 = vand.u32 2147483647, %v1549_v41  ;;  %v988_v13 = vsel %vm6703_vm8, %v6669_v2, %v984_v21 }
 0x108   : > { %vm1627_vm12 = vweird.f32 %v5545_v14  ;;  %v993_v40 = vsel %vm990_vm9, %v992_v46, %v988_v13  ;;  %vm1295_vm13 = vcmp.eq.f32.partialorder %v1294_v7, 8.507059e+37  ;;  %v871_v13 = vmul.f32 1.442695, %v5043_v35 }
 0x109   : > { %v1289_v0 = vadd.f32 %v5541_v53, %v1288_v22  ;;  %v1623_v4 = vsub.f32 1.0, %v1622_v23  ;;  %v6716_v6 = vmul.f32 %v993_v40, %v6509_v30  ;;  %vm1628_vm14 = vmor %vm1626_vm10, %vm1627_vm12  ;;  %vm1631_vm15 = vcmp.eq.f32.partialorder %v1630_v31, 8.507059e+37 }
 0x10a   : > { %vm1000_vm0 = vweird.f32 %v895_v52  ;;  %v1004_v35 = vand.u32 2147483647, %v895_v52 }
 0x10b   : > { %9860 = vst [vmem:[#allocation28_spill] sm:$0xff] %v6716_v6  ;;  %v1293_v22 = vsel %vm6708_vm11, %v5541_v53, %v1289_v0  ;;  %v1624_v25 = vmul.f32 %v5545_v14, %v1623_v4  ;;  %v5057_v2 = vmul.f32 -1.442695, %v6716_v6  ;;  %v5073_v63 = vadd.f32 -2.1972246, %v6716_v6  ;;  %v6723_v11 = vpop.permute.xlu2 %566 }
 0x10c   : > { %9861 = vst [vmem:[#allocation29_spill] sm:$0xff] %v6723_v11  ;;  %v1298_v40 = vsel %vm1295_vm13, %v1297_v29, %v1293_v22  ;;  %v5547_v53 = vpop.eup %5546  ;;  %vm1005_vm3 = vcmp.eq.f32.partialorder %v1004_v35, 8.507059e+37 }
 0x10d   : > { %v1625_v33 = vadd.f32 %v5545_v14, %v1624_v25  ;;  %5548 = vpow2.f32 %v5057_v2  ;;  %v5089_v30 = vmul.f32 -2.0, %v5073_v63  ;;  %v996_v25 = vmul.f32 %v5547_v53, %v895_v52  ;;  %v6738_v63 = vld [vmem:[%s6184_s8 + $0x40] sm:$0xff] }
 0x10e   : > { %5550 = vpow2.f32 %v871_v13  ;;  %vm1001_vm1 = vweird.f32 %v5547_v53 }
 0x10f   : > { %v1629_v46 = vsel %vm1628_vm14, %v5545_v14, %v1625_v33  ;;  %v1523_v4 = vmul.f32 1.442695, %v5089_v30  ;;  %v997_v23 = vsub.f32 1.0, %v996_v25  ;;  %vm1002_vm2 = vmor %vm1000_vm0, %vm1001_vm1 }
 0x110   : > { %v1634_v48 = vsel %vm1631_vm15, %v1633_v36, %v1629_v46  ;;  %v1006_v36 = vand.u32 2147483648, %v895_v52  ;;  %v5028_v46 = vadd.f32 -2.1972246, %v6738_v63 }
 0x111   : > { %v6725_v41 = vmul.f32 %v1634_v48, %v1298_v40  ;;  %5552 = vpow2.f32 %v1523_v4  ;;  %v998_v22 = vmul.f32 %v5547_v53, %v997_v23 }
 0x112   : > { %v1007_v2 = vor.u32 1.1754944e-38, %v1006_v36  ;;  %v6745_v36 = vpop.permute.xlu0 %534 }
 0x113   : > { %9862 = vst [vmem:[#allocation30_spill] sm:$0xff] %v6725_v41  ;;  %v6729_v16 = vmul.f32 %v6725_v41, %v6725_v41  ;;  %v5549_v21 = vpop.eup %5548  ;;  %v6734_v31 = vpop.permute.xlu2 %570  ;;  %v999_v33 = vadd.f32 %v5547_v53, %v998_v22 }
 0x114   : > { %v5551_v0 = vpop.eup %5550  ;;  %v1214_v7 = vadd.f32 1.0, %v5549_v21  ;;  %9864 = vst [vmem:[#allocation32_spill] sm:$0xff] %v6734_v31  ;;  %v5044_v31 = vmul.f32 -2.0, %v5028_v46 }
 0x115   : > { %9863 = vst [vmem:[#allocation31_spill] sm:$0xff] %v6729_v16  ;;  %1837 = vxpose.xlu1.b32.cont [5/16] %v6729_v16, 128  ;;  %v6732_v14 = vadd.f32 1.0, %v5551_v0  ;;  %v1003_v30 = vsel %vm1002_vm2, %v5547_v53, %v999_v33 }
 0x116   : > { %5554 = vrcp.f32 %v1214_v7  ;;  %vm1305_vm4 = vweird.f32 %v1214_v7  ;;  %v1309_v48 = vand.u32 2147483647, %v1214_v7  ;;  %v1311_v4 = vand.u32 2147483648, %v1214_v7 }
 0x117   : > { %v5553_v17 = vpop.eup %5552  ;;  %5556 = vrcp.f32 %v6732_v14  ;;  %v1008_v52 = vsel %vm1005_vm3, %v1007_v2, %v1003_v30  ;;  %vm1015_vm5 = vweird.f32 %v6732_v14  ;;  %v1019_v22 = vand.u32 2147483647, %v6732_v14 }
 0x118   : > { %v1550_v29 = vadd.f32 1.0, %v5553_v17  ;;  %v6743_v0 = vmul.f32 %v1008_v52, %v6653_v26  ;;  %v1021_v41 = vand.u32 2147483648, %v6732_v14  ;;  %vm6759_vm11 = vcmp.eq.f32.partialorder %v1309_v48, 8.507059e+37 }
 0x119   : > { %vm1020_vm14 = vcmp.eq.f32.partialorder %v1019_v22, 8.507059e+37 }
 0x11a   : > { %5558 = vrcp.f32 %v1550_v29  ;;  %vm1641_vm7 = vweird.f32 %v1550_v29  ;;  %9865 = vst [vmem:[#allocation33_spill] sm:$0xff] %v6743_v0  ;;  %v1645_v17 = vand.u32 2147483647, %v1550_v29  ;;  %v1647_v35 = vand.u32 2147483648, %v1550_v29 }
 0x11b   : > { %v6749_v30 = vpop.permute.xlu2 %574  ;;  %v5074_v52 = vadd.f32 -2.1972246, %v6743_v0 }
 0x11c   : > { %v5555_v13 = vpop.eup %5554  ;;  %9866 = vst [vmem:[#allocation34_spill] sm:$0xff] %v6749_v30  ;;  %v1312_v30 = vor.u32 1.1754944e-38, %v1311_v4  ;;  %vm1646_vm15 = vcmp.eq.f32.partialorder %v1645_v17, 8.507059e+37 }
 0x11d   : > { %v1301_v40 = vmul.f32 %v5555_v13, %v1214_v7  ;;  %v5557_v25 = vpop.eup %5556  ;;  %vm1306_vm6 = vweird.f32 %v5555_v13  ;;  %v5090_v7 = vmul.f32 -2.0, %v5074_v52 }
 0x11e   : > { %v1011_v53 = vmul.f32 %v5557_v25, %v6732_v14  ;;  %vm6754_vm8 = vmor %vm1305_vm4, %vm1306_vm6  ;;  %vm1016_vm9 = vweird.f32 %v5557_v25 }
 0x11f   : > { %v1302_v21 = vsub.f32 1.0, %v1301_v40  ;;  %v5058_v40 = vmul.f32 -1.442695, %v6743_v0  ;;  %v1648_v0 = vor.u32 1.1754944e-38, %v1647_v35  ;;  %vm6767_vm12 = vmor %vm1015_vm5, %vm1016_vm9  ;;  %v1525_v4 = vmul.f32 1.442695, %v5090_v7 }
 0x120   : > { %v5559_v23 = vpop.eup %5558  ;;  %v1012_v6 = vsub.f32 1.0, %v1011_v53  ;;  %v1022_v53 = vor.u32 1.1754944e-38, %v1021_v41 }
 0x121   : > { %v1303_v33 = vmul.f32 %v5555_v13, %v1302_v21  ;;  %v1637_v2 = vmul.f32 %v5559_v23, %v1550_v29  ;;  %vm1642_vm10 = vweird.f32 %v5559_v23  ;;  %5560 = vpow2.f32 %v5058_v40  ;;  %v6799_v40 = vld [vmem:[%s6184_s8 + $0x50] sm:$0xff] }
 0x122   : > { %v1013_v12 = vmul.f32 %v5557_v25, %v1012_v6  ;;  %vm6772_vm13 = vmor %vm1641_vm7, %vm1642_vm10  ;;  %v873_v6 = vmul.f32 1.442695, %v5044_v31  ;;  %5562 = vpow2.f32 %v1525_v4  ;;  %v6786_v31 = vpop.permute.xlu0 %562  ;;  %v5030_v46 = vadd.f32 -2.1972246, %v6799_v40 }
 0x123   : > { %v1304_v11 = vadd.f32 %v5555_v13, %v1303_v33  ;;  %v1638_v58 = vsub.f32 1.0, %v1637_v2  ;;  %v6777_v2 = vld [vmem:[%s6184_s8 + $0x48] sm:$0xff] }
 0x124   : > { %v1014_v33 = vadd.f32 %v5557_v25, %v1013_v12  ;;  %v5029_v12 = vadd.f32 -2.1972246, %v6777_v2  ;;  %5564 = vpow2.f32 %v873_v6 }
 0x125   : > { %v1308_v16 = vsel %vm6754_vm8, %v5555_v13, %v1304_v11  ;;  %v1639_v50 = vmul.f32 %v5559_v23, %v1638_v58 }
 0x126   : > { %v1313_v11 = vsel %vm6759_vm11, %v1312_v30, %v1308_v16  ;;  %v1018_v41 = vsel %vm6767_vm12, %v5557_v25, %v1014_v33  ;;  %v482_v16 = vpop.permute.xlu2 %481  ;;  %v5045_v30 = vmul.f32 -2.0, %v5029_v12 }
 0x127   : > { %v1640_v58 = vadd.f32 %v5559_v23, %v1639_v50  ;;  %v5561_v14 = vpop.eup %5560  ;;  %v1023_v13 = vsel %vm1020_vm14, %v1022_v53, %v1018_v41 }
 0x128   : > { %v1215_v50 = vadd.f32 1.0, %v5561_v14  ;;  %v6791_v22 = vmul.f32 %v1023_v13, %v6694_v15  ;;  %v5563_v26 = vpop.eup %5562  ;;  %v875_v53 = vmul.f32 1.442695, %v5045_v30  ;;  %v5046_v14 = vmul.f32 -2.0, %v5030_v46 }
 0x129   : > { %v1644_v29 = vsel %vm6772_vm13, %v5559_v23, %v1640_v58  ;;  %v1551_v21 = vadd.f32 1.0, %v5563_v26 }
 0x12a   : > { %v1649_v35 = vsel %vm1646_vm15, %v1648_v0, %v1644_v29  ;;  %9876 = vst [vmem:[#allocation36_spill] sm:$0xff] %v6791_v22  ;;  %5566 = vrcp.f32 %v1215_v50  ;;  %v5059_v23 = vmul.f32 -1.442695, %v6791_v22  ;;  %v512_v0 = vmul.f32 %v6520_v49, %v482_v16  ;;  %v5565_v15 = vpop.eup %5564  ;;  %v6806_v6 = vpop.permute.xlu0 %578 }
 0x12b   : > { %v6788_v17 = vmul.f32 %v1649_v35, %v1313_v11  ;;  %v5075_v52 = vadd.f32 -2.1972246, %v6791_v22  ;;  %9877 = vst [vmem:[#allocation37_spill] sm:$0xff] %v6806_v6  ;;  %v6808_v11 = vadd.f32 1.0, %v5565_v15  ;;  %v609_v41 = vmul.f32 %v6563_v10, %v6806_v6 }
 0x12c   : > { %5568 = vpow2.f32 %v5059_v23  ;;  %v528_v4 = vadd.f32 %v512_v0, %v6479_v54  ;;  %vm1320_vm0 = vweird.f32 %v1215_v50  ;;  %v641_v16 = vmul.f32 %v6520_v49, %v6447_v60 }
 0x12d   : > { %9875 = vst [vmem:[#allocation35_spill] sm:$0xff] %v6788_v17  ;;  %v6795_v25 = vmul.f32 %v6788_v17, %v6788_v17  ;;  %v5091_v7 = vmul.f32 -2.0, %v5075_v52  ;;  %5570 = vrcp.f32 %v1551_v21  ;;  %v1326_v30 = vand.u32 2147483648, %v1215_v50 }
 0x12e   : > { %v625_v35 = vadd.f32 %v609_v41, %v528_v4  ;;  %v1324_v26 = vand.u32 2147483647, %v1215_v50  ;;  %v877_v52 = vmul.f32 1.442695, %v5046_v14  ;;  %vm1656_vm3 = vweird.f32 %v1551_v21 }
 0x12f   : > { %1838 = vxpose.xlu1.b32.cont [6/16] %v6795_v25, 128  ;;  %v1527_v33 = vmul.f32 1.442695, %v5091_v7  ;;  %v1662_v46 = vand.u32 2147483648, %v1551_v21  ;;  %v1660_v60 = vand.u32 2147483647, %v1551_v21  ;;  %v1327_v41 = vor.u32 1.1754944e-38, %v1326_v30 }
 0x130   : > { %v5567_v48 = vpop.eup %5566  ;;  %vm1325_vm5 = vcmp.eq.f32.partialorder %v1324_v26, 8.507059e+37  ;;  %vm1030_vm8 = vweird.f32 %v6808_v11 }
 0x131   : > { %v1316_v58 = vmul.f32 %v5567_v48, %v1215_v50  ;;  %5572 = vpow2.f32 %v1527_v33  ;;  %vm1321_vm1 = vweird.f32 %v5567_v48  ;;  %v6822_v33 = vadd.f32 %v641_v16, %v625_v35 }
 0x132   : > { %v5569_v29 = vpop.eup %5568  ;;  %5574 = vpow2.f32 %v875_v53  ;;  %vm6818_vm2 = vmor %vm1320_vm0, %vm1321_vm1  ;;  %vm1661_vm7 = vcmp.eq.f32.partialorder %v1660_v60, 8.507059e+37 }
 0x133   : > { %v1317_v13 = vsub.f32 1.0, %v1316_v58  ;;  %v6812_v12 = vadd.f32 1.0, %v5569_v29  ;;  %v5571_v54 = vpop.eup %5570  ;;  %5576 = vrcp.f32 %v6808_v11  ;;  %9880 = vst [vmem:[#allocation38_spill] sm:$0xff] %v6822_v33 }
 0x134   : > { %v1652_v0 = vmul.f32 %v5571_v54, %v1551_v21  ;;  %vm1657_vm4 = vweird.f32 %v5571_v54  ;;  %v1034_v21 = vand.u32 2147483647, %v6808_v11 }
 0x135   : > { %v1318_v23 = vmul.f32 %v5567_v48, %v1317_v13  ;;  %5578 = vrcp.f32 %v6812_v12  ;;  %vm1658_vm6 = vmor %vm1656_vm3, %vm1657_vm4  ;;  %v1339_v26 = vand.u32 2147483647, %v6812_v12  ;;  %vm1335_vm9 = vweird.f32 %v6812_v12 }
 0x136   : > { %v1653_v4 = vsub.f32 1.0, %v1652_v0  ;;  %5580 = vpow2.f32 %v877_v52 }
 0x137   : > { %v1319_v15 = vadd.f32 %v5567_v48, %v1318_v23  ;;  %v5573_v53 = vpop.eup %5572  ;;  %v1663_v23 = vor.u32 1.1754944e-38, %v1662_v46  ;;  %v1036_v46 = vand.u32 2147483648, %v6808_v11  ;;  %vm6848_vm12 = vcmp.eq.f32.partialorder %v1339_v26, 8.507059e+37 }
 0x138   : > { %v5575_v58 = vpop.eup %5574  ;;  %v1552_v50 = vadd.f32 1.0, %v5573_v53  ;;  %v1654_v14 = vmul.f32 %v5571_v54, %v1653_v4 }
 0x139   : > { %v1323_v29 = vsel %vm6818_vm2, %v5567_v48, %v1319_v15  ;;  %v6826_v13 = vpop.eup %5576  ;;  %v6829_v35 = vadd.f32 1.0, %v5575_v58  ;;  %v1341_v58 = vand.u32 2147483648, %v6812_v12  ;;  %vm1035_vm2 = vcmp.eq.f32.partialorder %v1034_v21, 8.507059e+37 }
 0x13a   : > { %5582 = vrcp.f32 %v1552_v50  ;;  %v1655_v17 = vadd.f32 %v5571_v54, %v1654_v14  ;;  %v1328_v16 = vsel %vm1325_vm5, %v1327_v41, %v1323_v29  ;;  %v1026_v52 = vmul.f32 %v6826_v13, %v6808_v11 }
 0x13b   : > { %v5579_v0 = vpop.eup %5578  ;;  %5584 = vrcp.f32 %v6829_v35  ;;  %v1675_v41 = vand.u32 2147483647, %v1552_v50  ;;  %vm1031_vm11 = vweird.f32 %v6826_v13  ;;  %vm1671_vm14 = vweird.f32 %v1552_v50 }
 0x13c   : > { %v1331_v30 = vmul.f32 %v5579_v0, %v6812_v12  ;;  %v1659_v48 = vsel %vm1658_vm6, %v5571_v54, %v1655_v17  ;;  %v5581_v53 = vpop.eup %5580  ;;  %vm1336_vm10 = vweird.f32 %v5579_v0  ;;  %v1027_v60 = vsub.f32 1.0, %v1026_v52  ;;  %vm6865_vm0 = vmor %vm1030_vm8, %vm1031_vm11 }
 0x13d   : > { %v1664_v15 = vsel %vm1661_vm7, %v1663_v23, %v1659_v48  ;;  %vm6854_vm13 = vmor %vm1335_vm9, %vm1336_vm10  ;;  %v1677_v48 = vand.u32 2147483648, %v1552_v50  ;;  %v1037_v12 = vor.u32 1.1754944e-38, %v1036_v46  ;;  %vm6871_vm1 = vcmp.eq.f32.partialorder %v1675_v41, 8.507059e+37 }
 0x13e   : > { %v1332_v7 = vsub.f32 1.0, %v1331_v30  ;;  %v6839_v4 = vmul.f32 %v1664_v15, %v1328_v16  ;;  %v1028_v52 = vmul.f32 %v6826_v13, %v1027_v60  ;;  %v6860_v15 = vld [vmem:[%s6184_s8 + $0x58] sm:$0xff]  ;;  %v6875_v60 = vpop.permute.xlu2 %485  ;;  %vm1045_vm4 = vweird.f32 %v6829_v35 }
 0x13f   : > { %9890 = vst [vmem:[#allocation40_spill] sm:$0xff] %v6875_v60  ;;  %v5031_v46 = vadd.f32 -2.1972246, %v6860_v15 }
 0x140   : > { %9881 = vst [vmem:[#allocation39_spill] sm:$0xff] %v6839_v4  ;;  %v5583_v17 = vpop.eup %5582  ;;  %v1333_v54 = vmul.f32 %v5579_v0, %v1332_v7  ;;  %v6846_v29 = vmul.f32 %v6839_v4, %v6839_v4  ;;  %v1342_v4 = vor.u32 1.1754944e-38, %v1341_v58  ;;  %v1678_v58 = vor.u32 1.1754944e-38, %v1677_v48 }
 0x141   : > { %v1667_v23 = vmul.f32 %v5583_v17, %v1552_v50  ;;  %vm1672_vm15 = vweird.f32 %v5583_v17  ;;  %v5585_v33 = vpop.eup %5584  ;;  %v1051_v50 = vand.u32 2147483648, %v6829_v35 }
 0x142   : > { %v1334_v16 = vadd.f32 %v5579_v0, %v1333_v54  ;;  %1839 = vxpose.xlu1.b32.cont [7/16] %v6846_v29, 128  ;;  %v6869_v54 = vadd.f32 1.0, %v5581_v53  ;;  %vm6883_vm3 = vmor %vm1671_vm14, %vm1672_vm15  ;;  %v1041_v21 = vmul.f32 %v5585_v33, %v6829_v35  ;;  %vm1046_vm5 = vweird.f32 %v5585_v33 }
 0x143   : > { %v1668_v26 = vsub.f32 1.0, %v1667_v23  ;;  %v1029_v23 = vadd.f32 %v6826_v13, %v1028_v52  ;;  %v1049_v52 = vand.u32 2147483647, %v6829_v35  ;;  %vm6913_vm6 = vmor %vm1045_vm4, %vm1046_vm5 }
 0x144   : > { %v1338_v11 = vsel %vm6854_vm13, %v5579_v0, %v1334_v16  ;;  %5586 = vrcp.f32 %v6869_v54  ;;  %v6893_v0 = vld [vmem:[%s6184_s8 + $0x60] sm:$0xff]  ;;  %v1042_v7 = vsub.f32 1.0, %v1041_v21  ;;  %vm1060_vm8 = vweird.f32 %v6869_v54 }
 0x145   : > { %v1669_v6 = vmul.f32 %v5583_v17, %v1668_v26  ;;  %v1033_v41 = vsel %vm6865_vm0, %v6826_v13, %v1029_v23  ;;  %v1343_v26 = vsel %vm6848_vm12, %v1342_v4, %v1338_v11  ;;  %v5047_v23 = vmul.f32 -2.0, %v5031_v46 }
 0x146   : > { %v1038_v30 = vsel %vm1035_vm2, %v1037_v12, %v1033_v41  ;;  %v5032_v60 = vadd.f32 -2.1972246, %v6893_v0  ;;  %v1043_v4 = vmul.f32 %v5585_v33, %v1042_v7  ;;  %vm1050_vm7 = vcmp.eq.f32.partialorder %v1049_v52, 8.507059e+37  ;;  %v6925_v35 = vpop.permute.xlu2 %582 }
 0x147   : > { %v1670_v16 = vadd.f32 %v5583_v17, %v1669_v6  ;;  %v6900_v48 = vmul.f32 %v1038_v30, %v6738_v63  ;;  %v879_v21 = vmul.f32 1.442695, %v5047_v23  ;;  %9898 = vst [vmem:[#allocation44_spill] sm:$0xff] %v6925_v35 }
 0x148   : > { %v1044_v46 = vadd.f32 %v5585_v33, %v1043_v4 }
 0x149   : > { %9893 = vst [vmem:[#allocation41_spill] sm:$0xff] %v6900_v48  ;;  %v1674_v13 = vsel %vm6883_vm3, %v5583_v17, %v1670_v16  ;;  %v5060_v12 = vmul.f32 -1.442695, %v6900_v48  ;;  %v5076_v14 = vadd.f32 -2.1972246, %v6900_v48  ;;  %v1052_v17 = vor.u32 1.1754944e-38, %v1051_v50 }
 0x14a   : > { %v1679_v6 = vsel %vm6871_vm1, %v1678_v58, %v1674_v13  ;;  %v5587_v11 = vpop.eup %5586  ;;  %v6923_v16 = vld [vmem:[%s6184_s8 + $0x68] sm:$0xff]  ;;  %v5048_v50 = vmul.f32 -2.0, %v5032_v60  ;;  %v1064_v60 = vand.u32 2147483647, %v6869_v54 }
 0x14b   : > { %v6909_v63 = vmul.f32 %v1679_v6, %v1343_v26  ;;  %5588 = vpow2.f32 %v5060_v12  ;;  %v5092_v22 = vmul.f32 -2.0, %v5076_v14  ;;  %v1056_v58 = vmul.f32 %v5587_v11, %v6869_v54 }
 0x14c   : > { %v1048_v26 = vsel %vm6913_vm6, %v5585_v33, %v1044_v46  ;;  %v5033_v6 = vadd.f32 -2.1972246, %v6923_v16  ;;  %v881_v53 = vmul.f32 1.442695, %v5048_v50  ;;  %vm1061_vm9 = vweird.f32 %v5587_v11 }
 0x14d   : > { %9894 = vst [vmem:[#allocation42_spill] sm:$0xff] %v6909_v63  ;;  %v6920_v41 = vmul.f32 %v6909_v63, %v6909_v63  ;;  %v1529_v30 = vmul.f32 1.442695, %v5092_v22  ;;  %v1057_v52 = vsub.f32 1.0, %v1056_v58  ;;  %v1053_v7 = vsel %vm1050_vm7, %v1052_v17, %v1048_v26  ;;  %vm1062_vm10 = vmor %vm1060_vm8, %vm1061_vm9 }
 0x14e   : > { %v6931_v13 = vmul.f32 %v1053_v7, %v6777_v2  ;;  %v1066_v17 = vand.u32 2147483648, %v6869_v54  ;;  %v5049_v22 = vmul.f32 -2.0, %v5033_v6  ;;  %vm1065_vm11 = vcmp.eq.f32.partialorder %v1064_v60, 8.507059e+37 }
 0x14f   : > { %9897 = vst [vmem:[#allocation43_spill] sm:$0xff] %v6920_v41  ;;  %1840 = vxpose.xlu1.b32.cont [8/16] %v6920_v41, 128  ;;  %5590 = vpow2.f32 %v1529_v30  ;;  %v1058_v4 = vmul.f32 %v5587_v11, %v1057_v52 }
 0x150   : > { %9899 = vst [vmem:[#allocation45_spill] sm:$0xff] %v6931_v13  ;;  %5592 = vpow2.f32 %v879_v21  ;;  %v5061_v12 = vmul.f32 -1.442695, %v6931_v13  ;;  %v5077_v14 = vadd.f32 -2.1972246, %v6931_v13  ;;  %v6939_v21 = vpop.permute.xlu2 %586  ;;  %v1067_v7 = vor.u32 1.1754944e-38, %v1066_v17 }
 0x151   : > { %v5589_v23 = vpop.eup %5588  ;;  %9900 = vst [vmem:[#allocation46_spill] sm:$0xff] %v6939_v21  ;;  %v1059_v30 = vadd.f32 %v5587_v11, %v1058_v4  ;;  %v611_v50 = vmul.f32 %v6563_v10, %v6939_v21  ;;  %v883_v6 = vmul.f32 1.442695, %v5049_v22 }
 0x152   : > { %v1217_v33 = vadd.f32 1.0, %v5589_v23  ;;  %5594 = vpow2.f32 %v5061_v12  ;;  %v5093_v2 = vmul.f32 -2.0, %v5077_v14  ;;  %v643_v23 = vmul.f32 %v6520_v49, %v6449_v3 }
 0x153   : > { %v627_v14 = vadd.f32 %v611_v50, %v6667_v19  ;;  %v1063_v4 = vsel %vm1062_vm10, %v5587_v11, %v1059_v30 }
 0x154   : > { %5596 = vrcp.f32 %v1217_v33  ;;  %v1531_v58 = vmul.f32 1.442695, %v5093_v2  ;;  %v1354_v2 = vand.u32 2147483647, %v1217_v33  ;;  %v1068_v10 = vsel %vm1065_vm11, %v1067_v7, %v1063_v4 }
 0x155   : > { %v5591_v46 = vpop.eup %5590  ;;  %5598 = vpow2.f32 %v881_v53  ;;  %v1356_v13 = vand.u32 2147483648, %v1217_v33  ;;  %v6952_v48 = vadd.f32 %v643_v23, %v627_v14  ;;  %vm1350_vm12 = vweird.f32 %v1217_v33 }
 0x156   : > { %v5593_v26 = vpop.eup %5592  ;;  %v1553_v52 = vadd.f32 1.0, %v5591_v46  ;;  %5600 = vpow2.f32 %v1531_v58  ;;  %v6956_v11 = vmul.f32 %v1068_v10, %v6799_v40  ;;  %vm6958_vm14 = vcmp.eq.f32.partialorder %v1354_v2, 8.507059e+37 }
 0x157   : > { %v6950_v63 = vadd.f32 1.0, %v5593_v26  ;;  %9901 = vst [vmem:[#allocation47_spill] sm:$0xff] %v6952_v48  ;;  %v1357_v7 = vor.u32 1.1754944e-38, %v1356_v13 }
 0x158   : > { %5602 = vrcp.f32 %v1553_v52  ;;  %v5595_v12 = vpop.eup %5594  ;;  %v1690_v3 = vand.u32 2147483647, %v1553_v52  ;;  %v1692_v49 = vand.u32 2147483648, %v1553_v52  ;;  %9902 = vst [vmem:[#allocation48_spill] sm:$0xff] %v6956_v11  ;;  %vm1686_vm15 = vweird.f32 %v1553_v52 }
 0x159   : > { %v6948_v46 = vadd.f32 1.0, %v5595_v12  ;;  %5604 = vpow2.f32 %v883_v6  ;;  %v5062_v13 = vmul.f32 -1.442695, %v6956_v11  ;;  %v5078_v2 = vadd.f32 -2.1972246, %v6956_v11 }
 0x15a   : > { %v5597_v53 = vpop.eup %5596  ;;  %vm6971_vm2 = vcmp.eq.f32.partialorder %v1690_v3, 8.507059e+37  ;;  %v1693_v6 = vor.u32 1.1754944e-38, %v1692_v49  ;;  %vm1075_vm6 = vweird.f32 %v6950_v63  ;;  %v1081_v35 = vand.u32 2147483648, %v6950_v63 }
 0x15b   : > { %v5599_v54 = vpop.eup %5598  ;;  %v1346_v17 = vmul.f32 %v5597_v53, %v1217_v33  ;;  %5606 = vrcp.f32 %v6948_v46  ;;  %vm1351_vm13 = vweird.f32 %v5597_v53  ;;  %vm1365_vm3 = vweird.f32 %v6948_v46 }
 0x15c   : > { %v5601_v60 = vpop.eup %5600  ;;  %5608 = vrcp.f32 %v6950_v63  ;;  %v6965_v26 = vadd.f32 1.0, %v5599_v54  ;;  %vm6967_vm0 = vmor %vm1350_vm12, %vm1351_vm13  ;;  %v1369_v54 = vand.u32 2147483647, %v6948_v46  ;;  %v5094_v48 = vmul.f32 -2.0, %v5078_v2 }
 0x15d   : > { %v1347_v19 = vsub.f32 1.0, %v1346_v17  ;;  %v6962_v30 = vadd.f32 1.0, %v5601_v60  ;;  %v1371_v17 = vand.u32 2147483648, %v6948_v46 }
 0x15e   : > { %v5603_v22 = vpop.eup %5602  ;;  %vm7015_vm11 = vcmp.eq.f32.partialorder %v1369_v54, 8.507059e+37 }
 0x15f   : > { %v1348_v50 = vmul.f32 %v5597_v53, %v1347_v19  ;;  %v1682_v23 = vmul.f32 %v5603_v22, %v1553_v52  ;;  %vm1687_vm1 = vweird.f32 %v5603_v22  ;;  %5610 = vrcp.f32 %v6962_v30  ;;  %v6976_v12 = vpop.eup %5604 }
 0x160   : > { %vm1701_vm4 = vweird.f32 %v6962_v30  ;;  %v1705_v19 = vand.u32 2147483647, %v6962_v30  ;;  %vm6990_vm5 = vmor %vm1686_vm15, %vm1687_vm1  ;;  %v1707_v11 = vand.u32 2147483648, %v6962_v30  ;;  %5612 = vpow2.f32 %v5062_v13 }
 0x161   : > { %v1349_v14 = vadd.f32 %v5597_v53, %v1348_v50  ;;  %v1683_v4 = vsub.f32 1.0, %v1682_v23  ;;  %v5607_v10 = vpop.eup %5606  ;;  %v1533_v52 = vmul.f32 1.442695, %v5094_v48  ;;  %5614 = vrcp.f32 %v6965_v26 }
 0x162   : > { %v1361_v60 = vmul.f32 %v5607_v10, %v6948_v46  ;;  %v5609_v50 = vpop.eup %5608  ;;  %vm1366_vm7 = vweird.f32 %v5607_v10  ;;  %v1372_v40 = vor.u32 1.1754944e-38, %v1371_v17  ;;  %v1082_v46 = vor.u32 1.1754944e-38, %v1081_v35 }
 0x163   : > { %v1353_v3 = vsel %vm6967_vm0, %v5597_v53, %v1349_v14  ;;  %v1684_v49 = vmul.f32 %v5603_v22, %v1683_v4  ;;  %v1071_v14 = vmul.f32 %v5609_v50, %v6950_v63  ;;  %vm7009_vm8 = vmor %vm1365_vm3, %vm1366_vm7  ;;  %5616 = vpow2.f32 %v1533_v52 }
 0x164   : > { %v1362_v53 = vsub.f32 1.0, %v1361_v60  ;;  %v1358_v21 = vsel %vm6958_vm14, %v1357_v7, %v1353_v3  ;;  %vm1076_vm9 = vweird.f32 %v5609_v50  ;;  %v1708_v17 = vor.u32 1.1754944e-38, %v1707_v11 }
 0x165   : > { %v1685_v33 = vadd.f32 %v5603_v22, %v1684_v49  ;;  %v5611_v4 = vpop.eup %5610  ;;  %v1079_v49 = vand.u32 2147483647, %v6950_v63  ;;  %v1072_v48 = vsub.f32 1.0, %v1071_v14  ;;  %vm7029_vm12 = vmor %vm1075_vm6, %vm1076_vm9  ;;  %vm1706_vm15 = vcmp.eq.f32.partialorder %v1705_v19, 8.507059e+37 }
 0x166   : > { %v1363_v2 = vmul.f32 %v5607_v10, %v1362_v53  ;;  %v1697_v41 = vmul.f32 %v5611_v4, %v6962_v30  ;;  %vm1702_vm10 = vweird.f32 %v5611_v4  ;;  %v5613_v23 = vpop.eup %5612  ;;  %vm1090_vm0 = vweird.f32 %v6965_v26 }
 0x167   : > { %v1689_v13 = vsel %vm6990_vm5, %v5603_v22, %v1685_v33  ;;  %v7025_v52 = vadd.f32 1.0, %v5613_v23  ;;  %v7033_v54 = vpop.eup %5614  ;;  %vm7037_vm13 = vmor %vm1701_vm4, %vm1702_vm10  ;;  %vm1080_vm14 = vcmp.eq.f32.partialorder %v1079_v49, 8.507059e+37  ;;  %v7055_v58 = vadd.f32 1.0, %v6976_v12 }
 0x168   : > { %v1694_v60 = vsel %vm6971_vm2, %v1693_v6, %v1689_v13  ;;  %v1364_v22 = vadd.f32 %v5607_v10, %v1363_v2  ;;  %v1698_v3 = vsub.f32 1.0, %v1697_v41  ;;  %v1073_v6 = vmul.f32 %v5609_v50, %v1072_v48 }
 0x169   : > { %v7013_v7 = vmul.f32 %v1694_v60, %v1358_v21  ;;  %5618 = vrcp.f32 %v7025_v52  ;;  %v5617_v63 = vpop.eup %5616  ;;  %v1086_v60 = vmul.f32 %v7033_v54, %v6965_v26  ;;  %vm1091_vm1 = vweird.f32 %v7033_v54 }
 0x16a   : > { %v1368_v14 = vsel %vm7009_vm8, %v5607_v10, %v1364_v22  ;;  %v1699_v21 = vmul.f32 %v5611_v4, %v1698_v3  ;;  %v1074_v13 = vadd.f32 %v5609_v50, %v1073_v6  ;;  %v7052_v49 = vadd.f32 1.0, %v5617_v63  ;;  %vm7077_vm2 = vmor %vm1090_vm0, %vm1091_vm1 }
 0x16b   : > { %9913 = vst [vmem:[#allocation49_spill] sm:$0xff] %v7013_v7  ;;  %v7021_v53 = vmul.f32 %v7013_v7, %v7013_v7  ;;  %v1373_v2 = vsel %vm7015_vm11, %v1372_v40, %v1368_v14  ;;  %v1087_v3 = vsub.f32 1.0, %v1086_v60  ;;  %vm1380_vm4 = vweird.f32 %v7025_v52  ;;  %v7091_v60 = vpop.permute.xlu0 %590 }
 0x16c   : > { %v1700_v10 = vadd.f32 %v5611_v4, %v1699_v21  ;;  %v1078_v30 = vsel %vm7029_vm12, %v5609_v50, %v1074_v13  ;;  %v1094_v50 = vand.u32 2147483647, %v6965_v26  ;;  %5620 = vrcp.f32 %v7052_v49 }
 0x16d   : > { %1841 = vxpose.xlu1.b32.cont [9/16] %v7021_v53, 128  ;;  %v1083_v19 = vsel %vm1080_vm14, %v1082_v46, %v1078_v30  ;;  %v1088_v40 = vmul.f32 %v7033_v54, %v1087_v3  ;;  %5622 = vrcp.f32 %v7055_v58  ;;  %v1386_v63 = vand.u32 2147483648, %v7025_v52  ;;  %v494_v30 = vpop.permute.xlu2 %493 }
 0x16e   : > { %v1704_v11 = vsel %vm7037_vm13, %v5611_v4, %v1700_v10  ;;  %v7058_v22 = vmul.f32 %v1083_v19, %v6860_v15  ;;  %v1096_v4 = vand.u32 2147483648, %v6965_v26  ;;  %vm7083_vm3 = vcmp.eq.f32.partialorder %v1094_v50, 8.507059e+37  ;;  %v7099_v50 = vld [vmem:[%s6088_s5 + $0x3] ss:$0 sm:$0xff] }
 0x16f   : > { %v1709_v48 = vsel %vm1706_vm15, %v1708_v17, %v1704_v11  ;;  %v5619_v6 = vpop.eup %5618  ;;  %v1089_v41 = vadd.f32 %v7033_v54, %v1088_v40  ;;  %v1384_v26 = vand.u32 2147483647, %v7025_v52  ;;  %vm1716_vm6 = vweird.f32 %v7052_v49  ;;  %v7113_v40 = vld [vmem:[%s6088_s5 + $0x2] ss:$0 sm:$0xff] }
 0x170   : > { %9920 = vst [vmem:[#allocation50_spill] sm:$0xff] %v7058_v22  ;;  %v7061_v23 = vmul.f32 %v1709_v48, %v1373_v2  ;;  %v5063_v33 = vmul.f32 -1.442695, %v7058_v22  ;;  %v5079_v12 = vadd.f32 -2.1972246, %v7058_v22  ;;  %v1376_v46 = vmul.f32 %v5619_v6, %v7025_v52  ;;  %v7128_v22 = vld [vmem:[%s6184_s8 + $0x70] sm:$0xff] }
 0x171   : > { %v1097_v17 = vor.u32 1.1754944e-38, %v1096_v4  ;;  %vm1381_vm5 = vweird.f32 %v5619_v6  ;;  %v1093_v11 = vsel %vm7077_vm2, %v7033_v54, %v1089_v41  ;;  %v1720_v3 = vand.u32 2147483647, %v7052_v49 }
 0x172   : > { %9921 = vst [vmem:[#allocation51_spill] sm:$0xff] %v7061_v23  ;;  %v7071_v15 = vmul.f32 %v7061_v23, %v7061_v23  ;;  %5624 = vpow2.f32 %v5063_v33  ;;  %v5095_v21 = vmul.f32 -2.0, %v5079_v12  ;;  %v1377_v13 = vsub.f32 1.0, %v1376_v46  ;;  %v5621_v10 = vpop.eup %5620  ;;  %vm7107_vm7 = vmor %vm1380_vm4, %vm1381_vm5 }
 0x173   : > { %v1712_v48 = vmul.f32 %v5621_v10, %v7052_v49  ;;  %v515_v4 = vmul.f32 %v7099_v50, %v494_v30  ;;  %v7102_v33 = vpop.eup %5622  ;;  %vm1717_vm8 = vweird.f32 %v5621_v10  ;;  %v1722_v54 = vand.u32 2147483648, %v7052_v49 }
 0x174   : > { %v1535_v2 = vmul.f32 1.442695, %v5095_v21  ;;  %v1378_v19 = vmul.f32 %v5619_v6, %v1377_v13  ;;  %v612_v46 = vmul.f32 %v7113_v40, %v7091_v60  ;;  %v1098_v52 = vsel %vm7083_vm3, %v1097_v17, %v1093_v11  ;;  %vm7135_vm10 = vmor %vm1716_vm6, %vm1717_vm8 }
 0x175   : > { %1842 = vxpose.xlu1.b32.cont [10/16] %v7071_v15, 128  ;;  %v1713_v41 = vsub.f32 1.0, %v1712_v48  ;;  %v531_v13 = vadd.f32 %v515_v4, %v6544_v24  ;;  %v644_v30 = vmul.f32 %v7099_v50, %v6522_v32  ;;  %v1387_v23 = vor.u32 1.1754944e-38, %v1386_v63 }
 0x176   : > { %5626 = vpow2.f32 %v1535_v2  ;;  %v1379_v21 = vadd.f32 %v5619_v6, %v1378_v19  ;;  %v7125_v2 = vmul.f32 %v1098_v52, %v6893_v0  ;;  %vm1385_vm9 = vcmp.eq.f32.partialorder %v1384_v26, 8.507059e+37 }
 0x177   : > { %v1714_v48 = vmul.f32 %v5621_v10, %v1713_v41  ;;  %v628_v24 = vadd.f32 %v612_v46, %v531_v13  ;;  %v1723_v35 = vor.u32 1.1754944e-38, %v1722_v54  ;;  %v1101_v0 = vmul.f32 %v7102_v33, %v7055_v58 }
 0x178   : > { %v5625_v14 = vpop.eup %5624  ;;  %9928 = vst [vmem:[#allocation52_spill] sm:$0xff] %v7125_v2  ;;  %v1383_v19 = vsel %vm7107_vm7, %v5619_v6, %v1379_v21  ;;  %vm1721_vm11 = vcmp.eq.f32.partialorder %v1720_v3, 8.507059e+37  ;;  %v5034_v26 = vadd.f32 -2.1972246, %v7128_v22  ;;  %v5064_v49 = vmul.f32 -1.442695, %v7125_v2 }
 0x179   : > { %v7122_v7 = vadd.f32 1.0, %v5625_v14  ;;  %v1715_v17 = vadd.f32 %v5621_v10, %v1714_v48  ;;  %v7142_v6 = vadd.f32 %v644_v30, %v628_v24  ;;  %v1388_v11 = vsel %vm1385_vm9, %v1387_v23, %v1383_v19  ;;  %v7151_v14 = vld [vmem:[%s6184_s8 + $0x78] sm:$0xff] }
 0x17a   : > { %v5080_v4 = vadd.f32 -2.1972246, %v7125_v2  ;;  %v1109_v46 = vand.u32 2147483647, %v7055_v58  ;;  %v1102_v41 = vsub.f32 1.0, %v1101_v0  ;;  %v1111_v23 = vand.u32 2147483648, %v7055_v58 }
 0x17b   : > { %5628 = vrcp.f32 %v7122_v7  ;;  %9931 = vst [vmem:[#allocation53_spill] sm:$0xff] %v7142_v6  ;;  %v1719_v12 = vsel %vm7135_vm10, %v5621_v10, %v1715_v17  ;;  %v5050_v52 = vmul.f32 -2.0, %v5034_v26  ;;  %v5035_v10 = vadd.f32 -2.1972246, %v7151_v14 }
 0x17c   : > { %v5627_v63 = vpop.eup %5626  ;;  %v1724_v21 = vsel %vm1721_vm11, %v1723_v35, %v1719_v12  ;;  %5630 = vpow2.f32 %v5064_v49  ;;  %v5096_v3 = vmul.f32 -2.0, %v5080_v4  ;;  %v1103_v48 = vmul.f32 %v7102_v33, %v1102_v41 }
 0x17d   : > { %v1556_v54 = vadd.f32 1.0, %v5627_v63  ;;  %v7153_v13 = vmul.f32 %v1724_v21, %v1388_v11  ;;  %vm1105_vm12 = vweird.f32 %v7055_v58  ;;  %vm1395_vm13 = vweird.f32 %v7122_v7 }
 0x17e   : > { %v1537_v19 = vmul.f32 1.442695, %v5096_v3  ;;  %v1104_v35 = vadd.f32 %v7102_v33, %v1103_v48  ;;  %vm7166_vm14 = vcmp.eq.f32.partialorder %v1109_v46, 8.507059e+37  ;;  %vm1106_vm15 = vweird.f32 %v7102_v33 }
 0x17f   : > { %9932 = vst [vmem:[#allocation54_spill] sm:$0xff] %v7153_v13  ;;  %5632 = vrcp.f32 %v1556_v54  ;;  %v7160_v24 = vmul.f32 %v7153_v13, %v7153_v13  ;;  %v1112_v26 = vor.u32 1.1754944e-38, %v1111_v23  ;;  %v885_v63 = vmul.f32 1.442695, %v5050_v52  ;;  %vm1107_vm1 = vmor %vm1105_vm12, %vm1106_vm15 }
 0x180   : > { %5634 = vpow2.f32 %v1537_v19  ;;  %v1399_v58 = vand.u32 2147483647, %v7122_v7  ;;  %v1401_v49 = vand.u32 2147483648, %v7122_v7  ;;  %v5051_v4 = vmul.f32 -2.0, %v5035_v10 }
 0x181   : > { %v5629_v30 = vpop.eup %5628  ;;  %1843 = vxpose.xlu1.b32.cont [11/16] %v7160_v24, 128  ;;  %v1108_v3 = vsel %vm1107_vm1, %v7102_v33, %v1104_v35  ;;  %5636 = vpow2.f32 %v885_v63  ;;  %v1735_v10 = vand.u32 2147483647, %v1556_v54  ;;  %vm1731_vm3 = vweird.f32 %v1556_v54 }
 0x182   : > { %v1391_v32 = vmul.f32 %v5629_v30, %v7122_v7  ;;  %v5631_v11 = vpop.eup %5630  ;;  %vm1396_vm0 = vweird.f32 %v5629_v30  ;;  %v1113_v23 = vsel %vm7166_vm14, %v1112_v26, %v1108_v3  ;;  %v887_v52 = vmul.f32 1.442695, %v5051_v4 }
 0x183   : > { %v7174_v21 = vadd.f32 1.0, %v5631_v11  ;;  %vm7181_vm2 = vmor %vm1395_vm13, %vm1396_vm0  ;;  %v7187_v33 = vmul.f32 %v1113_v23, %v6923_v16  ;;  %vm7189_vm5 = vcmp.eq.f32.partialorder %v1399_v58, 8.507059e+37  ;;  %v1402_v7 = vor.u32 1.1754944e-38, %v1401_v49 }
 0x184   : > { %v1392_v17 = vsub.f32 1.0, %v1391_v32  ;;  %v1737_v32 = vand.u32 2147483648, %v1556_v54  ;;  %vm1736_vm7 = vcmp.eq.f32.partialorder %v1735_v10, 8.507059e+37 }
 0x185   : > { %v5633_v12 = vpop.eup %5632  ;;  %5638 = vrcp.f32 %v7174_v21  ;;  %9937 = vst [vmem:[#allocation55_spill] sm:$0xff] %v7187_v33  ;;  %v5065_v4 = vmul.f32 -1.442695, %v7187_v33  ;;  %v5081_v58 = vadd.f32 -2.1972246, %v7187_v33  ;;  %vm1410_vm8 = vweird.f32 %v7174_v21 }
 0x186   : > { %v1393_v46 = vmul.f32 %v5629_v30, %v1392_v17  ;;  %v1727_v41 = vmul.f32 %v5633_v12, %v1556_v54  ;;  %v5635_v17 = vpop.eup %5634  ;;  %vm1732_vm4 = vweird.f32 %v5633_v12  ;;  %5640 = vpow2.f32 %v887_v52 }
 0x187   : > { %v1557_v0 = vadd.f32 1.0, %v5635_v17  ;;  %vm1733_vm6 = vmor %vm1731_vm3, %vm1732_vm4  ;;  %v1738_v54 = vor.u32 1.1754944e-38, %v1737_v32 }
 0x188   : > { %v1394_v19 = vadd.f32 %v5629_v30, %v1393_v46  ;;  %v1728_v11 = vsub.f32 1.0, %v1727_v41  ;;  %v5637_v46 = vpop.eup %5636 }
 0x189   : > { %5642 = vrcp.f32 %v1557_v0  ;;  %v7197_v3 = vadd.f32 1.0, %v5637_v46  ;;  %vm1746_vm11 = vweird.f32 %v1557_v0 }
 0x18a   : > { %v1398_v26 = vsel %vm7181_vm2, %v5629_v30, %v1394_v19  ;;  %v1729_v63 = vmul.f32 %v5633_v12, %v1728_v11  ;;  %5644 = vpow2.f32 %v5065_v4  ;;  %v5097_v19 = vmul.f32 -2.0, %v5081_v58 }
 0x18b   : > { %v5639_v49 = vpop.eup %5638  ;;  %v1403_v41 = vsel %vm7189_vm5, %v1402_v7, %v1398_v26  ;;  %5646 = vrcp.f32 %v7197_v3  ;;  %v1414_v26 = vand.u32 2147483647, %v7174_v21  ;;  %vm1120_vm0 = vweird.f32 %v7197_v3 }
 0x18c   : > { %v1730_v16 = vadd.f32 %v5633_v12, %v1729_v63  ;;  %v1406_v23 = vmul.f32 %v5639_v49, %v7174_v21  ;;  %v5641_v48 = vpop.eup %5640  ;;  %vm1411_vm9 = vweird.f32 %v5639_v49  ;;  %v1539_v17 = vmul.f32 1.442695, %v5097_v19 }
 0x18d   : > { %v1416_v63 = vand.u32 2147483648, %v7174_v21  ;;  %vm7212_vm10 = vmor %vm1410_vm8, %vm1411_vm9  ;;  %v7220_v21 = vadd.f32 1.0, %v5641_v48  ;;  %vm1415_vm13 = vcmp.eq.f32.partialorder %v1414_v26, 8.507059e+37 }
 0x18e   : > { %v1734_v30 = vsel %vm1733_vm6, %v5633_v12, %v1730_v16  ;;  %v1407_v32 = vsub.f32 1.0, %v1406_v23  ;;  %5648 = vpow2.f32 %v1539_v17 }
 0x18f   : > { %v1739_v52 = vsel %vm1736_vm7, %v1738_v54, %v1734_v30  ;;  %v5643_v11 = vpop.eup %5642  ;;  %v1752_v54 = vand.u32 2147483648, %v1557_v0  ;;  %v1750_v30 = vand.u32 2147483647, %v1557_v0  ;;  %v1417_v19 = vor.u32 1.1754944e-38, %v1416_v63 }
 0x190   : > { %v7204_v10 = vmul.f32 %v1739_v52, %v1403_v41  ;;  %v5645_v35 = vpop.eup %5644  ;;  %v1408_v7 = vmul.f32 %v5639_v49, %v1407_v32  ;;  %v1742_v4 = vmul.f32 %v5643_v11, %v1557_v0  ;;  %vm1747_vm12 = vweird.f32 %v5643_v11 }
 0x191   : > { %v7216_v16 = vadd.f32 1.0, %v5645_v35  ;;  %v5647_v23 = vpop.eup %5646  ;;  %vm1748_vm14 = vmor %vm1746_vm11, %vm1747_vm12  ;;  %v1753_v17 = vor.u32 1.1754944e-38, %v1752_v54  ;;  %vm1751_vm15 = vcmp.eq.f32.partialorder %v1750_v30, 8.507059e+37  ;;  %v1126_v0 = vand.u32 2147483648, %v7197_v3 }
 0x192   : > { %9940 = vst [vmem:[#allocation56_spill] sm:$0xff] %v7204_v10  ;;  %v7209_v12 = vmul.f32 %v7204_v10, %v7204_v10  ;;  %v1409_v58 = vadd.f32 %v5639_v49, %v1408_v7  ;;  %v1743_v41 = vsub.f32 1.0, %v1742_v4  ;;  %v1116_v7 = vmul.f32 %v5647_v23, %v7197_v3 }
 0x193   : > { %5650 = vrcp.f32 %v7216_v16  ;;  %vm1121_vm1 = vweird.f32 %v5647_v23  ;;  %v1431_v30 = vand.u32 2147483648, %v7216_v16  ;;  %vm1425_vm4 = vweird.f32 %v7216_v16 }
 0x194   : > { %1844 = vxpose.xlu1.b32.cont [12/16] %v7209_v12, 128  ;;  %v1413_v52 = vsel %vm7212_vm10, %v5639_v49, %v1409_v58  ;;  %v1744_v32 = vmul.f32 %v5643_v11, %v1743_v41  ;;  %v5649_v4 = vpop.eup %5648  ;;  %5652 = vrcp.f32 %v7220_v21  ;;  %v1117_v48 = vsub.f32 1.0, %v1116_v7  ;;  %vm7238_vm2 = vmor %vm1120_vm0, %vm1121_vm1 }
 0x195   : > { %v1418_v10 = vsel %vm1415_vm13, %v1417_v19, %v1413_v52  ;;  %v1558_v13 = vadd.f32 1.0, %v5649_v4  ;;  %v1124_v49 = vand.u32 2147483647, %v7197_v3  ;;  %v1127_v3 = vor.u32 1.1754944e-38, %v1126_v0 }
 0x196   : > { %v1745_v35 = vadd.f32 %v5643_v11, %v1744_v32  ;;  %v1118_v58 = vmul.f32 %v5647_v23, %v1117_v48  ;;  %vm1135_vm6 = vweird.f32 %v7220_v21  ;;  %v1139_v48 = vand.u32 2147483647, %v7220_v21 }
 0x197   : > { %5654 = vrcp.f32 %v1558_v13  ;;  %vm7242_vm3 = vcmp.eq.f32.partialorder %v1124_v49, 8.507059e+37  ;;  %v1432_v0 = vor.u32 1.1754944e-38, %v1431_v30  ;;  %vm1761_vm9 = vweird.f32 %v1558_v13 }
 0x198   : > { %v1749_v63 = vsel %vm1748_vm14, %v5643_v11, %v1745_v35  ;;  %v1119_v52 = vadd.f32 %v5647_v23, %v1118_v58  ;;  %v1141_v35 = vand.u32 2147483648, %v7220_v21  ;;  %vm1140_vm12 = vcmp.eq.f32.partialorder %v1139_v48, 8.507059e+37 }
 0x199   : > { %v5651_v33 = vpop.eup %5650  ;;  %v1754_v2 = vsel %vm1751_vm15, %v1753_v17, %v1749_v63  ;;  %v1429_v17 = vand.u32 2147483647, %v7216_v16 }
 0x19a   : > { %v7230_v26 = vmul.f32 %v1754_v2, %v1418_v10  ;;  %v1421_v46 = vmul.f32 %v5651_v33, %v7216_v16  ;;  %v5653_v41 = vpop.eup %5652  ;;  %vm1426_vm5 = vweird.f32 %v5651_v33  ;;  %v1123_v4 = vsel %vm7238_vm2, %v5647_v23, %v1119_v52 }
 0x19b   : > { %v1131_v32 = vmul.f32 %v5653_v41, %v7220_v21  ;;  %vm1136_vm7 = vweird.f32 %v5653_v41  ;;  %vm7259_vm8 = vmor %vm1425_vm4, %vm1426_vm5  ;;  %v1142_v16 = vor.u32 1.1754944e-38, %v1141_v35  ;;  %vm1430_vm13 = vcmp.eq.f32.partialorder %v1429_v17, 8.507059e+37 }
 0x19c   : > { %9943 = vst [vmem:[#allocation57_spill] sm:$0xff] %v7230_v26  ;;  %v7235_v54 = vmul.f32 %v7230_v26, %v7230_v26  ;;  %v1422_v11 = vsub.f32 1.0, %v1421_v46  ;;  %v1767_v26 = vand.u32 2147483648, %v1558_v13  ;;  %vm7268_vm11 = vmor %vm1135_vm6, %vm1136_vm7 }
 0x19d   : > { %v5655_v7 = vpop.eup %5654  ;;  %v1132_v63 = vsub.f32 1.0, %v1131_v32 }
 0x19e   : > { %1845 = vxpose.xlu1.b32.cont [13/16] %v7235_v54, 128  ;;  %v1423_v10 = vmul.f32 %v5651_v33, %v1422_v11  ;;  %v1757_v46 = vmul.f32 %v5655_v7, %v1558_v13  ;;  %v1128_v11 = vsel %vm7242_vm3, %v1127_v3, %v1123_v4  ;;  %vm1762_vm10 = vweird.f32 %v5655_v7 }
 0x19f   : > { %v7264_v23 = vmul.f32 %v1128_v11, %v7128_v22  ;;  %v1133_v19 = vmul.f32 %v5653_v41, %v1132_v63  ;;  %vm1763_vm14 = vmor %vm1761_vm9, %vm1762_vm10  ;;  %v1768_v63 = vor.u32 1.1754944e-38, %v1767_v26 }
 0x1a0   : > { %v1424_v49 = vadd.f32 %v5651_v33, %v1423_v10  ;;  %v1758_v52 = vsub.f32 1.0, %v1757_v46  ;;  %v1765_v10 = vand.u32 2147483647, %v1558_v13 }
 0x1a1   : > { %9950 = vst [vmem:[#allocation58_spill] sm:$0xff] %v7264_v23  ;;  %v5066_v2 = vmul.f32 -1.442695, %v7264_v23  ;;  %v5082_v3 = vadd.f32 -2.1972246, %v7264_v23  ;;  %v1134_v32 = vadd.f32 %v5653_v41, %v1133_v19 }
 0x1a2   : > { %v1428_v22 = vsel %vm7259_vm8, %v5651_v33, %v1424_v49  ;;  %v1759_v4 = vmul.f32 %v5655_v7, %v1758_v52  ;;  %vm1766_vm15 = vcmp.eq.f32.partialorder %v1765_v10, 8.507059e+37 }
 0x1a3   : > { %5656 = vpow2.f32 %v5066_v2  ;;  %v5098_v21 = vmul.f32 -2.0, %v5082_v3  ;;  %v1138_v46 = vsel %vm7268_vm11, %v5653_v41, %v1134_v32  ;;  %v1433_v6 = vsel %vm1430_vm13, %v1432_v0, %v1428_v22 }
 0x1a4   : > { %v1760_v35 = vadd.f32 %v5655_v7, %v1759_v4  ;;  %v1143_v11 = vsel %vm1140_vm12, %v1142_v16, %v1138_v46 }
 0x1a5   : > { %v1541_v23 = vmul.f32 1.442695, %v5098_v21  ;;  %v7280_v48 = vmul.f32 %v1143_v11, %v7151_v14 }
 0x1a6   : > { %v1764_v58 = vsel %vm1763_vm14, %v5655_v7, %v1760_v35 }
 0x1a7   : > { %v1769_v33 = vsel %vm1766_vm15, %v1768_v63, %v1764_v58  ;;  %5658 = vpow2.f32 %v1541_v23  ;;  %v5067_v13 = vmul.f32 -1.442695, %v7280_v48  ;;  %v5083_v26 = vadd.f32 -2.1972246, %v7280_v48 }
 0x1a8   : > { %v7284_v17 = vmul.f32 %v1769_v33, %v1433_v6 }
 0x1a9   : > { %v5657_v49 = vpop.eup %5656  ;;  %5660 = vpow2.f32 %v5067_v13  ;;  %v5099_v41 = vmul.f32 -2.0, %v5083_v26 }
 0x1aa   : > { %v7288_v19 = vmul.f32 %v7284_v17, %v7284_v17  ;;  %v1223_v0 = vadd.f32 1.0, %v5657_v49 }
 0x1ab   : > { %v1543_v52 = vmul.f32 1.442695, %v5099_v41 }
 0x1ac   : > { %1846 = vxpose.xlu1.b32.cont [14/16] %v7288_v19, 128  ;;  %5662 = vrcp.f32 %v1223_v0  ;;  %vm1440_vm0 = vweird.f32 %v1223_v0  ;;  %v1446_v22 = vand.u32 2147483648, %v1223_v0  ;;  %v1444_v63 = vand.u32 2147483647, %v1223_v0 }
 0x1ad   : > { %v5659_v14 = vpop.eup %5658  ;;  %5664 = vpow2.f32 %v1543_v52 }
 0x1ae   : > { %v1559_v7 = vadd.f32 1.0, %v5659_v14  ;;  %v1447_v26 = vor.u32 1.1754944e-38, %v1446_v22  ;;  %vm1445_vm5 = vcmp.eq.f32.partialorder %v1444_v63, 8.507059e+37 }
 0x1af   : > { %v5661_v23 = vpop.eup %5660 }
 0x1b0   : > { %5666 = vrcp.f32 %v1559_v7  ;;  %v1224_v10 = vadd.f32 1.0, %v5661_v23  ;;  %v1782_v46 = vand.u32 2147483648, %v1559_v7  ;;  %vm1776_vm3 = vweird.f32 %v1559_v7 }
 0x1b1   : > { %v1780_v13 = vand.u32 2147483647, %v1559_v7 }
 0x1b2   : > { %v5663_v6 = vpop.eup %5662  ;;  %5668 = vrcp.f32 %v1224_v10  ;;  %vm1455_vm7 = vweird.f32 %v1224_v10 }
 0x1b3   : > { %v5665_v30 = vpop.eup %5664  ;;  %v1436_v16 = vmul.f32 %v5663_v6, %v1223_v0  ;;  %vm1441_vm1 = vweird.f32 %v5663_v6  ;;  %v1783_v0 = vor.u32 1.1754944e-38, %v1782_v46  ;;  %vm1781_vm9 = vcmp.eq.f32.partialorder %v1780_v13, 8.507059e+37 }
 0x1b4   : > { %v1560_v2 = vadd.f32 1.0, %v5665_v30  ;;  %vm7291_vm2 = vmor %vm1440_vm0, %vm1441_vm1  ;;  %v501_v46 = vmul.f32 %v7099_v50, %v6530_v43 }
 0x1b5   : > { %v1437_v3 = vsub.f32 1.0, %v1436_v16  ;;  %v1461_v16 = vand.u32 2147483648, %v1224_v10 }
 0x1b6   : > { %v5667_v32 = vpop.eup %5666  ;;  %5670 = vrcp.f32 %v1560_v2  ;;  %vm1791_vm10 = vweird.f32 %v1560_v2 }
 0x1b7   : > { %v1438_v4 = vmul.f32 %v5663_v6, %v1437_v3  ;;  %v1772_v21 = vmul.f32 %v5667_v32, %v1559_v7  ;;  %vm1777_vm4 = vweird.f32 %v5667_v32  ;;  %v1459_v7 = vand.u32 2147483647, %v1224_v10 }
 0x1b8   : > { %v5669_v11 = vpop.eup %5668  ;;  %vm7297_vm6 = vmor %vm1776_vm3, %vm1777_vm4 }
 0x1b9   : > { %v1439_v58 = vadd.f32 %v5663_v6, %v1438_v4  ;;  %v1773_v33 = vsub.f32 1.0, %v1772_v21  ;;  %v1451_v49 = vmul.f32 %v5669_v11, %v1224_v10  ;;  %vm1456_vm8 = vweird.f32 %v5669_v11 }
 0x1ba   : > { %vm7303_vm11 = vmor %vm1455_vm7, %vm1456_vm8  ;;  %vm1460_vm13 = vcmp.eq.f32.partialorder %v1459_v7, 8.507059e+37 }
 0x1bb   : > { %v1443_v41 = vsel %vm7291_vm2, %v5663_v6, %v1439_v58  ;;  %v1774_v52 = vmul.f32 %v5667_v32, %v1773_v33  ;;  %v1452_v30 = vsub.f32 1.0, %v1451_v49  ;;  %v1797_v6 = vand.u32 2147483648, %v1560_v2 }
 0x1bc   : > { %v5671_v14 = vpop.eup %5670  ;;  %v1448_v4 = vsel %vm1445_vm5, %v1447_v26, %v1443_v41  ;;  %v1795_v58 = vand.u32 2147483647, %v1560_v2 }
 0x1bd   : > { %v1775_v3 = vadd.f32 %v5667_v32, %v1774_v52  ;;  %v1787_v22 = vmul.f32 %v5671_v14, %v1560_v2  ;;  %v1453_v21 = vmul.f32 %v5669_v11, %v1452_v30  ;;  %vm1792_vm12 = vweird.f32 %v5671_v14 }
 0x1be   : > { %v1462_v52 = vor.u32 1.1754944e-38, %v1461_v16  ;;  %vm1793_vm14 = vmor %vm1791_vm10, %vm1792_vm12  ;;  %vm1796_vm15 = vcmp.eq.f32.partialorder %v1795_v58, 8.507059e+37 }
 0x1bf   : > { %v1779_v63 = vsel %vm7297_vm6, %v5667_v32, %v1775_v3  ;;  %v1788_v35 = vsub.f32 1.0, %v1787_v22  ;;  %v1454_v49 = vadd.f32 %v5669_v11, %v1453_v21  ;;  %v1798_v32 = vor.u32 1.1754944e-38, %v1797_v6  ;;  %v7323_v3 = vpop.permute.xlu1 %554  ;;  %v7335_v21 = vld [vmem:[%s6088_s5] ss:$0 sm:$0xff] }
 0x1c0   : > { %v1784_v33 = vsel %vm1781_vm9, %v1783_v0, %v1779_v63  ;;  %v404_v6 = vmul.f32 %v7335_v21, %v6320_v9  ;;  %v694_v63 = vlaneseq }
 0x1c1   : > { %v7307_v13 = vmul.f32 %v1784_v33, %v1448_v4  ;;  %v1789_v10 = vmul.f32 %v5671_v14, %v1788_v35  ;;  %v1458_v26 = vsel %vm7303_vm11, %v5669_v11, %v1454_v49  ;;  %v7330_v4 = vld [vmem:[%s6088_s5 + $0x1] ss:$0 sm:$0xff]  ;;  %v598_v49 = vmul.f32 %v7113_v40, %v6745_v36 }
 0x1c2   : > { %v1463_v2 = vsel %vm1460_vm13, %v1462_v52, %v1458_v26  ;;  %v7341_v58 = vshrl.u32 %v694_v63, 7  ;;  %v7343_v33 = vand.u32 127, %v694_v63  ;;  %v405_v52 = vmul.f32 %v7335_v21, %v6233_v55 }
 0x1c3   : > { %v7313_v41 = vmul.f32 %v7307_v13, %v7307_v13  ;;  %v1790_v23 = vadd.f32 %v5671_v14, %v1789_v10  ;;  %v662_v63 = vmul.f32 %v7330_v4, %v6745_v36  ;;  %v503_v36 = vmul.f32 %v7099_v50, %v6396_v61 }
 0x1c4   : > { %v713_v26 = vsub.s32 %v7341_v58, %v7343_v33  ;;  %v663_v61 = vmul.f32 %v7330_v4, %v6658_v42 }
 0x1c5   : > { %1847 = vxpose.xlu1.b32.cont [15/16] %v7313_v41, 128  ;;  %v1794_v0 = vsel %vm1793_vm14, %v5671_v14, %v1790_v23  ;;  %v323_v14 = vmul.f32 %v7330_v4, %v6216_v39  ;;  %v324_v39 = vmul.f32 %v7330_v4, %v6226_v47 }
 0x1c6   : > { %v1799_v30 = vsel %vm1796_vm15, %v1798_v32, %v1794_v0  ;;  %v502_v0 = vmul.f32 %v7099_v50, %v6596_v51  ;;  %v730_v47 = vsub.s32 0, %v713_v26  ;;  %vm729_vm0 = vcmp.lt.s32.totalorder %v713_v26, 0 }
 0x1c7   : > { %v7316_v16 = vmul.f32 %v1799_v30, %v1463_v2  ;;  %v7325_v7 = vpop.permute.xlu1 %558  ;;  %v420_v35 = vadd.f32 %v404_v6, %v323_v14  ;;  %v421_v23 = vadd.f32 %v405_v52, %v324_v39  ;;  %v630_v2 = vmul.f32 %v7099_v50, %v6320_v9 }
 0x1c8   : > { %v696_v30 = vadd.s32 8, %v7341_v58  ;;  %v599_v14 = vmul.f32 %v7113_v40, %v6658_v42  ;;  %v631_v9 = vmul.f32 %v7099_v50, %v6233_v55  ;;  %v406_v51 = vmul.f32 %v7335_v21, %v6341_v37 }
 0x1c9   : > { %9959 = vst [vmem:[#allocation59_spill] sm:$0xff] %v7316_v16  ;;  %v7320_v11 = vmul.f32 %v7316_v16, %v7316_v16  ;;  %v517_v10 = vadd.f32 %v501_v46, %v420_v35  ;;  %v518_v46 = vadd.f32 %v502_v0, %v421_v23  ;;  %v600_v0 = vmul.f32 %v7113_v40, %v6511_v28 }
 0x1ca   : > { %v714_v35 = vsub.s32 %v696_v30, %v7343_v33 }
 0x1cb   : > { %v614_v32 = vadd.f32 %v598_v49, %v517_v10  ;;  %v731_v49 = vsel %vm729_vm0, %v730_v47, %v713_v26  ;;  %v615_v39 = vadd.f32 %v599_v14, %v518_v46  ;;  %v697_v26 = vadd.s32 16, %v7341_v58 }
 0x1cc   : > { %vm777_vm1 = vcmp.le.s32.totalorder %v731_v49, 3  ;;  %v733_v23 = vsub.s32 0, %v714_v35  ;;  %vm732_vm2 = vcmp.lt.s32.totalorder %v714_v35, 0 }
 0x1cd   : > { %1848 = vxpose.xlu1.b32.end [16/16] %v7320_v11, 128  ;;  %v646_v6 = vadd.f32 %v630_v2, %v614_v32  ;;  %v325_v32 = vmul.f32 %v7330_v4, %v6213_v38  ;;  %v647_v30 = vadd.f32 %v631_v9, %v615_v39  ;;  %v715_v38 = vsub.s32 %v697_v26, %v7343_v33 }
 0x1ce   : > { %v698_v39 = vadd.s32 24, %v7341_v58 }
 0x1cf   : > { %v7327_v22 = vpop.permute.xlu1 %469  ;;  %v678_v52 = vadd.f32 %v662_v63, %v646_v6  ;;  %v422_v2 = vadd.f32 %v406_v51, %v325_v32  ;;  %v734_v6 = vsel %vm732_vm2, %v733_v23, %v714_v35  ;;  %v679_v46 = vadd.f32 %v663_v61, %v647_v30 }
 0x1d0   : > { %vm778_vm3 = vcmp.le.s32.totalorder %v734_v6, 3  ;;  %v736_v51 = vsub.s32 0, %v715_v38  ;;  %vm735_vm4 = vcmp.lt.s32.totalorder %v715_v38, 0  ;;  %v664_v35 = vmul.f32 %v7330_v4, %v6511_v28 }
 0x1d1   : > { %v7377_v47 = vsel %vm777_vm1, 0.0, %v678_v52  ;;  %v519_v14 = vadd.f32 %v503_v36, %v422_v2  ;;  %v7389_v42 = vsel %vm778_vm3, 0.0, %v679_v46  ;;  %v716_v36 = vsub.s32 %v698_v39, %v7343_v33 }
 0x1d2   : > { %v328_v6 = vmul.f32 %v7330_v4, %v6187_v20  ;;  %v506_v46 = vmul.f32 %v7099_v50, %v6598_v8  ;;  %v410_v20 = vmul.f32 %v7335_v21, %v6285_v44  ;;  %v603_v8 = vmul.f32 %v7113_v40, %v7323_v3 }
 0x1d3   : > { %v616_v63 = vadd.f32 %v600_v0, %v519_v14  ;;  %v739_v2 = vsub.s32 0, %v716_v36  ;;  %vm738_vm6 = vcmp.lt.s32.totalorder %v716_v36, 0 }
 0x1d5   : > { %v740_v14 = vsel %vm738_vm6, %v739_v2, %v716_v36  ;;  %v9960_v36 = vld [vmem:[#allocation25_spill] sm:$0xff]  ;;  %v635_v2 = vmul.f32 %v7099_v50, %v6366_v5 }
 0x1d6   : > { %vm780_vm7 = vcmp.le.s32.totalorder %v740_v14, 3 }
 0x1d7   : > { %v7353_v43 = vpop.permute.xlu1 %473 }
 0x1f9   : > { %v1849_v10 = vpop.trf.xlu1 }
 0x1fa   : > { %v1865_v16 = vadd.f32 %v1849_v10, %v6526_v62 }
 0x1fc   : > { %v1881_v55 = vmul.f32 0.5, %v1865_v16  ;;  %v632_v16 = vmul.f32 %v7099_v50, %v6341_v37  ;;  %v737_v37 = vsel %vm735_vm4, %v736_v51, %v715_v38  ;;  %v665_v38 = vmul.f32 %v7330_v4, %v6677_v27 }
 0x1fd   : > { %vm779_vm5 = vcmp.le.s32.totalorder %v737_v37, 3  ;;  %v329_v27 = vmul.f32 %v7330_v4, %v6238_v59 }
 0x1fe   : > { %v1897_v62 = vmul.f32 %v1881_v55, %v7377_v47  ;;  %v648_v10 = vadd.f32 %v632_v16, %v616_v63  ;;  %v699_v55 = vadd.s32 32, %v7341_v58  ;;  %v681_v61 = vadd.f32 %v665_v38, %v6689_v56 }
 0x1ff   : > { %v666_v56 = vmul.f32 %v7330_v4, %v6573_v18 }
 0x200   : > { %1913 = vadd.xlane.f32.xlu0 %v1897_v62  ;;  %v680_v26 = vadd.f32 %v664_v35, %v648_v10  ;;  %v717_v62 = vsub.s32 %v699_v55, %v7343_v33 }
 0x201   : > { %v1850_v49 = vpop.trf.xlu1  ;;  %v682_v37 = vadd.f32 %v666_v56, %v6608_v34 }
 0x202   : > { %v1866_v9 = vadd.f32 %v1850_v49, %v6587_v45  ;;  %v7395_v30 = vsel %vm779_vm5, 0.0, %v680_v26  ;;  %v742_v49 = vsub.s32 0, %v717_v62  ;;  %vm741_vm8 = vcmp.lt.s32.totalorder %v717_v62, 0 }
 0x203   : > { %v507_v26 = vmul.f32 %v7099_v50, %v9960_v36  ;;  %v9965_v36 = vld [vmem:[#allocation5_spill] sm:$0xff] }
 0x204   : > { %v1882_v52 = vmul.f32 0.5, %v1866_v9  ;;  %v700_v9 = vadd.s32 40, %v7341_v58  ;;  %v743_v35 = vsel %vm741_vm8, %v742_v49, %v717_v62 }
 0x205   : > { %vm781_vm9 = vcmp.le.s32.totalorder %v743_v35, 3 }
 0x206   : > { %v1898_v32 = vmul.f32 %v1882_v52, %v7389_v42  ;;  %v7416_v52 = vsel %vm780_vm7, 0.0, %v681_v61  ;;  %v718_v59 = vsub.s32 %v700_v9, %v7343_v33  ;;  %v7429_v14 = vsel %vm781_vm9, 0.0, %v682_v37 }
 0x208   : > { %1915 = vadd.xlane.f32.xlu2 %v1898_v32  ;;  %v426_v32 = vadd.f32 %v410_v20, %v329_v27  ;;  %vm744_vm10 = vcmp.lt.s32.totalorder %v718_v59, 0 }
 0x209   : > { %v1851_v23 = vpop.trf.xlu1 }
 0x20a   : > { %v1867_v45 = vadd.f32 %v1851_v23, %v6636_v1  ;;  %v409_v1 = vmul.f32 %v7335_v21, %v6366_v5  ;;  %v523_v38 = vadd.f32 %v507_v26, %v426_v32  ;;  %v605_v32 = vmul.f32 %v7113_v40, %v6786_v31  ;;  %v9966_v26 = vld [vmem:[#allocation17_spill] sm:$0xff] }
 0x20c   : > { %v1883_v0 = vmul.f32 0.5, %v1867_v45  ;;  %v425_v39 = vadd.f32 %v409_v1, %v328_v6  ;;  %v9961_v45 = vld [vmem:[#allocation31_spill] sm:$0xff]  ;;  %v604_v6 = vmul.f32 %v7113_v40, %v7325_v7 }
 0x20e   : > { %v1899_v28 = vmul.f32 %v1883_v0, %v7395_v30  ;;  %v522_v10 = vadd.f32 %v506_v46, %v425_v39  ;;  %v745_v0 = vsub.s32 0, %v718_v59  ;;  %v9962_v46 = vld [vmem:[#allocation16_spill] sm:$0xff]  ;;  %v620_v27 = vadd.f32 %v604_v6, %v523_v38  ;;  %v9963_v39 = vld [vmem:[#allocation6_spill] sm:$0xff] }
 0x20f   : > { %v411_v49 = vmul.f32 %v7335_v21, %v9962_v46  ;;  %v330_v56 = vmul.f32 %v7330_v4, %v9963_v39  ;;  %v9969_v39 = vld [vmem:[#allocation11_spill] sm:$0xff] }
 0x210   : > { %1917 = vadd.xlane.f32.xlu2 %v1899_v28  ;;  %v619_v23 = vadd.f32 %v603_v8, %v522_v10  ;;  %v701_v28 = vadd.s32 48, %v7341_v58  ;;  %v746_v61 = vsel %vm744_vm10, %v745_v0, %v718_v59  ;;  %v9964_v8 = vld [vmem:[#allocation27_spill] sm:$0xff]  ;;  %v668_v0 = vmul.f32 %v7330_v4, %v7325_v7 }
 0x211   : > { %v1852_v16 = vpop.trf.xlu1  ;;  %vm782_vm11 = vcmp.le.s32.totalorder %v746_v61, 3  ;;  %v427_v35 = vadd.f32 %v411_v49, %v330_v56  ;;  %v413_v56 = vmul.f32 %v7335_v21, %v9969_v39 }
 0x212   : > { %v1868_v63 = vadd.f32 %v1852_v16, %v6687_v57  ;;  %v651_v34 = vadd.f32 %v635_v2, %v619_v23  ;;  %v667_v16 = vmul.f32 %v7330_v4, %v7323_v3  ;;  %v719_v5 = vsub.s32 %v701_v28, %v7343_v33 }
 0x213   : > { %v508_v3 = vmul.f32 %v7099_v50, %v9964_v8  ;;  %v412_v23 = vmul.f32 %v7335_v21, %v9966_v26  ;;  %v637_v28 = vmul.f32 %v7099_v50, %v9962_v46  ;;  %v669_v46 = vmul.f32 %v7330_v4, %v6786_v31 }
 0x214   : > { %v1884_v51 = vmul.f32 0.5, %v1868_v63  ;;  %v636_v63 = vmul.f32 %v7099_v50, %v6285_v44  ;;  %v683_v9 = vadd.f32 %v667_v16, %v651_v34  ;;  %v748_v10 = vsub.s32 0, %v719_v5 }
 0x215   : > { %vm747_vm12 = vcmp.lt.s32.totalorder %v719_v5, 0  ;;  %v509_v34 = vmul.f32 %v7099_v50, %v7327_v22  ;;  %v510_v31 = vmul.f32 %v7099_v50, %v7353_v43 }
 0x216   : > { %v1900_v57 = vmul.f32 %v1884_v51, %v7416_v52  ;;  %v7447_v59 = vsel %vm782_vm11, 0.0, %v683_v9  ;;  %v652_v37 = vadd.f32 %v636_v63, %v620_v27  ;;  %v749_v2 = vsel %vm747_vm12, %v748_v10, %v719_v5  ;;  %v9967_v63 = vld [vmem:[#allocation29_spill] sm:$0xff] }
 0x217   : > { %vm783_vm13 = vcmp.le.s32.totalorder %v749_v2, 3  ;;  %v703_v5 = vadd.s32 64, %v7341_v58  ;;  %v606_v7 = vmul.f32 %v7113_v40, %v9967_v63  ;;  %v9971_v2 = vld [vmem:[#allocation32_spill] sm:$0xff] }
 0x218   : > { %1919 = vadd.xlane.f32.xlu0 %v1900_v57  ;;  %v702_v57 = vadd.s32 56, %v7341_v58  ;;  %v684_v38 = vadd.f32 %v668_v0, %v652_v37  ;;  %v607_v43 = vmul.f32 %v7113_v40, %v9971_v2 }
 0x219   : > { %v1853_v18 = vpop.trf.xlu1 }
 0x21a   : > { %v1869_v55 = vadd.f32 %v1853_v18, %v9961_v45  ;;  %v524_v45 = vadd.f32 %v508_v3, %v427_v35  ;;  %v7469_v27 = vsel %vm783_vm13, 0.0, %v684_v38  ;;  %v721_v3 = vsub.s32 %v703_v5, %v7343_v33  ;;  %v9970_v35 = vld [vmem:[#allocation43_spill] sm:$0xff] }
 0x21b   : > { %v705_v5 = vadd.s32 80, %v7341_v58 }
 0x21c   : > { %v1885_v62 = vmul.f32 0.5, %v1869_v55  ;;  %v720_v55 = vsub.s32 %v702_v57, %v7343_v33  ;;  %vm753_vm0 = vcmp.lt.s32.totalorder %v721_v3, 0 }
 0x21e   : > { %v1901_v1 = vmul.f32 %v1885_v62, %v7429_v14  ;;  %v621_v62 = vadd.f32 %v605_v32, %v524_v45  ;;  %v751_v16 = vsub.s32 0, %v720_v55  ;;  %vm750_vm14 = vcmp.lt.s32.totalorder %v720_v55, 0 }
 0x220   : > { %1921 = vadd.xlane.f32.xlu2 %v1901_v1  ;;  %v653_v9 = vadd.f32 %v637_v28, %v621_v62  ;;  %v752_v8 = vsel %vm750_vm14, %v751_v16, %v720_v55  ;;  %v639_v16 = vmul.f32 %v7099_v50, %v9969_v39  ;;  %v9973_v39 = vld [vmem:[#allocation18_spill] sm:$0xff] }
 0x221   : > { %v1854_v20 = vpop.trf.xlu1  ;;  %vm784_vm15 = vcmp.le.s32.totalorder %v752_v8, 3  ;;  %v9974_v8 = vld [vmem:[#allocation23_spill] sm:$0xff] }
 0x222   : > { %v1870_v51 = vadd.f32 %v1854_v20, %v6795_v25  ;;  %v331_v25 = vmul.f32 %v7330_v4, %v9965_v36  ;;  %v685_v57 = vadd.f32 %v669_v46, %v653_v9  ;;  %v638_v36 = vmul.f32 %v7099_v50, %v9966_v26  ;;  %v9972_v9 = vld [vmem:[#allocation34_spill] sm:$0xff] }
 0x223   : > { %v608_v46 = vmul.f32 %v7113_v40, %v9972_v9 }
 0x224   : > { %v1886_v44 = vmul.f32 0.5, %v1870_v51  ;;  %v428_v61 = vadd.f32 %v412_v23, %v331_v25  ;;  %v9968_v51 = vld [vmem:[#allocation8_spill] sm:$0xff]  ;;  %v754_v25 = vsub.s32 0, %v721_v3  ;;  %v704_v23 = vadd.s32 72, %v7341_v58 }
 0x225   : > { %v7485_v55 = vsel %vm784_vm15, 0.0, %v685_v57 }
 0x226   : > { %v1902_v18 = vmul.f32 %v1886_v44, %v7447_v59  ;;  %v525_v22 = vadd.f32 %v509_v34, %v428_v61  ;;  %v755_v38 = vsel %vm753_vm0, %v754_v25, %v721_v3  ;;  %v722_v26 = vsub.s32 %v704_v23, %v7343_v33 }
 0x227   : > { %vm785_vm1 = vcmp.le.s32.totalorder %v755_v38, 3  ;;  %v624_v3 = vadd.f32 %v608_v46, %v9974_v8  ;;  %v7520_v38 = vld [vmem:[%s6088_s5 + $0x3] ss:$0 sm:$0xff] }
 0x228   : > { %1923 = vadd.xlane.f32.xlu0 %v1902_v18  ;;  %v622_v10 = vadd.f32 %v606_v7, %v525_v22  ;;  %v670_v18 = vmul.f32 %v7330_v4, %v9967_v63  ;;  %v757_v63 = vsub.s32 0, %v722_v26  ;;  %vm756_vm2 = vcmp.lt.s32.totalorder %v722_v26, 0 }
 0x229   : > { %v1855_v6 = vpop.trf.xlu1 }
 0x22a   : > { %v1871_v1 = vadd.f32 %v1855_v6, %v6846_v29  ;;  %v332_v29 = vmul.f32 %v7330_v4, %v9968_v51  ;;  %v654_v0 = vadd.f32 %v638_v36, %v622_v10 }
 0x22c   : > { %v1887_v49 = vmul.f32 0.5, %v1871_v1  ;;  %v429_v37 = vadd.f32 %v413_v56, %v332_v29  ;;  %v686_v34 = vadd.f32 %v670_v18, %v654_v0  ;;  %v758_v29 = vsel %vm756_vm2, %v757_v63, %v722_v26  ;;  %v9976_v18 = vld [vmem:[#allocation10_spill] sm:$0xff]  ;;  %v9978_v26 = vld [vmem:[#allocation40_spill] sm:$0xff] }
 0x22d   : > { %v640_v56 = vmul.f32 %v7099_v50, %v9973_v39  ;;  %vm786_vm3 = vcmp.le.s32.totalorder %v758_v29, 3 }
 0x22e   : > { %v1903_v20 = vmul.f32 %v1887_v49, %v7469_v27  ;;  %v526_v28 = vadd.f32 %v510_v31, %v429_v37  ;;  %v671_v49 = vmul.f32 %v7330_v4, %v9971_v2  ;;  %v7499_v22 = vsel %vm785_vm1, 0.0, %v686_v34 }
 0x22f   : > { %v672_v37 = vmul.f32 %v7330_v4, %v9972_v9  ;;  %v513_v34 = vmul.f32 %v7520_v38, %v9978_v26 }
 0x230   : > { %1925 = vadd.xlane.f32.xlu2 %v1903_v20  ;;  %v623_v6 = vadd.f32 %v607_v43, %v526_v28 }
 0x231   : > { %v1856_v44 = vpop.trf.xlu1 }
 0x232   : > { %v1872_v32 = vadd.f32 %v1856_v44, %v9970_v35  ;;  %v655_v20 = vadd.f32 %v639_v16, %v623_v6  ;;  %v706_v44 = vadd.s32 88, %v7341_v58  ;;  %v707_v6 = vadd.s32 96, %v7341_v58 }
 0x234   : > { %v1888_v45 = vmul.f32 0.5, %v1872_v32  ;;  %v687_v57 = vadd.f32 %v671_v49, %v655_v20  ;;  %v656_v32 = vadd.f32 %v640_v56, %v624_v3  ;;  %v724_v23 = vsub.s32 %v706_v44, %v7343_v33  ;;  %v9981_v49 = vld [vmem:[#allocation44_spill] sm:$0xff] }
 0x236   : > { %v1904_v62 = vmul.f32 %v1888_v45, %v7485_v55  ;;  %v7510_v36 = vsel %vm786_vm3, 0.0, %v687_v57  ;;  %v9977_v45 = vld [vmem:[#allocation14_spill] sm:$0xff]  ;;  %v688_v43 = vadd.f32 %v672_v37, %v656_v32  ;;  %vm762_vm6 = vcmp.lt.s32.totalorder %v724_v23, 0 }
 0x237   : > { %9975 = vst [vmem:[#allocation25_spill] sm:$0xff] %v7510_v36  ;;  %v416_v2 = vmul.f32 %v7335_v21, %v9977_v45  ;;  %v642_v3 = vmul.f32 %v7520_v38, %v9977_v45  ;;  %v709_v45 = vadd.s32 112, %v7341_v58 }
 0x238   : > { %1927 = vadd.xlane.f32.xlu0 %v1904_v62  ;;  %v763_v62 = vsub.s32 0, %v724_v23 }
 0x239   : > { %v1857_v1 = vpop.trf.xlu1 }
 0x23a   : > { %v1873_v61 = vadd.f32 %v1857_v1, %v7021_v53  ;;  %v723_v53 = vsub.s32 %v705_v5, %v7343_v33  ;;  %v9980_v5 = vld [vmem:[#allocation37_spill] sm:$0xff]  ;;  %v764_v46 = vsel %vm762_vm6, %v763_v62, %v724_v23 }
 0x23b   : > { %v673_v63 = vmul.f32 %v7330_v4, %v9980_v5  ;;  %vm788_vm7 = vcmp.le.s32.totalorder %v764_v46, 3  ;;  %v9988_v5 = vld [vmem:[#allocation47_spill] sm:$0xff] }
 0x23c   : > { %v1889_v7 = vmul.f32 0.5, %v1873_v61  ;;  %v760_v40 = vsub.s32 0, %v723_v53  ;;  %vm759_vm4 = vcmp.lt.s32.totalorder %v723_v53, 0 }
 0x23e   : > { %v1905_v51 = vmul.f32 %v1889_v7, %v7499_v22  ;;  %v761_v25 = vsel %vm759_vm4, %v760_v40, %v723_v53  ;;  %v5933_v7 = vld [vmem:[%s6088_s5 + $0x2] ss:$0 sm:$0xff]  ;;  %v9982_v53 = vld [vmem:[#allocation38_spill] sm:$0xff] }
 0x23f   : > { %vm787_vm5 = vcmp.le.s32.totalorder %v761_v25, 3  ;;  %v610_v9 = vmul.f32 %v5933_v7, %v9981_v49  ;;  %v689_v29 = vadd.f32 %v673_v63, %v9982_v53 }
 0x240   : > { %1929 = vadd.xlane.f32.xlu2 %v1905_v51  ;;  %v7525_v16 = vsel %vm787_vm5, 0.0, %v688_v43  ;;  %v725_v51 = vsub.s32 %v707_v6, %v7343_v33  ;;  %v9986_v6 = vld [vmem:[#allocation12_spill] sm:$0xff] }
 0x241   : > { %v1858_v10 = vpop.trf.xlu1  ;;  %9979 = vst [vmem:[#allocation31_spill] sm:$0xff] %v7525_v16  ;;  %v7538_v40 = vsel %vm788_vm7, 0.0, %v689_v29 }
 0x242   : > { %v1874_v31 = vadd.f32 %v1858_v10, %v7071_v15  ;;  %v335_v15 = vmul.f32 %v7330_v4, %v9976_v18  ;;  %v766_v57 = vsub.s32 0, %v725_v51  ;;  %v708_v10 = vadd.s32 104, %v7341_v58  ;;  %9983 = vst [vmem:[#allocation16_spill] sm:$0xff] %v7538_v40 }
 0x243   : > { %vm765_vm8 = vcmp.lt.s32.totalorder %v725_v51, 0 }
 0x244   : > { %v1890_v35 = vmul.f32 0.5, %v1874_v31  ;;  %v432_v61 = vadd.f32 %v416_v2, %v335_v15  ;;  %v767_v37 = vsel %vm765_vm8, %v766_v57, %v725_v51  ;;  %v710_v51 = vadd.s32 120, %v7341_v58 }
 0x245   : > { %vm789_vm9 = vcmp.le.s32.totalorder %v767_v37, 3 }
 0x246   : > { %v1906_v50 = vmul.f32 %v1890_v35, %v7510_v36  ;;  %v529_v20 = vadd.f32 %v513_v34, %v432_v61  ;;  %v674_v35 = vmul.f32 %v7330_v4, %v9981_v49  ;;  %v727_v34 = vsub.s32 %v709_v45, %v7343_v33 }
 0x248   : > { %1931 = vadd.xlane.f32.xlu0 %v1906_v50  ;;  %v626_v39 = vadd.f32 %v610_v9, %v529_v20  ;;  %v726_v50 = vsub.s32 %v708_v10, %v7343_v33  ;;  %v772_v46 = vsub.s32 0, %v727_v34  ;;  %vm771_vm12 = vcmp.lt.s32.totalorder %v727_v34, 0  ;;  %v9990_v10 = vld [vmem:[#allocation53_spill] sm:$0xff] }
 0x249   : > { %v1859_v0 = vpop.trf.xlu1 }
 0x24a   : > { %v1875_v28 = vadd.f32 %v1859_v0, %v7160_v24  ;;  %v658_v44 = vadd.f32 %v642_v3, %v626_v39  ;;  %v769_v15 = vsub.s32 0, %v726_v50  ;;  %vm768_vm10 = vcmp.lt.s32.totalorder %v726_v50, 0  ;;  %v9985_v0 = vld [vmem:[#allocation46_spill] sm:$0xff] }
 0x24b   : > { %v773_v3 = vsel %vm771_vm12, %v772_v46, %v727_v34 }
 0x24c   : > { %v1891_v1 = vmul.f32 0.5, %v1875_v28  ;;  %v690_v25 = vadd.f32 %v674_v35, %v658_v44  ;;  %v675_v28 = vmul.f32 %v7330_v4, %v9985_v0  ;;  %v770_v26 = vsel %vm768_vm10, %v769_v15, %v726_v50 }
 0x24d   : > { %vm790_vm11 = vcmp.le.s32.totalorder %v770_v26, 3  ;;  %vm791_vm13 = vcmp.le.s32.totalorder %v773_v3, 3 }
 0x24e   : > { %v1907_v24 = vmul.f32 %v1891_v1, %v7525_v16  ;;  %v7546_v43 = vsel %vm789_vm9, 0.0, %v690_v25  ;;  %v338_v1 = vmul.f32 %v7330_v4, %v9986_v6  ;;  %v691_v63 = vadd.f32 %v675_v28, %v9988_v5 }
 0x24f   : > { %9984 = vst [vmem:[#allocation6_spill] sm:$0xff] %v7546_v43 }
 0x250   : > { %1933 = vadd.xlane.f32.xlu2 %v1907_v24  ;;  %v7560_v39 = vsel %vm790_vm11, 0.0, %v691_v63 }
 0x251   : > { %v1860_v56 = vpop.trf.xlu1  ;;  %9989 = vst [vmem:[#allocation27_spill] sm:$0xff] %v7560_v39 }
 0x252   : > { %v1876_v8 = vadd.f32 %v1860_v56, %v7209_v12  ;;  %v498_v12 = vpop.permute.xlu2 %497 }
 0x253   : > { %v516_v20 = vmul.f32 %v7520_v38, %v498_v12 }
 0x254   : > { %v1892_v31 = vmul.f32 0.5, %v1876_v8 }
 0x256   : > { %v1908_v32 = vmul.f32 %v1892_v31, %v7538_v40 }
 0x258   : > { %1935 = vadd.xlane.f32.xlu0 %v1908_v32 }
 0x259   : > { %v1861_v23 = vpop.trf.xlu1 }
 0x25a   : > { %v1877_v18 = vadd.f32 %v1861_v23, %v7235_v54  ;;  %v9987_v54 = vld [vmem:[#allocation15_spill] sm:$0xff]  ;;  %v595_v9 = vpop.permute.xlu2 %594 }
 0x25b   : > { %v419_v61 = vmul.f32 %v7335_v21, %v9987_v54  ;;  %v676_v21 = vmul.f32 %v7330_v4, %v7091_v60  ;;  %v613_v56 = vmul.f32 %v5933_v7, %v595_v9  ;;  %v645_v32 = vmul.f32 %v7520_v38, %v9987_v54 }
 0x25c   : > { %v1893_v2 = vmul.f32 0.5, %v1877_v18  ;;  %v677_v12 = vmul.f32 %v7330_v4, %v595_v9 }
 0x25d   : > { %v435_v29 = vadd.f32 %v419_v61, %v338_v1  ;;  %v692_v31 = vadd.f32 %v676_v21, %v9990_v10 }
 0x25e   : > { %v1909_v62 = vmul.f32 %v1893_v2, %v7546_v43 }
 0x25f   : > { %v532_v57 = vadd.f32 %v516_v20, %v435_v29  ;;  %v7570_v7 = vsel %vm791_vm13, 0.0, %v692_v31  ;;  %v9993_v31 = vld [vmem:[#allocation7_spill] sm:$0xff] }
 0x260   : > { %1937 = vadd.xlane.f32.xlu2 %v1909_v62  ;;  %9991 = vst [vmem:[#allocation5_spill] sm:$0xff] %v7570_v7 }
 0x261   : > { %v1862_v49 = vpop.trf.xlu1  ;;  %v629_v44 = vadd.f32 %v613_v56, %v532_v57 }
 0x262   : > { %v1878_v24 = vadd.f32 %v1862_v49, %v7288_v19  ;;  %v728_v19 = vsub.s32 %v710_v51, %v7343_v33 }
 0x263   : > { %v661_v50 = vadd.f32 %v645_v32, %v629_v44  ;;  %v7591_v44 = vmul.f32 -0.5, %v9993_v31 }
 0x264   : > { %v1894_v53 = vmul.f32 0.5, %v1878_v24  ;;  %v775_v37 = vsub.s32 0, %v728_v19  ;;  %vm774_vm14 = vcmp.lt.s32.totalorder %v728_v19, 0 }
 0x265   : > { %v693_v23 = vadd.f32 %v677_v12, %v661_v50  ;;  %9994 = vst [vmem:[#allocation29_spill] sm:$0xff] %v7591_v44 }
 0x266   : > { %v1910_v8 = vmul.f32 %v1894_v53, %v7560_v39  ;;  %v776_v25 = vsel %vm774_vm14, %v775_v37, %v728_v19 }
 0x267   : > { %vm792_vm15 = vcmp.le.s32.totalorder %v776_v25, 3 }
 0x268   : > { %1939 = vadd.xlane.f32.xlu0 %v1910_v8  ;;  %v7577_v2 = vsel %vm792_vm15, 0.0, %v693_v23 }
 0x269   : > { %v1863_v58 = vpop.trf.xlu1  ;;  %9992 = vst [vmem:[#allocation17_spill] sm:$0xff] %v7577_v2 }
 0x26a   : > { %v1879_v35 = vadd.f32 %v1863_v58, %v7313_v41 }
 0x26c   : > { %v1895_v60 = vmul.f32 0.5, %v1879_v35 }
 0x26e   : > { %v1911_v33 = vmul.f32 %v1895_v60, %v7570_v7 }
 0x270   : > { %1941 = vadd.xlane.f32.xlu2 %v1911_v33 }
 0x271   : > { %v1864_v18 = vpop.trf.xlu1 }
 0x272   : > { %v1880_v41 = vadd.f32 %v1864_v18, %v7320_v11 }
 0x273   : > { %v1914_v15 = vpop.xlane.xlu0 %1913 }
 0x274   : > { %v1896_v45 = vmul.f32 0.5, %v1880_v41  ;;  %v7575_v38 = vadd.f32 -1.0, %v1914_v15 }
 0x276   : > { %v5116_v0 = vmul.f32 -2.0, %v7575_v38  ;;  %v1912_v28 = vmul.f32 %v1896_v45, %v7577_v2  ;;  %v9654_v58 = vmax.f32 %v7575_v38, 0.0 }
 0x278   : > { %v2025_v4 = vmul.f32 1.442695, %v5116_v0  ;;  %1943 = vadd.xlane.f32.xlu0 %v1912_v28 }
 0x27a   : > { %5672 = vpow2.f32 %v2025_v4 }
 0x27b   : > { %v1916_v62 = vpop.xlane.xlu2 %1915 }
 0x27c   : > { %v7581_v26 = vadd.f32 -1.0, %v1916_v62 }
 0x27e   : > { %v5117_v34 = vmul.f32 -2.0, %v7581_v26 }
 0x280   : > { %v5673_v6 = vpop.eup %5672  ;;  %v2027_v11 = vmul.f32 1.442695, %v5117_v34  ;;  %v9996_v34 = vld [vmem:[#allocation9_spill] sm:$0xff] }
 0x281   : > { %v2057_v1 = vadd.f32 1.0, %v5673_v6  ;;  %v7603_v6 = vmul.f32 -0.5, %v9996_v34 }
 0x282   : > { %5674 = vpow2.f32 %v2027_v11 }
 0x283   : > { %5676 = vrcp.f32 %v2057_v1  ;;  %v1918_v54 = vpop.xlane.xlu2 %1917  ;;  %v2084_v29 = vand.u32 2147483648, %v2057_v1  ;;  %v2082_v56 = vand.u32 2147483647, %v2057_v1  ;;  %vm2078_vm1 = vweird.f32 %v2057_v1  ;;  %9997 = vst [vmem:[#allocation11_spill] sm:$0xff] %v7603_v6 }
 0x284   : > { %v7584_v61 = vadd.f32 -1.0, %v1918_v54 }
 0x285   : > { %v2085_v35 = vor.u32 1.1754944e-38, %v2084_v29  ;;  %vm2083_vm3 = vcmp.eq.f32.partialorder %v2082_v56, 8.507059e+37 }
 0x286   : > { %v5118_v5 = vmul.f32 -2.0, %v7584_v61 }
 0x288   : > { %v5675_v63 = vpop.eup %5674  ;;  %v2029_v49 = vmul.f32 1.442695, %v5118_v5  ;;  %v9653_v5 = vmax.f32 %v7581_v26, 0.0 }
 0x289   : > { %v5677_v9 = vpop.eup %5676  ;;  %v2058_v24 = vadd.f32 1.0, %v5675_v63 }
 0x28a   : > { %v2074_v46 = vmul.f32 %v5677_v9, %v2057_v1  ;;  %5678 = vpow2.f32 %v2029_v49  ;;  %vm2079_vm0 = vweird.f32 %v5677_v9 }
 0x28b   : > { %5680 = vrcp.f32 %v2058_v24  ;;  %v1920_v20 = vpop.xlane.xlu0 %1919  ;;  %vm2080_vm2 = vmor %vm2078_vm1, %vm2079_vm0  ;;  %v2099_v18 = vand.u32 2147483648, %v2058_v24  ;;  %v2097_v45 = vand.u32 2147483647, %v2058_v24  ;;  %vm2093_vm5 = vweird.f32 %v2058_v24 }
 0x28c   : > { %v2075_v51 = vsub.f32 1.0, %v2074_v46  ;;  %v7587_v53 = vadd.f32 -1.0, %v1920_v20 }
 0x28d   : > { %v2100_v11 = vor.u32 1.1754944e-38, %v2099_v18  ;;  %vm2098_vm7 = vcmp.eq.f32.partialorder %v2097_v45, 8.507059e+37 }
 0x28e   : > { %v2076_v21 = vmul.f32 %v5677_v9, %v2075_v51  ;;  %v5119_v8 = vmul.f32 -2.0, %v7587_v53 }
 0x290   : > { %v5679_v3 = vpop.eup %5678  ;;  %v2077_v57 = vadd.f32 %v5677_v9, %v2076_v21  ;;  %v2031_v19 = vmul.f32 1.442695, %v5119_v8 }
 0x291   : > { %v5681_v10 = vpop.eup %5680  ;;  %v2059_v32 = vadd.f32 1.0, %v5679_v3 }
 0x292   : > { %v2081_v37 = vsel %vm2080_vm2, %v5677_v9, %v2077_v57  ;;  %v2089_v60 = vmul.f32 %v5681_v10, %v2058_v24  ;;  %5682 = vpow2.f32 %v2031_v19  ;;  %vm2094_vm4 = vweird.f32 %v5681_v10 }
 0x293   : > { %v2086_v50 = vsel %vm2083_vm3, %v2085_v35, %v2081_v37  ;;  %5684 = vrcp.f32 %v2059_v32  ;;  %v1922_v12 = vpop.xlane.xlu2 %1921  ;;  %vm2095_vm6 = vmor %vm2093_vm5, %vm2094_vm4  ;;  %v2114_v51 = vand.u32 2147483648, %v2059_v32  ;;  %v2112_v8 = vand.u32 2147483647, %v2059_v32 }
 0x294   : > { %v2313_v33 = vmul.f32 %v2086_v50, %v9654_v58  ;;  %v2090_v25 = vsub.f32 1.0, %v2089_v60  ;;  %v7596_v23 = vadd.f32 -1.0, %v1922_v12  ;;  %vm2108_vm9 = vweird.f32 %v2059_v32 }
 0x295   : > { %v2115_v35 = vor.u32 1.1754944e-38, %v2114_v51  ;;  %v9652_v50 = vmax.f32 %v7584_v61, 0.0  ;;  %vm2113_vm11 = vcmp.eq.f32.partialorder %v2112_v8, 8.507059e+37 }
 0x296   : > { %9995 = vst [vmem:[#allocation8_spill] sm:$0xff] %v7596_v23  ;;  %v7599_v41 = vadd.f32 %v2313_v33, %v7591_v44  ;;  %v2091_v15 = vmul.f32 %v5681_v10, %v2090_v25  ;;  %v5120_v0 = vmul.f32 -2.0, %v7596_v23 }
 0x298   : > { %v5683_v28 = vpop.eup %5682  ;;  %v2092_v4 = vadd.f32 %v5681_v10, %v2091_v15  ;;  %v2033_v54 = vmul.f32 1.442695, %v5120_v0 }
 0x299   : > { %v5685_v62 = vpop.eup %5684  ;;  %v2060_v1 = vadd.f32 1.0, %v5683_v28  ;;  %2361 = vxpose.xlu2.b32.start [1/16] %v7599_v41, 128 }
 0x29a   : > { %v2096_v63 = vsel %vm2095_vm6, %v5681_v10, %v2092_v4  ;;  %v2104_v49 = vmul.f32 %v5685_v62, %v2059_v32  ;;  %vm2109_vm8 = vweird.f32 %v5685_v62  ;;  %v9999_v10 = vld [vmem:[#allocation13_spill] sm:$0xff] }
 0x29b   : > { %v2101_v9 = vsel %vm2098_vm7, %v2100_v11, %v2096_v63  ;;  %5686 = vrcp.f32 %v2060_v1  ;;  %v1924_v46 = vpop.xlane.xlu0 %1923  ;;  %v7616_v31 = vmul.f32 -0.5, %v9999_v10  ;;  %vm2110_vm10 = vmor %vm2108_vm9, %vm2109_vm8  ;;  %v2127_v28 = vand.u32 2147483647, %v2060_v1 }
 0x29c   : > { %v2314_v24 = vmul.f32 %v2101_v9, %v9653_v5  ;;  %v2105_v20 = vsub.f32 1.0, %v2104_v49  ;;  %5688 = vpow2.f32 %v2033_v54  ;;  %v7609_v29 = vadd.f32 -1.0, %v1924_v46  ;;  %v10002_v9 = vld [vmem:[#allocation20_spill] sm:$0xff] }
 0x29d   : > { %10000 = vst [vmem:[#allocation32_spill] sm:$0xff] %v7616_v31  ;;  %v2129_v4 = vand.u32 2147483648, %v2060_v1  ;;  %vm2123_vm13 = vweird.f32 %v2060_v1  ;;  %v7629_v46 = vmul.f32 -0.5, %v10002_v9  ;;  %vm2128_vm15 = vcmp.eq.f32.partialorder %v2127_v28, 8.507059e+37 }
 0x29e   : > { %9998 = vst [vmem:[#allocation43_spill] sm:$0xff] %v7609_v29  ;;  %v7612_v21 = vadd.f32 %v2314_v24, %v7603_v6  ;;  %v2106_v56 = vmul.f32 %v5685_v62, %v2105_v20  ;;  %v5121_v3 = vmul.f32 -2.0, %v7609_v29  ;;  %v9650_v24 = vmax.f32 %v7587_v53, 0.0 }
 0x29f   : > { %10003 = vst [vmem:[#allocation18_spill] sm:$0xff] %v7629_v46  ;;  %v2130_v20 = vor.u32 1.1754944e-38, %v2129_v4  ;;  %v9649_v9 = vmax.f32 %v7596_v23, 0.0 }
 0x2a0   : > { %v2107_v57 = vadd.f32 %v5685_v62, %v2106_v56  ;;  %v2035_v37 = vmul.f32 1.442695, %v5121_v3 }
 0x2a1   : > { %v5687_v19 = vpop.eup %5686  ;;  %2362 = vxpose.xlu2.b32.cont [2/16] %v7612_v21, 128 }
 0x2a2   : > { %v5689_v60 = vpop.eup %5688  ;;  %v2111_v12 = vsel %vm2110_vm10, %v5685_v62, %v2107_v57  ;;  %v2119_v33 = vmul.f32 %v5687_v19, %v2060_v1  ;;  %5690 = vpow2.f32 %v2035_v37  ;;  %vm2124_vm12 = vweird.f32 %v5687_v19 }
 0x2a3   : > { %v2116_v25 = vsel %vm2113_vm11, %v2115_v35, %v2111_v12  ;;  %v2061_v18 = vadd.f32 1.0, %v5689_v60  ;;  %v1926_v15 = vpop.xlane.xlu2 %1925  ;;  %vm2125_vm14 = vmor %vm2123_vm13, %vm2124_vm12 }
 0x2a4   : > { %v2315_v32 = vmul.f32 %v2116_v25, %v9652_v50  ;;  %v2120_v45 = vsub.f32 1.0, %v2119_v33  ;;  %v7622_v0 = vadd.f32 -1.0, %v1926_v15 }
 0x2a5   : > { %5692 = vrcp.f32 %v2061_v18  ;;  %v2144_v12 = vand.u32 2147483648, %v2061_v18  ;;  %v2142_v15 = vand.u32 2147483647, %v2061_v18  ;;  %vm2138_vm1 = vweird.f32 %v2061_v18 }
 0x2a6   : > { %10001 = vst [vmem:[#allocation34_spill] sm:$0xff] %v7622_v0  ;;  %v7625_v34 = vadd.f32 %v2315_v32, %v7616_v31  ;;  %v2121_v11 = vmul.f32 %v5687_v19, %v2120_v45  ;;  %v5122_v62 = vmul.f32 -2.0, %v7622_v0 }
 0x2a7   : > { %vm2143_vm3 = vcmp.eq.f32.partialorder %v2142_v15, 8.507059e+37 }
 0x2a8   : > { %v2122_v54 = vadd.f32 %v5687_v19, %v2121_v11  ;;  %v2037_v63 = vmul.f32 1.442695, %v5122_v62  ;;  %v5691_v49 = vpop.eup %5690  ;;  %v10005_v11 = vld [vmem:[#allocation24_spill] sm:$0xff] }
 0x2a9   : > { %2363 = vxpose.xlu2.b32.cont [3/16] %v7625_v34, 128  ;;  %v2062_v56 = vadd.f32 1.0, %v5691_v49  ;;  %v7645_v62 = vmul.f32 -0.5, %v10005_v11  ;;  %v9648_v11 = vmax.f32 %v7609_v29, 0.0 }
 0x2aa   : > { %v2126_v51 = vsel %vm2125_vm14, %v5687_v19, %v2122_v54  ;;  %5694 = vpow2.f32 %v2037_v63  ;;  %v2145_v54 = vor.u32 1.1754944e-38, %v2144_v12 }
 0x2ab   : > { %v5693_v8 = vpop.eup %5692  ;;  %v2131_v3 = vsel %vm2128_vm15, %v2130_v20, %v2126_v51  ;;  %v1928_v57 = vpop.xlane.xlu0 %1927  ;;  %5696 = vrcp.f32 %v2062_v56  ;;  %10006 = vst [vmem:[#allocation10_spill] sm:$0xff] %v7645_v62  ;;  %vm2153_vm5 = vweird.f32 %v2062_v56 }
 0x2ac   : > { %v2316_v1 = vmul.f32 %v2131_v3, %v9650_v24  ;;  %v2134_v10 = vmul.f32 %v5693_v8, %v2061_v18  ;;  %v7635_v35 = vadd.f32 -1.0, %v1928_v57  ;;  %vm2139_vm0 = vweird.f32 %v5693_v8 }
 0x2ad   : > { %vm2140_vm2 = vmor %vm2138_vm1, %vm2139_vm0 }
 0x2ae   : > { %10004 = vst [vmem:[#allocation23_spill] sm:$0xff] %v7635_v35  ;;  %v7638_v37 = vadd.f32 %v2316_v1, %v7629_v46  ;;  %v2135_v60 = vsub.f32 1.0, %v2134_v10  ;;  %v5123_v19 = vmul.f32 -2.0, %v7635_v35  ;;  %v2159_v1 = vand.u32 2147483648, %v2062_v56 }
 0x2b0   : > { %v5695_v33 = vpop.eup %5694  ;;  %v2136_v25 = vmul.f32 %v5693_v8, %v2135_v60  ;;  %v2039_v45 = vmul.f32 1.442695, %v5123_v19  ;;  %v2157_v60 = vand.u32 2147483647, %v2062_v56 }
 0x2b1   : > { %v7641_v32 = vadd.f32 1.0, %v5695_v33  ;;  %2364 = vxpose.xlu2.b32.cont [4/16] %v7638_v37, 128  ;;  %v5697_v28 = vpop.eup %5696 }
 0x2b2   : > { %v2137_v4 = vadd.f32 %v5693_v8, %v2136_v25  ;;  %v2149_v63 = vmul.f32 %v5697_v28, %v2062_v56  ;;  %vm2154_vm4 = vweird.f32 %v5697_v28  ;;  %vm2158_vm7 = vcmp.eq.f32.partialorder %v2157_v60, 8.507059e+37 }
 0x2b3   : > { %5698 = vrcp.f32 %v7641_v32  ;;  %v1930_v49 = vpop.xlane.xlu2 %1929  ;;  %vm2155_vm6 = vmor %vm2153_vm5, %vm2154_vm4  ;;  %vm2168_vm9 = vweird.f32 %v7641_v32 }
 0x2b4   : > { %v2141_v20 = vsel %vm2140_vm2, %v5693_v8, %v2137_v4  ;;  %5700 = vpow2.f32 %v2039_v45  ;;  %v2150_v3 = vsub.f32 1.0, %v2149_v63  ;;  %v7649_v57 = vadd.f32 -1.0, %v1930_v49  ;;  %v10008_v45 = vld [vmem:[#allocation28_spill] sm:$0xff] }
 0x2b5   : > { %v2146_v51 = vsel %vm2143_vm3, %v2145_v54, %v2141_v20  ;;  %v7658_v4 = vmul.f32 -0.5, %v10008_v45  ;;  %v2160_v54 = vor.u32 1.1754944e-38, %v2159_v1  ;;  %v2172_v45 = vand.u32 2147483647, %v7641_v32 }
 0x2b6   : > { %10007 = vst [vmem:[#allocation14_spill] sm:$0xff] %v7649_v57  ;;  %v2317_v18 = vmul.f32 %v2146_v51, %v9649_v9  ;;  %v2151_v10 = vmul.f32 %v5697_v28, %v2150_v3  ;;  %v5124_v12 = vmul.f32 -2.0, %v7649_v57 }
 0x2b7   : > { %10009 = vst [vmem:[#allocation40_spill] sm:$0xff] %v7658_v4  ;;  %vm2173_vm11 = vcmp.eq.f32.partialorder %v2172_v45, 8.507059e+37 }
 0x2b8   : > { %v7655_v19 = vadd.f32 %v2317_v18, %v7645_v62  ;;  %v2152_v8 = vadd.f32 %v5697_v28, %v2151_v10  ;;  %v2041_v25 = vmul.f32 1.442695, %v5124_v12  ;;  %v2174_v12 = vand.u32 2147483648, %v7641_v32 }
 0x2b9   : > { %v5699_v33 = vpop.eup %5698 }
 0x2ba   : > { %v5701_v15 = vpop.eup %5700  ;;  %v2164_v63 = vmul.f32 %v5699_v33, %v7641_v32  ;;  %2365 = vxpose.xlu2.b32.cont [5/16] %v7655_v19, 128  ;;  %v2156_v49 = vsel %vm2155_vm6, %v5697_v28, %v2152_v8  ;;  %5702 = vpow2.f32 %v2041_v25  ;;  %vm2169_vm8 = vweird.f32 %v5699_v33 }
 0x2bb   : > { %v2064_v20 = vadd.f32 1.0, %v5701_v15  ;;  %v1932_v51 = vpop.xlane.xlu0 %1931  ;;  %v2161_v3 = vsel %vm2158_vm7, %v2160_v54, %v2156_v49  ;;  %v10011_v54 = vld [vmem:[#allocation33_spill] sm:$0xff]  ;;  %v9651_v49 = vmax.f32 %v7622_v0, 0.0  ;;  %vm2170_vm10 = vmor %vm2168_vm9, %vm2169_vm8 }
 0x2bc   : > { %v2165_v56 = vsub.f32 1.0, %v2164_v63  ;;  %v7663_v18 = vadd.f32 -1.0, %v1932_v51  ;;  %v2318_v10 = vmul.f32 %v2161_v3, %v9648_v11  ;;  %v7675_v63 = vmul.f32 -0.5, %v10011_v54 }
 0x2bd   : > { %5704 = vrcp.f32 %v2064_v20  ;;  %v2175_v51 = vor.u32 1.1754944e-38, %v2174_v12  ;;  %vm2183_vm13 = vweird.f32 %v2064_v20 }
 0x2be   : > { %10010 = vst [vmem:[#allocation37_spill] sm:$0xff] %v7663_v18  ;;  %v2166_v1 = vmul.f32 %v5699_v33, %v2165_v56  ;;  %v5125_v28 = vmul.f32 -2.0, %v7663_v18  ;;  %v7671_v60 = vadd.f32 %v2318_v10, %v7658_v4 }
 0x2bf   : > { %10012 = vst [vmem:[#allocation44_spill] sm:$0xff] %v7675_v63 }
 0x2c0   : > { %v2167_v8 = vadd.f32 %v5699_v33, %v2166_v1  ;;  %v2043_v25 = vmul.f32 1.442695, %v5125_v28  ;;  %v5703_v15 = vpop.eup %5702 }
 0x2c1   : > { %v2065_v56 = vadd.f32 1.0, %v5703_v15  ;;  %v2187_v15 = vand.u32 2147483647, %v2064_v20 }
 0x2c2   : > { %v2171_v3 = vsel %vm2170_vm10, %v5699_v33, %v2167_v8  ;;  %5706 = vpow2.f32 %v2043_v25  ;;  %2366 = vxpose.xlu2.b32.cont [6/16] %v7671_v60, 128  ;;  %v2189_v33 = vand.u32 2147483648, %v2064_v20 }
 0x2c3   : > { %v5705_v10 = vpop.eup %5704  ;;  %v2176_v11 = vsel %vm2173_vm11, %v2175_v51, %v2171_v3  ;;  %v1934_v1 = vpop.xlane.xlu2 %1933  ;;  %5708 = vrcp.f32 %v2065_v56  ;;  %vm2188_vm15 = vcmp.eq.f32.partialorder %v2187_v15, 8.507059e+37  ;;  %vm2198_vm1 = vweird.f32 %v2065_v56 }
 0x2c4   : > { %v2319_v32 = vmul.f32 %v2176_v11, %v9651_v49  ;;  %v2179_v28 = vmul.f32 %v5705_v10, %v2064_v20  ;;  %v7681_v54 = vadd.f32 -1.0, %v1934_v1  ;;  %vm2184_vm12 = vweird.f32 %v5705_v10  ;;  %v10014_v1 = vld [vmem:[#allocation36_spill] sm:$0xff] }
 0x2c5   : > { %v7691_v49 = vmul.f32 -0.5, %v10014_v1  ;;  %vm2185_vm14 = vmor %vm2183_vm13, %vm2184_vm12  ;;  %v2204_v1 = vand.u32 2147483648, %v2065_v56 }
 0x2c6   : > { %10013 = vst [vmem:[#allocation38_spill] sm:$0xff] %v7681_v54  ;;  %v7684_v9 = vadd.f32 %v2319_v32, %v7675_v63  ;;  %v2180_v12 = vsub.f32 1.0, %v2179_v28  ;;  %v5126_v45 = vmul.f32 -2.0, %v7681_v54  ;;  %v2190_v32 = vor.u32 1.1754944e-38, %v2189_v33 }
 0x2c7   : > { %10015 = vst [vmem:[#allocation46_spill] sm:$0xff] %v7691_v49  ;;  %v2202_v33 = vand.u32 2147483647, %v2065_v56 }
 0x2c8   : > { %v5707_v8 = vpop.eup %5706  ;;  %v2181_v25 = vmul.f32 %v5705_v10, %v2180_v12  ;;  %v2045_v3 = vmul.f32 1.442695, %v5126_v45  ;;  %v9660_v12 = vmax.f32 %v7635_v35, 0.0 }
 0x2c9   : > { %v7687_v51 = vadd.f32 1.0, %v5707_v8  ;;  %v5709_v24 = vpop.eup %5708  ;;  %vm2203_vm3 = vcmp.eq.f32.partialorder %v2202_v33, 8.507059e+37 }
 0x2ca   : > { %v2182_v11 = vadd.f32 %v5705_v10, %v2181_v25  ;;  %2367 = vxpose.xlu2.b32.cont [7/16] %v7684_v9, 128  ;;  %v2194_v28 = vmul.f32 %v5709_v24, %v2065_v56  ;;  %vm2199_vm0 = vweird.f32 %v5709_v24 }
 0x2cb   : > { %5710 = vrcp.f32 %v7687_v51  ;;  %v1936_v50 = vpop.xlane.xlu0 %1935  ;;  %vm2200_vm2 = vmor %vm2198_vm1, %vm2199_vm0  ;;  %vm2213_vm5 = vweird.f32 %v7687_v51 }
 0x2cc   : > { %v2186_v5 = vsel %vm2185_vm14, %v5705_v10, %v2182_v11  ;;  %5712 = vpow2.f32 %v2045_v3  ;;  %v2195_v8 = vsub.f32 1.0, %v2194_v28  ;;  %v7695_v25 = vadd.f32 -1.0, %v1936_v50  ;;  %v10017_v3 = vld [vmem:[#allocation41_spill] sm:$0xff] }
 0x2cd   : > { %v2191_v45 = vsel %vm2188_vm15, %v2190_v32, %v2186_v5  ;;  %v7704_v50 = vmul.f32 -0.5, %v10017_v3  ;;  %v9663_v11 = vmax.f32 %v7649_v57, 0.0  ;;  %v2205_v32 = vor.u32 1.1754944e-38, %v2204_v1 }
 0x2ce   : > { %10016 = vst [vmem:[#allocation12_spill] sm:$0xff] %v7695_v25  ;;  %v2320_v20 = vmul.f32 %v2191_v45, %v9660_v12  ;;  %v2196_v58 = vmul.f32 %v5709_v24, %v2195_v8  ;;  %v5127_v63 = vmul.f32 -2.0, %v7695_v25  ;;  %v2219_v12 = vand.u32 2147483648, %v7687_v51 }
 0x2cf   : > { %10018 = vst [vmem:[#allocation15_spill] sm:$0xff] %v7704_v50 }
 0x2d0   : > { %v7701_v0 = vadd.f32 %v2320_v20, %v7691_v49  ;;  %v2197_v10 = vadd.f32 %v5709_v24, %v2196_v58  ;;  %v2047_v15 = vmul.f32 1.442695, %v5127_v63  ;;  %v2217_v49 = vand.u32 2147483647, %v7687_v51 }
 0x2d1   : > { %v5711_v4 = vpop.eup %5710 }
 0x2d2   : > { %v5713_v5 = vpop.eup %5712  ;;  %v2209_v28 = vmul.f32 %v5711_v4, %v7687_v51  ;;  %2368 = vxpose.xlu2.b32.cont [8/16] %v7701_v0, 128  ;;  %v2201_v45 = vsel %vm2200_vm2, %v5709_v24, %v2197_v10  ;;  %5714 = vpow2.f32 %v2047_v15  ;;  %vm2214_vm4 = vweird.f32 %v5711_v4 }
 0x2d3   : > { %v2067_v8 = vadd.f32 1.0, %v5713_v5  ;;  %v1938_v20 = vpop.xlane.xlu2 %1937  ;;  %v2206_v58 = vsel %vm2203_vm3, %v2205_v32, %v2201_v45  ;;  %v10020_v32 = vld [vmem:[#allocation45_spill] sm:$0xff]  ;;  %v9667_v45 = vmax.f32 %v7663_v18, 0.0  ;;  %vm2215_vm6 = vmor %vm2213_vm5, %vm2214_vm4  ;;  %vm2218_vm7 = vcmp.eq.f32.partialorder %v2217_v49, 8.507059e+37 }
 0x2d4   : > { %v2210_v56 = vsub.f32 1.0, %v2209_v28  ;;  %v7709_v63 = vadd.f32 -1.0, %v1938_v20  ;;  %v2321_v3 = vmul.f32 %v2206_v58, %v9663_v11  ;;  %v7721_v28 = vmul.f32 -0.5, %v10020_v32 }
 0x2d5   : > { %5716 = vrcp.f32 %v2067_v8  ;;  %v2220_v20 = vor.u32 1.1754944e-38, %v2219_v12  ;;  %vm2228_vm9 = vweird.f32 %v2067_v8 }
 0x2d6   : > { %10019 = vst [vmem:[#allocation47_spill] sm:$0xff] %v7709_v63  ;;  %v2211_v1 = vmul.f32 %v5711_v4, %v2210_v56  ;;  %v5128_v24 = vmul.f32 -2.0, %v7709_v63  ;;  %v7717_v33 = vadd.f32 %v2321_v3, %v7704_v50 }
 0x2d7   : > { %10021 = vst [vmem:[#allocation53_spill] sm:$0xff] %v7721_v28 }
 0x2d8   : > { %v2212_v10 = vadd.f32 %v5711_v4, %v2211_v1  ;;  %v2049_v15 = vmul.f32 1.442695, %v5128_v24  ;;  %v5715_v5 = vpop.eup %5714 }
 0x2d9   : > { %v2068_v56 = vadd.f32 1.0, %v5715_v5  ;;  %v2232_v5 = vand.u32 2147483647, %v2067_v8 }
 0x2da   : > { %v2216_v58 = vsel %vm2215_vm6, %v5711_v4, %v2212_v10  ;;  %5718 = vpow2.f32 %v2049_v15  ;;  %2369 = vxpose.xlu2.b32.cont [9/16] %v7717_v33, 128  ;;  %v2234_v4 = vand.u32 2147483648, %v2067_v8 }
 0x2db   : > { %v5717_v3 = vpop.eup %5716  ;;  %v2221_v11 = vsel %vm2218_vm7, %v2220_v20, %v2216_v58  ;;  %v1940_v1 = vpop.xlane.xlu0 %1939  ;;  %5720 = vrcp.f32 %v2068_v56  ;;  %vm2233_vm11 = vcmp.eq.f32.partialorder %v2232_v5, 8.507059e+37  ;;  %vm2243_vm13 = vweird.f32 %v2068_v56 }
 0x2dc   : > { %v2322_v51 = vmul.f32 %v2221_v11, %v9667_v45  ;;  %v2224_v24 = vmul.f32 %v5717_v3, %v2067_v8  ;;  %v7727_v32 = vadd.f32 -1.0, %v1940_v1  ;;  %vm2229_vm8 = vweird.f32 %v5717_v3  ;;  %v10022_v1 = vld [vmem:[#allocation48_spill] sm:$0xff] }
 0x2dd   : > { %v7737_v45 = vmul.f32 -0.5, %v10022_v1  ;;  %vm2230_vm10 = vmor %vm2228_vm9, %vm2229_vm8  ;;  %v2249_v1 = vand.u32 2147483648, %v2068_v56 }
 0x2de   : > { %v7730_v50 = vadd.f32 %v2322_v51, %v7721_v28  ;;  %v2225_v12 = vsub.f32 1.0, %v2224_v24  ;;  %v5129_v49 = vmul.f32 -2.0, %v7727_v32  ;;  %v2235_v51 = vor.u32 1.1754944e-38, %v2234_v4 }
 0x2df   : > { %10023 = vst [vmem:[#allocation7_spill] sm:$0xff] %v7737_v45  ;;  %v2247_v4 = vand.u32 2147483647, %v2068_v56 }
 0x2e0   : > { %v5719_v10 = vpop.eup %5718  ;;  %v2226_v15 = vmul.f32 %v5717_v3, %v2225_v12  ;;  %v2051_v58 = vmul.f32 1.442695, %v5129_v49  ;;  %v9676_v12 = vmax.f32 %v7681_v54, 0.0 }
 0x2e1   : > { %v7733_v20 = vadd.f32 1.0, %v5719_v10  ;;  %v5721_v18 = vpop.eup %5720  ;;  %vm2248_vm15 = vcmp.eq.f32.partialorder %v2247_v4, 8.507059e+37 }
 0x2e2   : > { %v2227_v11 = vadd.f32 %v5717_v3, %v2226_v15  ;;  %2370 = vxpose.xlu2.b32.cont [10/16] %v7730_v50, 128  ;;  %v2239_v24 = vmul.f32 %v5721_v18, %v2068_v56  ;;  %vm2244_vm12 = vweird.f32 %v5721_v18 }
 0x2e3   : > { %5722 = vrcp.f32 %v7733_v20  ;;  %v1942_v28 = vpop.xlane.xlu2 %1941  ;;  %vm2245_vm14 = vmor %vm2243_vm13, %vm2244_vm12  ;;  %vm2258_vm1 = vweird.f32 %v7733_v20 }
 0x2e4   : > { %v2231_v57 = vsel %vm2230_vm10, %v5717_v3, %v2227_v11  ;;  %5724 = vpow2.f32 %v2051_v58  ;;  %v2240_v10 = vsub.f32 1.0, %v2239_v24  ;;  %v7741_v15 = vadd.f32 -1.0, %v1942_v28  ;;  %v10024_v58 = vld [vmem:[#allocation50_spill] sm:$0xff] }
 0x2e5   : > { %v2236_v49 = vsel %vm2233_vm11, %v2235_v51, %v2231_v57  ;;  %v7750_v28 = vmul.f32 -0.5, %v10024_v58  ;;  %v9679_v11 = vmax.f32 %v7695_v25, 0.0  ;;  %v2250_v51 = vor.u32 1.1754944e-38, %v2249_v1 }
 0x2e6   : > { %v2323_v8 = vmul.f32 %v2236_v49, %v9676_v12  ;;  %v2241_v35 = vmul.f32 %v5721_v18, %v2240_v10  ;;  %v5130_v29 = vmul.f32 -2.0, %v7741_v15  ;;  %v2264_v12 = vand.u32 2147483648, %v7733_v20 }
 0x2e7   : > { %10025 = vst [vmem:[#allocation9_spill] sm:$0xff] %v7750_v28 }
 0x2e8   : > { %v7747_v62 = vadd.f32 %v2323_v8, %v7737_v45  ;;  %v2242_v3 = vadd.f32 %v5721_v18, %v2241_v35  ;;  %v2053_v5 = vmul.f32 1.442695, %v5130_v29  ;;  %v2262_v45 = vand.u32 2147483647, %v7733_v20 }
 0x2e9   : > { %v5723_v23 = vpop.eup %5722 }
 0x2ea   : > { %v5725_v57 = vpop.eup %5724  ;;  %v2254_v24 = vmul.f32 %v5723_v23, %v7733_v20  ;;  %2371 = vxpose.xlu2.b32.cont [11/16] %v7747_v62, 128  ;;  %v2246_v49 = vsel %vm2245_vm14, %v5721_v18, %v2242_v3  ;;  %5726 = vpow2.f32 %v2053_v5  ;;  %vm2259_vm0 = vweird.f32 %v5723_v23 }
 0x2eb   : > { %v2070_v10 = vadd.f32 1.0, %v5725_v57  ;;  %v1944_v8 = vpop.xlane.xlu0 %1943  ;;  %v2251_v35 = vsel %vm2248_vm15, %v2250_v51, %v2246_v49  ;;  %v10027_v51 = vld [vmem:[#allocation52_spill] sm:$0xff]  ;;  %v9683_v49 = vmax.f32 %v7709_v63, 0.0  ;;  %vm2260_vm2 = vmor %vm2258_vm1, %vm2259_vm0  ;;  %vm2263_vm3 = vcmp.eq.f32.partialorder %v2262_v45, 8.507059e+37 }
 0x2ec   : > { %v2255_v56 = vsub.f32 1.0, %v2254_v24  ;;  %v7755_v29 = vadd.f32 -1.0, %v1944_v8  ;;  %v2324_v58 = vmul.f32 %v2251_v35, %v9679_v11  ;;  %v7767_v24 = vmul.f32 -0.5, %v10027_v51 }
 0x2ed   : > { %5728 = vrcp.f32 %v2070_v10  ;;  %v2265_v8 = vor.u32 1.1754944e-38, %v2264_v12  ;;  %vm2273_vm5 = vweird.f32 %v2070_v10 }
 0x2ee   : > { %10026 = vst [vmem:[#allocation13_spill] sm:$0xff] %v7755_v29  ;;  %v2256_v1 = vmul.f32 %v5723_v23, %v2255_v56  ;;  %v5131_v18 = vmul.f32 -2.0, %v7755_v29  ;;  %v7763_v4 = vadd.f32 %v2324_v58, %v7750_v28  ;;  %v2279_v28 = vand.u32 2147483648, %v2070_v10 }
 0x2ef   : > { %10028 = vst [vmem:[#allocation20_spill] sm:$0xff] %v7767_v24 }
 0x2f0   : > { %v2257_v3 = vadd.f32 %v5723_v23, %v2256_v1  ;;  %v2055_v5 = vmul.f32 1.442695, %v5131_v18  ;;  %v5727_v57 = vpop.eup %5726 }
 0x2f1   : > { %v2071_v56 = vadd.f32 1.0, %v5727_v57  ;;  %v2280_v57 = vor.u32 1.1754944e-38, %v2279_v28 }
 0x2f2   : > { %v2261_v35 = vsel %vm2260_vm2, %v5723_v23, %v2257_v3  ;;  %5730 = vpow2.f32 %v2055_v5  ;;  %2372 = vxpose.xlu2.b32.cont [12/16] %v7763_v4, 128  ;;  %v2277_v23 = vand.u32 2147483647, %v2070_v10 }
 0x2f3   : > { %v5729_v58 = vpop.eup %5728  ;;  %v2266_v11 = vsel %vm2263_vm3, %v2265_v8, %v2261_v35  ;;  %5732 = vrcp.f32 %v2071_v56  ;;  %v9688_v8 = vmax.f32 %v7727_v32, 0.0  ;;  %vm2288_vm9 = vweird.f32 %v2071_v56 }
 0x2f4   : > { %v2325_v20 = vmul.f32 %v2266_v11, %v9683_v49  ;;  %v2269_v1 = vmul.f32 %v5729_v58, %v2070_v10  ;;  %vm2274_vm4 = vweird.f32 %v5729_v58  ;;  %vm2278_vm7 = vcmp.eq.f32.partialorder %v2277_v23, 8.507059e+37 }
 0x2f5   : > { %vm2275_vm6 = vmor %vm2273_vm5, %vm2274_vm4 }
 0x2f6   : > { %v7774_v18 = vadd.f32 %v2325_v20, %v7767_v24  ;;  %v2270_v51 = vsub.f32 1.0, %v2269_v1  ;;  %v10029_v20 = vld [vmem:[#allocation55_spill] sm:$0xff]  ;;  %v2292_v24 = vand.u32 2147483647, %v2071_v56 }
 0x2f7   : > { %v7779_v1 = vmul.f32 -0.5, %v10029_v20 }
 0x2f8   : > { %v5731_v25 = vpop.eup %5730  ;;  %v2271_v12 = vmul.f32 %v5729_v58, %v2270_v51  ;;  %vm2293_vm11 = vcmp.eq.f32.partialorder %v2292_v24, 8.507059e+37  ;;  %v9689_v24 = vmax.f32 %v7755_v29, 0.0 }
 0x2f9   : > { %v2072_v45 = vadd.f32 1.0, %v5731_v25  ;;  %v5733_v3 = vpop.eup %5732 }
 0x2fa   : > { %v2272_v5 = vadd.f32 %v5729_v58, %v2271_v12  ;;  %2373 = vxpose.xlu2.b32.cont [13/16] %v7774_v18, 128  ;;  %v2284_v11 = vmul.f32 %v5733_v3, %v2071_v56  ;;  %v2294_v12 = vand.u32 2147483648, %v2071_v56  ;;  %vm2289_vm8 = vweird.f32 %v5733_v3 }
 0x2fb   : > { %5734 = vrcp.f32 %v2072_v45  ;;  %vm2290_vm10 = vmor %vm2288_vm9, %vm2289_vm8  ;;  %v2307_v56 = vand.u32 2147483647, %v2072_v45  ;;  %vm2303_vm13 = vweird.f32 %v2072_v45 }
 0x2fc   : > { %v2276_v35 = vsel %vm2275_vm6, %v5729_v58, %v2272_v5  ;;  %v2285_v49 = vsub.f32 1.0, %v2284_v11  ;;  %v2295_v58 = vor.u32 1.1754944e-38, %v2294_v12  ;;  %v9690_v5 = vmax.f32 %v7741_v15, 0.0  ;;  %v10030_v11 = vld [vmem:[#allocation58_spill] sm:$0xff] }
 0x2fd   : > { %v2281_v51 = vsel %vm2278_vm7, %v2280_v57, %v2276_v35  ;;  %v7789_v35 = vmul.f32 -0.5, %v10030_v11  ;;  %vm2308_vm15 = vcmp.eq.f32.partialorder %v2307_v56, 8.507059e+37  ;;  %v10033_v56 = vld [vmem:[#allocation21_spill] sm:$0xff] }
 0x2fe   : > { %v2326_v25 = vmul.f32 %v2281_v51, %v9688_v8  ;;  %v2286_v10 = vmul.f32 %v5733_v3, %v2285_v49 }
 0x300   : > { %v7784_v28 = vadd.f32 %v2326_v25, %v7779_v1  ;;  %v2287_v54 = vadd.f32 %v5733_v3, %v2286_v10  ;;  %v2309_v25 = vand.u32 2147483648, %v2072_v45 }
 0x301   : > { %v5735_v63 = vpop.eup %5734 }
 0x302   : > { %v2299_v23 = vmul.f32 %v5735_v63, %v2072_v45  ;;  %2374 = vxpose.xlu2.b32.cont [14/16] %v7784_v28, 128  ;;  %v2291_v57 = vsel %vm2290_vm10, %v5733_v3, %v2287_v54  ;;  %vm2304_vm12 = vweird.f32 %v5735_v63  ;;  %v2310_v54 = vor.u32 1.1754944e-38, %v2309_v25 }
 0x303   : > { %v2296_v49 = vsel %vm2293_vm11, %v2295_v58, %v2291_v57  ;;  %vm2305_vm14 = vmor %vm2303_vm13, %vm2304_vm12  ;;  %v7799_v58 = vmul.f32 -0.5, %v7280_v48 }
 0x304   : > { %v2300_v20 = vsub.f32 1.0, %v2299_v23  ;;  %v2327_v51 = vmul.f32 %v2296_v49, %v9690_v5  ;;  %v10032_v49 = vld [vmem:[#allocation19_spill] sm:$0xff] }
 0x305   : > { %10031 = vst [vmem:[#allocation24_spill] sm:$0xff] %v7799_v58 }
 0x306   : > { %v2301_v10 = vmul.f32 %v5735_v63, %v2300_v20  ;;  %v7794_v12 = vadd.f32 %v2327_v51, %v7789_v35  ;;  %v2345_v20 = vmul.f32 %v10032_v49, %v7377_v47 }
 0x308   : > { %v2302_v8 = vadd.f32 %v5735_v63, %v2301_v10 }
 0x30a   : > { %v2306_v3 = vsel %vm2305_vm14, %v5735_v63, %v2302_v8  ;;  %2375 = vxpose.xlu2.b32.cont [15/16] %v7794_v12, 128 }
 0x30b   : > { %v2311_v23 = vsel %vm2308_vm15, %v2310_v54, %v2306_v3  ;;  %v2346_v54 = vmul.f32 %v10033_v56, %v7389_v42 }
 0x30c   : > { %v2328_v57 = vmul.f32 %v2311_v23, %v9689_v24 }
 0x30e   : > { %v7804_v11 = vadd.f32 %v2328_v57, %v7799_v58 }
 0x312   : > { %2376 = vxpose.xlu2.b32.end [16/16] %v7804_v11, 128 }
 0x333   : > { %v2377_v45 = vpop.trf.xlu2 }
 0x334   : > { %v2393_v63 = vadd.f32 %v2377_v45, %v7599_v41 }
 0x336   : > { %v2409_v8 = vmul.f32 %v2393_v63, %v2345_v20  ;;  %v10034_v20 = vld [vmem:[#allocation22_spill] sm:$0xff] }
 0x338   : > { %v2425_v51 = vmul.f32 0.01, %v2409_v8 }
 0x33a   : > { %v2441_v48 = vsub.f32 %v10032_v49, %v2425_v51  ;;  %v2347_v49 = vmul.f32 %v10034_v20, %v7395_v30 }
 0x33b   : > { %v2378_v25 = vpop.trf.xlu2 }
 0x33c   : > { %v2457_v10 = vand.u32 2147483647, %v2441_v48  ;;  %v2394_v3 = vadd.f32 %v2378_v25, %v7612_v21 }
 0x33e   : > { %v5132_v23 = vadd.f32 -0.0099, %v2457_v10  ;;  %v2410_v57 = vmul.f32 %v2394_v3, %v2346_v54 }
 0x340   : > { %v2489_v24 = vmax.f32 %v5132_v23, 0.0  ;;  %v2426_v5 = vmul.f32 0.01, %v2410_v57 }
 0x342   : > { %v7814_v58 = vclamps-f32 %v2489_v24, 1.0  ;;  %v2442_v29 = vsub.f32 %v10033_v56, %v2426_v5  ;;  %v10035_v56 = vld [vmem:[#allocation26_spill] sm:$0xff] }
 0x343   : > { %v2379_v41 = vpop.trf.xlu2  ;;  %v2348_v54 = vmul.f32 %v10035_v56, %v7416_v52 }
 0x344   : > { %v2458_v45 = vand.u32 2147483647, %v2442_v29  ;;  %v2395_v63 = vadd.f32 %v2379_v41, %v7625_v34  ;;  %v7822_v8 = vmul.f32 %v7814_v58, %v7814_v58 }
 0x346   : > { %v5133_v21 = vadd.f32 -0.0099, %v2458_v45  ;;  %v2411_v51 = vmul.f32 %v2395_v63, %v2347_v49  ;;  %2553 = vxpose.xlu0.b32.start [1/16] %v7822_v8, 128 }
 0x348   : > { %v2490_v48 = vmax.f32 %v5133_v21, 0.0  ;;  %v2427_v24 = vmul.f32 0.01, %v2411_v51  ;;  %v10036_v51 = vld [vmem:[#allocation30_spill] sm:$0xff] }
 0x34a   : > { %v7825_v25 = vclamps-f32 %v2490_v48, 1.0  ;;  %v2443_v5 = vsub.f32 %v10034_v20, %v2427_v24  ;;  %v2349_v48 = vmul.f32 %v10036_v51, %v7429_v14 }
 0x34b   : > { %v2380_v29 = vpop.trf.xlu2 }
 0x34c   : > { %v2459_v10 = vand.u32 2147483647, %v2443_v5  ;;  %v2396_v34 = vadd.f32 %v2380_v29, %v7638_v37  ;;  %v7833_v3 = vmul.f32 %v7825_v25, %v7825_v25 }
 0x34e   : > { %v5134_v23 = vadd.f32 -0.0099, %v2459_v10  ;;  %v2412_v57 = vmul.f32 %v2396_v34, %v2348_v54  ;;  %2554 = vxpose.xlu0.b32.cont [2/16] %v7833_v3, 128 }
 0x350   : > { %v2491_v41 = vmax.f32 %v5134_v23, 0.0  ;;  %v2428_v45 = vmul.f32 0.01, %v2412_v57 }
 0x352   : > { %v7836_v49 = vclamps-f32 %v2491_v41, 1.0  ;;  %v2444_v20 = vsub.f32 %v10035_v56, %v2428_v45  ;;  %v10038_v41 = vld [vmem:[#allocation35_spill] sm:$0xff] }
 0x353   : > { %v2381_v63 = vpop.trf.xlu2  ;;  %v2350_v45 = vmul.f32 %v10038_v41, %v7447_v59 }
 0x354   : > { %v2460_v21 = vand.u32 2147483647, %v2444_v20  ;;  %v2397_v37 = vadd.f32 %v2381_v63, %v7655_v19  ;;  %v7844_v24 = vmul.f32 %v7836_v49, %v7836_v49 }
 0x356   : > { %v5135_v5 = vadd.f32 -0.0099, %v2460_v21  ;;  %v2413_v29 = vmul.f32 %v2397_v37, %v2349_v48  ;;  %2555 = vxpose.xlu0.b32.cont [3/16] %v7844_v24, 128 }
 0x358   : > { %v2492_v10 = vmax.f32 %v5135_v5, 0.0  ;;  %v2429_v54 = vmul.f32 0.01, %v2413_v29 }
 0x35a   : > { %v7847_v34 = vclamps-f32 %v2492_v10, 1.0  ;;  %v2445_v56 = vsub.f32 %v10036_v51, %v2429_v54  ;;  %v10040_v54 = vld [vmem:[#allocation39_spill] sm:$0xff] }
 0x35b   : > { %v2382_v23 = vpop.trf.xlu2 }
 0x35c   : > { %10037 = vst [vmem:[#allocation28_spill] sm:$0xff] %v7847_v34  ;;  %v2461_v57 = vand.u32 2147483647, %v2445_v56  ;;  %v2398_v19 = vadd.f32 %v2382_v23, %v7671_v60  ;;  %v7855_v20 = vmul.f32 %v7847_v34, %v7847_v34  ;;  %v2351_v56 = vmul.f32 %v10040_v54, %v7469_v27 }
 0x35e   : > { %v5136_v63 = vadd.f32 -0.0099, %v2461_v57  ;;  %v2414_v21 = vmul.f32 %v2398_v19, %v2350_v45  ;;  %2556 = vxpose.xlu0.b32.cont [4/16] %v7855_v20, 128 }
 0x360   : > { %v2493_v48 = vmax.f32 %v5136_v63, 0.0  ;;  %v2430_v37 = vmul.f32 0.01, %v2414_v21 }
 0x362   : > { %v7858_v5 = vclamps-f32 %v2493_v48, 1.0  ;;  %v2446_v51 = vsub.f32 %v10038_v41, %v2430_v37 }
 0x363   : > { %v2383_v29 = vpop.trf.xlu2 }
 0x364   : > { %10039 = vst [vmem:[#allocation33_spill] sm:$0xff] %v7858_v5  ;;  %v2462_v10 = vand.u32 2147483647, %v2446_v51  ;;  %v2399_v60 = vadd.f32 %v2383_v29, %v7684_v9  ;;  %v7866_v23 = vmul.f32 %v7858_v5, %v7858_v5  ;;  %v10042_v51 = vld [vmem:[#allocation42_spill] sm:$0xff] }
 0x365   : > { %v2352_v34 = vmul.f32 %v10042_v51, %v7485_v55 }
 0x366   : > { %v5137_v57 = vadd.f32 -0.0099, %v2462_v10  ;;  %v2415_v45 = vmul.f32 %v2399_v60, %v2351_v56  ;;  %2557 = vxpose.xlu0.b32.cont [5/16] %v7866_v23, 128 }
 0x368   : > { %v2494_v19 = vmax.f32 %v5137_v57, 0.0  ;;  %v2431_v63 = vmul.f32 0.01, %v2415_v45 }
 0x36a   : > { %v7869_v21 = vclamps-f32 %v2494_v19, 1.0  ;;  %v2447_v41 = vsub.f32 %v10040_v54, %v2431_v63 }
 0x36b   : > { %v2384_v48 = vpop.trf.xlu2 }
 0x36c   : > { %10041 = vst [vmem:[#allocation36_spill] sm:$0xff] %v7869_v21  ;;  %v2463_v37 = vand.u32 2147483647, %v2447_v41  ;;  %v2400_v9 = vadd.f32 %v2384_v48, %v7701_v0  ;;  %v7877_v29 = vmul.f32 %v7869_v21, %v7869_v21  ;;  %v10044_v41 = vld [vmem:[#allocation49_spill] sm:$0xff] }
 0x36d   : > { %v2353_v5 = vmul.f32 %v10044_v41, %v7499_v22 }
 0x36e   : > { %v5138_v10 = vadd.f32 -0.0099, %v2463_v37  ;;  %v2416_v56 = vmul.f32 %v2400_v9, %v2352_v34  ;;  %2558 = vxpose.xlu0.b32.cont [6/16] %v7877_v29, 128 }
 0x370   : > { %v2495_v60 = vmax.f32 %v5138_v10, 0.0  ;;  %v2432_v57 = vmul.f32 0.01, %v2416_v56 }
 0x372   : > { %v7880_v45 = vclamps-f32 %v2495_v60, 1.0  ;;  %v2448_v54 = vsub.f32 %v10042_v51, %v2432_v57 }
 0x373   : > { %v2385_v19 = vpop.trf.xlu2 }
 0x374   : > { %10043 = vst [vmem:[#allocation41_spill] sm:$0xff] %v7880_v45  ;;  %v2464_v63 = vand.u32 2147483647, %v2448_v54  ;;  %v2401_v0 = vadd.f32 %v2385_v19, %v7717_v33  ;;  %v7888_v48 = vmul.f32 %v7880_v45, %v7880_v45  ;;  %v10046_v54 = vld [vmem:[#allocation51_spill] sm:$0xff] }
 0x375   : > { %v2354_v21 = vmul.f32 %v10046_v54, %v7510_v36 }
 0x376   : > { %v5139_v34 = vadd.f32 -0.0099, %v2464_v63  ;;  %v2417_v37 = vmul.f32 %v2401_v0, %v2353_v5  ;;  %2559 = vxpose.xlu0.b32.cont [7/16] %v7888_v48, 128 }
 0x378   : > { %v2496_v9 = vmax.f32 %v5139_v34, 0.0  ;;  %v2433_v10 = vmul.f32 0.01, %v2417_v37 }
 0x37a   : > { %v7891_v56 = vclamps-f32 %v2496_v9, 1.0  ;;  %v2449_v51 = vsub.f32 %v10044_v41, %v2433_v10 }
 0x37b   : > { %v2386_v60 = vpop.trf.xlu2 }
 0x37c   : > { %10045 = vst [vmem:[#allocation45_spill] sm:$0xff] %v7891_v56  ;;  %v2465_v57 = vand.u32 2147483647, %v2449_v51  ;;  %v2402_v33 = vadd.f32 %v2386_v60, %v7730_v50  ;;  %v7899_v19 = vmul.f32 %v7891_v56, %v7891_v56  ;;  %v10048_v51 = vld [vmem:[#allocation54_spill] sm:$0xff] }
 0x37d   : > { %v2355_v45 = vmul.f32 %v10048_v51, %v7525_v16 }
 0x37e   : > { %v5140_v5 = vadd.f32 -0.0099, %v2465_v57  ;;  %v2418_v63 = vmul.f32 %v2402_v33, %v2354_v21  ;;  %2560 = vxpose.xlu0.b32.cont [8/16] %v7899_v19, 128 }
 0x380   : > { %v2497_v0 = vmax.f32 %v5140_v5, 0.0  ;;  %v2434_v34 = vmul.f32 0.01, %v2418_v63 }
 0x382   : > { %v7902_v37 = vclamps-f32 %v2497_v0, 1.0  ;;  %v2450_v41 = vsub.f32 %v10046_v54, %v2434_v34 }
 0x383   : > { %v2387_v9 = vpop.trf.xlu2 }
 0x384   : > { %10047 = vst [vmem:[#allocation48_spill] sm:$0xff] %v7902_v37  ;;  %v2466_v10 = vand.u32 2147483647, %v2450_v41  ;;  %v2403_v50 = vadd.f32 %v2387_v9, %v7747_v62  ;;  %v7910_v60 = vmul.f32 %v7902_v37, %v7902_v37  ;;  %v10049_v41 = vld [vmem:[#allocation56_spill] sm:$0xff] }
 0x385   : > { %v2356_v56 = vmul.f32 %v10049_v41, %v7538_v40 }
 0x386   : > { %v5141_v21 = vadd.f32 -0.0099, %v2466_v10  ;;  %v2419_v57 = vmul.f32 %v2403_v50, %v2355_v45  ;;  %2561 = vxpose.xlu0.b32.cont [9/16] %v7910_v60, 128 }
 0x388   : > { %v2498_v33 = vmax.f32 %v5141_v21, 0.0  ;;  %v2435_v5 = vmul.f32 0.01, %v2419_v57 }
 0x38a   : > { %v7913_v63 = vclamps-f32 %v2498_v33, 1.0  ;;  %v2451_v54 = vsub.f32 %v10048_v51, %v2435_v5 }
 0x38b   : > { %v2388_v0 = vpop.trf.xlu2 }
 0x38c   : > { %v2467_v34 = vand.u32 2147483647, %v2451_v54  ;;  %v2404_v62 = vadd.f32 %v2388_v0, %v7763_v4  ;;  %v7921_v9 = vmul.f32 %v7913_v63, %v7913_v63  ;;  %v10050_v54 = vld [vmem:[#allocation57_spill] sm:$0xff] }
 0x38d   : > { %v2357_v37 = vmul.f32 %v10050_v54, %v7546_v43 }
 0x38e   : > { %v5142_v45 = vadd.f32 -0.0099, %v2467_v34  ;;  %v2420_v10 = vmul.f32 %v2404_v62, %v2356_v56  ;;  %2562 = vxpose.xlu0.b32.cont [10/16] %v7921_v9, 128 }
 0x390   : > { %v2499_v50 = vmax.f32 %v5142_v45, 0.0  ;;  %v2436_v21 = vmul.f32 0.01, %v2420_v10 }
 0x392   : > { %v7924_v57 = vclamps-f32 %v2499_v50, 1.0  ;;  %v2452_v51 = vsub.f32 %v10049_v41, %v2436_v21 }
 0x393   : > { %v2389_v33 = vpop.trf.xlu2 }
 0x394   : > { %v2468_v5 = vand.u32 2147483647, %v2452_v51  ;;  %v2405_v4 = vadd.f32 %v2389_v33, %v7774_v18  ;;  %v7932_v0 = vmul.f32 %v7924_v57, %v7924_v57  ;;  %v2358_v51 = vmul.f32 %v7284_v17, %v7560_v39 }
 0x396   : > { %v5143_v56 = vadd.f32 -0.0099, %v2468_v5  ;;  %v2421_v34 = vmul.f32 %v2405_v4, %v2357_v37  ;;  %2563 = vxpose.xlu0.b32.cont [11/16] %v7932_v0, 128 }
 0x398   : > { %v2500_v62 = vmax.f32 %v5143_v56, 0.0  ;;  %v2437_v45 = vmul.f32 0.01, %v2421_v34 }
 0x39a   : > { %v7935_v10 = vclamps-f32 %v2500_v62, 1.0  ;;  %v2453_v41 = vsub.f32 %v10050_v54, %v2437_v45 }
 0x39b   : > { %v2390_v50 = vpop.trf.xlu2 }
 0x39c   : > { %10051 = vst [vmem:[#allocation50_spill] sm:$0xff] %v7935_v10  ;;  %v2469_v21 = vand.u32 2147483647, %v2453_v41  ;;  %v2406_v18 = vadd.f32 %v2390_v50, %v7784_v28  ;;  %v7943_v33 = vmul.f32 %v7935_v10, %v7935_v10  ;;  %v2359_v41 = vmul.f32 %v7307_v13, %v7570_v7 }
 0x39e   : > { %v5144_v37 = vadd.f32 -0.0099, %v2469_v21  ;;  %v2422_v5 = vmul.f32 %v2406_v18, %v2358_v51  ;;  %2564 = vxpose.xlu0.b32.cont [12/16] %v7943_v33, 128 }
 0x3a0   : > { %v2501_v4 = vmax.f32 %v5144_v37, 0.0  ;;  %v2438_v56 = vmul.f32 0.01, %v2422_v5 }
 0x3a2   : > { %v7946_v34 = vclamps-f32 %v2501_v4, 1.0  ;;  %v2454_v54 = vsub.f32 %v7284_v17, %v2438_v56 }
 0x3a3   : > { %v2391_v62 = vpop.trf.xlu2 }
 0x3a4   : > { %v2470_v45 = vand.u32 2147483647, %v2454_v54  ;;  %v2407_v28 = vadd.f32 %v2391_v62, %v7794_v12  ;;  %v7954_v50 = vmul.f32 %v7946_v34, %v7946_v34  ;;  %v10053_v54 = vld [vmem:[#allocation59_spill] sm:$0xff] }
 0x3a5   : > { %v2360_v10 = vmul.f32 %v10053_v54, %v7577_v2 }
 0x3a6   : > { %v5145_v21 = vadd.f32 -0.0099, %v2470_v45  ;;  %v2423_v51 = vmul.f32 %v2407_v28, %v2359_v41  ;;  %2565 = vxpose.xlu0.b32.cont [13/16] %v7954_v50, 128 }
 0x3a8   : > { %v2502_v18 = vmax.f32 %v5145_v21, 0.0  ;;  %v2439_v37 = vmul.f32 0.01, %v2423_v51 }
 0x3aa   : > { %v7957_v5 = vclamps-f32 %v2502_v18, 1.0  ;;  %v2455_v17 = vsub.f32 %v7307_v13, %v2439_v37 }
 0x3ab   : > { %v2392_v4 = vpop.trf.xlu2 }
 0x3ac   : > { %10052 = vst [vmem:[#allocation52_spill] sm:$0xff] %v7957_v5  ;;  %v2471_v56 = vand.u32 2147483647, %v2455_v17  ;;  %v2408_v12 = vadd.f32 %v2392_v4, %v7804_v11  ;;  %v7965_v62 = vmul.f32 %v7957_v5, %v7957_v5 }
 0x3ae   : > { %v5146_v45 = vadd.f32 -0.0099, %v2471_v56  ;;  %v2424_v41 = vmul.f32 %v2408_v12, %v2360_v10  ;;  %2566 = vxpose.xlu0.b32.cont [14/16] %v7965_v62, 128 }
 0x3b0   : > { %v2503_v28 = vmax.f32 %v5146_v45, 0.0  ;;  %v2440_v21 = vmul.f32 0.01, %v2424_v41 }
 0x3b2   : > { %v7968_v13 = vclamps-f32 %v2503_v28, 1.0  ;;  %v2456_v51 = vsub.f32 %v10053_v54, %v2440_v21 }
 0x3b4   : > { %10054 = vst [vmem:[#allocation55_spill] sm:$0xff] %v7968_v13  ;;  %v2472_v18 = vand.u32 2147483647, %v2456_v51  ;;  %v7973_v11 = vmul.f32 %v7968_v13, %v7968_v13 }
 0x3b6   : > { %v5147_v37 = vadd.f32 -0.0099, %v2472_v18  ;;  %2567 = vxpose.xlu0.b32.cont [15/16] %v7973_v11, 128 }
 0x3b8   : > { %v2504_v17 = vmax.f32 %v5147_v37, 0.0 }
 0x3ba   : > { %v7976_v4 = vclamps-f32 %v2504_v17, 1.0 }
 0x3bc   : > { %10055 = vst [vmem:[#allocation58_spill] sm:$0xff] %v7976_v4  ;;  %v7980_v10 = vmul.f32 %v7976_v4, %v7976_v4 }
 0x3be   : > { %2568 = vxpose.xlu0.b32.end [16/16] %v7980_v10, 128 }
 0x3ea   : > { %v2569_v56 = vpop.trf.xlu0 }
 0x3eb   : > { %v2585_v54 = vadd.f32 %v2569_v56, %v7822_v8 }
 0x3ed   : > { %v2601_v12 = vmul.f32 0.5, %v2585_v54 }
 0x3ef   : > { %v2617_v45 = vmul.f32 %v2601_v12, %v7377_v47 }
 0x3f1   : > { %2633 = vadd.xlane.f32.xlu1 %v2617_v45  ;;  %2729 = vst [vmem:[%s7988_s11] sm:$0xff] %v2617_v45 }
 0x3f2   : > { %v2570_v41 = vpop.trf.xlu0 }
 0x3f3   : > { %v2586_v28 = vadd.f32 %v2570_v41, %v7833_v3 }
 0x3f5   : > { %v2602_v21 = vmul.f32 0.5, %v2586_v28 }
 0x3f7   : > { %v2618_v51 = vmul.f32 %v2602_v21, %v7389_v42 }
 0x3f9   : > { %2635 = vadd.xlane.f32.xlu1 %v2618_v51  ;;  %2730 = vst [vmem:[%s7988_s11 + $0x8] sm:$0xff] %v2618_v51 }
 0x3fa   : > { %v2571_v8 = vpop.trf.xlu0 }
 0x3fb   : > { %v2587_v18 = vadd.f32 %v2571_v8, %v7844_v24 }
 0x3fd   : > { %v2603_v37 = vmul.f32 0.5, %v2587_v18 }
 0x3ff   : > { %v2619_v17 = vmul.f32 %v2603_v37, %v7395_v30 }
 0x401   : > { %2637 = vadd.xlane.f32.xlu1 %v2619_v17  ;;  %2731 = vst [vmem:[%s7988_s11 + $0x10] sm:$0xff] %v2619_v17 }
 0x402   : > { %v2572_v56 = vpop.trf.xlu0 }
 0x403   : > { %v2588_v54 = vadd.f32 %v2572_v56, %v7855_v20 }
 0x405   : > { %v2604_v3 = vmul.f32 0.5, %v2588_v54 }
 0x407   : > { %v2620_v12 = vmul.f32 %v2604_v3, %v7416_v52 }
 0x409   : > { %2639 = vadd.xlane.f32.xlu1 %v2620_v12  ;;  %2732 = vst [vmem:[%s7988_s11 + $0x18] sm:$0xff] %v2620_v12 }
 0x40a   : > { %v2573_v45 = vpop.trf.xlu0 }
 0x40b   : > { %v2589_v41 = vadd.f32 %v2573_v45, %v7866_v23 }
 0x40d   : > { %v2605_v24 = vmul.f32 0.5, %v2589_v41 }
 0x40f   : > { %v2621_v28 = vmul.f32 %v2605_v24, %v7429_v14 }
 0x411   : > { %2641 = vadd.xlane.f32.xlu1 %v2621_v28  ;;  %2733 = vst [vmem:[%s7988_s11 + $0x20] sm:$0xff] %v2621_v28 }
 0x412   : > { %v2574_v21 = vpop.trf.xlu0 }
 0x413   : > { %v2590_v51 = vadd.f32 %v2574_v21, %v7877_v29 }
 0x415   : > { %v2606_v20 = vmul.f32 0.5, %v2590_v51 }
 0x417   : > { %v2622_v8 = vmul.f32 %v2606_v20, %v7447_v59 }
 0x419   : > { %2643 = vadd.xlane.f32.xlu1 %v2622_v8  ;;  %2734 = vst [vmem:[%s7988_s11 + $0x28] sm:$0xff] %v2622_v8 }
 0x41a   : > { %v2575_v18 = vpop.trf.xlu0 }
 0x41b   : > { %v2591_v37 = vadd.f32 %v2575_v18, %v7888_v48 }
 0x41d   : > { %v2607_v23 = vmul.f32 0.5, %v2591_v37 }
 0x41f   : > { %v2623_v17 = vmul.f32 %v2607_v23, %v7469_v27 }
 0x421   : > { %2645 = vadd.xlane.f32.xlu1 %v2623_v17  ;;  %2735 = vst [vmem:[%s7988_s11 + $0x30] sm:$0xff] %v2623_v17 }
 0x422   : > { %v2576_v56 = vpop.trf.xlu0 }
 0x423   : > { %v2592_v54 = vadd.f32 %v2576_v56, %v7899_v19 }
 0x425   : > { %v2608_v29 = vmul.f32 0.5, %v2592_v54 }
 0x427   : > { %v2624_v3 = vmul.f32 %v2608_v29, %v7485_v55 }
 0x429   : > { %2647 = vadd.xlane.f32.xlu1 %v2624_v3  ;;  %2736 = vst [vmem:[%s7988_s11 + $0x38] sm:$0xff] %v2624_v3 }
 0x42a   : > { %v2577_v12 = vpop.trf.xlu0 }
 0x42b   : > { %v2593_v45 = vadd.f32 %v2577_v12, %v7910_v60 }
 0x42d   : > { %v2609_v41 = vmul.f32 0.5, %v2593_v45 }
 0x42f   : > { %v2625_v48 = vmul.f32 %v2609_v41, %v7499_v22 }
 0x431   : > { %2737 = vst [vmem:[%s7988_s11 + $0x40] sm:$0xff] %v2625_v48  ;;  %2649 = vadd.xlane.f32.xlu2 %v2625_v48 }
 0x432   : > { %v2578_v24 = vpop.trf.xlu0 }
 0x433   : > { %v2594_v28 = vadd.f32 %v2578_v24, %v7921_v9 }
 0x435   : > { %v2610_v19 = vmul.f32 0.5, %v2594_v28 }
 0x437   : > { %v2626_v21 = vmul.f32 %v2610_v19, %v7510_v36 }
 0x439   : > { %2651 = vadd.xlane.f32.xlu0 %v2626_v21  ;;  %2738 = vst [vmem:[%s7988_s11 + $0x48] sm:$0xff] %v2626_v21 }
 0x43a   : > { %v2579_v51 = vpop.trf.xlu0 }
 0x43b   : > { %v2595_v20 = vadd.f32 %v2579_v51, %v7932_v0 }
 0x43d   : > { %v2611_v60 = vmul.f32 0.5, %v2595_v20 }
 0x43f   : > { %v2627_v8 = vmul.f32 %v2611_v60, %v7525_v16 }
 0x441   : > { %2653 = vadd.xlane.f32.xlu1 %v2627_v8  ;;  %2739 = vst [vmem:[%s7988_s11 + $0x50] sm:$0xff] %v2627_v8 }
 0x442   : > { %v2580_v18 = vpop.trf.xlu0 }
 0x443   : > { %v2596_v37 = vadd.f32 %v2580_v18, %v7943_v33 }
 0x445   : > { %v2612_v9 = vmul.f32 0.5, %v2596_v37 }
 0x447   : > { %v2628_v23 = vmul.f32 %v2612_v9, %v7538_v40 }
 0x449   : > { %2655 = vadd.xlane.f32.xlu1 %v2628_v23  ;;  %2740 = vst [vmem:[%s7988_s11 + $0x58] sm:$0xff] %v2628_v23 }
 0x44a   : > { %v2581_v17 = vpop.trf.xlu0 }
 0x44b   : > { %v2597_v56 = vadd.f32 %v2581_v17, %v7954_v50 }
 0x44d   : > { %v2613_v0 = vmul.f32 0.5, %v2597_v56 }
 0x44f   : > { %v2629_v54 = vmul.f32 %v2613_v0, %v7546_v43 }
 0x451   : > { %2657 = vadd.xlane.f32.xlu1 %v2629_v54  ;;  %2741 = vst [vmem:[%s7988_s11 + $0x60] sm:$0xff] %v2629_v54 }
 0x452   : > { %v2582_v29 = vpop.trf.xlu0 }
 0x453   : > { %v2598_v3 = vadd.f32 %v2582_v29, %v7965_v62 }
 0x455   : > { %v2614_v12 = vmul.f32 0.5, %v2598_v3 }
 0x457   : > { %v2630_v33 = vmul.f32 %v2614_v12, %v7560_v39 }
 0x459   : > { %2659 = vadd.xlane.f32.xlu1 %v2630_v33  ;;  %2742 = vst [vmem:[%s7988_s11 + $0x68] sm:$0xff] %v2630_v33 }
 0x45a   : > { %v2583_v45 = vpop.trf.xlu0 }
 0x45b   : > { %v2599_v41 = vadd.f32 %v2583_v45, %v7973_v11 }
 0x45d   : > { %v2615_v48 = vmul.f32 0.5, %v2599_v41 }
 0x45f   : > { %v2631_v50 = vmul.f32 %v2615_v48, %v7570_v7 }
 0x461   : > { %2661 = vadd.xlane.f32.xlu1 %v2631_v50  ;;  %2743 = vst [vmem:[%s7988_s11 + $0x70] sm:$0xff] %v2631_v50 }
 0x462   : > { %v2584_v24 = vpop.trf.xlu0 }
 0x463   : > { %v2600_v28 = vadd.f32 %v2584_v24, %v7980_v10 }
 0x464   : > { %v2634_v19 = vpop.xlane.xlu1 %2633 }
 0x465   : > { %v2616_v21 = vmul.f32 0.5, %v2600_v28  ;;  %v5164_v62 = vadd.f32 -1.0, %v2634_v19 }
 0x467   : > { %v2632_v51 = vmul.f32 %v2616_v21, %v7577_v2  ;;  %v5180_v20 = vmul.f32 -2.0, %v5164_v62 }
 0x469   : > { %2663 = vadd.xlane.f32.xlu1 %v2632_v51  ;;  %2744 = vst [vmem:[%s7988_s11 + $0x78] sm:$0xff] %v2632_v51  ;;  %v2777_v8 = vmul.f32 1.442695, %v5180_v20 }
 0x46b   : > { %5736 = vpow2.f32 %v2777_v8 }
 0x46c   : > { %v2636_v60 = vpop.xlane.xlu1 %2635 }
 0x46d   : > { %v8036_v18 = vadd.f32 -1.0, %v2636_v60 }
 0x46f   : > { %v5181_v11 = vmul.f32 -2.0, %v8036_v18 }
 0x471   : > { %v2779_v9 = vmul.f32 1.442695, %v5181_v11  ;;  %v5737_v10 = vpop.eup %5736 }
 0x472   : > { %v2809_v56 = vadd.f32 1.0, %v5737_v10 }
 0x473   : > { %5738 = vpow2.f32 %v2779_v9 }
 0x474   : > { %v2638_v37 = vpop.xlane.xlu1 %2637  ;;  %5740 = vrcp.f32 %v2809_v56  ;;  %vm2830_vm1 = vweird.f32 %v2809_v56 }
 0x475   : > { %v8039_v23 = vadd.f32 -1.0, %v2638_v37 }
 0x477   : > { %v5182_v17 = vmul.f32 -2.0, %v8039_v23 }
 0x479   : > { %v2781_v54 = vmul.f32 1.442695, %v5182_v17  ;;  %v5739_v3 = vpop.eup %5738 }
 0x47a   : > { %v8045_v33 = vadd.f32 1.0, %v5739_v3  ;;  %v5741_v45 = vpop.eup %5740 }
 0x47b   : > { %5742 = vpow2.f32 %v2781_v54  ;;  %v2826_v28 = vmul.f32 %v5741_v45, %v2809_v56  ;;  %vm2831_vm0 = vweird.f32 %v5741_v45 }
 0x47c   : > { %v2640_v0 = vpop.xlane.xlu1 %2639  ;;  %5744 = vrcp.f32 %v8045_v33  ;;  %vm2832_vm2 = vmor %vm2830_vm1, %vm2831_vm0  ;;  %vm2845_vm5 = vweird.f32 %v8045_v33 }
 0x47d   : > { %v8042_v29 = vadd.f32 -1.0, %v2640_v0  ;;  %v2827_v51 = vsub.f32 1.0, %v2826_v28  ;;  %v2681_v0 = vmax.f32 %v5164_v62, 0.0  ;;  %v2834_v28 = vand.u32 2147483647, %v2809_v56 }
 0x47f   : > { %v5183_v12 = vmul.f32 -2.0, %v8042_v29  ;;  %v2828_v9 = vmul.f32 %v5741_v45, %v2827_v51  ;;  %vm2835_vm3 = vcmp.eq.f32.partialorder %v2834_v28, 8.507059e+37 }
 0x481   : > { %v2783_v48 = vmul.f32 1.442695, %v5183_v12  ;;  %v5743_v24 = vpop.eup %5742  ;;  %v2829_v3 = vadd.f32 %v5741_v45, %v2828_v9 }
 0x482   : > { %v8051_v21 = vadd.f32 1.0, %v5743_v24  ;;  %v5745_v20 = vpop.eup %5744 }
 0x483   : > { %5746 = vpow2.f32 %v2783_v48  ;;  %v2841_v10 = vmul.f32 %v5745_v20, %v8045_v33  ;;  %v2836_v48 = vand.u32 2147483648, %v2809_v56  ;;  %v2833_v62 = vsel %vm2832_vm2, %v5741_v45, %v2829_v3 }
 0x484   : > { %v2642_v41 = vpop.xlane.xlu1 %2641  ;;  %5748 = vrcp.f32 %v8051_v21  ;;  %v10056_v56 = vmax.f32 %v7575_v38, 0.0  ;;  %vm2846_vm4 = vweird.f32 %v5745_v20  ;;  %v2849_v38 = vand.u32 2147483647, %v8045_v33 }
 0x485   : > { %v8048_v50 = vadd.f32 -1.0, %v2642_v41  ;;  %v2842_v12 = vsub.f32 1.0, %v2841_v10  ;;  %v2837_v10 = vor.u32 1.1754944e-38, %v2836_v48  ;;  %vm2847_vm6 = vmor %vm2845_vm5, %vm2846_vm4  ;;  %vm2860_vm9 = vweird.f32 %v8051_v21 }
 0x486   : > { %vm2850_vm7 = vcmp.eq.f32.partialorder %v2849_v38, 8.507059e+37 }
 0x487   : > { %v5184_v19 = vmul.f32 -2.0, %v8048_v50 }
 0x489   : > { %v2785_v8 = vmul.f32 1.442695, %v5184_v19  ;;  %v5747_v37 = vpop.eup %5746 }
 0x48a   : > { %v8058_v54 = vadd.f32 1.0, %v5747_v37  ;;  %v8060_v41 = vpop.eup %5748  ;;  %v2843_v37 = vmul.f32 %v5745_v20, %v2842_v12  ;;  %v2851_v12 = vand.u32 2147483648, %v8045_v33 }
 0x48b   : > { %5750 = vpow2.f32 %v2785_v8  ;;  %v2856_v9 = vmul.f32 %v8060_v41, %v8051_v21  ;;  %vm2861_vm8 = vweird.f32 %v8060_v41 }
 0x48c   : > { %v2644_v60 = vpop.xlane.xlu1 %2643  ;;  %5752 = vrcp.f32 %v8058_v54  ;;  %v2844_v13 = vadd.f32 %v5745_v20, %v2843_v37  ;;  %vm2862_vm10 = vmor %vm2860_vm9, %vm2861_vm8  ;;  %vm2875_vm13 = vweird.f32 %v8058_v54 }
 0x48d   : > { %v8053_v11 = vadd.f32 -1.0, %v2644_v60  ;;  %v2697_v60 = vmul.f32 0.1, %v2681_v0  ;;  %v2838_v0 = vsel %vm2835_vm3, %v2837_v10, %v2833_v62  ;;  %v2857_v45 = vsub.f32 1.0, %v2856_v9 }
 0x48e   : > { %v2848_v62 = vsel %vm2847_vm6, %v5745_v20, %v2844_v13  ;;  %v2852_v10 = vor.u32 1.1754944e-38, %v2851_v12  ;;  %v10058_v13 = vmax.f32 %v7581_v26, 0.0  ;;  %v2864_v26 = vand.u32 2147483647, %v8051_v21 }
 0x48f   : > { %v5185_v17 = vmul.f32 -2.0, %v8053_v11  ;;  %v2858_v37 = vmul.f32 %v8060_v41, %v2857_v45 }
 0x490   : > { %v2853_v33 = vsel %vm2850_vm7, %v2852_v10, %v2848_v62  ;;  %vm2865_vm11 = vcmp.eq.f32.partialorder %v2864_v26, 8.507059e+37 }
 0x491   : > { %v2787_v19 = vmul.f32 1.442695, %v5185_v17  ;;  %v5751_v8 = vpop.eup %5750  ;;  %v8070_v17 = vadd.f32 %v2697_v60, %v10056_v56 }
 0x492   : > { %v8072_v2 = vadd.f32 1.0, %v5751_v8  ;;  %v8075_v3 = vpop.eup %5752 }
 0x493   : > { %5754 = vpow2.f32 %v2787_v19  ;;  %10057 = vst [vmem:[#allocation19_spill] sm:$0xff] %v8070_v17  ;;  %v3065_v28 = vmul.f32 %v2838_v0, %v8070_v17  ;;  %v2871_v9 = vmul.f32 %v8075_v3, %v8058_v54  ;;  %v2683_v0 = vmax.f32 %v8039_v23, 0.0 }
 0x494   : > { %v2646_v24 = vpop.xlane.xlu1 %2645  ;;  %5756 = vrcp.f32 %v8072_v2  ;;  %vm2876_vm12 = vweird.f32 %v8075_v3  ;;  %vm2890_vm1 = vweird.f32 %v8072_v2 }
 0x495   : > { %v8063_v51 = vadd.f32 -1.0, %v2646_v24  ;;  %v2682_v24 = vmax.f32 %v8036_v18, 0.0  ;;  %v8088_v56 = vadd.f32 %v3065_v28, %v7591_v44  ;;  %v2872_v45 = vsub.f32 1.0, %v2871_v9  ;;  %vm2877_vm14 = vmor %vm2875_vm13, %vm2876_vm12 }
 0x496   : > { %v2866_v28 = vand.u32 2147483648, %v8051_v21 }
 0x497   : > { %v5186_v4 = vmul.f32 -2.0, %v8063_v51  ;;  %v2698_v8 = vmul.f32 0.1, %v2682_v24  ;;  %v2859_v24 = vadd.f32 %v8060_v41, %v2858_v37  ;;  %v2873_v9 = vmul.f32 %v8075_v3, %v2872_v45 }
 0x499   : > { %v2789_v19 = vmul.f32 1.442695, %v5186_v4  ;;  %v5755_v18 = vpop.eup %5754  ;;  %v8096_v20 = vadd.f32 %v2698_v8, %v10058_v13  ;;  %v2699_v8 = vmul.f32 0.1, %v2683_v0  ;;  %v2863_v37 = vsel %vm2862_vm10, %v8060_v41, %v2859_v24 }
 0x49a   : > { %v8101_v12 = vpop.eup %5756  ;;  %v2867_v13 = vor.u32 1.1754944e-38, %v2866_v28  ;;  %v2684_v41 = vmax.f32 %v8042_v29, 0.0  ;;  %v2874_v24 = vadd.f32 %v8075_v3, %v2873_v9 }
 0x49b   : > { %5758 = vpow2.f32 %v2789_v19  ;;  %10059 = vst [vmem:[#allocation21_spill] sm:$0xff] %v8096_v20  ;;  %v3066_v38 = vmul.f32 %v2853_v33, %v8096_v20  ;;  %v2886_v10 = vmul.f32 %v8101_v12, %v8072_v2  ;;  %vm2891_vm0 = vweird.f32 %v8101_v12 }
 0x49c   : > { %v2648_v48 = vpop.xlane.xlu1 %2647  ;;  %v2878_v9 = vsel %vm2877_vm14, %v8075_v3, %v2874_v24  ;;  %v10062_v3 = vmax.f32 %v7587_v53, 0.0  ;;  %v2894_v53 = vand.u32 2147483647, %v8072_v2  ;;  %vm2892_vm2 = vmor %vm2890_vm1, %vm2891_vm0 }
 0x49d   : > { %v8082_v60 = vadd.f32 -1.0, %v2648_v48  ;;  %v8092_v48 = vadd.f32 1.0, %v5755_v18  ;;  %v8115_v33 = vadd.f32 %v3066_v38, %v7603_v6  ;;  %v2887_v45 = vsub.f32 1.0, %v2886_v10  ;;  %v10071_v6 = vld [vmem:[#allocation40_spill] sm:$0xff] }
 0x49e   : > { %v2881_v38 = vand.u32 2147483648, %v8058_v54  ;;  %vm2895_vm3 = vcmp.eq.f32.partialorder %v2894_v53, 8.507059e+37 }
 0x49f   : > { %v5187_v4 = vmul.f32 -2.0, %v8082_v60  ;;  %5760 = vrcp.f32 %v8092_v48  ;;  %v2888_v10 = vmul.f32 %v8101_v12, %v2887_v45  ;;  %vm2905_vm5 = vweird.f32 %v8092_v48 }
 0x4a1   : > { %v2791_v19 = vmul.f32 1.442695, %v5187_v4  ;;  %v5759_v62 = vpop.eup %5758  ;;  %v10060_v4 = vmax.f32 %v7584_v61, 0.0  ;;  %v2889_v24 = vadd.f32 %v8101_v12, %v2888_v10 }
 0x4a2   : > { %v8122_v20 = vadd.f32 1.0, %v5759_v62 }
 0x4a3   : > { %3113 = vxpose.xlu1.b32.start [1/16] %v8088_v56, 128  ;;  %5762 = vpow2.f32 %v2791_v19  ;;  %v8120_v0 = vadd.f32 %v2699_v8, %v10060_v4  ;;  %v2879_v19 = vand.u32 2147483647, %v8058_v54  ;;  %v2882_v4 = vor.u32 1.1754944e-38, %v2881_v38 }
 0x4a4   : > { %v2650_v23 = vpop.xlane.xlu2 %2649  ;;  %5764 = vrcp.f32 %v8122_v20  ;;  %v2893_v10 = vsel %vm2892_vm2, %v8101_v12, %v2889_v24  ;;  %v2686_v12 = vmax.f32 %v8053_v11, 0.0  ;;  %vm2920_vm9 = vweird.f32 %v8122_v20 }
 0x4a5   : > { %v8107_v18 = vadd.f32 -1.0, %v2650_v23  ;;  %10061 = vst [vmem:[#allocation22_spill] sm:$0xff] %v8120_v0  ;;  %v2868_v23 = vsel %vm2865_vm11, %v2867_v13, %v2863_v37  ;;  %v8128_v28 = vpop.eup %5760  ;;  %v2700_v37 = vmul.f32 0.1, %v2684_v41  ;;  %vm2880_vm15 = vcmp.eq.f32.partialorder %v2879_v19, 8.507059e+37 }
 0x4a6   : > { %v3067_v61 = vmul.f32 %v2868_v23, %v8120_v0  ;;  %v2901_v13 = vmul.f32 %v8128_v28, %v8092_v48  ;;  %vm2906_vm4 = vweird.f32 %v8128_v28 }
 0x4a7   : > { %v5188_v21 = vmul.f32 -2.0, %v8107_v18  ;;  %v8150_v41 = vadd.f32 %v2700_v37, %v10062_v3  ;;  %vm2907_vm6 = vmor %vm2905_vm5, %vm2906_vm4 }
 0x4a8   : > { %v8142_v23 = vadd.f32 %v3067_v61, %v7616_v31  ;;  %v2902_v45 = vsub.f32 1.0, %v2901_v13  ;;  %v2896_v61 = vand.u32 2147483648, %v8072_v2 }
 0x4a9   : > { %v2793_v8 = vmul.f32 1.442695, %v5188_v21  ;;  %v5763_v62 = vpop.eup %5762  ;;  %v2883_v21 = vsel %vm2880_vm15, %v2882_v4, %v2878_v9  ;;  %10063 = vst [vmem:[#allocation26_spill] sm:$0xff] %v8150_v41 }
 0x4aa   : > { %v8146_v0 = vadd.f32 1.0, %v5763_v62  ;;  %v8155_v38 = vpop.eup %5764  ;;  %v2903_v13 = vmul.f32 %v8128_v28, %v2902_v45 }
 0x4ab   : > { %3114 = vxpose.xlu1.b32.cont [2/16] %v8115_v33, 128  ;;  %5766 = vpow2.f32 %v2793_v8  ;;  %v2916_v4 = vmul.f32 %v8155_v38, %v8122_v20  ;;  %vm2921_vm8 = vweird.f32 %v8155_v38 }
 0x4ac   : > { %v2652_v26 = vpop.xlane.xlu0 %2651  ;;  %5768 = vrcp.f32 %v8146_v0  ;;  %v2904_v24 = vadd.f32 %v8128_v28, %v2903_v13  ;;  %v2702_v13 = vmul.f32 0.1, %v2686_v12  ;;  %v10068_v12 = vld [vmem:[#allocation43_spill] sm:$0xff]  ;;  %vm2922_vm10 = vmor %vm2920_vm9, %vm2921_vm8  ;;  %vm2935_vm13 = vweird.f32 %v8146_v0 }
 0x4ad   : > { %v8135_v29 = vadd.f32 -1.0, %v2652_v26  ;;  %v2685_v26 = vmax.f32 %v8048_v50, 0.0  ;;  %v3068_v50 = vmul.f32 %v2883_v21, %v8150_v41  ;;  %v2897_v21 = vor.u32 1.1754944e-38, %v2896_v61 }
 0x4ae   : > { %v2917_v45 = vsub.f32 1.0, %v2916_v4  ;;  %v2908_v4 = vsel %vm2907_vm6, %v8128_v28, %v2904_v24  ;;  %v10069_v28 = vmax.f32 %v10068_v12, 0.0 }
 0x4af   : > { %v5189_v54 = vmul.f32 -2.0, %v8135_v29  ;;  %v2701_v62 = vmul.f32 0.1, %v2685_v26  ;;  %v8169_v3 = vadd.f32 %v3068_v50, %v7629_v46  ;;  %v2898_v41 = vsel %vm2895_vm3, %v2897_v21, %v2893_v10  ;;  %v10067_v46 = vld [vmem:[#allocation10_spill] sm:$0xff] }
 0x4b0   : > { %v2911_v50 = vand.u32 2147483648, %v8092_v48  ;;  %v2918_v21 = vmul.f32 %v8155_v38, %v2917_v45  ;;  %v8204_v24 = vadd.f32 %v2702_v13, %v10069_v28 }
 0x4b1   : > { %v2795_v8 = vmul.f32 1.442695, %v5189_v54  ;;  %v5767_v9 = vpop.eup %5766  ;;  %v10064_v54 = vld [vmem:[#allocation8_spill] sm:$0xff] }
 0x4b2   : > { %v10065_v26 = vmax.f32 %v10064_v54, 0.0  ;;  %v8176_v31 = vadd.f32 1.0, %v5767_v9  ;;  %v8182_v61 = vpop.eup %5768  ;;  %10070 = vst [vmem:[#allocation35_spill] sm:$0xff] %v8204_v24  ;;  %v2919_v45 = vadd.f32 %v8155_v38, %v2918_v21 }
 0x4b3   : > { %3115 = vxpose.xlu1.b32.cont [3/16] %v8142_v23, 128  ;;  %5770 = vpow2.f32 %v2795_v8  ;;  %v2931_v54 = vmul.f32 %v8182_v61, %v8146_v0  ;;  %vm2936_vm12 = vweird.f32 %v8182_v61 }
 0x4b4   : > { %v2654_v19 = vpop.xlane.xlu1 %2653  ;;  %5772 = vrcp.f32 %v8176_v31  ;;  %vm2937_vm14 = vmor %vm2935_vm13, %vm2936_vm12  ;;  %vm2950_vm1 = vweird.f32 %v8176_v31 }
 0x4b5   : > { %v8162_v37 = vadd.f32 -1.0, %v2654_v19  ;;  %v8174_v19 = vadd.f32 %v2701_v62, %v10065_v26  ;;  %v2909_v62 = vand.u32 2147483647, %v8092_v48  ;;  %v2912_v26 = vor.u32 1.1754944e-38, %v2911_v50 }
 0x4b6   : > { %v2932_v50 = vsub.f32 1.0, %v2931_v54 }
 0x4b7   : > { %v5190_v2 = vmul.f32 -2.0, %v8162_v37  ;;  %10066 = vst [vmem:[#allocation30_spill] sm:$0xff] %v8174_v19  ;;  %v3069_v8 = vmul.f32 %v2898_v41, %v8174_v19  ;;  %vm2910_vm7 = vcmp.eq.f32.partialorder %v2909_v62, 8.507059e+37  ;;  %v2926_v62 = vand.u32 2147483648, %v8122_v20 }
 0x4b8   : > { %v2933_v12 = vmul.f32 %v8182_v61, %v2932_v50 }
 0x4b9   : > { %v2797_v9 = vmul.f32 1.442695, %v5190_v2  ;;  %v5771_v10 = vpop.eup %5770  ;;  %v8196_v41 = vadd.f32 %v3069_v8, %v10067_v46  ;;  %v2913_v2 = vsel %vm2910_vm7, %v2912_v26, %v2908_v4  ;;  %v2923_v26 = vsel %vm2922_vm10, %v8155_v38, %v2919_v45 }
 0x4ba   : > { %v8200_v19 = vadd.f32 1.0, %v5771_v10  ;;  %v8209_v8 = vpop.eup %5772  ;;  %v2924_v10 = vand.u32 2147483647, %v8122_v20  ;;  %v2927_v46 = vor.u32 1.1754944e-38, %v2926_v62  ;;  %v2688_v38 = vmax.f32 %v8082_v60, 0.0 }
 0x4bb   : > { %3116 = vxpose.xlu1.b32.cont [4/16] %v8169_v3, 128  ;;  %5774 = vpow2.f32 %v2797_v9  ;;  %v3070_v9 = vmul.f32 %v2913_v2, %v8204_v24  ;;  %v2946_v28 = vmul.f32 %v8209_v8, %v8176_v31  ;;  %v2934_v45 = vadd.f32 %v8182_v61, %v2933_v12 }
 0x4bc   : > { %v2656_v53 = vpop.xlane.xlu1 %2655  ;;  %5776 = vrcp.f32 %v8200_v19  ;;  %vm2925_vm11 = vcmp.eq.f32.partialorder %v2924_v10, 8.507059e+37  ;;  %vm2951_vm0 = vweird.f32 %v8209_v8  ;;  %vm2965_vm5 = vweird.f32 %v8200_v19 }
 0x4bd   : > { %v8188_v11 = vadd.f32 -1.0, %v2656_v53  ;;  %v2687_v53 = vmax.f32 %v8063_v51, 0.0  ;;  %v8223_v2 = vadd.f32 %v3070_v9, %v10071_v6  ;;  %v2928_v24 = vsel %vm2925_vm11, %v2927_v46, %v2923_v26  ;;  %vm2952_vm2 = vmor %vm2950_vm1, %vm2951_vm0 }
 0x4be   : > { %v2947_v50 = vsub.f32 1.0, %v2946_v28  ;;  %v2941_v9 = vand.u32 2147483648, %v8146_v0  ;;  %v2939_v46 = vand.u32 2147483647, %v8146_v0  ;;  %v2704_v26 = vmul.f32 0.1, %v2688_v38 }
 0x4bf   : > { %v5191_v48 = vmul.f32 -2.0, %v8188_v11  ;;  %v2703_v21 = vmul.f32 0.1, %v2687_v53  ;;  %v2938_v12 = vsel %vm2937_vm14, %v8182_v61, %v2934_v45  ;;  %v10076_v38 = vld [vmem:[#allocation23_spill] sm:$0xff] }
 0x4c0   : > { %v2948_v28 = vmul.f32 %v8209_v8, %v2947_v50  ;;  %vm2940_vm15 = vcmp.eq.f32.partialorder %v2939_v46, 8.507059e+37  ;;  %v10077_v61 = vmax.f32 %v10076_v38, 0.0  ;;  %v2956_v46 = vand.u32 2147483648, %v8176_v31 }
 0x4c1   : > { %v2799_v13 = vmul.f32 1.442695, %v5191_v48  ;;  %v5775_v54 = vpop.eup %5774  ;;  %v10072_v48 = vld [vmem:[#allocation34_spill] sm:$0xff] }
 0x4c2   : > { %v10073_v53 = vmax.f32 %v10072_v48, 0.0  ;;  %v8230_v44 = vadd.f32 1.0, %v5775_v54  ;;  %v8236_v62 = vpop.eup %5776  ;;  %v8258_v45 = vadd.f32 %v2704_v26, %v10077_v61  ;;  %v2949_v50 = vadd.f32 %v8209_v8, %v2948_v28 }
 0x4c3   : > { %3117 = vxpose.xlu1.b32.cont [5/16] %v8196_v41, 128  ;;  %5778 = vpow2.f32 %v2799_v13  ;;  %v2961_v48 = vmul.f32 %v8236_v62, %v8200_v19  ;;  %vm2966_vm4 = vweird.f32 %v8236_v62 }
 0x4c4   : > { %v2658_v51 = vpop.xlane.xlu1 %2657  ;;  %5780 = vrcp.f32 %v8230_v44  ;;  %10078 = vst [vmem:[#allocation42_spill] sm:$0xff] %v8258_v45  ;;  %vm2967_vm6 = vmor %vm2965_vm5, %vm2966_vm4  ;;  %vm2980_vm9 = vweird.f32 %v8230_v44 }
 0x4c5   : > { %v8215_v4 = vadd.f32 -1.0, %v2658_v51  ;;  %v8228_v51 = vadd.f32 %v2703_v21, %v10073_v53  ;;  %v10075_v53 = vld [vmem:[#allocation44_spill] sm:$0xff] }
 0x4c7   : > { %v5192_v20 = vmul.f32 -2.0, %v8215_v4  ;;  %10074 = vst [vmem:[#allocation39_spill] sm:$0xff] %v8228_v51  ;;  %v3071_v13 = vmul.f32 %v2928_v24, %v8228_v51  ;;  %v2942_v24 = vor.u32 1.1754944e-38, %v2941_v9  ;;  %v2962_v9 = vsub.f32 1.0, %v2961_v48 }
 0x4c8   : > { %v2953_v48 = vsel %vm2952_vm2, %v8209_v8, %v2949_v50  ;;  %v10080_v8 = vld [vmem:[#allocation14_spill] sm:$0xff] }
 0x4c9   : > { %v2801_v21 = vmul.f32 1.442695, %v5192_v20  ;;  %v5779_v54 = vpop.eup %5778  ;;  %v8250_v51 = vadd.f32 %v3071_v13, %v10075_v53  ;;  %v2943_v20 = vsel %vm2940_vm15, %v2942_v24, %v2938_v12  ;;  %v2963_v24 = vmul.f32 %v8236_v62, %v2962_v9 }
 0x4ca   : > { %v8254_v6 = vadd.f32 1.0, %v5779_v54  ;;  %v8263_v13 = vpop.eup %5780  ;;  %v2954_v54 = vand.u32 2147483647, %v8176_v31  ;;  %v10081_v50 = vmax.f32 %v10080_v8, 0.0 }
 0x4cb   : > { %3118 = vxpose.xlu1.b32.cont [6/16] %v8223_v2, 128  ;;  %5782 = vpow2.f32 %v2801_v21  ;;  %v2976_v38 = vmul.f32 %v8263_v13, %v8230_v44  ;;  %vm2981_vm8 = vweird.f32 %v8263_v13 }
 0x4cc   : > { %v2660_v10 = vpop.xlane.xlu1 %2659  ;;  %5784 = vrcp.f32 %v8254_v6  ;;  %vm2955_vm3 = vcmp.eq.f32.partialorder %v2954_v54, 8.507059e+37  ;;  %v2971_v54 = vand.u32 2147483648, %v8200_v19  ;;  %vm2982_vm10 = vmor %vm2980_vm9, %vm2981_vm8  ;;  %vm2995_vm13 = vweird.f32 %v8254_v6 }
 0x4cd   : > { %v8243_v60 = vadd.f32 -1.0, %v2660_v10  ;;  %v2689_v10 = vmax.f32 %v8107_v18, 0.0  ;;  %v3072_v18 = vmul.f32 %v2943_v20, %v8258_v45  ;;  %v2957_v20 = vor.u32 1.1754944e-38, %v2956_v46  ;;  %v10079_v45 = vld [vmem:[#allocation46_spill] sm:$0xff] }
 0x4ce   : > { %v2977_v46 = vsub.f32 1.0, %v2976_v38 }
 0x4cf   : > { %v5193_v0 = vmul.f32 -2.0, %v8243_v60  ;;  %v2705_v12 = vmul.f32 0.1, %v2689_v10  ;;  %v8277_v53 = vadd.f32 %v3072_v18, %v10079_v45  ;;  %v2690_v10 = vmax.f32 %v8135_v29, 0.0 }
 0x4d0   : > { %v2978_v8 = vmul.f32 %v8263_v13, %v2977_v46 }
 0x4d1   : > { %v2803_v26 = vmul.f32 1.442695, %v5193_v0  ;;  %v5783_v28 = vpop.eup %5782  ;;  %v2958_v0 = vsel %vm2955_vm3, %v2957_v20, %v2953_v48  ;;  %v8285_v9 = vadd.f32 %v2705_v12, %v10081_v50  ;;  %v2706_v48 = vmul.f32 0.1, %v2690_v10 }
 0x4d2   : > { %v8281_v17 = vadd.f32 1.0, %v5783_v28  ;;  %v8290_v18 = vpop.eup %5784  ;;  %v2969_v28 = vand.u32 2147483647, %v8200_v19 }
 0x4d3   : > { %3119 = vxpose.xlu1.b32.cont [7/16] %v8250_v51, 128  ;;  %5786 = vpow2.f32 %v2803_v26  ;;  %10082 = vst [vmem:[#allocation49_spill] sm:$0xff] %v8285_v9  ;;  %v3073_v29 = vmul.f32 %v2958_v0, %v8285_v9  ;;  %v2991_v50 = vmul.f32 %v8290_v18, %v8254_v6  ;;  %v2972_v0 = vor.u32 1.1754944e-38, %v2971_v54  ;;  %v10083_v9 = vld [vmem:[#allocation15_spill] sm:$0xff] }
 0x4d4   : > { %v2662_v21 = vpop.xlane.xlu1 %2661  ;;  %5788 = vrcp.f32 %v8281_v17  ;;  %vm2970_vm7 = vcmp.eq.f32.partialorder %v2969_v28, 8.507059e+37  ;;  %vm2996_vm12 = vweird.f32 %v8290_v18  ;;  %vm3010_vm1 = vweird.f32 %v8281_v17 }
 0x4d5   : > { %v8274_v61 = vadd.f32 -1.0, %v2662_v21  ;;  %v2964_v21 = vadd.f32 %v8236_v62, %v2963_v24  ;;  %v8304_v45 = vadd.f32 %v3073_v29, %v10083_v9  ;;  %v2992_v46 = vsub.f32 1.0, %v2991_v50  ;;  %vm2997_vm14 = vmor %vm2995_vm13, %vm2996_vm12 }
 0x4d6   : > { %v2986_v29 = vand.u32 2147483648, %v8230_v44 }
 0x4d7   : > { %v5194_v31 = vmul.f32 -2.0, %v8274_v61  ;;  %v2968_v20 = vsel %vm2967_vm6, %v8236_v62, %v2964_v21  ;;  %v2691_v62 = vmax.f32 %v8162_v37, 0.0  ;;  %v2979_v21 = vadd.f32 %v8263_v13, %v2978_v8 }
 0x4d8   : > { %v2973_v7 = vsel %vm2970_vm7, %v2972_v0, %v2968_v20  ;;  %v2993_v8 = vmul.f32 %v8290_v18, %v2992_v46  ;;  %v2987_v0 = vor.u32 1.1754944e-38, %v2986_v29  ;;  %v3001_v29 = vand.u32 2147483648, %v8254_v6 }
 0x4d9   : > { %v2805_v12 = vmul.f32 1.442695, %v5194_v31  ;;  %v5787_v38 = vpop.eup %5786  ;;  %v10084_v31 = vld [vmem:[#allocation37_spill] sm:$0xff]  ;;  %v2983_v20 = vsel %vm2982_vm10, %v8263_v13, %v2979_v21 }
 0x4da   : > { %v10085_v10 = vmax.f32 %v10084_v31, 0.0  ;;  %v8311_v5 = vadd.f32 1.0, %v5787_v38  ;;  %v8317_v54 = vpop.eup %5788  ;;  %v2707_v38 = vmul.f32 0.1, %v2691_v62  ;;  %v10087_v31 = vld [vmem:[#allocation53_spill] sm:$0xff]  ;;  %v2994_v13 = vadd.f32 %v8290_v18, %v2993_v8  ;;  %v10091_v8 = vld [vmem:[#allocation7_spill] sm:$0xff] }
 0x4db   : > { %3120 = vxpose.xlu1.b32.cont [8/16] %v8277_v53, 128  ;;  %5790 = vpow2.f32 %v2805_v12  ;;  %v2984_v12 = vand.u32 2147483647, %v8230_v44  ;;  %v3006_v50 = vmul.f32 %v8317_v54, %v8281_v17  ;;  %vm3011_vm0 = vweird.f32 %v8317_v54 }
 0x4dc   : > { %v2664_v26 = vpop.xlane.xlu1 %2663  ;;  %5792 = vrcp.f32 %v8311_v5  ;;  %vm3012_vm2 = vmor %vm3010_vm1, %vm3011_vm0  ;;  %vm3025_vm5 = vweird.f32 %v8311_v5 }
 0x4dd   : > { %v8297_v24 = vadd.f32 -1.0, %v2664_v26  ;;  %v8309_v26 = vadd.f32 %v2706_v48, %v10085_v10  ;;  %vm2985_vm11 = vcmp.eq.f32.partialorder %v2984_v12, 8.507059e+37  ;;  %v3007_v21 = vsub.f32 1.0, %v3006_v50 }
 0x4de   : > { %v2988_v44 = vsel %vm2985_vm11, %v2987_v0, %v2983_v20  ;;  %v3002_v20 = vor.u32 1.1754944e-38, %v3001_v29  ;;  %v10092_v0 = vld [vmem:[#allocation12_spill] sm:$0xff]  ;;  %v3016_v29 = vand.u32 2147483648, %v8281_v17 }
 0x4df   : > { %v5195_v19 = vmul.f32 -2.0, %v8297_v24  ;;  %10086 = vst [vmem:[#allocation51_spill] sm:$0xff] %v8309_v26  ;;  %v3074_v28 = vmul.f32 %v2973_v7, %v8309_v26  ;;  %v10088_v26 = vld [vmem:[#allocation38_spill] sm:$0xff] }
 0x4e0   : > { %v10089_v62 = vmax.f32 %v10088_v26, 0.0 }
 0x4e1   : > { %v2807_v48 = vmul.f32 1.442695, %v5195_v19  ;;  %v5791_v37 = vpop.eup %5790  ;;  %v8329_v7 = vadd.f32 %v3074_v28, %v10087_v31  ;;  %v2692_v19 = vmax.f32 %v8188_v11, 0.0  ;;  %v2999_v11 = vand.u32 2147483647, %v8254_v6 }
 0x4e2   : > { %v8332_v10 = vadd.f32 1.0, %v5791_v37  ;;  %v8336_v9 = vadd.f32 %v2707_v38, %v10089_v62  ;;  %v5793_v46 = vpop.eup %5792  ;;  %v3008_v37 = vmul.f32 %v8317_v54, %v3007_v21 }
 0x4e3   : > { %3121 = vxpose.xlu1.b32.cont [9/16] %v8304_v45, 128  ;;  %5794 = vpow2.f32 %v2807_v48  ;;  %v2708_v12 = vmul.f32 0.1, %v2692_v19  ;;  %v2998_v48 = vsel %vm2997_vm14, %v8290_v18, %v2994_v13  ;;  %v3021_v38 = vmul.f32 %v5793_v46, %v8311_v5 }
 0x4e4   : > { %10090 = vst [vmem:[#allocation54_spill] sm:$0xff] %v8336_v9  ;;  %v3075_v28 = vmul.f32 %v2988_v44, %v8336_v9  ;;  %5796 = vrcp.f32 %v8332_v10  ;;  %vm3000_vm15 = vcmp.eq.f32.partialorder %v2999_v11, 8.507059e+37  ;;  %v10093_v44 = vmax.f32 %v10092_v0, 0.0 }
 0x4e5   : > { %v3003_v6 = vsel %vm3000_vm15, %v3002_v20, %v2998_v48  ;;  %v2693_v9 = vmax.f32 %v8215_v4, 0.0  ;;  %v3009_v18 = vadd.f32 %v8317_v54, %v3008_v37  ;;  %v3022_v13 = vsub.f32 1.0, %v3021_v38  ;;  %v10095_v38 = vld [vmem:[#allocation9_spill] sm:$0xff] }
 0x4e6   : > { %v8350_v50 = vadd.f32 %v3075_v28, %v10091_v8  ;;  %v8354_v62 = vadd.f32 %v2708_v12, %v10093_v44  ;;  %v3014_v11 = vand.u32 2147483647, %v8281_v17  ;;  %v3017_v37 = vor.u32 1.1754944e-38, %v3016_v29 }
 0x4e7   : > { %v2709_v4 = vmul.f32 0.1, %v2693_v9  ;;  %v3013_v12 = vsel %vm3012_vm2, %v8317_v54, %v3009_v18  ;;  %v2694_v44 = vmax.f32 %v8243_v60, 0.0  ;;  %vm3026_vm4 = vweird.f32 %v5793_v46 }
 0x4e8   : > { %10094 = vst [vmem:[#allocation56_spill] sm:$0xff] %v8354_v62  ;;  %v3076_v28 = vmul.f32 %v3003_v6, %v8354_v62  ;;  %vm3015_vm3 = vcmp.eq.f32.partialorder %v3014_v11, 8.507059e+37  ;;  %v10096_v6 = vld [vmem:[#allocation47_spill] sm:$0xff]  ;;  %v3031_v18 = vand.u32 2147483648, %v8311_v5  ;;  %v3029_v29 = vand.u32 2147483647, %v8311_v5  ;;  %vm3027_vm6 = vmor %vm3025_vm5, %vm3026_vm4 }
 0x4e9   : > { %v5795_v26 = vpop.eup %5794  ;;  %v3018_v0 = vsel %vm3015_vm3, %v3017_v37, %v3013_v12  ;;  %v10097_v62 = vmax.f32 %v10096_v6, 0.0  ;;  %v10099_v12 = vld [vmem:[#allocation20_spill] sm:$0xff]  ;;  %v2695_v6 = vmax.f32 %v8274_v61, 0.0  ;;  %vm3040_vm9 = vweird.f32 %v8332_v10 }
 0x4ea   : > { %v8356_v19 = vadd.f32 1.0, %v5795_v26  ;;  %v5797_v21 = vpop.eup %5796  ;;  %v3023_v26 = vmul.f32 %v5793_v46, %v3022_v13  ;;  %v8370_v20 = vadd.f32 %v3076_v28, %v10095_v38  ;;  %v2710_v28 = vmul.f32 0.1, %v2694_v44 }
 0x4eb   : > { %3122 = vxpose.xlu1.b32.cont [10/16] %v8329_v7, 128  ;;  %v3036_v48 = vmul.f32 %v5797_v21, %v8332_v10  ;;  %v8375_v17 = vadd.f32 %v2709_v4, %v10097_v62  ;;  %v3032_v4 = vor.u32 1.1754944e-38, %v3031_v18  ;;  %vm3030_vm7 = vcmp.eq.f32.partialorder %v3029_v29, 8.507059e+37 }
 0x4ec   : > { %5798 = vrcp.f32 %v8356_v19  ;;  %v3024_v8 = vadd.f32 %v5793_v46, %v3023_v26  ;;  %vm3041_vm8 = vweird.f32 %v5797_v21  ;;  %v3044_v44 = vand.u32 2147483647, %v8332_v10 }
 0x4ed   : > { %10098 = vst [vmem:[#allocation57_spill] sm:$0xff] %v8375_v17  ;;  %v3037_v9 = vsub.f32 1.0, %v3036_v48  ;;  %v3077_v13 = vmul.f32 %v3018_v0, %v8375_v17  ;;  %v10100_v48 = vmax.f32 %v7727_v32, 0.0  ;;  %vm3042_vm10 = vmor %vm3040_vm9, %vm3041_vm8  ;;  %v2711_v32 = vmul.f32 0.1, %v2695_v6  ;;  %v10102_v6 = vld [vmem:[#allocation13_spill] sm:$0xff] }
 0x4ee   : > { %v3028_v60 = vsel %vm3027_vm6, %v5793_v46, %v3024_v8  ;;  %v3046_v46 = vand.u32 2147483648, %v8332_v10  ;;  %vm3045_vm11 = vcmp.eq.f32.partialorder %v3044_v44, 8.507059e+37  ;;  %v3061_v10 = vand.u32 2147483648, %v8356_v19  ;;  %v10104_v44 = vld [vmem:[#allocation24_spill] sm:$0xff] }
 0x4ef   : > { %v3038_v11 = vmul.f32 %v5797_v21, %v3037_v9  ;;  %v8384_v26 = vadd.f32 %v3077_v13, %v10099_v12  ;;  %v8388_v37 = vadd.f32 %v2710_v28, %v10100_v48  ;;  %v3033_v0 = vsel %vm3030_vm7, %v3032_v4, %v3028_v60 }
 0x4f0   : > { %v3047_v13 = vor.u32 1.1754944e-38, %v3046_v46  ;;  %v10101_v28 = vmax.f32 %v7741_v15, 0.0  ;;  %vm3055_vm13 = vweird.f32 %v8356_v19  ;;  %v3062_v15 = vor.u32 1.1754944e-38, %v3061_v10 }
 0x4f1   : > { %v3039_v17 = vadd.f32 %v5797_v21, %v3038_v11  ;;  %v3078_v8 = vmul.f32 %v3033_v0, %v8388_v37  ;;  %v2696_v11 = vmax.f32 %v8297_v24, 0.0 }
 0x4f2   : > { %v5799_v54 = vpop.eup %5798  ;;  %v8401_v60 = vadd.f32 %v2711_v32, %v10101_v28 }
 0x4f3   : > { %3123 = vxpose.xlu1.b32.cont [11/16] %v8350_v50, 128  ;;  %v3051_v62 = vmul.f32 %v5799_v54, %v8356_v19  ;;  %v3043_v9 = vsel %vm3042_vm10, %v5797_v21, %v3039_v17  ;;  %v8397_v61 = vadd.f32 %v3078_v8, %v7779_v1  ;;  %vm3056_vm12 = vweird.f32 %v5799_v54 }
 0x4f4   : > { %v3048_v29 = vsel %vm3045_vm11, %v3047_v13, %v3043_v9  ;;  %v3059_v17 = vand.u32 2147483647, %v8356_v19  ;;  %vm3057_vm14 = vmor %vm3055_vm13, %vm3056_vm12  ;;  %v2712_v4 = vmul.f32 0.1, %v2696_v11 }
 0x4f5   : > { %v3052_v5 = vsub.f32 1.0, %v3051_v62  ;;  %v3079_v21 = vmul.f32 %v3048_v29, %v8401_v60 }
 0x4f6   : > { %vm3060_vm15 = vcmp.eq.f32.partialorder %v3059_v17, 8.507059e+37 }
 0x4f7   : > { %v3053_v18 = vmul.f32 %v5799_v54, %v3052_v5  ;;  %v8410_v0 = vadd.f32 %v3079_v21, %v7789_v35  ;;  %v10103_v5 = vmax.f32 %v10102_v6, 0.0 }
 0x4f9   : > { %v3054_v62 = vadd.f32 %v5799_v54, %v3053_v18  ;;  %v8414_v46 = vadd.f32 %v2712_v4, %v10103_v5  ;;  %v3099_v5 = vmul.f32 %v7836_v49, %v7395_v30 }
 0x4fb   : > { %3124 = vxpose.xlu1.b32.cont [12/16] %v8370_v20, 128  ;;  %v3058_v48 = vsel %vm3057_vm14, %v5799_v54, %v3054_v62  ;;  %v3097_v54 = vmul.f32 %v7814_v58, %v7377_v47  ;;  %v3098_v62 = vmul.f32 %v7825_v25, %v7389_v42 }
 0x4fc   : > { %v3063_v24 = vsel %vm3060_vm15, %v3062_v15, %v3058_v48 }
 0x4fd   : > { %v3080_v8 = vmul.f32 %v3063_v24, %v8414_v46 }
 0x4ff   : > { %v8419_v32 = vadd.f32 %v3080_v8, %v10104_v44 }
 0x503   : > { %3125 = vxpose.xlu1.b32.cont [13/16] %v8384_v26, 128 }
 0x50b   : > { %3126 = vxpose.xlu1.b32.cont [14/16] %v8397_v61, 128 }
 0x513   : > { %3127 = vxpose.xlu1.b32.cont [15/16] %v8410_v0, 128 }
 0x51b   : > { %3128 = vxpose.xlu1.b32.end [16/16] %v8419_v32, 128 }
 0x547   : > { %v3129_v19 = vpop.trf.xlu1 }
 0x548   : > { %v3145_v9 = vadd.f32 %v3129_v19, %v8088_v56 }
 0x54a   : > { %v3161_v18 = vmul.f32 %v3145_v9, %v3097_v54 }
 0x54c   : > { %v3177_v13 = vmul.f32 0.0099, %v3161_v18 }
 0x54e   : > { %v3193_v29 = vsub.f32 %v7814_v58, %v3177_v13 }
 0x54f   : > { %v3130_v28 = vpop.trf.xlu1 }
 0x550   : > { %v3209_v11 = vand.u32 2147483647, %v3193_v29  ;;  %v3146_v10 = vadd.f32 %v3130_v28, %v8115_v33 }
 0x552   : > { %v5196_v21 = vadd.f32 -0.009801, %v3209_v11  ;;  %v3162_v17 = vmul.f32 %v3146_v10, %v3098_v62  ;;  %v10105_v11 = vld [vmem:[#allocation28_spill] sm:$0xff] }
 0x553   : > { %v3100_v62 = vmul.f32 %v10105_v11, %v7416_v52 }
 0x554   : > { %v3241_v4 = vmax.f32 %v5196_v21, 0.0  ;;  %v3178_v48 = vmul.f32 0.0099, %v3162_v17 }
 0x556   : > { %v8429_v15 = vclamps-f32 %v3241_v4, 1.0  ;;  %v3194_v24 = vsub.f32 %v7825_v25, %v3178_v48 }
 0x557   : > { %v3131_v56 = vpop.trf.xlu1 }
 0x558   : > { %v8434_v6 = vmul.f32 %v8429_v15, %v8429_v15  ;;  %v3210_v58 = vand.u32 2147483647, %v3194_v24  ;;  %v3147_v8 = vadd.f32 %v3131_v56, %v8142_v23 }
 0x55a   : > { %v5197_v33 = vadd.f32 -0.009801, %v3210_v58  ;;  %v3163_v19 = vmul.f32 %v3147_v8, %v3099_v5  ;;  %3305 = vxpose.xlu2.b32.start [1/16] %v8434_v6, 128  ;;  %v10106_v5 = vld [vmem:[#allocation33_spill] sm:$0xff] }
 0x55b   : > { %v3101_v8 = vmul.f32 %v10106_v5, %v7429_v14 }
 0x55c   : > { %v3242_v54 = vmax.f32 %v5197_v33, 0.0  ;;  %v3179_v9 = vmul.f32 0.0099, %v3163_v19 }
 0x55e   : > { %v8440_v18 = vclamps-f32 %v3242_v54, 1.0  ;;  %v3195_v25 = vsub.f32 %v7836_v49, %v3179_v9 }
 0x55f   : > { %v3132_v13 = vpop.trf.xlu1 }
 0x560   : > { %v8445_v29 = vmul.f32 %v8440_v18, %v8440_v18  ;;  %v3211_v28 = vand.u32 2147483647, %v3195_v25  ;;  %v3148_v23 = vadd.f32 %v3132_v13, %v8169_v3 }
 0x562   : > { %v5198_v10 = vadd.f32 -0.009801, %v3211_v28  ;;  %v3164_v21 = vmul.f32 %v3148_v23, %v3100_v62  ;;  %3306 = vxpose.xlu2.b32.cont [2/16] %v8445_v29, 128  ;;  %v10107_v23 = vld [vmem:[#allocation36_spill] sm:$0xff] }
 0x564   : > { %v3243_v17 = vmax.f32 %v5198_v10, 0.0  ;;  %v3180_v4 = vmul.f32 0.0099, %v3164_v21  ;;  %v3102_v10 = vmul.f32 %v10107_v23, %v7447_v59 }
 0x566   : > { %v8451_v48 = vclamps-f32 %v3243_v17, 1.0  ;;  %v3196_v49 = vsub.f32 %v10105_v11, %v3180_v4 }
 0x567   : > { %v3133_v24 = vpop.trf.xlu1 }
 0x568   : > { %v8456_v56 = vmul.f32 %v8451_v48, %v8451_v48  ;;  %v3212_v58 = vand.u32 2147483647, %v3196_v49  ;;  %v3149_v3 = vadd.f32 %v3133_v24, %v8196_v41 }
 0x56a   : > { %v5199_v33 = vadd.f32 -0.009801, %v3212_v58  ;;  %v3165_v19 = vmul.f32 %v3149_v3, %v3101_v8  ;;  %3307 = vxpose.xlu2.b32.cont [3/16] %v8456_v56, 128 }
 0x56c   : > { %v3244_v54 = vmax.f32 %v5199_v33, 0.0  ;;  %v3181_v9 = vmul.f32 0.0099, %v3165_v19  ;;  %v10108_v33 = vld [vmem:[#allocation41_spill] sm:$0xff] }
 0x56d   : > { %v3103_v19 = vmul.f32 %v10108_v33, %v7469_v27 }
 0x56e   : > { %v8462_v25 = vclamps-f32 %v3244_v54, 1.0  ;;  %v3197_v13 = vsub.f32 %v10106_v5, %v3181_v9 }
 0x56f   : > { %v3134_v28 = vpop.trf.xlu1 }
 0x570   : > { %v8467_v11 = vmul.f32 %v8462_v25, %v8462_v25  ;;  %v3213_v62 = vand.u32 2147483647, %v3197_v13  ;;  %v3150_v41 = vadd.f32 %v3134_v28, %v8223_v2 }
 0x572   : > { %v5200_v21 = vadd.f32 -0.009801, %v3213_v62  ;;  %v3166_v17 = vmul.f32 %v3150_v41, %v3102_v10  ;;  %3308 = vxpose.xlu2.b32.cont [4/16] %v8467_v11, 128 }
 0x574   : > { %v3245_v4 = vmax.f32 %v5200_v21, 0.0  ;;  %v3182_v49 = vmul.f32 0.0099, %v3166_v17  ;;  %v10109_v17 = vld [vmem:[#allocation45_spill] sm:$0xff] }
 0x576   : > { %v8473_v24 = vclamps-f32 %v3245_v4, 1.0  ;;  %v3198_v58 = vsub.f32 %v10107_v23, %v3182_v49  ;;  %v3104_v4 = vmul.f32 %v10109_v17, %v7485_v55 }
 0x577   : > { %v3135_v5 = vpop.trf.xlu1 }
 0x578   : > { %v8478_v8 = vmul.f32 %v8473_v24, %v8473_v24  ;;  %v3214_v3 = vand.u32 2147483647, %v3198_v58  ;;  %v3151_v2 = vadd.f32 %v3135_v5, %v8250_v51 }
 0x57a   : > { %v5201_v54 = vadd.f32 -0.009801, %v3214_v3  ;;  %v3167_v9 = vmul.f32 %v3151_v2, %v3103_v19  ;;  %3309 = vxpose.xlu2.b32.cont [5/16] %v8478_v8, 128 }
 0x57c   : > { %v3246_v13 = vmax.f32 %v5201_v54, 0.0  ;;  %v3183_v28 = vmul.f32 0.0099, %v3167_v9 }
 0x57e   : > { %v8484_v62 = vclamps-f32 %v3246_v13, 1.0  ;;  %v3199_v23 = vsub.f32 %v10108_v33, %v3183_v28  ;;  %v10110_v13 = vld [vmem:[#allocation48_spill] sm:$0xff] }
 0x57f   : > { %v3136_v10 = vpop.trf.xlu1  ;;  %v3105_v28 = vmul.f32 %v10110_v13, %v7499_v22 }
 0x580   : > { %v8489_v41 = vmul.f32 %v8484_v62, %v8484_v62  ;;  %v3215_v21 = vand.u32 2147483647, %v3199_v23  ;;  %v3152_v51 = vadd.f32 %v3136_v10, %v8277_v53 }
 0x582   : > { %v5202_v49 = vadd.f32 -0.009801, %v3215_v21  ;;  %v3168_v58 = vmul.f32 %v3152_v51, %v3104_v4  ;;  %3310 = vxpose.xlu2.b32.cont [6/16] %v8489_v41, 128 }
 0x584   : > { %v3247_v5 = vmax.f32 %v5202_v49, 0.0  ;;  %v3184_v3 = vmul.f32 0.0099, %v3168_v58 }
 0x586   : > { %v8495_v19 = vclamps-f32 %v3247_v5, 1.0  ;;  %v3200_v33 = vsub.f32 %v10109_v17, %v3184_v3  ;;  %v3106_v3 = vmul.f32 %v7913_v63, %v7510_v36 }
 0x587   : > { %v3137_v2 = vpop.trf.xlu1 }
 0x588   : > { %v8500_v54 = vmul.f32 %v8495_v19, %v8495_v19  ;;  %v3216_v9 = vand.u32 2147483647, %v3200_v33  ;;  %v3153_v53 = vadd.f32 %v3137_v2, %v8304_v45 }
 0x58a   : > { %v5203_v23 = vadd.f32 -0.009801, %v3216_v9  ;;  %v3169_v10 = vmul.f32 %v3153_v53, %v3105_v28  ;;  %3311 = vxpose.xlu2.b32.cont [7/16] %v8500_v54, 128 }
 0x58c   : > { %v3248_v21 = vmax.f32 %v5203_v23, 0.0  ;;  %v3185_v4 = vmul.f32 0.0099, %v3169_v10 }
 0x58e   : > { %v8506_v51 = vclamps-f32 %v3248_v21, 1.0  ;;  %v3201_v17 = vsub.f32 %v10110_v13, %v3185_v4  ;;  %v3107_v4 = vmul.f32 %v7924_v57, %v7525_v16 }
 0x58f   : > { %v3138_v49 = vpop.trf.xlu1 }
 0x590   : > { %v8511_v58 = vmul.f32 %v8506_v51, %v8506_v51  ;;  %v3217_v5 = vand.u32 2147483647, %v3201_v17  ;;  %v3154_v45 = vadd.f32 %v3138_v49, %v8329_v7 }
 0x592   : > { %v5204_v33 = vadd.f32 -0.009801, %v3217_v5  ;;  %v3170_v2 = vmul.f32 %v3154_v45, %v3106_v3  ;;  %3312 = vxpose.xlu2.b32.cont [8/16] %v8511_v58, 128 }
 0x594   : > { %v3249_v9 = vmax.f32 %v5204_v33, 0.0  ;;  %v3186_v28 = vmul.f32 0.0099, %v3170_v2 }
 0x596   : > { %v8517_v53 = vclamps-f32 %v3249_v9, 1.0  ;;  %v3202_v13 = vsub.f32 %v7913_v63, %v3186_v28  ;;  %v10113_v28 = vld [vmem:[#allocation50_spill] sm:$0xff] }
 0x597   : > { %v3139_v23 = vpop.trf.xlu1 }
 0x598   : > { %10111 = vst [vmem:[#allocation59_spill] sm:$0xff] %v8517_v53  ;;  %v8522_v10 = vmul.f32 %v8517_v53, %v8517_v53  ;;  %v3218_v21 = vand.u32 2147483647, %v3202_v13  ;;  %v3155_v7 = vadd.f32 %v3139_v23, %v8350_v50  ;;  %v3108_v13 = vmul.f32 %v10113_v28, %v7538_v40 }
 0x59a   : > { %v5205_v17 = vadd.f32 -0.009801, %v3218_v21  ;;  %v3171_v49 = vmul.f32 %v3155_v7, %v3107_v4  ;;  %3313 = vxpose.xlu2.b32.cont [9/16] %v8522_v10, 128 }
 0x59c   : > { %v3250_v5 = vmax.f32 %v5205_v17, 0.0  ;;  %v3187_v3 = vmul.f32 0.0099, %v3171_v49 }
 0x59e   : > { %v8528_v45 = vclamps-f32 %v3250_v5, 1.0  ;;  %v3203_v63 = vsub.f32 %v7924_v57, %v3187_v3 }
 0x59f   : > { %v3140_v33 = vpop.trf.xlu1 }
 0x5a0   : > { %10112 = vst [vmem:[#allocation8_spill] sm:$0xff] %v8528_v45  ;;  %v8533_v2 = vmul.f32 %v8528_v45, %v8528_v45  ;;  %v3219_v9 = vand.u32 2147483647, %v3203_v63  ;;  %v3156_v50 = vadd.f32 %v3140_v33, %v8370_v20  ;;  %v3109_v63 = vmul.f32 %v7946_v34, %v7546_v43 }
 0x5a2   : > { %v5206_v23 = vadd.f32 -0.009801, %v3219_v9  ;;  %v3172_v21 = vmul.f32 %v3156_v50, %v3108_v13  ;;  %3314 = vxpose.xlu2.b32.cont [10/16] %v8533_v2, 128 }
 0x5a4   : > { %v3251_v4 = vmax.f32 %v5206_v23, 0.0  ;;  %v3188_v7 = vmul.f32 0.0099, %v3172_v21 }
 0x5a6   : > { %v8539_v17 = vclamps-f32 %v3251_v4, 1.0  ;;  %v3204_v57 = vsub.f32 %v10113_v28, %v3188_v7 }
 0x5a7   : > { %v3141_v49 = vpop.trf.xlu1 }
 0x5a8   : > { %10114 = vst [vmem:[#allocation43_spill] sm:$0xff] %v8539_v17  ;;  %v8544_v5 = vmul.f32 %v8539_v17, %v8539_v17  ;;  %v3220_v3 = vand.u32 2147483647, %v3204_v57  ;;  %v3157_v20 = vadd.f32 %v3141_v49, %v8384_v26  ;;  %v10116_v57 = vld [vmem:[#allocation52_spill] sm:$0xff] }
 0x5a9   : > { %v3110_v17 = vmul.f32 %v10116_v57, %v7560_v39 }
 0x5aa   : > { %v5207_v33 = vadd.f32 -0.009801, %v3220_v3  ;;  %v3173_v9 = vmul.f32 %v3157_v20, %v3109_v63  ;;  %3315 = vxpose.xlu2.b32.cont [11/16] %v8544_v5, 128 }
 0x5ac   : > { %v3252_v13 = vmax.f32 %v5207_v33, 0.0  ;;  %v3189_v50 = vmul.f32 0.0099, %v3173_v9 }
 0x5ae   : > { %v8550_v23 = vclamps-f32 %v3252_v13, 1.0  ;;  %v3205_v28 = vsub.f32 %v7946_v34, %v3189_v50 }
 0x5af   : > { %v3142_v21 = vpop.trf.xlu1 }
 0x5b0   : > { %10115 = vst [vmem:[#allocation34_spill] sm:$0xff] %v8550_v23  ;;  %v8555_v4 = vmul.f32 %v8550_v23, %v8550_v23  ;;  %v3221_v7 = vand.u32 2147483647, %v3205_v28  ;;  %v3158_v26 = vadd.f32 %v3142_v21, %v8397_v61  ;;  %v10118_v28 = vld [vmem:[#allocation5_spill] sm:$0xff]  ;;  %v10119_v23 = vld [vmem:[#allocation55_spill] sm:$0xff] }
 0x5b1   : > { %v3111_v45 = vmul.f32 %v10119_v23, %v10118_v28 }
 0x5b2   : > { %v5208_v49 = vadd.f32 -0.009801, %v3221_v7  ;;  %v3174_v3 = vmul.f32 %v3158_v26, %v3110_v17  ;;  %3316 = vxpose.xlu2.b32.cont [12/16] %v8555_v4, 128 }
 0x5b4   : > { %v3253_v63 = vmax.f32 %v5208_v49, 0.0  ;;  %v3190_v20 = vmul.f32 0.0099, %v3174_v3 }
 0x5b6   : > { %v8561_v33 = vclamps-f32 %v3253_v63, 1.0  ;;  %v3206_v34 = vsub.f32 %v10116_v57, %v3190_v20 }
 0x5b7   : > { %v3143_v9 = vpop.trf.xlu1 }
 0x5b8   : > { %10117 = vst [vmem:[#allocation23_spill] sm:$0xff] %v8561_v33  ;;  %v8566_v13 = vmul.f32 %v8561_v33, %v8561_v33  ;;  %v3222_v50 = vand.u32 2147483647, %v3206_v34  ;;  %v3159_v61 = vadd.f32 %v3143_v9, %v8410_v0  ;;  %v10121_v34 = vld [vmem:[#allocation17_spill] sm:$0xff]  ;;  %v10122_v33 = vld [vmem:[#allocation58_spill] sm:$0xff] }
 0x5b9   : > { %v3112_v53 = vmul.f32 %v10122_v33, %v10121_v34 }
 0x5ba   : > { %v5209_v17 = vadd.f32 -0.009801, %v3222_v50  ;;  %v3175_v21 = vmul.f32 %v3159_v61, %v3111_v45  ;;  %3317 = vxpose.xlu2.b32.cont [13/16] %v8566_v13, 128 }
 0x5bc   : > { %v3254_v7 = vmax.f32 %v5209_v17, 0.0  ;;  %v3191_v26 = vmul.f32 0.0099, %v3175_v21 }
 0x5be   : > { %v8572_v49 = vclamps-f32 %v3254_v7, 1.0  ;;  %v3207_v57 = vsub.f32 %v10119_v23, %v3191_v26 }
 0x5bf   : > { %v3144_v3 = vpop.trf.xlu1 }
 0x5c0   : > { %10120 = vst [vmem:[#allocation14_spill] sm:$0xff] %v8572_v49  ;;  %v8577_v63 = vmul.f32 %v8572_v49, %v8572_v49  ;;  %v3223_v20 = vand.u32 2147483647, %v3207_v57  ;;  %v3160_v0 = vadd.f32 %v3144_v3, %v8419_v32 }
 0x5c2   : > { %v5210_v45 = vadd.f32 -0.009801, %v3223_v20  ;;  %v3176_v9 = vmul.f32 %v3160_v0, %v3112_v53  ;;  %3318 = vxpose.xlu2.b32.cont [14/16] %v8577_v63, 128 }
 0x5c4   : > { %v3255_v50 = vmax.f32 %v5210_v45, 0.0  ;;  %v3192_v61 = vmul.f32 0.0099, %v3176_v9 }
 0x5c6   : > { %v8583_v17 = vclamps-f32 %v3255_v50, 1.0  ;;  %v3208_v23 = vsub.f32 %v10122_v33, %v3192_v61 }
 0x5c8   : > { %10123 = vst [vmem:[#allocation37_spill] sm:$0xff] %v8583_v17  ;;  %v8588_v21 = vmul.f32 %v8583_v17, %v8583_v17  ;;  %v3224_v7 = vand.u32 2147483647, %v3208_v23 }
 0x5ca   : > { %v5211_v26 = vadd.f32 -0.009801, %v3224_v7  ;;  %3319 = vxpose.xlu2.b32.cont [15/16] %v8588_v21, 128 }
 0x5cc   : > { %v3256_v32 = vmax.f32 %v5211_v26, 0.0 }
 0x5ce   : > { %v8591_v53 = vclamps-f32 %v3256_v32, 1.0 }
 0x5d0   : > { %10124 = vst [vmem:[#allocation38_spill] sm:$0xff] %v8591_v53  ;;  %v8595_v57 = vmul.f32 %v8591_v53, %v8591_v53 }
 0x5d2   : > { %3320 = vxpose.xlu2.b32.end [16/16] %v8595_v57, 128 }
 0x5f3   : > { %v3321_v3 = vpop.trf.xlu2 }
 0x5f4   : > { %v3337_v33 = vadd.f32 %v3321_v3, %v8434_v6 }
 0x5f6   : > { %v3353_v20 = vmul.f32 0.5, %v3337_v33 }
 0x5f8   : > { %v3369_v0 = vmul.f32 %v3353_v20, %v7377_v47 }
 0x5fa   : > { %3385 = vadd.xlane.f32.xlu0 %v3369_v0  ;;  %5244 = vst [vmem:[%s7988_s11 + $0x80] sm:$0xff] %v3369_v0 }
 0x5fb   : > { %v3322_v45 = vpop.trf.xlu2 }
 0x5fc   : > { %v3338_v9 = vadd.f32 %v3322_v45, %v8445_v29 }
 0x5fe   : > { %v3354_v50 = vmul.f32 0.5, %v3338_v9 }
 0x600   : > { %v3370_v61 = vmul.f32 %v3354_v50, %v7389_v42 }
 0x602   : > { %3387 = vadd.xlane.f32.xlu0 %v3370_v61  ;;  %5245 = vst [vmem:[%s7988_s11 + $0x88] sm:$0xff] %v3370_v61 }
 0x603   : > { %v3323_v23 = vpop.trf.xlu2 }
 0x604   : > { %v3339_v7 = vadd.f32 %v3323_v23, %v8456_v56 }
 0x606   : > { %v3355_v6 = vmul.f32 0.5, %v3339_v7 }
 0x608   : > { %v3371_v26 = vmul.f32 %v3355_v6, %v7395_v30 }
 0x60a   : > { %3389 = vadd.xlane.f32.xlu0 %v3371_v26  ;;  %5246 = vst [vmem:[%s7988_s11 + $0x90] sm:$0xff] %v3371_v26 }
 0x60b   : > { %v3324_v32 = vpop.trf.xlu2 }
 0x60c   : > { %v3340_v3 = vadd.f32 %v3324_v32, %v8467_v11 }
 0x60e   : > { %v3356_v29 = vmul.f32 0.5, %v3340_v3 }
 0x610   : > { %v3372_v33 = vmul.f32 %v3356_v29, %v7416_v52 }
 0x612   : > { %3391 = vadd.xlane.f32.xlu0 %v3372_v33  ;;  %5247 = vst [vmem:[%s7988_s11 + $0x98] sm:$0xff] %v3372_v33 }
 0x613   : > { %v3325_v20 = vpop.trf.xlu2 }
 0x614   : > { %v3341_v0 = vadd.f32 %v3325_v20, %v8478_v8 }
 0x616   : > { %v3357_v56 = vmul.f32 0.5, %v3341_v0 }
 0x618   : > { %v3373_v45 = vmul.f32 %v3357_v56, %v7429_v14 }
 0x61a   : > { %3393 = vadd.xlane.f32.xlu0 %v3373_v45  ;;  %5248 = vst [vmem:[%s7988_s11 + $0xa0] sm:$0xff] %v3373_v45 }
 0x61b   : > { %v3326_v9 = vpop.trf.xlu2 }
 0x61c   : > { %v3342_v50 = vadd.f32 %v3326_v9, %v8489_v41 }
 0x61e   : > { %v3358_v11 = vmul.f32 0.5, %v3342_v50 }
 0x620   : > { %v3374_v61 = vmul.f32 %v3358_v11, %v7447_v59 }
 0x622   : > { %3395 = vadd.xlane.f32.xlu0 %v3374_v61  ;;  %5249 = vst [vmem:[%s7988_s11 + $0xa8] sm:$0xff] %v3374_v61 }
 0x623   : > { %v3327_v23 = vpop.trf.xlu2 }
 0x624   : > { %v3343_v7 = vadd.f32 %v3327_v23, %v8500_v54 }
 0x626   : > { %v3359_v6 = vmul.f32 0.5, %v3343_v7 }
 0x628   : > { %v3375_v8 = vmul.f32 %v3359_v6, %v7469_v27 }
 0x62a   : > { %5250 = vst [vmem:[%s7988_s11 + $0xb0] sm:$0xff] %v3375_v8  ;;  %3397 = vadd.xlane.f32.xlu0 %v3375_v8 }
 0x62b   : > { %v3328_v26 = vpop.trf.xlu2 }
 0x62c   : > { %v3344_v32 = vadd.f32 %v3328_v26, %v8511_v58 }
 0x62e   : > { %v3360_v3 = vmul.f32 0.5, %v3344_v32 }
 0x630   : > { %v3376_v41 = vmul.f32 %v3360_v3, %v7485_v55 }
 0x632   : > { %5251 = vst [vmem:[%s7988_s11 + $0xb8] sm:$0xff] %v3376_v41  ;;  %3399 = vadd.xlane.f32.xlu0 %v3376_v41 }
 0x633   : > { %v3329_v29 = vpop.trf.xlu2 }
 0x634   : > { %v3345_v33 = vadd.f32 %v3329_v29, %v8522_v10 }
 0x636   : > { %v3361_v20 = vmul.f32 0.5, %v3345_v33 }
 0x638   : > { %v3377_v54 = vmul.f32 %v3361_v20, %v7499_v22 }
 0x63a   : > { %5252 = vst [vmem:[%s7988_s11 + $0xc0] sm:$0xff] %v3377_v54  ;;  %3401 = vadd.xlane.f32.xlu0 %v3377_v54 }
 0x63b   : > { %v3330_v0 = vpop.trf.xlu2 }
 0x63c   : > { %v3346_v56 = vadd.f32 %v3330_v0, %v8533_v2 }
 0x63e   : > { %v3362_v45 = vmul.f32 0.5, %v3346_v56 }
 0x640   : > { %v3378_v58 = vmul.f32 %v3362_v45, %v7510_v36 }
 0x642   : > { %5253 = vst [vmem:[%s7988_s11 + $0xc8] sm:$0xff] %v3378_v58  ;;  %3403 = vadd.xlane.f32.xlu0 %v3378_v58 }
 0x643   : > { %v3331_v9 = vpop.trf.xlu2 }
 0x644   : > { %v3347_v50 = vadd.f32 %v3331_v9, %v8544_v5 }
 0x646   : > { %v3363_v11 = vmul.f32 0.5, %v3347_v50 }
 0x648   : > { %v3379_v10 = vmul.f32 %v3363_v11, %v7525_v16 }
 0x64a   : > { %5254 = vst [vmem:[%s7988_s11 + $0xd0] sm:$0xff] %v3379_v10  ;;  %3405 = vadd.xlane.f32.xlu0 %v3379_v10 }
 0x64b   : > { %v3332_v61 = vpop.trf.xlu2 }
 0x64c   : > { %v3348_v23 = vadd.f32 %v3332_v61, %v8555_v4 }
 0x64e   : > { %v3364_v7 = vmul.f32 0.5, %v3348_v23 }
 0x650   : > { %v3380_v2 = vmul.f32 %v3364_v7, %v7538_v40 }
 0x652   : > { %5255 = vst [vmem:[%s7988_s11 + $0xd8] sm:$0xff] %v3380_v2  ;;  %3407 = vadd.xlane.f32.xlu0 %v3380_v2 }
 0x653   : > { %v3333_v6 = vpop.trf.xlu2 }
 0x654   : > { %v3349_v8 = vadd.f32 %v3333_v6, %v8566_v13 }
 0x656   : > { %v3365_v26 = vmul.f32 0.5, %v3349_v8 }
 0x658   : > { %v3381_v5 = vmul.f32 %v3365_v26, %v7546_v43 }
 0x65a   : > { %5256 = vst [vmem:[%s7988_s11 + $0xe0] sm:$0xff] %v3381_v5  ;;  %3409 = vadd.xlane.f32.xlu0 %v3381_v5 }
 0x65b   : > { %v3334_v32 = vpop.trf.xlu2 }
 0x65c   : > { %v3350_v3 = vadd.f32 %v3334_v32, %v8577_v63 }
 0x65e   : > { %v3366_v41 = vmul.f32 0.5, %v3350_v3 }
 0x660   : > { %v3382_v4 = vmul.f32 %v3366_v41, %v7560_v39 }
 0x662   : > { %5257 = vst [vmem:[%s7988_s11 + $0xe8] sm:$0xff] %v3382_v4  ;;  %3411 = vadd.xlane.f32.xlu0 %v3382_v4 }
 0x663   : > { %v3335_v29 = vpop.trf.xlu2 }
 0x664   : > { %v3351_v33 = vadd.f32 %v3335_v29, %v8588_v21 }
 0x666   : > { %v3367_v20 = vmul.f32 0.5, %v3351_v33 }
 0x668   : > { %v3383_v13 = vmul.f32 %v3367_v20, %v10118_v28 }
 0x66a   : > { %5258 = vst [vmem:[%s7988_s11 + $0xf0] sm:$0xff] %v3383_v13  ;;  %3413 = vadd.xlane.f32.xlu0 %v3383_v13 }
 0x66b   : > { %v3336_v54 = vpop.trf.xlu2 }
 0x66c   : > { %v3352_v0 = vadd.f32 %v3336_v54, %v8595_v57 }
 0x66d   : > { %v3386_v56 = vpop.xlane.xlu0 %3385 }
 0x66e   : > { %v3368_v45 = vmul.f32 0.5, %v3352_v0  ;;  %v5228_v63 = vadd.f32 -1.0, %v3386_v56 }
 0x670   : > { %v3384_v58 = vmul.f32 %v3368_v45, %v10121_v34  ;;  %v5260_v9 = vmul.f32 -2.0, %v5228_v63  ;;  %v3433_v32 = vmax.f32 %v5228_v63, 0.0  ;;  %v10136_v34 = vld [vmem:[#allocation18_spill] sm:$0xff] }
 0x672   : > { %5259 = vst [vmem:[%s7988_s11 + $0xf8] sm:$0xff] %v3384_v58  ;;  %v3530_v50 = vmul.f32 1.442695, %v5260_v9  ;;  %3415 = vadd.xlane.f32.xlu1 %v3384_v58  ;;  %v3449_v20 = vmul.f32 0.099, %v3433_v32 }
 0x674   : > { %5800 = vpow2.f32 %v3530_v50 }
 0x675   : > { %v3388_v11 = vpop.xlane.xlu0 %3387 }
 0x676   : > { %v5229_v21 = vadd.f32 -1.0, %v3388_v11 }
 0x678   : > { %v5261_v10 = vmul.f32 -2.0, %v5229_v21  ;;  %v3434_v11 = vmax.f32 %v5229_v21, 0.0 }
 0x67a   : > { %v5801_v61 = vpop.eup %5800  ;;  %v3532_v23 = vmul.f32 1.442695, %v5261_v10 }
 0x67b   : > { %v3562_v7 = vadd.f32 1.0, %v5801_v61  ;;  %v10125_v61 = vld [vmem:[#allocation19_spill] sm:$0xff] }
 0x67c   : > { %5802 = vpow2.f32 %v3532_v23  ;;  %v8653_v23 = vadd.f32 %v3449_v20, %v10125_v61 }
 0x67d   : > { %5804 = vrcp.f32 %v3562_v7  ;;  %v3390_v2 = vpop.xlane.xlu0 %3389  ;;  %v3589_v13 = vand.u32 2147483648, %v3562_v7  ;;  %v3587_v0 = vand.u32 2147483647, %v3562_v7  ;;  %vm3583_vm1 = vweird.f32 %v3562_v7 }
 0x67e   : > { %v8646_v57 = vadd.f32 -1.0, %v3390_v2  ;;  %10126 = vst [vmem:[#allocation12_spill] sm:$0xff] %v8653_v23 }
 0x67f   : > { %v3590_v50 = vor.u32 1.1754944e-38, %v3589_v13  ;;  %vm3588_vm3 = vcmp.eq.f32.partialorder %v3587_v0, 8.507059e+37  ;;  %v10127_v13 = vld [vmem:[#allocation29_spill] sm:$0xff] }
 0x680   : > { %v5262_v6 = vmul.f32 -2.0, %v8646_v57 }
 0x682   : > { %v5803_v8 = vpop.eup %5802  ;;  %v3534_v26 = vmul.f32 1.442695, %v5262_v6 }
 0x683   : > { %v5805_v5 = vpop.eup %5804  ;;  %v3563_v3 = vadd.f32 1.0, %v5803_v8 }
 0x684   : > { %v3579_v41 = vmul.f32 %v5805_v5, %v3562_v7  ;;  %5806 = vpow2.f32 %v3534_v26  ;;  %vm3584_vm0 = vweird.f32 %v5805_v5  ;;  %v3450_v7 = vmul.f32 0.099, %v3434_v11  ;;  %v10128_v11 = vld [vmem:[#allocation21_spill] sm:$0xff] }
 0x685   : > { %5808 = vrcp.f32 %v3563_v3  ;;  %v3392_v4 = vpop.xlane.xlu0 %3391  ;;  %vm3585_vm2 = vmor %vm3583_vm1, %vm3584_vm0  ;;  %v3602_v20 = vand.u32 2147483647, %v3563_v3  ;;  %vm3598_vm5 = vweird.f32 %v3563_v3 }
 0x686   : > { %v3580_v29 = vsub.f32 1.0, %v3579_v41  ;;  %v8649_v33 = vadd.f32 -1.0, %v3392_v4  ;;  %v3604_v4 = vand.u32 2147483648, %v3563_v3  ;;  %v8665_v61 = vadd.f32 %v3450_v7, %v10128_v11 }
 0x687   : > { %vm3603_vm7 = vcmp.eq.f32.partialorder %v3602_v20, 8.507059e+37 }
 0x688   : > { %v3581_v54 = vmul.f32 %v5805_v5, %v3580_v29  ;;  %v5263_v56 = vmul.f32 -2.0, %v8649_v33  ;;  %10129 = vst [vmem:[#allocation9_spill] sm:$0xff] %v8665_v61 }
 0x68a   : > { %v5807_v45 = vpop.eup %5806  ;;  %v3582_v58 = vadd.f32 %v5805_v5, %v3581_v54  ;;  %v3536_v9 = vmul.f32 1.442695, %v5263_v56 }
 0x68b   : > { %v5809_v63 = vpop.eup %5808  ;;  %v3564_v10 = vadd.f32 1.0, %v5807_v45  ;;  %v3605_v45 = vor.u32 1.1754944e-38, %v3604_v4 }
 0x68c   : > { %v3586_v2 = vsel %vm3585_vm2, %v5805_v5, %v3582_v58  ;;  %v3594_v6 = vmul.f32 %v5809_v63, %v3563_v3  ;;  %vm3599_vm4 = vweird.f32 %v5809_v63  ;;  %v3435_v58 = vmax.f32 %v8646_v57, 0.0 }
 0x68d   : > { %v3591_v8 = vsel %vm3588_vm3, %v3590_v50, %v3586_v2  ;;  %5810 = vrcp.f32 %v3564_v10  ;;  %v3394_v26 = vpop.xlane.xlu0 %3393  ;;  %vm3600_vm6 = vmor %vm3598_vm5, %vm3599_vm4  ;;  %vm3613_vm9 = vweird.f32 %v3564_v10 }
 0x68e   : > { %v3818_v32 = vmul.f32 %v3591_v8, %v8653_v23  ;;  %v3595_v41 = vsub.f32 1.0, %v3594_v6  ;;  %5812 = vpow2.f32 %v3536_v9  ;;  %v8656_v29 = vadd.f32 -1.0, %v3394_v26 }
 0x68f   : > { %v3451_v57 = vmul.f32 0.099, %v3435_v58 }
 0x690   : > { %v8659_v21 = vadd.f32 %v3818_v32, %v10127_v13  ;;  %v3596_v54 = vmul.f32 %v5809_v63, %v3595_v41  ;;  %v5264_v5 = vmul.f32 -2.0, %v8656_v29  ;;  %v10130_v13 = vld [vmem:[#allocation11_spill] sm:$0xff] }
 0x692   : > { %v3597_v0 = vadd.f32 %v5809_v63, %v3596_v54  ;;  %v3538_v9 = vmul.f32 1.442695, %v5264_v5  ;;  %v3617_v54 = vand.u32 2147483647, %v3564_v10  ;;  %v3619_v5 = vand.u32 2147483648, %v3564_v10 }
 0x693   : > { %v5811_v56 = vpop.eup %5810  ;;  %3866 = vxpose.xlu0.b32.start [1/16] %v8659_v21, 128 }
 0x694   : > { %v5813_v50 = vpop.eup %5812  ;;  %v3601_v2 = vsel %vm3600_vm6, %v5809_v63, %v3597_v0  ;;  %v3609_v6 = vmul.f32 %v5811_v56, %v3564_v10  ;;  %5814 = vpow2.f32 %v3538_v9  ;;  %vm3614_vm8 = vweird.f32 %v5811_v56  ;;  %v10131_v9 = vld [vmem:[#allocation22_spill] sm:$0xff] }
 0x695   : > { %v3606_v8 = vsel %vm3603_vm7, %v3605_v45, %v3601_v2  ;;  %v3565_v26 = vadd.f32 1.0, %v5813_v50  ;;  %v3396_v32 = vpop.xlane.xlu0 %3395  ;;  %v8675_v50 = vadd.f32 %v3451_v57, %v10131_v9  ;;  %vm3615_vm10 = vmor %vm3613_vm9, %vm3614_vm8  ;;  %v3620_v11 = vor.u32 1.1754944e-38, %v3619_v5  ;;  %v10133_v57 = vld [vmem:[#allocation32_spill] sm:$0xff] }
 0x696   : > { %v3819_v3 = vmul.f32 %v3606_v8, %v8665_v61  ;;  %v3610_v41 = vsub.f32 1.0, %v3609_v6  ;;  %v8668_v4 = vadd.f32 -1.0, %v3396_v32  ;;  %vm3618_vm11 = vcmp.eq.f32.partialorder %v3617_v54, 8.507059e+37 }
 0x697   : > { %5816 = vrcp.f32 %v3565_v26  ;;  %10132 = vst [vmem:[#allocation47_spill] sm:$0xff] %v8675_v50  ;;  %v3436_v10 = vmax.f32 %v8649_v33, 0.0  ;;  %v3634_v9 = vand.u32 2147483648, %v3565_v26  ;;  %vm3628_vm13 = vweird.f32 %v3565_v26 }
 0x698   : > { %v8671_v23 = vadd.f32 %v3819_v3, %v10130_v13  ;;  %v3611_v7 = vmul.f32 %v5811_v56, %v3610_v41  ;;  %v5265_v63 = vmul.f32 -2.0, %v8668_v4 }
 0x69a   : > { %v3612_v20 = vadd.f32 %v5811_v56, %v3611_v7  ;;  %v3540_v0 = vmul.f32 1.442695, %v5265_v63  ;;  %v5815_v45 = vpop.eup %5814 }
 0x69b   : > { %3867 = vxpose.xlu0.b32.cont [2/16] %v8671_v23, 128  ;;  %v3566_v2 = vadd.f32 1.0, %v5815_v45  ;;  %v3632_v45 = vand.u32 2147483647, %v3565_v26 }
 0x69c   : > { %v3616_v58 = vsel %vm3615_vm10, %v5811_v56, %v3612_v20  ;;  %5818 = vpow2.f32 %v3540_v0  ;;  %v3452_v20 = vmul.f32 0.099, %v3436_v10  ;;  %v10134_v10 = vld [vmem:[#allocation26_spill] sm:$0xff] }
 0x69d   : > { %v5817_v6 = vpop.eup %5816  ;;  %v3621_v8 = vsel %vm3618_vm11, %v3620_v11, %v3616_v58  ;;  %v3398_v32 = vpop.xlane.xlu0 %3397  ;;  %5820 = vrcp.f32 %v3566_v2  ;;  %vm3633_vm15 = vcmp.eq.f32.partialorder %v3632_v45, 8.507059e+37  ;;  %vm3643_vm1 = vweird.f32 %v3566_v2 }
 0x69e   : > { %v3820_v3 = vmul.f32 %v3621_v8, %v8675_v50  ;;  %v3624_v41 = vmul.f32 %v5817_v6, %v3565_v26  ;;  %v8680_v7 = vadd.f32 -1.0, %v3398_v32  ;;  %vm3629_vm12 = vweird.f32 %v5817_v6 }
 0x69f   : > { %v3437_v32 = vmax.f32 %v8656_v29, 0.0  ;;  %vm3630_vm14 = vmor %vm3628_vm13, %vm3629_vm12  ;;  %v3649_v29 = vand.u32 2147483648, %v3566_v2 }
 0x6a0   : > { %v8683_v63 = vadd.f32 %v3820_v3, %v10133_v57  ;;  %v3625_v5 = vsub.f32 1.0, %v3624_v41  ;;  %v5266_v56 = vmul.f32 -2.0, %v8680_v7  ;;  %v3635_v3 = vor.u32 1.1754944e-38, %v3634_v9 }
 0x6a1   : > { %v3647_v9 = vand.u32 2147483647, %v3566_v2 }
 0x6a2   : > { %v5819_v54 = vpop.eup %5818  ;;  %v3626_v0 = vmul.f32 %v5817_v6, %v3625_v5  ;;  %v3542_v58 = vmul.f32 1.442695, %v5266_v56  ;;  %v8692_v5 = vadd.f32 %v3452_v20, %v10134_v10 }
 0x6a3   : > { %v8686_v11 = vadd.f32 1.0, %v5819_v54  ;;  %3868 = vxpose.xlu0.b32.cont [3/16] %v8683_v63, 128  ;;  %v5821_v33 = vpop.eup %5820  ;;  %vm3648_vm3 = vcmp.eq.f32.partialorder %v3647_v9, 8.507059e+37 }
 0x6a4   : > { %v3627_v8 = vadd.f32 %v5817_v6, %v3626_v0  ;;  %v3639_v41 = vmul.f32 %v5821_v33, %v3566_v2  ;;  %10135 = vst [vmem:[#allocation13_spill] sm:$0xff] %v8692_v5  ;;  %v3453_v0 = vmul.f32 0.099, %v3437_v32  ;;  %vm3644_vm0 = vweird.f32 %v5821_v33  ;;  %v10137_v32 = vld [vmem:[#allocation30_spill] sm:$0xff] }
 0x6a5   : > { %5822 = vrcp.f32 %v8686_v11  ;;  %v3400_v57 = vpop.xlane.xlu0 %3399  ;;  %vm3645_vm2 = vmor %vm3643_vm1, %vm3644_vm0  ;;  %vm3658_vm5 = vweird.f32 %v8686_v11 }
 0x6a6   : > { %v3631_v50 = vsel %vm3630_vm14, %v5817_v6, %v3627_v8  ;;  %v3640_v56 = vsub.f32 1.0, %v3639_v41  ;;  %5824 = vpow2.f32 %v3542_v58  ;;  %v8694_v13 = vadd.f32 -1.0, %v3400_v57 }
 0x6a7   : > { %v3636_v54 = vsel %vm3633_vm15, %v3635_v3, %v3631_v50  ;;  %v3438_v50 = vmax.f32 %v8668_v4, 0.0  ;;  %v3650_v57 = vor.u32 1.1754944e-38, %v3649_v29  ;;  %v8705_v3 = vadd.f32 %v3453_v0, %v10137_v32  ;;  %v10139_v0 = vld [vmem:[#allocation10_spill] sm:$0xff] }
 0x6a8   : > { %v3821_v26 = vmul.f32 %v3636_v54, %v8692_v5  ;;  %v3641_v61 = vmul.f32 %v5821_v33, %v3640_v56  ;;  %v5267_v53 = vmul.f32 -2.0, %v8694_v13 }
 0x6a9   : > { %10138 = vst [vmem:[#allocation24_spill] sm:$0xff] %v8705_v3  ;;  %v3454_v4 = vmul.f32 0.099, %v3438_v50  ;;  %v10140_v50 = vld [vmem:[#allocation35_spill] sm:$0xff] }
 0x6aa   : > { %v8699_v17 = vadd.f32 %v3821_v26, %v10136_v34  ;;  %v3642_v6 = vadd.f32 %v5821_v33, %v3641_v61  ;;  %v3544_v45 = vmul.f32 1.442695, %v5267_v53  ;;  %v3664_v26 = vand.u32 2147483648, %v8686_v11 }
 0x6ab   : > { %v5823_v20 = vpop.eup %5822  ;;  %v3662_v34 = vand.u32 2147483647, %v8686_v11 }
 0x6ac   : > { %v3654_v58 = vmul.f32 %v5823_v20, %v8686_v11  ;;  %3869 = vxpose.xlu0.b32.cont [4/16] %v8699_v17, 128  ;;  %v5825_v8 = vpop.eup %5824  ;;  %v3646_v41 = vsel %vm3645_vm2, %v5821_v33, %v3642_v6  ;;  %5826 = vpow2.f32 %v3544_v45  ;;  %vm3659_vm4 = vweird.f32 %v5823_v20 }
 0x6ad   : > { %v3402_v10 = vpop.xlane.xlu0 %3401  ;;  %v3651_v54 = vsel %vm3648_vm3, %v3650_v57, %v3646_v41  ;;  %v3568_v2 = vadd.f32 1.0, %v5825_v8  ;;  %vm3660_vm6 = vmor %vm3658_vm5, %vm3659_vm4  ;;  %v3665_v57 = vor.u32 1.1754944e-38, %v3664_v26  ;;  %v8718_v8 = vadd.f32 %v3454_v4, %v10140_v50 }
 0x6ae   : > { %v3655_v61 = vsub.f32 1.0, %v3654_v58  ;;  %v8707_v56 = vadd.f32 -1.0, %v3402_v10  ;;  %v3822_v53 = vmul.f32 %v3651_v54, %v8705_v3  ;;  %vm3663_vm7 = vcmp.eq.f32.partialorder %v3662_v34, 8.507059e+37 }
 0x6af   : > { %5828 = vrcp.f32 %v3568_v2  ;;  %10141 = vst [vmem:[#allocation28_spill] sm:$0xff] %v8718_v8  ;;  %v3439_v11 = vmax.f32 %v8680_v7, 0.0  ;;  %v3440_v7 = vmax.f32 %v8694_v13, 0.0  ;;  %vm3673_vm9 = vweird.f32 %v3568_v2 }
 0x6b0   : > { %v3656_v29 = vmul.f32 %v5823_v20, %v3655_v61  ;;  %v8713_v33 = vadd.f32 %v3822_v53, %v10139_v0  ;;  %v5268_v9 = vmul.f32 -2.0, %v8707_v56 }
 0x6b2   : > { %v3657_v6 = vadd.f32 %v5823_v20, %v3656_v29  ;;  %v5827_v45 = vpop.eup %5826  ;;  %v3546_v58 = vmul.f32 1.442695, %v5268_v9  ;;  %v10142_v9 = vld [vmem:[#allocation40_spill] sm:$0xff] }
 0x6b3   : > { %v3569_v41 = vadd.f32 1.0, %v5827_v45  ;;  %v3677_v45 = vand.u32 2147483647, %v3568_v2 }
 0x6b4   : > { %v3661_v32 = vsel %vm3660_vm6, %v5823_v20, %v3657_v6  ;;  %3870 = vxpose.xlu0.b32.cont [5/16] %v8713_v33, 128  ;;  %5830 = vpow2.f32 %v3546_v58  ;;  %v3455_v6 = vmul.f32 0.099, %v3439_v11 }
 0x6b5   : > { %v3666_v10 = vsel %vm3663_vm7, %v3665_v57, %v3661_v32  ;;  %v3404_v54 = vpop.xlane.xlu0 %3403  ;;  %v5829_v61 = vpop.eup %5828  ;;  %5832 = vrcp.f32 %v3569_v41  ;;  %v3679_v57 = vand.u32 2147483648, %v3568_v2  ;;  %vm3678_vm11 = vcmp.eq.f32.partialorder %v3677_v45, 8.507059e+37 }
 0x6b6   : > { %v3823_v53 = vmul.f32 %v3666_v10, %v8718_v8  ;;  %v3669_v29 = vmul.f32 %v5829_v61, %v3568_v2  ;;  %v8723_v26 = vadd.f32 -1.0, %v3404_v54  ;;  %vm3674_vm8 = vweird.f32 %v5829_v61 }
 0x6b7   : > { %vm3675_vm10 = vmor %vm3673_vm9, %vm3674_vm8  ;;  %v3680_v11 = vor.u32 1.1754944e-38, %v3679_v57  ;;  %v3692_v5 = vand.u32 2147483647, %v3569_v41  ;;  %v3694_v28 = vand.u32 2147483648, %v3569_v41  ;;  %vm3688_vm13 = vweird.f32 %v3569_v41 }
 0x6b8   : > { %v8726_v4 = vadd.f32 %v3823_v53, %v10142_v9  ;;  %v3670_v20 = vsub.f32 1.0, %v3669_v29  ;;  %v5269_v34 = vmul.f32 -2.0, %v8723_v26  ;;  %v10143_v29 = vld [vmem:[#allocation39_spill] sm:$0xff] }
 0x6b9   : > { %v8732_v0 = vadd.f32 %v3455_v6, %v10143_v29  ;;  %v10145_v29 = vld [vmem:[#allocation44_spill] sm:$0xff]  ;;  %vm3693_vm15 = vcmp.eq.f32.partialorder %v3692_v5, 8.507059e+37 }
 0x6ba   : > { %v5831_v58 = vpop.eup %5830  ;;  %v3671_v50 = vmul.f32 %v5829_v61, %v3670_v20  ;;  %v3548_v32 = vmul.f32 1.442695, %v5269_v34 }
 0x6bb   : > { %v5833_v10 = vpop.eup %5832  ;;  %v3570_v8 = vadd.f32 1.0, %v5831_v58  ;;  %10144 = vst [vmem:[#allocation33_spill] sm:$0xff] %v8732_v0  ;;  %v3456_v58 = vmul.f32 0.099, %v3440_v7 }
 0x6bc   : > { %3871 = vxpose.xlu0.b32.cont [6/16] %v8726_v4, 128  ;;  %v3672_v54 = vadd.f32 %v5829_v61, %v3671_v50  ;;  %v3684_v53 = vmul.f32 %v5833_v10, %v3569_v41  ;;  %vm3689_vm12 = vweird.f32 %v5833_v10 }
 0x6bd   : > { %v3406_v9 = vpop.xlane.xlu0 %3405  ;;  %5834 = vrcp.f32 %v3570_v8  ;;  %vm3690_vm14 = vmor %vm3688_vm13, %vm3689_vm12  ;;  %vm3703_vm1 = vweird.f32 %v3570_v8 }
 0x6be   : > { %v3676_v20 = vsel %vm3675_vm10, %v5829_v61, %v3672_v54  ;;  %v3685_v3 = vsub.f32 1.0, %v3684_v53  ;;  %5836 = vpow2.f32 %v3548_v32  ;;  %v8734_v34 = vadd.f32 -1.0, %v3406_v9  ;;  %v10146_v54 = vld [vmem:[#allocation42_spill] sm:$0xff] }
 0x6bf   : > { %v3681_v13 = vsel %vm3678_vm11, %v3680_v11, %v3676_v20  ;;  %v3695_v9 = vor.u32 1.1754944e-38, %v3694_v28  ;;  %v3441_v32 = vmax.f32 %v8707_v56, 0.0  ;;  %v8743_v53 = vadd.f32 %v3456_v58, %v10146_v54  ;;  %v10148_v58 = vld [vmem:[#allocation46_spill] sm:$0xff] }
 0x6c0   : > { %v3824_v2 = vmul.f32 %v3681_v13, %v8732_v0  ;;  %v3686_v50 = vmul.f32 %v5833_v10, %v3685_v3  ;;  %v5270_v6 = vmul.f32 -2.0, %v8734_v34  ;;  %v3707_v56 = vand.u32 2147483647, %v3570_v8 }
 0x6c1   : > { %10147 = vst [vmem:[#allocation36_spill] sm:$0xff] %v8743_v53 }
 0x6c2   : > { %v8739_v49 = vadd.f32 %v3824_v2, %v10145_v29  ;;  %v3687_v45 = vadd.f32 %v5833_v10, %v3686_v50  ;;  %v3550_v61 = vmul.f32 1.442695, %v5270_v6  ;;  %v3457_v6 = vmul.f32 0.099, %v3441_v32 }
 0x6c3   : > { %v5835_v57 = vpop.eup %5834  ;;  %v3709_v29 = vand.u32 2147483648, %v3570_v8  ;;  %vm3708_vm3 = vcmp.eq.f32.partialorder %v3707_v56, 8.507059e+37 }
 0x6c4   : > { %v5837_v7 = vpop.eup %5836  ;;  %v3691_v11 = vsel %vm3690_vm14, %v5833_v10, %v3687_v45  ;;  %v3699_v3 = vmul.f32 %v5835_v57, %v3570_v8  ;;  %3872 = vxpose.xlu0.b32.cont [7/16] %v8739_v49, 128  ;;  %5838 = vpow2.f32 %v3550_v61  ;;  %vm3704_vm0 = vweird.f32 %v5835_v57 }
 0x6c5   : > { %v3408_v20 = vpop.xlane.xlu0 %3407  ;;  %v3696_v13 = vsel %vm3693_vm15, %v3695_v9, %v3691_v11  ;;  %v3571_v2 = vadd.f32 1.0, %v5837_v7  ;;  %v10149_v7 = vld [vmem:[#allocation49_spill] sm:$0xff]  ;;  %vm3705_vm2 = vmor %vm3703_vm1, %vm3704_vm0 }
 0x6c6   : > { %v8746_v41 = vadd.f32 -1.0, %v3408_v20  ;;  %v3825_v50 = vmul.f32 %v3696_v13, %v8743_v53  ;;  %v3700_v28 = vsub.f32 1.0, %v3699_v3  ;;  %v8754_v11 = vadd.f32 %v3457_v6, %v10149_v7  ;;  %v10151_v6 = vld [vmem:[#allocation15_spill] sm:$0xff] }
 0x6c7   : > { %5840 = vrcp.f32 %v3571_v2  ;;  %v3710_v3 = vor.u32 1.1754944e-38, %v3709_v29  ;;  %vm3718_vm5 = vweird.f32 %v3571_v2 }
 0x6c8   : > { %v8750_v54 = vadd.f32 %v3825_v50, %v10148_v58  ;;  %v3701_v5 = vmul.f32 %v5835_v57, %v3700_v28  ;;  %v5271_v10 = vmul.f32 -2.0, %v8746_v41  ;;  %10150 = vst [vmem:[#allocation41_spill] sm:$0xff] %v8754_v11  ;;  %v3442_v58 = vmax.f32 %v8723_v26, 0.0 }
 0x6ca   : > { %v3702_v45 = vadd.f32 %v5835_v57, %v3701_v5  ;;  %v3552_v9 = vmul.f32 1.442695, %v5271_v10  ;;  %v5839_v61 = vpop.eup %5838  ;;  %v3458_v56 = vmul.f32 0.099, %v3442_v58 }
 0x6cb   : > { %v3572_v20 = vadd.f32 1.0, %v5839_v61 }
 0x6cc   : > { %v3706_v32 = vsel %vm3705_vm2, %v5835_v57, %v3702_v45  ;;  %5842 = vpow2.f32 %v3552_v9  ;;  %3873 = vxpose.xlu0.b32.cont [8/16] %v8750_v54, 128  ;;  %v3724_v45 = vand.u32 2147483648, %v3571_v2 }
 0x6cd   : > { %v3410_v13 = vpop.xlane.xlu0 %3409  ;;  %v5841_v50 = vpop.eup %5840  ;;  %v3711_v28 = vsel %vm3708_vm3, %v3710_v3, %v3706_v32  ;;  %5844 = vrcp.f32 %v3572_v20  ;;  %v3722_v3 = vand.u32 2147483647, %v3571_v2  ;;  %v3737_v39 = vand.u32 2147483647, %v3572_v20 }
 0x6ce   : > { %v8758_v5 = vadd.f32 -1.0, %v3410_v13  ;;  %v3826_v8 = vmul.f32 %v3711_v28, %v8754_v11  ;;  %v3714_v10 = vmul.f32 %v5841_v50, %v3571_v2  ;;  %vm3719_vm4 = vweird.f32 %v5841_v50 }
 0x6cf   : > { %v3443_v28 = vmax.f32 %v8734_v34, 0.0  ;;  %vm3720_vm6 = vmor %vm3718_vm5, %vm3719_vm4  ;;  %vm3723_vm7 = vcmp.eq.f32.partialorder %v3722_v3, 8.507059e+37  ;;  %v3739_v11 = vand.u32 2147483648, %v3572_v20  ;;  %vm3733_vm9 = vweird.f32 %v3572_v20 }
 0x6d0   : > { %v8762_v7 = vadd.f32 %v3826_v8, %v10151_v6  ;;  %v3715_v29 = vsub.f32 1.0, %v3714_v10  ;;  %v5272_v57 = vmul.f32 -2.0, %v8758_v5  ;;  %v3725_v10 = vor.u32 1.1754944e-38, %v3724_v45 }
 0x6d1   : > { %vm3738_vm11 = vcmp.eq.f32.partialorder %v3737_v39, 8.507059e+37 }
 0x6d2   : > { %v5843_v9 = vpop.eup %5842  ;;  %v3716_v61 = vmul.f32 %v5841_v50, %v3715_v29  ;;  %v3554_v32 = vmul.f32 1.442695, %v5272_v57  ;;  %v10152_v29 = vld [vmem:[#allocation51_spill] sm:$0xff] }
 0x6d3   : > { %v8765_v26 = vadd.f32 1.0, %v5843_v9  ;;  %v5845_v13 = vpop.eup %5844  ;;  %v8771_v6 = vadd.f32 %v3458_v56, %v10152_v29  ;;  %v10153_v29 = vld [vmem:[#allocation54_spill] sm:$0xff] }
 0x6d4   : > { %v3717_v53 = vadd.f32 %v5841_v50, %v3716_v61  ;;  %5846 = vpow2.f32 %v3554_v32  ;;  %3874 = vxpose.xlu0.b32.cont [9/16] %v8762_v7, 128  ;;  %v3729_v58 = vmul.f32 %v5845_v13, %v3572_v20  ;;  %v3459_v32 = vmul.f32 0.099, %v3443_v28 }
 0x6d5   : > { %v3412_v8 = vpop.xlane.xlu0 %3411  ;;  %5848 = vrcp.f32 %v8765_v26  ;;  %vm3734_vm8 = vweird.f32 %v5845_v13  ;;  %vm3748_vm13 = vweird.f32 %v8765_v26 }
 0x6d6   : > { %v3721_v57 = vsel %vm3720_vm6, %v5841_v50, %v3717_v53  ;;  %v8773_v9 = vadd.f32 -1.0, %v3412_v8  ;;  %v3730_v2 = vsub.f32 1.0, %v3729_v58  ;;  %vm3735_vm10 = vmor %vm3733_vm9, %vm3734_vm8  ;;  %v3740_v8 = vor.u32 1.1754944e-38, %v3739_v11 }
 0x6d7   : > { %v3726_v61 = vsel %vm3723_vm7, %v3725_v10, %v3721_v57  ;;  %v3444_v10 = vmax.f32 %v8746_v41, 0.0  ;;  %v8784_v57 = vadd.f32 %v3459_v32, %v10153_v29  ;;  %v3754_v11 = vand.u32 2147483648, %v8765_v26 }
 0x6d8   : > { %v3827_v34 = vmul.f32 %v3726_v61, %v8771_v6  ;;  %v3731_v0 = vmul.f32 %v5845_v13, %v3730_v2  ;;  %v5273_v45 = vmul.f32 -2.0, %v8773_v9 }
 0x6d9   : > { %10154 = vst [vmem:[#allocation45_spill] sm:$0xff] %v8784_v57  ;;  %v3460_v41 = vmul.f32 0.099, %v3444_v10  ;;  %v10156_v10 = vld [vmem:[#allocation56_spill] sm:$0xff] }
 0x6da   : > { %v5847_v43 = vpop.eup %5846  ;;  %v8778_v40 = vadd.f32 %v3827_v34, %v10087_v31  ;;  %v3732_v53 = vadd.f32 %v5845_v13, %v3731_v0  ;;  %v3556_v3 = vmul.f32 1.442695, %v5273_v45  ;;  %v3752_v45 = vand.u32 2147483647, %v8765_v26  ;;  %v10155_v31 = vld [vmem:[#allocation7_spill] sm:$0xff] }
 0x6db   : > { %v5849_v56 = vpop.eup %5848  ;;  %v3574_v50 = vadd.f32 1.0, %v5847_v43  ;;  %v8798_v29 = vadd.f32 %v3460_v41, %v10156_v10 }
 0x6dc   : > { %v3744_v28 = vmul.f32 %v5849_v56, %v8765_v26  ;;  %3875 = vxpose.xlu0.b32.cont [10/16] %v8778_v40, 128  ;;  %v3736_v61 = vsel %vm3735_vm10, %v5845_v13, %v3732_v53  ;;  %vm3749_vm12 = vweird.f32 %v5849_v56  ;;  %vm3753_vm15 = vcmp.eq.f32.partialorder %v3752_v45, 8.507059e+37 }
 0x6dd   : > { %v3414_v58 = vpop.xlane.xlu0 %3413  ;;  %5850 = vrcp.f32 %v3574_v50  ;;  %v3741_v2 = vsel %vm3738_vm11, %v3740_v8, %v3736_v61  ;;  %vm3750_vm14 = vmor %vm3748_vm13, %vm3749_vm12  ;;  %v3445_v8 = vmax.f32 %v8758_v5, 0.0  ;;  %vm3763_vm1 = vweird.f32 %v3574_v50 }
 0x6de   : > { %v3745_v0 = vsub.f32 1.0, %v3744_v28  ;;  %5852 = vpow2.f32 %v3556_v3  ;;  %v3828_v43 = vmul.f32 %v3741_v2, %v8784_v57  ;;  %v8788_v20 = vadd.f32 -1.0, %v3414_v58 }
 0x6df   : > { %v3755_v3 = vor.u32 1.1754944e-38, %v3754_v11  ;;  %v3461_v5 = vmul.f32 0.099, %v3445_v8  ;;  %v3769_v57 = vand.u32 2147483648, %v3574_v50 }
 0x6e0   : > { %v3746_v34 = vmul.f32 %v5849_v56, %v3745_v0  ;;  %v8792_v32 = vadd.f32 %v3828_v43, %v10155_v31  ;;  %v5274_v39 = vmul.f32 -2.0, %v8788_v20 }
 0x6e2   : > { %v3747_v13 = vadd.f32 %v5849_v56, %v3746_v34  ;;  %v3558_v28 = vmul.f32 1.442695, %v5274_v39  ;;  %v3767_v39 = vand.u32 2147483647, %v3574_v50 }
 0x6e3   : > { %v5851_v53 = vpop.eup %5850 }
 0x6e4   : > { %v5853_v58 = vpop.eup %5852  ;;  %v3751_v61 = vsel %vm3750_vm14, %v5849_v56, %v3747_v13  ;;  %v3759_v2 = vmul.f32 %v5851_v53, %v3574_v50  ;;  %3876 = vxpose.xlu0.b32.cont [11/16] %v8792_v32, 128  ;;  %5854 = vpow2.f32 %v3558_v28  ;;  %vm3764_vm0 = vweird.f32 %v5851_v53 }
 0x6e5   : > { %v3416_v0 = vpop.xlane.xlu1 %3415  ;;  %v3756_v43 = vsel %vm3753_vm15, %v3755_v3, %v3751_v61  ;;  %v3575_v34 = vadd.f32 1.0, %v5853_v58  ;;  %v10157_v58 = vld [vmem:[#allocation57_spill] sm:$0xff]  ;;  %vm3765_vm2 = vmor %vm3763_vm1, %vm3764_vm0  ;;  %v3770_v61 = vor.u32 1.1754944e-38, %v3769_v57  ;;  %vm3768_vm3 = vcmp.eq.f32.partialorder %v3767_v39, 8.507059e+37 }
 0x6e6   : > { %v3829_v26 = vmul.f32 %v3756_v43, %v8798_v29  ;;  %v3760_v31 = vsub.f32 1.0, %v3759_v2  ;;  %v8802_v11 = vadd.f32 -1.0, %v3416_v0  ;;  %v8809_v10 = vadd.f32 %v3461_v5, %v10157_v58 }
 0x6e7   : > { %5856 = vrcp.f32 %v3575_v34  ;;  %vm3778_vm5 = vweird.f32 %v3575_v34 }
 0x6e8   : > { %v8805_v41 = vadd.f32 %v3829_v26, %v10095_v38  ;;  %v3761_v56 = vmul.f32 %v5851_v53, %v3760_v31  ;;  %v5275_v45 = vmul.f32 -2.0, %v8802_v11  ;;  %10158 = vst [vmem:[#allocation48_spill] sm:$0xff] %v8809_v10  ;;  %v3446_v26 = vmax.f32 %v8773_v9, 0.0 }
 0x6ea   : > { %v3762_v13 = vadd.f32 %v5851_v53, %v3761_v56  ;;  %v3560_v3 = vmul.f32 1.442695, %v5275_v45  ;;  %v5855_v28 = vpop.eup %5854  ;;  %v3784_v45 = vand.u32 2147483648, %v3575_v34 }
 0x6eb   : > { %v3576_v2 = vadd.f32 1.0, %v5855_v28 }
 0x6ec   : > { %v3766_v8 = vsel %vm3765_vm2, %v5851_v53, %v3762_v13  ;;  %5858 = vpow2.f32 %v3560_v3  ;;  %3877 = vxpose.xlu0.b32.cont [12/16] %v8805_v41, 128  ;;  %v3462_v53 = vmul.f32 0.099, %v3446_v26  ;;  %v3782_v13 = vand.u32 2147483647, %v3575_v34 }
 0x6ed   : > { %v5857_v0 = vpop.eup %5856  ;;  %v3771_v31 = vsel %vm3768_vm3, %v3770_v61, %v3766_v8  ;;  %5860 = vrcp.f32 %v3576_v2  ;;  %v3785_v9 = vor.u32 1.1754944e-38, %v3784_v45  ;;  %v3447_v61 = vmax.f32 %v8788_v20, 0.0 }
 0x6ee   : > { %v3830_v43 = vmul.f32 %v3771_v31, %v8809_v10  ;;  %v3774_v50 = vmul.f32 %v5857_v0, %v3575_v34  ;;  %vm3779_vm4 = vweird.f32 %v5857_v0  ;;  %v8820_v31 = vadd.f32 %v3462_v53, %v8388_v37 }
 0x6ef   : > { %vm3780_vm6 = vmor %vm3778_vm5, %vm3779_vm4  ;;  %vm3783_vm7 = vcmp.eq.f32.partialorder %v3782_v13, 8.507059e+37  ;;  %vm3793_vm9 = vweird.f32 %v3576_v2 }
 0x6f0   : > { %v8815_v56 = vadd.f32 %v3830_v43, %v10099_v12  ;;  %v3775_v5 = vsub.f32 1.0, %v3774_v50  ;;  %v3797_v12 = vand.u32 2147483647, %v3576_v2 }
 0x6f2   : > { %v5859_v57 = vpop.eup %5858  ;;  %v3776_v39 = vmul.f32 %v5857_v0, %v3775_v5  ;;  %vm3798_vm11 = vcmp.eq.f32.partialorder %v3797_v12, 8.507059e+37 }
 0x6f3   : > { %v3577_v3 = vadd.f32 1.0, %v5859_v57  ;;  %v5861_v28 = vpop.eup %5860  ;;  %v3799_v57 = vand.u32 2147483648, %v3576_v2 }
 0x6f4   : > { %v3777_v58 = vadd.f32 %v5857_v0, %v3776_v39  ;;  %3878 = vxpose.xlu0.b32.cont [13/16] %v8815_v56, 128  ;;  %v3789_v8 = vmul.f32 %v5861_v28, %v3576_v2  ;;  %v3463_v39 = vmul.f32 0.099, %v3447_v61  ;;  %vm3794_vm8 = vweird.f32 %v5861_v28 }
 0x6f5   : > { %5862 = vrcp.f32 %v3577_v3  ;;  %vm3795_vm10 = vmor %vm3793_vm9, %vm3794_vm8  ;;  %v3800_v37 = vor.u32 1.1754944e-38, %v3799_v57  ;;  %v3812_v2 = vand.u32 2147483647, %v3577_v3  ;;  %vm3808_vm13 = vweird.f32 %v3577_v3 }
 0x6f6   : > { %v3781_v43 = vsel %vm3780_vm6, %v5857_v0, %v3777_v58  ;;  %v3790_v50 = vsub.f32 1.0, %v3789_v8  ;;  %v3448_v0 = vmax.f32 %v8802_v11, 0.0  ;;  %v8829_v13 = vadd.f32 %v3463_v39, %v8401_v60 }
 0x6f7   : > { %v3786_v26 = vsel %vm3783_vm7, %v3785_v9, %v3781_v43  ;;  %v3814_v43 = vand.u32 2147483648, %v3577_v3  ;;  %vm3813_vm15 = vcmp.eq.f32.partialorder %v3812_v2, 8.507059e+37 }
 0x6f8   : > { %v3831_v5 = vmul.f32 %v3786_v26, %v8820_v31  ;;  %v3791_v34 = vmul.f32 %v5861_v28, %v3790_v50  ;;  %v3464_v26 = vmul.f32 0.099, %v3448_v0 }
 0x6f9   : > { %v3815_v57 = vor.u32 1.1754944e-38, %v3814_v43 }
 0x6fa   : > { %v8824_v45 = vadd.f32 %v3831_v5, %v7779_v1  ;;  %v3792_v10 = vadd.f32 %v5861_v28, %v3791_v34  ;;  %v8836_v60 = vadd.f32 %v3464_v26, %v8414_v46 }
 0x6fb   : > { %v5863_v20 = vpop.eup %5862 }
 0x6fc   : > { %v3804_v53 = vmul.f32 %v5863_v20, %v3577_v3  ;;  %3879 = vxpose.xlu0.b32.cont [14/16] %v8824_v45, 128  ;;  %v3796_v58 = vsel %vm3795_vm10, %v5861_v28, %v3792_v10  ;;  %vm3809_vm12 = vweird.f32 %v5863_v20  ;;  %v3850_v3 = vmul.f32 %v8429_v15, %v7377_v47 }
 0x6fd   : > { %v3801_v9 = vsel %vm3798_vm11, %v3800_v37, %v3796_v58  ;;  %vm3810_vm14 = vmor %vm3808_vm13, %vm3809_vm12 }
 0x6fe   : > { %v3805_v61 = vsub.f32 1.0, %v3804_v53  ;;  %v3832_v8 = vmul.f32 %v3801_v9, %v8829_v13  ;;  %v3851_v9 = vmul.f32 %v8440_v18, %v7389_v42 }
 0x700   : > { %v3806_v50 = vmul.f32 %v5863_v20, %v3805_v61  ;;  %v8833_v5 = vadd.f32 %v3832_v8, %v7789_v35 }
 0x702   : > { %v3807_v11 = vadd.f32 %v5863_v20, %v3806_v50 }
 0x704   : > { %v3811_v12 = vsel %vm3810_vm14, %v5863_v20, %v3807_v11  ;;  %3880 = vxpose.xlu0.b32.cont [15/16] %v8833_v5, 128 }
 0x705   : > { %v3816_v10 = vsel %vm3813_vm15, %v3815_v57, %v3811_v12 }
 0x706   : > { %v3833_v28 = vmul.f32 %v3816_v10, %v8836_v60 }
 0x708   : > { %v8841_v39 = vadd.f32 %v3833_v28, %v10104_v44 }
 0x70c   : > { %3881 = vxpose.xlu0.b32.end [16/16] %v8841_v39, 128 }
 0x738   : > { %v3882_v34 = vpop.trf.xlu0 }
 0x739   : > { %v3898_v37 = vadd.f32 %v3882_v34, %v8659_v21 }
 0x73b   : > { %v3914_v46 = vmul.f32 %v3898_v37, %v3850_v3 }
 0x73d   : > { %v3930_v0 = vmul.f32 0.009801, %v3914_v46 }
 0x73f   : > { %v3946_v20 = vsub.f32 %v8429_v15, %v3930_v0  ;;  %v3852_v15 = vmul.f32 %v8451_v48, %v7395_v30 }
 0x740   : > { %v3883_v53 = vpop.trf.xlu0 }
 0x741   : > { %v3962_v58 = vand.u32 2147483647, %v3946_v20  ;;  %v3899_v61 = vadd.f32 %v3883_v53, %v8671_v23  ;;  %v3853_v20 = vmul.f32 %v8462_v25, %v7416_v52 }
 0x743   : > { %v5276_v8 = vadd.f32 -0.00970299, %v3962_v58  ;;  %v3915_v43 = vmul.f32 %v3899_v61, %v3851_v9 }
 0x745   : > { %v3994_v26 = vmax.f32 %v5276_v8, 0.0  ;;  %v3931_v50 = vmul.f32 0.009801, %v3915_v43 }
 0x747   : > { %v8851_v2 = vclamps-f32 %v3994_v26, 1.0  ;;  %v3947_v11 = vsub.f32 %v8440_v18, %v3931_v50 }
 0x748   : > { %v3884_v21 = vpop.trf.xlu0 }
 0x749   : > { %v3963_v57 = vand.u32 2147483647, %v3947_v11  ;;  %v3900_v12 = vadd.f32 %v3884_v21, %v8683_v63  ;;  %v8859_v10 = vmul.f32 %v8851_v2, %v8851_v2  ;;  %v3854_v11 = vmul.f32 %v8473_v24, %v7429_v14 }
 0x74b   : > { %v5277_v23 = vadd.f32 -0.00970299, %v3963_v57  ;;  %v3916_v28 = vmul.f32 %v3900_v12, %v3852_v15  ;;  %4058 = vxpose.xlu2.b32.start [1/16] %v8859_v10, 128 }
 0x74d   : > { %v3995_v34 = vmax.f32 %v5277_v23, 0.0  ;;  %v3932_v3 = vmul.f32 0.009801, %v3916_v28 }
 0x74f   : > { %v8862_v37 = vclamps-f32 %v3995_v34, 1.0  ;;  %v3948_v18 = vsub.f32 %v8451_v48, %v3932_v3 }
 0x750   : > { %v3885_v46 = vpop.trf.xlu0 }
 0x751   : > { %v3964_v0 = vand.u32 2147483647, %v3948_v18  ;;  %v3901_v63 = vadd.f32 %v3885_v46, %v8699_v17  ;;  %v8870_v53 = vmul.f32 %v8862_v37, %v8862_v37  ;;  %v3855_v18 = vmul.f32 %v8484_v62, %v7447_v59 }
 0x753   : > { %v5278_v58 = vadd.f32 -0.00970299, %v3964_v0  ;;  %v3917_v9 = vmul.f32 %v3901_v63, %v3853_v20  ;;  %4059 = vxpose.xlu2.b32.cont [2/16] %v8870_v53, 128 }
 0x755   : > { %v3996_v61 = vmax.f32 %v5278_v58, 0.0  ;;  %v3933_v8 = vmul.f32 0.009801, %v3917_v9 }
 0x757   : > { %v8873_v43 = vclamps-f32 %v3996_v61, 1.0  ;;  %v3949_v48 = vsub.f32 %v8462_v25, %v3933_v8 }
 0x758   : > { %v3886_v26 = vpop.trf.xlu0 }
 0x759   : > { %v3965_v50 = vand.u32 2147483647, %v3949_v48  ;;  %v3902_v17 = vadd.f32 %v3886_v26, %v8713_v33  ;;  %v8881_v21 = vmul.f32 %v8873_v43, %v8873_v43  ;;  %v3856_v48 = vmul.f32 %v8495_v19, %v7469_v27 }
 0x75b   : > { %v5279_v57 = vadd.f32 -0.00970299, %v3965_v50  ;;  %v3918_v15 = vmul.f32 %v3902_v17, %v3854_v11  ;;  %4060 = vxpose.xlu2.b32.cont [3/16] %v8881_v21, 128 }
 0x75d   : > { %v3997_v12 = vmax.f32 %v5279_v57, 0.0  ;;  %v3934_v23 = vmul.f32 0.009801, %v3918_v15 }
 0x75f   : > { %v8884_v28 = vclamps-f32 %v3997_v12, 1.0  ;;  %v3950_v25 = vsub.f32 %v8473_v24, %v3934_v23 }
 0x760   : > { %v3887_v34 = vpop.trf.xlu0 }
 0x761   : > { %v3966_v3 = vand.u32 2147483647, %v3950_v25  ;;  %v3903_v33 = vadd.f32 %v3887_v34, %v8726_v4  ;;  %v8892_v46 = vmul.f32 %v8884_v28, %v8884_v28  ;;  %v3857_v25 = vmul.f32 %v8506_v51, %v7485_v55 }
 0x763   : > { %v5280_v0 = vadd.f32 -0.00970299, %v3966_v3  ;;  %v3919_v20 = vmul.f32 %v3903_v33, %v3855_v18  ;;  %4061 = vxpose.xlu2.b32.cont [4/16] %v8892_v46, 128 }
 0x765   : > { %v3998_v63 = vmax.f32 %v5280_v0, 0.0  ;;  %v3935_v58 = vmul.f32 0.009801, %v3919_v20 }
 0x767   : > { %v8895_v9 = vclamps-f32 %v3998_v63, 1.0  ;;  %v3951_v24 = vsub.f32 %v8484_v62, %v3935_v58 }
 0x768   : > { %v3888_v61 = vpop.trf.xlu0 }
 0x769   : > { %v3967_v8 = vand.u32 2147483647, %v3951_v24  ;;  %v3904_v4 = vadd.f32 %v3888_v61, %v8739_v49  ;;  %v8903_v26 = vmul.f32 %v8895_v9, %v8895_v9  ;;  %v10159_v24 = vld [vmem:[#allocation59_spill] sm:$0xff] }
 0x76a   : > { %v3858_v61 = vmul.f32 %v10159_v24, %v7499_v22 }
 0x76b   : > { %v5281_v50 = vadd.f32 -0.00970299, %v3967_v8  ;;  %v3920_v11 = vmul.f32 %v3904_v4, %v3856_v48  ;;  %4062 = vxpose.xlu2.b32.cont [5/16] %v8903_v26, 128 }
 0x76d   : > { %v3999_v17 = vmax.f32 %v5281_v50, 0.0  ;;  %v3936_v57 = vmul.f32 0.009801, %v3920_v11 }
 0x76f   : > { %v8906_v15 = vclamps-f32 %v3999_v17, 1.0  ;;  %v3952_v62 = vsub.f32 %v8495_v19, %v3936_v57 }
 0x770   : > { %v3889_v12 = vpop.trf.xlu0 }
 0x771   : > { %v3968_v23 = vand.u32 2147483647, %v3952_v62  ;;  %v3905_v49 = vadd.f32 %v3889_v12, %v8750_v54  ;;  %v8914_v34 = vmul.f32 %v8906_v15, %v8906_v15  ;;  %v10160_v12 = vld [vmem:[#allocation8_spill] sm:$0xff] }
 0x773   : > { %v5282_v3 = vadd.f32 -0.00970299, %v3968_v23  ;;  %v3921_v18 = vmul.f32 %v3905_v49, %v3857_v25  ;;  %4063 = vxpose.xlu2.b32.cont [6/16] %v8914_v34, 128  ;;  %v3859_v23 = vmul.f32 %v10160_v12, %v7510_v36 }
 0x775   : > { %v4000_v33 = vmax.f32 %v5282_v3, 0.0  ;;  %v3937_v0 = vmul.f32 0.009801, %v3921_v18 }
 0x777   : > { %v8917_v20 = vclamps-f32 %v4000_v33, 1.0  ;;  %v3953_v19 = vsub.f32 %v8506_v51, %v3937_v0 }
 0x778   : > { %v3890_v63 = vpop.trf.xlu0 }
 0x779   : > { %v3969_v58 = vand.u32 2147483647, %v3953_v19  ;;  %v3906_v54 = vadd.f32 %v3890_v63, %v8762_v7  ;;  %v8925_v8 = vmul.f32 %v8917_v20, %v8917_v20 }
 0x77b   : > { %v5283_v48 = vadd.f32 -0.00970299, %v3969_v58  ;;  %v3922_v4 = vmul.f32 %v3906_v54, %v3858_v61  ;;  %4064 = vxpose.xlu2.b32.cont [7/16] %v8925_v8, 128 }
 0x77d   : > { %v4001_v50 = vmax.f32 %v5283_v48, 0.0  ;;  %v3938_v11 = vmul.f32 0.009801, %v3922_v4 }
 0x77f   : > { %v8928_v17 = vclamps-f32 %v4001_v50, 1.0  ;;  %v3954_v51 = vsub.f32 %v10159_v24, %v3938_v11  ;;  %v10162_v24 = vld [vmem:[#allocation43_spill] sm:$0xff] }
 0x780   : > { %v3891_v57 = vpop.trf.xlu0  ;;  %v3860_v61 = vmul.f32 %v10162_v24, %v7525_v16 }
 0x781   : > { %v3970_v62 = vand.u32 2147483647, %v3954_v51  ;;  %v3907_v7 = vadd.f32 %v3891_v57, %v8778_v40  ;;  %v8936_v25 = vmul.f32 %v8928_v17, %v8928_v17 }
 0x783   : > { %v5284_v49 = vadd.f32 -0.00970299, %v3970_v62  ;;  %v3923_v3 = vmul.f32 %v3907_v7, %v3859_v23  ;;  %4065 = vxpose.xlu2.b32.cont [8/16] %v8936_v25, 128  ;;  %v10164_v23 = vld [vmem:[#allocation16_spill] sm:$0xff]  ;;  %v10165_v7 = vld [vmem:[#allocation34_spill] sm:$0xff] }
 0x785   : > { %v4002_v18 = vmax.f32 %v5284_v49, 0.0  ;;  %v3939_v33 = vmul.f32 0.009801, %v3923_v3  ;;  %v3861_v49 = vmul.f32 %v10165_v7, %v10164_v23 }
 0x787   : > { %v8939_v0 = vclamps-f32 %v4002_v18, 1.0  ;;  %v3955_v19 = vsub.f32 %v10160_v12, %v3939_v33 }
 0x788   : > { %v3892_v63 = vpop.trf.xlu0 }
 0x789   : > { %10161 = vst [vmem:[#allocation50_spill] sm:$0xff] %v8939_v0  ;;  %v3971_v58 = vand.u32 2147483647, %v3955_v19  ;;  %v3908_v40 = vadd.f32 %v3892_v63, %v8792_v32  ;;  %v8947_v54 = vmul.f32 %v8939_v0, %v8939_v0 }
 0x78b   : > { %v5285_v48 = vadd.f32 -0.00970299, %v3971_v58  ;;  %v3924_v4 = vmul.f32 %v3908_v40, %v3860_v61  ;;  %4066 = vxpose.xlu2.b32.cont [9/16] %v8947_v54, 128 }
 0x78d   : > { %v4003_v50 = vmax.f32 %v5285_v48, 0.0  ;;  %v3940_v11 = vmul.f32 0.009801, %v3924_v4  ;;  %v10167_v48 = vld [vmem:[#allocation6_spill] sm:$0xff]  ;;  %v10168_v4 = vld [vmem:[#allocation23_spill] sm:$0xff] }
 0x78f   : > { %v8950_v51 = vclamps-f32 %v4003_v50, 1.0  ;;  %v3956_v57 = vsub.f32 %v10162_v24, %v3940_v11  ;;  %v3862_v50 = vmul.f32 %v10168_v4, %v10167_v48 }
 0x790   : > { %v3893_v62 = vpop.trf.xlu0 }
 0x791   : > { %10163 = vst [vmem:[#allocation52_spill] sm:$0xff] %v8950_v51  ;;  %v3972_v12 = vand.u32 2147483647, %v3956_v57  ;;  %v3909_v32 = vadd.f32 %v3893_v62, %v8805_v41  ;;  %v8958_v3 = vmul.f32 %v8950_v51, %v8950_v51 }
 0x793   : > { %v5286_v18 = vadd.f32 -0.00970299, %v3972_v12  ;;  %v3925_v33 = vmul.f32 %v3909_v32, %v3861_v49  ;;  %4067 = vxpose.xlu2.b32.cont [10/16] %v8958_v3, 128 }
 0x795   : > { %v4004_v19 = vmax.f32 %v5286_v18, 0.0  ;;  %v3941_v63 = vmul.f32 0.009801, %v3925_v33 }
 0x797   : > { %v8961_v58 = vclamps-f32 %v4004_v19, 1.0  ;;  %v3957_v24 = vsub.f32 %v10165_v7, %v3941_v63  ;;  %v10170_v19 = vld [vmem:[#allocation27_spill] sm:$0xff]  ;;  %v10171_v63 = vld [vmem:[#allocation14_spill] sm:$0xff] }
 0x798   : > { %v3894_v61 = vpop.trf.xlu0 }
 0x799   : > { %10166 = vst [vmem:[#allocation55_spill] sm:$0xff] %v8961_v58  ;;  %v3973_v40 = vand.u32 2147483647, %v3957_v24  ;;  %v3910_v41 = vadd.f32 %v3894_v61, %v8815_v56  ;;  %v8969_v11 = vmul.f32 %v8961_v58, %v8961_v58  ;;  %v3863_v24 = vmul.f32 %v10171_v63, %v10170_v19  ;;  %v10174_v58 = vld [vmem:[#allocation37_spill] sm:$0xff] }
 0x79b   : > { %v5287_v57 = vadd.f32 -0.00970299, %v3973_v40  ;;  %v3926_v62 = vmul.f32 %v3910_v41, %v3862_v50  ;;  %4068 = vxpose.xlu2.b32.cont [11/16] %v8969_v11, 128 }
 0x79d   : > { %v4005_v12 = vmax.f32 %v5287_v57, 0.0  ;;  %v3942_v49 = vmul.f32 0.009801, %v3926_v62 }
 0x79f   : > { %v8972_v32 = vclamps-f32 %v4005_v12, 1.0  ;;  %v3958_v7 = vsub.f32 %v10168_v4, %v3942_v49 }
 0x7a0   : > { %v3895_v18 = vpop.trf.xlu0 }
 0x7a1   : > { %10169 = vst [vmem:[#allocation58_spill] sm:$0xff] %v8972_v32  ;;  %v3974_v33 = vand.u32 2147483647, %v3958_v7  ;;  %v3911_v56 = vadd.f32 %v3895_v18, %v8824_v45  ;;  %v8980_v61 = vmul.f32 %v8972_v32, %v8972_v32  ;;  %v10173_v7 = vld [vmem:[#allocation5_spill] sm:$0xff]  ;;  %v10177_v32 = vld [vmem:[#allocation38_spill] sm:$0xff] }
 0x7a2   : > { %v3864_v51 = vmul.f32 %v10174_v58, %v10173_v7 }
 0x7a3   : > { %v5288_v40 = vadd.f32 -0.00970299, %v3974_v33  ;;  %v3927_v50 = vmul.f32 %v3911_v56, %v3863_v24  ;;  %4069 = vxpose.xlu2.b32.cont [12/16] %v8980_v61, 128 }
 0x7a5   : > { %v4006_v41 = vmax.f32 %v5288_v40, 0.0  ;;  %v3943_v57 = vmul.f32 0.009801, %v3927_v50 }
 0x7a7   : > { %v8983_v62 = vclamps-f32 %v4006_v41, 1.0  ;;  %v3959_v4 = vsub.f32 %v10171_v63, %v3943_v57 }
 0x7a8   : > { %v3896_v12 = vpop.trf.xlu0 }
 0x7a9   : > { %10172 = vst [vmem:[#allocation19_spill] sm:$0xff] %v8983_v62  ;;  %v3975_v49 = vand.u32 2147483647, %v3959_v4  ;;  %v3912_v45 = vadd.f32 %v3896_v12, %v8833_v5  ;;  %v8991_v18 = vmul.f32 %v8983_v62, %v8983_v62  ;;  %v10176_v4 = vld [vmem:[#allocation17_spill] sm:$0xff] }
 0x7aa   : > { %v3865_v0 = vmul.f32 %v10177_v32, %v10176_v4 }
 0x7ab   : > { %v5289_v33 = vadd.f32 -0.00970299, %v3975_v49  ;;  %v3928_v24 = vmul.f32 %v3912_v45, %v3864_v51  ;;  %4070 = vxpose.xlu2.b32.cont [13/16] %v8991_v18, 128 }
 0x7ad   : > { %v4007_v56 = vmax.f32 %v5289_v33, 0.0  ;;  %v3944_v40 = vmul.f32 0.009801, %v3928_v24 }
 0x7af   : > { %v8994_v50 = vclamps-f32 %v4007_v56, 1.0  ;;  %v3960_v63 = vsub.f32 %v10174_v58, %v3944_v40 }
 0x7b0   : > { %v3897_v41 = vpop.trf.xlu0 }
 0x7b1   : > { %10175 = vst [vmem:[#allocation21_spill] sm:$0xff] %v8994_v50  ;;  %v3976_v57 = vand.u32 2147483647, %v3960_v63  ;;  %v3913_v5 = vadd.f32 %v3897_v41, %v8841_v39  ;;  %v9002_v12 = vmul.f32 %v8994_v50, %v8994_v50  ;;  %v10183_v50 = vld [vmem:[#allocation11_spill] sm:$0xff] }
 0x7b3   : > { %v5290_v51 = vadd.f32 -0.00970299, %v3976_v57  ;;  %v3929_v49 = vmul.f32 %v3913_v5, %v3865_v0  ;;  %4071 = vxpose.xlu2.b32.cont [14/16] %v9002_v12, 128 }
 0x7b5   : > { %v4008_v45 = vmax.f32 %v5290_v51, 0.0  ;;  %v3945_v33 = vmul.f32 0.009801, %v3929_v49 }
 0x7b7   : > { %v9005_v24 = vclamps-f32 %v4008_v45, 1.0  ;;  %v3961_v58 = vsub.f32 %v10177_v32, %v3945_v33 }
 0x7b9   : > { %10178 = vst [vmem:[#allocation22_spill] sm:$0xff] %v9005_v24  ;;  %v3977_v56 = vand.u32 2147483647, %v3961_v58  ;;  %v9010_v40 = vmul.f32 %v9005_v24, %v9005_v24 }
 0x7bb   : > { %v5291_v39 = vadd.f32 -0.00970299, %v3977_v56  ;;  %4072 = vxpose.xlu2.b32.cont [15/16] %v9010_v40, 128 }
 0x7bd   : > { %v4009_v63 = vmax.f32 %v5291_v39, 0.0 }
 0x7bf   : > { %v9013_v0 = vclamps-f32 %v4009_v63, 1.0 }
 0x7c1   : > { %10179 = vst [vmem:[#allocation26_spill] sm:$0xff] %v9013_v0  ;;  %v9017_v41 = vmul.f32 %v9013_v0, %v9013_v0 }
 0x7c3   : > { %4073 = vxpose.xlu2.b32.end [16/16] %v9017_v41, 128 }
 0x7e4   : > { %v4074_v57 = vpop.trf.xlu2 }
 0x7e5   : > { %v4090_v32 = vadd.f32 %v4074_v57, %v8859_v10 }
 0x7e7   : > { %v4106_v5 = vmul.f32 0.5, %v4090_v32 }
 0x7e9   : > { %v4122_v51 = vmul.f32 %v4106_v5, %v7377_v47 }
 0x7eb   : > { %5324 = vst [vmem:[%s7988_s11 + $0x100] sm:$0xff] %v4122_v51  ;;  %4138 = vadd.xlane.f32.xlu1 %v4122_v51 }
 0x7ec   : > { %v4075_v49 = vpop.trf.xlu2 }
 0x7ed   : > { %v4091_v45 = vadd.f32 %v4075_v49, %v8870_v53 }
 0x7ef   : > { %v4107_v33 = vmul.f32 0.5, %v4091_v45 }
 0x7f1   : > { %v4123_v58 = vmul.f32 %v4107_v33, %v7389_v42 }
 0x7f3   : > { %5325 = vst [vmem:[%s7988_s11 + $0x108] sm:$0xff] %v4123_v58  ;;  %4140 = vadd.xlane.f32.xlu1 %v4123_v58 }
 0x7f4   : > { %v4076_v56 = vpop.trf.xlu2 }
 0x7f5   : > { %v4092_v39 = vadd.f32 %v4076_v56, %v8881_v21 }
 0x7f7   : > { %v4108_v63 = vmul.f32 0.5, %v4092_v39 }
 0x7f9   : > { %v4124_v10 = vmul.f32 %v4108_v63, %v7395_v30 }
 0x7fb   : > { %5326 = vst [vmem:[%s7988_s11 + $0x110] sm:$0xff] %v4124_v10  ;;  %4142 = vadd.xlane.f32.xlu1 %v4124_v10 }
 0x7fc   : > { %v4077_v57 = vpop.trf.xlu2 }
 0x7fd   : > { %v4093_v32 = vadd.f32 %v4077_v57, %v8892_v46 }
 0x7ff   : > { %v4109_v5 = vmul.f32 0.5, %v4093_v32 }
 0x801   : > { %v4125_v53 = vmul.f32 %v4109_v5, %v7416_v52 }
 0x803   : > { %5327 = vst [vmem:[%s7988_s11 + $0x118] sm:$0xff] %v4125_v53  ;;  %4144 = vadd.xlane.f32.xlu1 %v4125_v53 }
 0x804   : > { %v4078_v51 = vpop.trf.xlu2 }
 0x805   : > { %v4094_v49 = vadd.f32 %v4078_v51, %v8903_v26 }
 0x807   : > { %v4110_v45 = vmul.f32 0.5, %v4094_v49 }
 0x809   : > { %v4126_v21 = vmul.f32 %v4110_v45, %v7429_v14 }
 0x80b   : > { %5328 = vst [vmem:[%s7988_s11 + $0x120] sm:$0xff] %v4126_v21  ;;  %4146 = vadd.xlane.f32.xlu1 %v4126_v21 }
 0x80c   : > { %v4079_v33 = vpop.trf.xlu2 }
 0x80d   : > { %v4095_v58 = vadd.f32 %v4079_v33, %v8914_v34 }
 0x80f   : > { %v4111_v56 = vmul.f32 0.5, %v4095_v58 }
 0x811   : > { %v4127_v46 = vmul.f32 %v4111_v56, %v7447_v59 }
 0x813   : > { %5329 = vst [vmem:[%s7988_s11 + $0x128] sm:$0xff] %v4127_v46  ;;  %4148 = vadd.xlane.f32.xlu1 %v4127_v46 }
 0x814   : > { %v4080_v39 = vpop.trf.xlu2 }
 0x815   : > { %v4096_v63 = vadd.f32 %v4080_v39, %v8925_v8 }
 0x817   : > { %v4112_v10 = vmul.f32 0.5, %v4096_v63 }
 0x819   : > { %v4128_v26 = vmul.f32 %v4112_v10, %v7469_v27 }
 0x81b   : > { %5330 = vst [vmem:[%s7988_s11 + $0x130] sm:$0xff] %v4128_v26  ;;  %4150 = vadd.xlane.f32.xlu1 %v4128_v26 }
 0x81c   : > { %v4081_v57 = vpop.trf.xlu2 }
 0x81d   : > { %v4097_v32 = vadd.f32 %v4081_v57, %v8936_v25 }
 0x81f   : > { %v4113_v5 = vmul.f32 0.5, %v4097_v32 }
 0x821   : > { %v4129_v34 = vmul.f32 %v4113_v5, %v7485_v55 }
 0x823   : > { %5331 = vst [vmem:[%s7988_s11 + $0x138] sm:$0xff] %v4129_v34  ;;  %4152 = vadd.xlane.f32.xlu1 %v4129_v34 }
 0x824   : > { %v4082_v53 = vpop.trf.xlu2 }
 0x825   : > { %v4098_v51 = vadd.f32 %v4082_v53, %v8947_v54 }
 0x827   : > { %v4114_v49 = vmul.f32 0.5, %v4098_v51 }
 0x829   : > { %v4130_v8 = vmul.f32 %v4114_v49, %v7499_v22 }
 0x82b   : > { %5332 = vst [vmem:[%s7988_s11 + $0x140] sm:$0xff] %v4130_v8  ;;  %4154 = vadd.xlane.f32.xlu1 %v4130_v8 }
 0x82c   : > { %v4083_v45 = vpop.trf.xlu2 }
 0x82d   : > { %v4099_v21 = vadd.f32 %v4083_v45, %v8958_v3 }
 0x82f   : > { %v4115_v33 = vmul.f32 0.5, %v4099_v21 }
 0x831   : > { %v4131_v25 = vmul.f32 %v4115_v33, %v7510_v36 }
 0x833   : > { %5333 = vst [vmem:[%s7988_s11 + $0x148] sm:$0xff] %v4131_v25  ;;  %4156 = vadd.xlane.f32.xlu0 %v4131_v25 }
 0x834   : > { %v4084_v58 = vpop.trf.xlu2 }
 0x835   : > { %v4100_v56 = vadd.f32 %v4084_v58, %v8969_v11 }
 0x837   : > { %v4116_v46 = vmul.f32 0.5, %v4100_v56 }
 0x839   : > { %v4132_v54 = vmul.f32 %v4116_v46, %v7525_v16 }
 0x83b   : > { %5334 = vst [vmem:[%s7988_s11 + $0x150] sm:$0xff] %v4132_v54  ;;  %4158 = vadd.xlane.f32.xlu1 %v4132_v54 }
 0x83c   : > { %v4085_v39 = vpop.trf.xlu2 }
 0x83d   : > { %v4101_v63 = vadd.f32 %v4085_v39, %v8980_v61 }
 0x83f   : > { %v4117_v10 = vmul.f32 0.5, %v4101_v63 }
 0x841   : > { %v4133_v3 = vmul.f32 %v4117_v10, %v10164_v23  ;;  %v10191_v23 = vld [vmem:[#allocation40_spill] sm:$0xff] }
 0x843   : > { %5335 = vst [vmem:[%s7988_s11 + $0x158] sm:$0xff] %v4133_v3  ;;  %4160 = vadd.xlane.f32.xlu2 %v4133_v3 }
 0x844   : > { %v4086_v26 = vpop.trf.xlu2 }
 0x845   : > { %v4102_v57 = vadd.f32 %v4086_v26, %v8991_v18 }
 0x847   : > { %v4118_v32 = vmul.f32 0.5, %v4102_v57 }
 0x849   : > { %v4134_v11 = vmul.f32 %v4118_v32, %v10167_v48  ;;  %v10189_v48 = vld [vmem:[#allocation10_spill] sm:$0xff] }
 0x84b   : > { %5336 = vst [vmem:[%s7988_s11 + $0x160] sm:$0xff] %v4134_v11  ;;  %4162 = vadd.xlane.f32.xlu1 %v4134_v11 }
 0x84c   : > { %v4087_v5 = vpop.trf.xlu2 }
 0x84d   : > { %v4103_v34 = vadd.f32 %v4087_v5, %v9002_v12 }
 0x84f   : > { %v4119_v53 = vmul.f32 0.5, %v4103_v34 }
 0x851   : > { %v4135_v61 = vmul.f32 %v4119_v53, %v10170_v19 }
 0x853   : > { %5337 = vst [vmem:[%s7988_s11 + $0x168] sm:$0xff] %v4135_v61  ;;  %4164 = vadd.xlane.f32.xlu1 %v4135_v61 }
 0x854   : > { %v4088_v51 = vpop.trf.xlu2 }
 0x855   : > { %v4104_v49 = vadd.f32 %v4088_v51, %v9010_v40 }
 0x857   : > { %v4120_v8 = vmul.f32 0.5, %v4104_v49 }
 0x859   : > { %v4136_v18 = vmul.f32 %v4120_v8, %v10173_v7 }
 0x85b   : > { %5338 = vst [vmem:[%s7988_s11 + $0x170] sm:$0xff] %v4136_v18  ;;  %4166 = vadd.xlane.f32.xlu1 %v4136_v18 }
 0x85c   : > { %v4089_v45 = vpop.trf.xlu2 }
 0x85d   : > { %v4105_v21 = vadd.f32 %v4089_v45, %v9017_v41 }
 0x85e   : > { %v4139_v33 = vpop.xlane.xlu1 %4138 }
 0x85f   : > { %v4121_v25 = vmul.f32 0.5, %v4105_v21  ;;  %v5308_v12 = vadd.f32 -1.0, %v4139_v33 }
 0x861   : > { %v4137_v58 = vmul.f32 %v4121_v25, %v10176_v4  ;;  %v5340_v56 = vmul.f32 -2.0, %v5308_v12  ;;  %v10180_v4 = vld [vmem:[#allocation12_spill] sm:$0xff] }
 0x863   : > { %5339 = vst [vmem:[%s7988_s11 + $0x178] sm:$0xff] %v4137_v58  ;;  %4168 = vadd.xlane.f32.xlu1 %v4137_v58  ;;  %v4283_v54 = vmul.f32 1.442695, %v5340_v56 }
 0x865   : > { %5864 = vpow2.f32 %v4283_v54 }
 0x866   : > { %v4141_v46 = vpop.xlane.xlu1 %4140 }
 0x867   : > { %v9068_v39 = vadd.f32 -1.0, %v4141_v46 }
 0x869   : > { %v5341_v40 = vmul.f32 -2.0, %v9068_v39  ;;  %v4187_v24 = vmax.f32 %v9068_v39, 0.0 }
 0x86b   : > { %v4285_v10 = vmul.f32 1.442695, %v5341_v40  ;;  %v5865_v41 = vpop.eup %5864 }
 0x86c   : > { %v4315_v57 = vadd.f32 1.0, %v5865_v41 }
 0x86d   : > { %5866 = vpow2.f32 %v4285_v10 }
 0x86e   : > { %v4143_v63 = vpop.xlane.xlu1 %4142  ;;  %5868 = vrcp.f32 %v4315_v57  ;;  %vm4336_vm1 = vweird.f32 %v4315_v57 }
 0x86f   : > { %v9071_v3 = vadd.f32 -1.0, %v4143_v63 }
 0x871   : > { %v5342_v26 = vmul.f32 -2.0, %v9071_v3 }
 0x873   : > { %v4287_v11 = vmul.f32 1.442695, %v5342_v26  ;;  %v5867_v34 = vpop.eup %5866 }
 0x874   : > { %v9077_v61 = vadd.f32 1.0, %v5867_v34  ;;  %v5869_v51 = vpop.eup %5868 }
 0x875   : > { %5870 = vpow2.f32 %v4287_v11  ;;  %v4332_v21 = vmul.f32 %v5869_v51, %v4315_v57  ;;  %vm4337_vm0 = vweird.f32 %v5869_v51 }
 0x876   : > { %v4145_v32 = vpop.xlane.xlu1 %4144  ;;  %5872 = vrcp.f32 %v9077_v61  ;;  %vm4338_vm2 = vmor %vm4336_vm1, %vm4337_vm0  ;;  %vm4351_vm5 = vweird.f32 %v9077_v61 }
 0x877   : > { %v9074_v5 = vadd.f32 -1.0, %v4145_v32  ;;  %v4333_v58 = vsub.f32 1.0, %v4332_v21  ;;  %v4186_v32 = vmax.f32 %v5308_v12, 0.0  ;;  %v4340_v21 = vand.u32 2147483647, %v4315_v57 }
 0x879   : > { %v5343_v53 = vmul.f32 -2.0, %v9074_v5  ;;  %v4334_v10 = vmul.f32 %v5869_v51, %v4333_v58  ;;  %vm4341_vm3 = vcmp.eq.f32.partialorder %v4340_v21, 8.507059e+37  ;;  %v4355_v21 = vand.u32 2147483647, %v9077_v61 }
 0x87b   : > { %v4289_v8 = vmul.f32 1.442695, %v5343_v53  ;;  %v5871_v45 = vpop.eup %5870  ;;  %v4335_v34 = vadd.f32 %v5869_v51, %v4334_v10  ;;  %vm4356_vm7 = vcmp.eq.f32.partialorder %v4355_v21, 8.507059e+37 }
 0x87c   : > { %v9083_v25 = vadd.f32 1.0, %v5871_v45  ;;  %v5873_v56 = vpop.eup %5872 }
 0x87d   : > { %5874 = vpow2.f32 %v4289_v8  ;;  %v4347_v41 = vmul.f32 %v5873_v56, %v9077_v61  ;;  %v4342_v8 = vand.u32 2147483648, %v4315_v57  ;;  %v4339_v12 = vsel %vm4338_vm2, %v5869_v51, %v4335_v34 }
 0x87e   : > { %v4147_v49 = vpop.xlane.xlu1 %4146  ;;  %5876 = vrcp.f32 %v9083_v25  ;;  %vm4352_vm4 = vweird.f32 %v5873_v56  ;;  %v4357_v34 = vand.u32 2147483648, %v9077_v61  ;;  %vm4366_vm9 = vweird.f32 %v9083_v25 }
 0x87f   : > { %v9080_v18 = vadd.f32 -1.0, %v4147_v49  ;;  %v4348_v53 = vsub.f32 1.0, %v4347_v41  ;;  %v4343_v41 = vor.u32 1.1754944e-38, %v4342_v8  ;;  %vm4353_vm6 = vmor %vm4351_vm5, %vm4352_vm4 }
 0x881   : > { %v5344_v33 = vmul.f32 -2.0, %v9080_v18 }
 0x883   : > { %v4291_v54 = vmul.f32 1.442695, %v5344_v33  ;;  %v5875_v63 = vpop.eup %5874 }
 0x884   : > { %v9090_v11 = vadd.f32 1.0, %v5875_v63  ;;  %v9092_v49 = vpop.eup %5876  ;;  %v4349_v63 = vmul.f32 %v5873_v56, %v4348_v53 }
 0x885   : > { %5878 = vpow2.f32 %v4291_v54  ;;  %v4362_v10 = vmul.f32 %v9092_v49, %v9083_v25  ;;  %vm4367_vm8 = vweird.f32 %v9092_v49 }
 0x886   : > { %v4149_v46 = vpop.xlane.xlu1 %4148  ;;  %5880 = vrcp.f32 %v9090_v11  ;;  %vm4368_vm10 = vmor %vm4366_vm9, %vm4367_vm8  ;;  %vm4381_vm13 = vweird.f32 %v9090_v11 }
 0x887   : > { %v9085_v40 = vadd.f32 -1.0, %v4149_v46  ;;  %v4202_v46 = vmul.f32 0.09801, %v4186_v32  ;;  %v4363_v7 = vsub.f32 1.0, %v4362_v10  ;;  %v4358_v10 = vor.u32 1.1754944e-38, %v4357_v34 }
 0x889   : > { %v5345_v26 = vmul.f32 -2.0, %v9085_v40  ;;  %v4218_v57 = vadd.f32 %v4202_v46, %v10180_v4  ;;  %v4203_v46 = vmul.f32 0.09801, %v4187_v24  ;;  %v10182_v24 = vld [vmem:[#allocation9_spill] sm:$0xff] }
 0x88b   : > { %v4293_v33 = vmul.f32 1.442695, %v5345_v26  ;;  %v5879_v54 = vpop.eup %5878  ;;  %v4344_v26 = vsel %vm4341_vm3, %v4343_v41, %v4339_v12  ;;  %v4364_v12 = vmul.f32 %v9092_v49, %v4363_v7  ;;  %v10181_v41 = vld [vmem:[#allocation29_spill] sm:$0xff] }
 0x88c   : > { %v9101_v32 = vadd.f32 1.0, %v5879_v54  ;;  %v9104_v51 = vpop.eup %5880  ;;  %v4571_v8 = vmul.f32 %v4344_v26, %v4218_v57  ;;  %v4188_v26 = vmax.f32 %v9071_v3, 0.0  ;;  %v4370_v3 = vand.u32 2147483647, %v9083_v25 }
 0x88d   : > { %5882 = vpow2.f32 %v4293_v33  ;;  %v4365_v7 = vadd.f32 %v9092_v49, %v4364_v12  ;;  %vm4382_vm12 = vweird.f32 %v9104_v51 }
 0x88e   : > { %v4151_v45 = vpop.xlane.xlu1 %4150  ;;  %5884 = vrcp.f32 %v9101_v32  ;;  %v9116_v57 = vadd.f32 %v4571_v8, %v10181_v41  ;;  %v4372_v8 = vand.u32 2147483648, %v9083_v25  ;;  %vm4371_vm11 = vcmp.eq.f32.partialorder %v4370_v3, 8.507059e+37  ;;  %vm4383_vm14 = vmor %vm4381_vm13, %vm4382_vm12 }
 0x88f   : > { %v9095_v58 = vadd.f32 -1.0, %v4151_v45  ;;  %v4350_v45 = vadd.f32 %v5873_v56, %v4349_v63  ;;  %v4377_v63 = vmul.f32 %v9104_v51, %v9090_v11  ;;  %vm4396_vm1 = vweird.f32 %v9101_v32 }
 0x891   : > { %v5346_v0 = vmul.f32 -2.0, %v9095_v58  ;;  %v4354_v54 = vsel %vm4353_vm6, %v5873_v56, %v4350_v45  ;;  %v4219_v56 = vadd.f32 %v4203_v46, %v10182_v24  ;;  %v4378_v45 = vsub.f32 1.0, %v4377_v63 }
 0x892   : > { %v4359_v61 = vsel %vm4356_vm7, %v4358_v10, %v4354_v54  ;;  %v4204_v46 = vmul.f32 0.09801, %v4188_v26  ;;  %v4369_v63 = vsel %vm4368_vm10, %v9092_v49, %v4365_v7  ;;  %v4373_v24 = vor.u32 1.1754944e-38, %v4372_v8 }
 0x893   : > { %v4295_v33 = vmul.f32 1.442695, %v5346_v0  ;;  %v5883_v39 = vpop.eup %5882  ;;  %v4379_v10 = vmul.f32 %v9104_v51, %v4378_v45  ;;  %v4189_v49 = vmax.f32 %v9074_v5, 0.0  ;;  %v4387_v8 = vand.u32 2147483648, %v9090_v11 }
 0x894   : > { %v9126_v34 = vpop.eup %5884 }
 0x895   : > { %5886 = vpow2.f32 %v4295_v33  ;;  %v4572_v33 = vmul.f32 %v4359_v61, %v4219_v56  ;;  %v4392_v41 = vmul.f32 %v9126_v34, %v9101_v32  ;;  %v4374_v56 = vsel %vm4371_vm11, %v4373_v24, %v4369_v63 }
 0x896   : > { %v4153_v53 = vpop.xlane.xlu1 %4152  ;;  %v4380_v7 = vadd.f32 %v9104_v51, %v4379_v10  ;;  %v4205_v63 = vmul.f32 0.09801, %v4189_v49  ;;  %v10186_v49 = vld [vmem:[#allocation13_spill] sm:$0xff]  ;;  %vm4397_vm0 = vweird.f32 %v9126_v34 }
 0x897   : > { %v9110_v4 = vadd.f32 -1.0, %v4153_v53  ;;  %v9120_v53 = vadd.f32 1.0, %v5883_v39  ;;  %v9139_v61 = vadd.f32 %v4572_v33, %v10183_v50  ;;  %v4393_v45 = vsub.f32 1.0, %v4392_v41  ;;  %vm4398_vm2 = vmor %vm4396_vm1, %vm4397_vm0 }
 0x898   : > { %v4384_v10 = vsel %vm4383_vm14, %v9104_v51, %v4380_v7  ;;  %v4221_v51 = vadd.f32 %v4205_v63, %v10186_v49  ;;  %v10187_v49 = vld [vmem:[#allocation18_spill] sm:$0xff] }
 0x899   : > { %v5347_v0 = vmul.f32 -2.0, %v9110_v4  ;;  %5888 = vrcp.f32 %v9120_v53  ;;  %v4394_v41 = vmul.f32 %v9126_v34, %v4393_v45  ;;  %vm4411_vm5 = vweird.f32 %v9120_v53 }
 0x89b   : > { %v4297_v39 = vmul.f32 1.442695, %v5347_v0  ;;  %v5887_v12 = vpop.eup %5886  ;;  %v10184_v0 = vld [vmem:[#allocation47_spill] sm:$0xff]  ;;  %v4395_v7 = vadd.f32 %v9126_v34, %v4394_v41 }
 0x89c   : > { %v4220_v26 = vadd.f32 %v4204_v46, %v10184_v0  ;;  %v4388_v0 = vor.u32 1.1754944e-38, %v4387_v8 }
 0x89d   : > { %4619 = vxpose.xlu1.b32.start [1/16] %v9116_v57, 128  ;;  %5890 = vpow2.f32 %v4297_v39  ;;  %v4385_v39 = vand.u32 2147483647, %v9090_v11 }
 0x89e   : > { %v4155_v21 = vpop.xlane.xlu1 %4154  ;;  %v4573_v3 = vmul.f32 %v4374_v56, %v4220_v26  ;;  %v10185_v26 = vld [vmem:[#allocation32_spill] sm:$0xff] }
 0x89f   : > { %v9131_v54 = vadd.f32 -1.0, %v4155_v21  ;;  %v9143_v21 = vadd.f32 1.0, %v5887_v12  ;;  %v9149_v50 = vpop.eup %5888  ;;  %vm4386_vm15 = vcmp.eq.f32.partialorder %v4385_v39, 8.507059e+37 }
 0x8a0   : > { %v4407_v24 = vmul.f32 %v9149_v50, %v9120_v53  ;;  %v9162_v56 = vadd.f32 %v4573_v3, %v10185_v26  ;;  %v4402_v3 = vand.u32 2147483648, %v9101_v32  ;;  %vm4412_vm4 = vweird.f32 %v9149_v50 }
 0x8a1   : > { %v5348_v25 = vmul.f32 -2.0, %v9131_v54  ;;  %5892 = vrcp.f32 %v9143_v21  ;;  %vm4413_vm6 = vmor %vm4411_vm5, %vm4412_vm4  ;;  %vm4426_vm9 = vweird.f32 %v9143_v21 }
 0x8a2   : > { %v4408_v45 = vsub.f32 1.0, %v4407_v24  ;;  %v4399_v24 = vsel %vm4398_vm2, %v9126_v34, %v4395_v7  ;;  %v4191_v34 = vmax.f32 %v9085_v40, 0.0 }
 0x8a3   : > { %v4299_v46 = vmul.f32 1.442695, %v5348_v25  ;;  %v5891_v12 = vpop.eup %5890  ;;  %v4389_v25 = vsel %vm4386_vm15, %v4388_v0, %v4384_v10 }
 0x8a4   : > { %v9166_v19 = vadd.f32 1.0, %v5891_v12  ;;  %v4409_v0 = vmul.f32 %v9149_v50, %v4408_v45 }
 0x8a5   : > { %4620 = vxpose.xlu1.b32.cont [2/16] %v9139_v61, 128  ;;  %5894 = vpow2.f32 %v4299_v46  ;;  %v4574_v46 = vmul.f32 %v4389_v25, %v4221_v51  ;;  %v4403_v25 = vor.u32 1.1754944e-38, %v4402_v3 }
 0x8a6   : > { %v4157_v33 = vpop.xlane.xlu0 %4156  ;;  %5896 = vrcp.f32 %v9166_v19  ;;  %v4410_v7 = vadd.f32 %v9149_v50, %v4409_v0  ;;  %v4207_v0 = vmul.f32 0.09801, %v4191_v34  ;;  %v10190_v34 = vld [vmem:[#allocation28_spill] sm:$0xff]  ;;  %vm4441_vm13 = vweird.f32 %v9166_v19 }
 0x8a7   : > { %v9155_v5 = vadd.f32 -1.0, %v4157_v33  ;;  %v4190_v33 = vmax.f32 %v9080_v18, 0.0  ;;  %v9172_v8 = vpop.eup %5892  ;;  %v4400_v18 = vand.u32 2147483647, %v9101_v32  ;;  %v9185_v51 = vadd.f32 %v4574_v46, %v10187_v49 }
 0x8a8   : > { %v4422_v26 = vmul.f32 %v9172_v8, %v9143_v21  ;;  %v4417_v46 = vand.u32 2147483648, %v9120_v53  ;;  %vm4427_vm8 = vweird.f32 %v9172_v8 }
 0x8a9   : > { %v5349_v11 = vmul.f32 -2.0, %v9155_v5  ;;  %v4206_v10 = vmul.f32 0.09801, %v4190_v33  ;;  %vm4401_vm3 = vcmp.eq.f32.partialorder %v4400_v18, 8.507059e+37  ;;  %vm4428_vm10 = vmor %vm4426_vm9, %vm4427_vm8 }
 0x8aa   : > { %v4423_v45 = vsub.f32 1.0, %v4422_v26  ;;  %v4414_v26 = vsel %vm4413_vm6, %v9149_v50, %v4410_v7  ;;  %v4223_v50 = vadd.f32 %v4207_v0, %v10190_v34 }
 0x8ab   : > { %v4301_v12 = vmul.f32 1.442695, %v5349_v11  ;;  %v5895_v41 = vpop.eup %5894  ;;  %v10188_v11 = vld [vmem:[#allocation24_spill] sm:$0xff] }
 0x8ac   : > { %v4222_v33 = vadd.f32 %v4206_v10, %v10188_v11  ;;  %v9189_v62 = vadd.f32 1.0, %v5895_v41  ;;  %v9195_v3 = vpop.eup %5896  ;;  %v4415_v10 = vand.u32 2147483647, %v9120_v53  ;;  %v4418_v11 = vor.u32 1.1754944e-38, %v4417_v46 }
 0x8ad   : > { %4621 = vxpose.xlu1.b32.cont [3/16] %v9162_v56, 128  ;;  %5898 = vpow2.f32 %v4301_v12  ;;  %v4437_v49 = vmul.f32 %v9195_v3, %v9166_v19  ;;  %v4432_v46 = vand.u32 2147483648, %v9143_v21  ;;  %vm4442_vm12 = vweird.f32 %v9195_v3 }
 0x8ae   : > { %v4159_v39 = vpop.xlane.xlu1 %4158  ;;  %5900 = vrcp.f32 %v9189_v62  ;;  %vm4416_vm7 = vcmp.eq.f32.partialorder %v4415_v10, 8.507059e+37  ;;  %vm4443_vm14 = vmor %vm4441_vm13, %vm4442_vm12  ;;  %vm4456_vm1 = vweird.f32 %v9189_v62 }
 0x8af   : > { %v9178_v63 = vadd.f32 -1.0, %v4159_v39  ;;  %v4404_v39 = vsel %vm4401_vm3, %v4403_v25, %v4399_v24  ;;  %v4424_v25 = vmul.f32 %v9172_v8, %v4423_v45  ;;  %v4438_v45 = vsub.f32 1.0, %v4437_v49 }
 0x8b0   : > { %v4575_v12 = vmul.f32 %v4404_v39, %v4222_v33  ;;  %v4192_v39 = vmax.f32 %v9095_v58, 0.0  ;;  %v4430_v58 = vand.u32 2147483647, %v9143_v21  ;;  %v4433_v34 = vor.u32 1.1754944e-38, %v4432_v46 }
 0x8b1   : > { %v5350_v32 = vmul.f32 -2.0, %v9178_v63  ;;  %v4425_v7 = vadd.f32 %v9172_v8, %v4424_v25  ;;  %v4439_v49 = vmul.f32 %v9195_v3, %v4438_v45  ;;  %v4447_v46 = vand.u32 2147483648, %v9166_v19 }
 0x8b2   : > { %v9208_v33 = vadd.f32 %v4575_v12, %v10189_v48  ;;  %v4208_v0 = vmul.f32 0.09801, %v4192_v39  ;;  %vm4431_vm11 = vcmp.eq.f32.partialorder %v4430_v58, 8.507059e+37 }
 0x8b3   : > { %v4303_v41 = vmul.f32 1.442695, %v5350_v32  ;;  %v5899_v40 = vpop.eup %5898  ;;  %v4419_v32 = vsel %vm4416_vm7, %v4418_v11, %v4414_v26  ;;  %v4429_v25 = vsel %vm4428_vm10, %v9172_v8, %v4425_v7  ;;  %v4193_v8 = vmax.f32 %v9110_v4, 0.0 }
 0x8b4   : > { %v9218_v48 = vpop.eup %5900  ;;  %v4576_v10 = vmul.f32 %v4419_v32, %v4223_v50  ;;  %v4434_v50 = vsel %vm4431_vm11, %v4433_v34, %v4429_v25  ;;  %v4440_v7 = vadd.f32 %v9195_v3, %v4439_v49 }
 0x8b5   : > { %4622 = vxpose.xlu1.b32.cont [4/16] %v9185_v51, 128  ;;  %5902 = vpow2.f32 %v4303_v41  ;;  %v4452_v11 = vmul.f32 %v9218_v48, %v9189_v62  ;;  %v4209_v25 = vmul.f32 0.09801, %v4193_v8  ;;  %v10194_v8 = vld [vmem:[#allocation36_spill] sm:$0xff]  ;;  %vm4457_vm0 = vweird.f32 %v9218_v48 }
 0x8b6   : > { %v4161_v18 = vpop.xlane.xlu2 %4160  ;;  %v9231_v32 = vadd.f32 %v4576_v10, %v10191_v23  ;;  %v4444_v49 = vsel %vm4443_vm14, %v9195_v3, %v4440_v7  ;;  %vm4458_vm2 = vmor %vm4456_vm1, %vm4457_vm0 }
 0x8b7   : > { %v9200_v24 = vadd.f32 -1.0, %v4161_v18  ;;  %v9212_v18 = vadd.f32 1.0, %v5899_v40  ;;  %v4453_v45 = vsub.f32 1.0, %v4452_v11  ;;  %v4225_v3 = vadd.f32 %v4209_v25, %v10194_v8  ;;  %v10195_v8 = vld [vmem:[#allocation46_spill] sm:$0xff] }
 0x8b9   : > { %v5351_v53 = vmul.f32 -2.0, %v9200_v24  ;;  %5904 = vrcp.f32 %v9212_v18  ;;  %v4454_v11 = vmul.f32 %v9218_v48, %v4453_v45  ;;  %vm4471_vm5 = vweird.f32 %v9212_v18 }
 0x8bb   : > { %v4305_v41 = vmul.f32 1.442695, %v5351_v53  ;;  %v5903_v26 = vpop.eup %5902  ;;  %v10192_v53 = vld [vmem:[#allocation33_spill] sm:$0xff]  ;;  %v4455_v7 = vadd.f32 %v9218_v48, %v4454_v11 }
 0x8bc   : > { %v4224_v39 = vadd.f32 %v4208_v0, %v10192_v53  ;;  %v4448_v53 = vor.u32 1.1754944e-38, %v4447_v46 }
 0x8bd   : > { %4623 = vxpose.xlu1.b32.cont [5/16] %v9208_v33, 128  ;;  %5906 = vpow2.f32 %v4305_v41  ;;  %v4445_v41 = vand.u32 2147483647, %v9166_v19  ;;  %v4459_v11 = vsel %vm4458_vm2, %v9218_v48, %v4455_v7  ;;  %v10196_v48 = vld [vmem:[#allocation41_spill] sm:$0xff] }
 0x8be   : > { %v4163_v12 = vpop.xlane.xlu1 %4162  ;;  %v4577_v58 = vmul.f32 %v4434_v50, %v4224_v39  ;;  %v10193_v39 = vld [vmem:[#allocation44_spill] sm:$0xff] }
 0x8bf   : > { %v9223_v40 = vadd.f32 -1.0, %v4163_v12  ;;  %v9235_v12 = vadd.f32 1.0, %v5903_v26  ;;  %v9241_v23 = vpop.eup %5904  ;;  %vm4446_vm15 = vcmp.eq.f32.partialorder %v4445_v41, 8.507059e+37 }
 0x8c0   : > { %v4467_v34 = vmul.f32 %v9241_v23, %v9212_v18  ;;  %v9254_v50 = vadd.f32 %v4577_v58, %v10193_v39  ;;  %v4462_v58 = vand.u32 2147483648, %v9189_v62  ;;  %vm4472_vm4 = vweird.f32 %v9241_v23 }
 0x8c1   : > { %v5352_v21 = vmul.f32 -2.0, %v9223_v40  ;;  %5908 = vrcp.f32 %v9235_v12  ;;  %vm4473_vm6 = vmor %vm4471_vm5, %vm4472_vm4  ;;  %vm4486_vm9 = vweird.f32 %v9235_v12 }
 0x8c2   : > { %v4468_v45 = vsub.f32 1.0, %v4467_v34 }
 0x8c3   : > { %v4307_v0 = vmul.f32 1.442695, %v5352_v21  ;;  %v5907_v26 = vpop.eup %5906  ;;  %v4449_v21 = vsel %vm4446_vm15, %v4448_v53, %v4444_v49 }
 0x8c4   : > { %v9258_v16 = vadd.f32 1.0, %v5907_v26  ;;  %v4469_v34 = vmul.f32 %v9241_v23, %v4468_v45 }
 0x8c5   : > { %4624 = vxpose.xlu1.b32.cont [6/16] %v9231_v32, 128  ;;  %5910 = vpow2.f32 %v4307_v0  ;;  %v4578_v0 = vmul.f32 %v4449_v21, %v4225_v3  ;;  %v4463_v21 = vor.u32 1.1754944e-38, %v4462_v58 }
 0x8c6   : > { %v4165_v10 = vpop.xlane.xlu1 %4164  ;;  %5912 = vrcp.f32 %v9258_v16  ;;  %v4470_v45 = vadd.f32 %v9241_v23, %v4469_v34  ;;  %vm4501_vm13 = vweird.f32 %v9258_v16 }
 0x8c7   : > { %v9247_v4 = vadd.f32 -1.0, %v4165_v10  ;;  %v4194_v10 = vmax.f32 %v9131_v54, 0.0  ;;  %v9264_v46 = vpop.eup %5908  ;;  %v4460_v54 = vand.u32 2147483647, %v9189_v62  ;;  %v9277_v3 = vadd.f32 %v4578_v0, %v10195_v8 }
 0x8c8   : > { %v4482_v53 = vmul.f32 %v9264_v46, %v9235_v12  ;;  %v4477_v0 = vand.u32 2147483648, %v9212_v18  ;;  %vm4487_vm8 = vweird.f32 %v9264_v46 }
 0x8c9   : > { %v5353_v19 = vmul.f32 -2.0, %v9247_v4  ;;  %v4210_v49 = vmul.f32 0.09801, %v4194_v10  ;;  %vm4461_vm3 = vcmp.eq.f32.partialorder %v4460_v54, 8.507059e+37  ;;  %v4195_v10 = vmax.f32 %v9155_v5, 0.0  ;;  %vm4488_vm10 = vmor %vm4486_vm9, %vm4487_vm8 }
 0x8ca   : > { %v4475_v5 = vand.u32 2147483647, %v9212_v18 }
 0x8cb   : > { %v4309_v26 = vmul.f32 1.442695, %v5353_v19  ;;  %v5911_v25 = vpop.eup %5910  ;;  %v4464_v19 = vsel %vm4461_vm3, %v4463_v21, %v4459_v11  ;;  %v4226_v7 = vadd.f32 %v4210_v49, %v10196_v48  ;;  %v4211_v11 = vmul.f32 0.09801, %v4195_v10  ;;  %v10197_v48 = vld [vmem:[#allocation15_spill] sm:$0xff] }
 0x8cc   : > { %v9281_v36 = vadd.f32 1.0, %v5911_v25  ;;  %v9287_v58 = vpop.eup %5912  ;;  %vm4476_vm7 = vcmp.eq.f32.partialorder %v4475_v5, 8.507059e+37 }
 0x8cd   : > { %4625 = vxpose.xlu1.b32.cont [7/16] %v9254_v50, 128  ;;  %5914 = vpow2.f32 %v4309_v26  ;;  %v4579_v26 = vmul.f32 %v4464_v19, %v4226_v7  ;;  %v4497_v8 = vmul.f32 %v9287_v58, %v9258_v16  ;;  %v4478_v19 = vor.u32 1.1754944e-38, %v4477_v0 }
 0x8ce   : > { %v4167_v41 = vpop.xlane.xlu1 %4166  ;;  %5916 = vrcp.f32 %v9281_v36  ;;  %vm4502_vm12 = vweird.f32 %v9287_v58  ;;  %vm4516_vm1 = vweird.f32 %v9281_v36 }
 0x8cf   : > { %v9274_v39 = vadd.f32 -1.0, %v4167_v41  ;;  %v4483_v41 = vsub.f32 1.0, %v4482_v53  ;;  %v4474_v53 = vsel %vm4473_vm6, %v9241_v23, %v4470_v45  ;;  %v9300_v7 = vadd.f32 %v4579_v26, %v10197_v48  ;;  %vm4503_vm14 = vmor %vm4501_vm13, %vm4502_vm12 }
 0x8d0   : > { %v4479_v10 = vsel %vm4476_vm7, %v4478_v19, %v4474_v53  ;;  %v4196_v23 = vmax.f32 %v9178_v63, 0.0  ;;  %v4492_v26 = vand.u32 2147483648, %v9235_v12  ;;  %v10198_v19 = vld [vmem:[#allocation53_spill] sm:$0xff] }
 0x8d1   : > { %v5354_v62 = vmul.f32 -2.0, %v9274_v39  ;;  %v4484_v21 = vmul.f32 %v9264_v46, %v4483_v41  ;;  %v4498_v41 = vsub.f32 1.0, %v4497_v8 }
 0x8d2   : > { %v4493_v8 = vor.u32 1.1754944e-38, %v4492_v26  ;;  %v4507_v26 = vand.u32 2147483648, %v9258_v16 }
 0x8d3   : > { %v4311_v25 = vmul.f32 1.442695, %v5354_v62  ;;  %v5915_v34 = vpop.eup %5914  ;;  %v4227_v62 = vadd.f32 %v4211_v11, %v8771_v6  ;;  %v4485_v45 = vadd.f32 %v9264_v46, %v4484_v21  ;;  %v4490_v6 = vand.u32 2147483647, %v9235_v12 }
 0x8d4   : > { %v9310_v0 = vpop.eup %5916  ;;  %v4212_v11 = vmul.f32 0.09801, %v4196_v23  ;;  %v4499_v53 = vmul.f32 %v9287_v58, %v4498_v41 }
 0x8d5   : > { %4626 = vxpose.xlu1.b32.cont [8/16] %v9277_v3, 128  ;;  %5918 = vpow2.f32 %v4311_v25  ;;  %v4580_v5 = vmul.f32 %v4479_v10, %v4227_v62  ;;  %v4512_v21 = vmul.f32 %v9310_v0, %v9281_v36  ;;  %vm4491_vm11 = vcmp.eq.f32.partialorder %v4490_v6, 8.507059e+37  ;;  %v10199_v10 = vld [vmem:[#allocation45_spill] sm:$0xff] }
 0x8d6   : > { %v4169_v54 = vpop.xlane.xlu1 %4168  ;;  %v4228_v23 = vadd.f32 %v4212_v11, %v10199_v10  ;;  %v4505_v6 = vand.u32 2147483647, %v9258_v16  ;;  %vm4517_vm0 = vweird.f32 %v9310_v0 }
 0x8d7   : > { %v9293_v49 = vadd.f32 -1.0, %v4169_v54  ;;  %v9304_v54 = vadd.f32 1.0, %v5915_v34  ;;  %v4489_v34 = vsel %vm4488_vm10, %v9264_v46, %v4485_v45  ;;  %v9321_v48 = vadd.f32 %v4580_v5, %v10198_v19  ;;  %vm4518_vm2 = vmor %vm4516_vm1, %vm4517_vm0 }
 0x8d8   : > { %v4494_v12 = vsel %vm4491_vm11, %v4493_v8, %v4489_v34  ;;  %v4500_v46 = vadd.f32 %v9287_v58, %v4499_v53  ;;  %v4513_v45 = vsub.f32 1.0, %v4512_v21  ;;  %v4508_v53 = vor.u32 1.1754944e-38, %v4507_v26  ;;  %v10200_v21 = vld [vmem:[#allocation7_spill] sm:$0xff] }
 0x8d9   : > { %v5355_v18 = vmul.f32 -2.0, %v9293_v49  ;;  %5920 = vrcp.f32 %v9304_v54  ;;  %v4581_v5 = vmul.f32 %v4494_v12, %v4228_v23  ;;  %vm4506_vm15 = vcmp.eq.f32.partialorder %v4505_v6, 8.507059e+37 }
 0x8da   : > { %v4514_v11 = vmul.f32 %v9310_v0, %v4513_v45  ;;  %vm4531_vm5 = vweird.f32 %v9304_v54 }
 0x8db   : > { %v4313_v25 = vmul.f32 1.442695, %v5355_v18  ;;  %v5919_v63 = vpop.eup %5918  ;;  %v4197_v18 = vmax.f32 %v9200_v24, 0.0  ;;  %v9338_v8 = vadd.f32 %v4581_v5, %v10200_v21 }
 0x8dc   : > { %v9324_v62 = vadd.f32 1.0, %v5919_v63  ;;  %v4504_v63 = vsel %vm4503_vm14, %v9287_v58, %v4500_v46  ;;  %v4515_v10 = vadd.f32 %v9310_v0, %v4514_v11  ;;  %v4522_v46 = vand.u32 2147483648, %v9281_v36 }
 0x8dd   : > { %4627 = vxpose.xlu1.b32.cont [9/16] %v9300_v7, 128  ;;  %5922 = vpow2.f32 %v4313_v25  ;;  %v4213_v24 = vmul.f32 0.09801, %v4197_v18  ;;  %v4509_v12 = vsel %vm4506_vm15, %v4508_v53, %v4504_v63  ;;  %v4198_v18 = vmax.f32 %v9223_v40, 0.0 }
 0x8de   : > { %5924 = vrcp.f32 %v9324_v62  ;;  %v4519_v40 = vsel %vm4518_vm2, %v9310_v0, %v4515_v10  ;;  %v4199_v11 = vmax.f32 %v9247_v4, 0.0  ;;  %v4537_v0 = vand.u32 2147483648, %v9304_v54 }
 0x8df   : > { %v5921_v41 = vpop.eup %5920  ;;  %v4229_v19 = vadd.f32 %v4213_v24, %v8798_v29  ;;  %v4520_v29 = vand.u32 2147483647, %v9281_v36  ;;  %v4214_v26 = vmul.f32 0.09801, %v4198_v18  ;;  %v4523_v24 = vor.u32 1.1754944e-38, %v4522_v46 }
 0x8e0   : > { %v4527_v34 = vmul.f32 %v5921_v41, %v9304_v54  ;;  %vm4532_vm4 = vweird.f32 %v5921_v41  ;;  %v4215_v18 = vmul.f32 0.09801, %v4199_v11  ;;  %v4538_v46 = vor.u32 1.1754944e-38, %v4537_v0 }
 0x8e1   : > { %v4582_v45 = vmul.f32 %v4509_v12, %v4229_v19  ;;  %vm4521_vm3 = vcmp.eq.f32.partialorder %v4520_v29, 8.507059e+37  ;;  %vm4533_vm6 = vmor %vm4531_vm5, %vm4532_vm4  ;;  %vm4546_vm9 = vweird.f32 %v9324_v62  ;;  %v4201_v0 = vmax.f32 %v9293_v49, 0.0 }
 0x8e2   : > { %v4528_v58 = vsub.f32 1.0, %v4527_v34  ;;  %v4524_v63 = vsel %vm4521_vm3, %v4523_v24, %v4519_v40  ;;  %v10201_v34 = vld [vmem:[#allocation48_spill] sm:$0xff] }
 0x8e3   : > { %v5923_v25 = vpop.eup %5922  ;;  %v4230_v53 = vadd.f32 %v4214_v26, %v10201_v34  ;;  %v4231_v26 = vadd.f32 %v4215_v18, %v8820_v31 }
 0x8e4   : > { %v9341_v16 = vadd.f32 1.0, %v5923_v25  ;;  %v5925_v23 = vpop.eup %5924  ;;  %v4529_v5 = vmul.f32 %v5921_v41, %v4528_v58  ;;  %v9354_v25 = vadd.f32 %v4582_v45, %v10095_v38  ;;  %v4535_v38 = vand.u32 2147483647, %v9304_v54  ;;  %v10202_v45 = vld [vmem:[#allocation20_spill] sm:$0xff] }
 0x8e5   : > { %4628 = vxpose.xlu1.b32.cont [10/16] %v9321_v48, 128  ;;  %v4542_v6 = vmul.f32 %v5925_v23, %v9324_v62  ;;  %v4583_v12 = vmul.f32 %v4524_v63, %v4230_v53  ;;  %vm4547_vm8 = vweird.f32 %v5925_v23  ;;  %v4552_v54 = vand.u32 2147483648, %v9324_v62 }
 0x8e6   : > { %5926 = vrcp.f32 %v9341_v16  ;;  %v4530_v36 = vadd.f32 %v5921_v41, %v4529_v5  ;;  %vm4536_vm7 = vcmp.eq.f32.partialorder %v4535_v38, 8.507059e+37  ;;  %v4200_v5 = vmax.f32 %v9274_v39, 0.0  ;;  %vm4548_vm10 = vmor %vm4546_vm9, %vm4547_vm8 }
 0x8e7   : > { %v4543_v21 = vsub.f32 1.0, %v4542_v6  ;;  %v9364_v29 = vadd.f32 %v4583_v12, %v10202_v45  ;;  %v4550_v63 = vand.u32 2147483647, %v9324_v62  ;;  %v4553_v31 = vor.u32 1.1754944e-38, %v4552_v54 }
 0x8e8   : > { %v4534_v10 = vsel %vm4533_vm6, %v5921_v41, %v4530_v36  ;;  %v4216_v11 = vmul.f32 0.09801, %v4200_v5  ;;  %v4567_v62 = vand.u32 2147483648, %v9341_v16  ;;  %vm4561_vm13 = vweird.f32 %v9341_v16 }
 0x8e9   : > { %v4544_v58 = vmul.f32 %v5925_v23, %v4543_v21  ;;  %v4539_v40 = vsel %vm4536_vm7, %v4538_v46, %v4534_v10  ;;  %vm4551_vm11 = vcmp.eq.f32.partialorder %v4550_v63, 8.507059e+37 }
 0x8ea   : > { %v4584_v41 = vmul.f32 %v4539_v40, %v4231_v26  ;;  %v4232_v21 = vadd.f32 %v4216_v11, %v8829_v13  ;;  %v4568_v10 = vor.u32 1.1754944e-38, %v4567_v62 }
 0x8eb   : > { %v4545_v6 = vadd.f32 %v5925_v23, %v4544_v58 }
 0x8ec   : > { %v5927_v19 = vpop.eup %5926  ;;  %v9373_v36 = vadd.f32 %v4584_v41, %v7779_v1  ;;  %v4217_v1 = vmul.f32 0.09801, %v4201_v0 }
 0x8ed   : > { %4629 = vxpose.xlu1.b32.cont [11/16] %v9338_v8, 128  ;;  %v4557_v4 = vmul.f32 %v5927_v19, %v9341_v16  ;;  %v4549_v34 = vsel %vm4548_vm10, %v5925_v23, %v4545_v6  ;;  %vm4562_vm12 = vweird.f32 %v5927_v19  ;;  %v4565_v23 = vand.u32 2147483647, %v9341_v16 }
 0x8ee   : > { %v4554_v39 = vsel %vm4551_vm11, %v4553_v31, %v4549_v34  ;;  %vm4563_vm14 = vmor %vm4561_vm13, %vm4562_vm12  ;;  %v4233_v49 = vadd.f32 %v4217_v1, %v8836_v60  ;;  %v4604_v6 = vmul.f32 %v8862_v37, %v7389_v42 }
 0x8ef   : > { %v4558_v24 = vsub.f32 1.0, %v4557_v4  ;;  %v4585_v38 = vmul.f32 %v4554_v39, %v4232_v21  ;;  %vm4566_vm15 = vcmp.eq.f32.partialorder %v4565_v23, 8.507059e+37 }
 0x8f1   : > { %v4559_v53 = vmul.f32 %v5927_v19, %v4558_v24  ;;  %v9382_v58 = vadd.f32 %v4585_v38, %v7789_v35 }
 0x8f3   : > { %v4560_v12 = vadd.f32 %v5927_v19, %v4559_v53 }
 0x8f5   : > { %4630 = vxpose.xlu1.b32.cont [12/16] %v9354_v25, 128  ;;  %v4564_v18 = vsel %vm4563_vm14, %v5927_v19, %v4560_v12  ;;  %v4603_v19 = vmul.f32 %v8851_v2, %v7377_v47 }
 0x8f6   : > { %v4569_v13 = vsel %vm4566_vm15, %v4568_v10, %v4564_v18  ;;  %v4606_v18 = vmul.f32 %v8884_v28, %v7416_v52 }
 0x8f7   : > { %v4586_v4 = vmul.f32 %v4569_v13, %v4233_v49 }
 0x8f9   : > { %v9387_v46 = vadd.f32 %v4586_v4, %v10104_v44 }
 0x8fd   : > { %4631 = vxpose.xlu1.b32.cont [13/16] %v9364_v29, 128 }
 0x905   : > { %4632 = vxpose.xlu1.b32.cont [14/16] %v9373_v36, 128 }
 0x90d   : > { %4633 = vxpose.xlu1.b32.cont [15/16] %v9382_v58, 128 }
 0x915   : > { %4634 = vxpose.xlu1.b32.end [16/16] %v9387_v46, 128 }
 0x941   : > { %v4635_v16 = vpop.trf.xlu1 }
 0x942   : > { %v4651_v45 = vadd.f32 %v4635_v16, %v9116_v57 }
 0x944   : > { %v4667_v35 = vmul.f32 %v4651_v45, %v4603_v19 }
 0x946   : > { %v4683_v26 = vmul.f32 0.00970299, %v4667_v35 }
 0x948   : > { %v4699_v40 = vsub.f32 %v8851_v2, %v4683_v26  ;;  %v4605_v2 = vmul.f32 %v8873_v43, %v7395_v30  ;;  %v4607_v26 = vmul.f32 %v8895_v9, %v7429_v14 }
 0x949   : > { %v4636_v5 = vpop.trf.xlu1 }
 0x94a   : > { %v4715_v60 = vand.u32 2147483647, %v4699_v40  ;;  %v4652_v44 = vadd.f32 %v4636_v5, %v9139_v61 }
 0x94c   : > { %v5356_v24 = vadd.f32 -0.00960596, %v4715_v60  ;;  %v4668_v54 = vmul.f32 %v4652_v44, %v4604_v6 }
 0x94e   : > { %v4747_v41 = vmax.f32 %v5356_v24, 0.0  ;;  %v4684_v63 = vmul.f32 0.00970299, %v4668_v54 }
 0x950   : > { %v5372_v11 = vclamps-f32 %v4747_v41, 1.0  ;;  %v4700_v34 = vsub.f32 %v8862_v37, %v4684_v63  ;;  %v4608_v63 = vmul.f32 %v8906_v15, %v7447_v59 }
 0x951   : > { %v4637_v53 = vpop.trf.xlu1 }
 0x952   : > { %v9398_v57 = vmul.f32 %v5372_v11, %v5372_v11  ;;  %v4716_v31 = vand.u32 2147483647, %v4700_v34  ;;  %v4653_v39 = vadd.f32 %v4637_v53, %v9162_v56 }
 0x954   : > { %v5357_v21 = vadd.f32 -0.00960596, %v4716_v31  ;;  %v4669_v0 = vmul.f32 %v4653_v39, %v4605_v2  ;;  %4811 = vxpose.xlu0.b32.start [1/16] %v9398_v57, 128 }
 0x956   : > { %v4748_v61 = vmax.f32 %v5357_v21, 0.0  ;;  %v4685_v12 = vmul.f32 0.00970299, %v4669_v0 }
 0x958   : > { %v5373_v62 = vclamps-f32 %v4748_v61, 1.0  ;;  %v4701_v38 = vsub.f32 %v8873_v43, %v4685_v12  ;;  %v4609_v61 = vmul.f32 %v8917_v20, %v7469_v27 }
 0x959   : > { %v4638_v23 = vpop.trf.xlu1 }
 0x95a   : > { %v9405_v37 = vmul.f32 %v5373_v62, %v5373_v62  ;;  %v4717_v1 = vand.u32 2147483647, %v4701_v38  ;;  %v4654_v10 = vadd.f32 %v4638_v23, %v9185_v51 }
 0x95c   : > { %v5358_v13 = vadd.f32 -0.00960596, %v4717_v1  ;;  %v4670_v56 = vmul.f32 %v4654_v10, %v4606_v18  ;;  %4812 = vxpose.xlu0.b32.cont [2/16] %v9405_v37, 128 }
 0x95e   : > { %v4749_v49 = vmax.f32 %v5358_v13, 0.0  ;;  %v4686_v4 = vmul.f32 0.00970299, %v4670_v56  ;;  %v4610_v56 = vmul.f32 %v8928_v17, %v7485_v55 }
 0x960   : > { %v5374_v16 = vclamps-f32 %v4749_v49, 1.0  ;;  %v4702_v19 = vsub.f32 %v8884_v28, %v4686_v4 }
 0x961   : > { %v4639_v45 = vpop.trf.xlu1 }
 0x962   : > { %v9412_v43 = vmul.f32 %v5374_v16, %v5374_v16  ;;  %v4718_v35 = vand.u32 2147483647, %v4702_v19  ;;  %v4655_v40 = vadd.f32 %v4639_v45, %v9208_v33 }
 0x964   : > { %v5359_v5 = vadd.f32 -0.00960596, %v4718_v35  ;;  %v4671_v51 = vmul.f32 %v4655_v40, %v4607_v26  ;;  %4813 = vxpose.xlu0.b32.cont [3/16] %v9412_v43, 128 }
 0x966   : > { %v4750_v60 = vmax.f32 %v5359_v5, 0.0  ;;  %v4687_v6 = vmul.f32 0.00970299, %v4671_v51  ;;  %v10203_v5 = vld [vmem:[#allocation50_spill] sm:$0xff] }
 0x967   : > { %v4611_v51 = vmul.f32 %v10203_v5, %v7499_v22 }
 0x968   : > { %v5375_v44 = vclamps-f32 %v4750_v60, 1.0  ;;  %v4703_v24 = vsub.f32 %v8895_v9, %v4687_v6 }
 0x969   : > { %v4640_v54 = vpop.trf.xlu1 }
 0x96a   : > { %v9419_v28 = vmul.f32 %v5375_v44, %v5375_v44  ;;  %v4719_v41 = vand.u32 2147483647, %v4703_v24  ;;  %v4656_v11 = vadd.f32 %v4640_v54, %v9231_v32 }
 0x96c   : > { %v5360_v34 = vadd.f32 -0.00960596, %v4719_v41  ;;  %v4672_v33 = vmul.f32 %v4656_v11, %v4608_v63  ;;  %4814 = vxpose.xlu0.b32.cont [4/16] %v9419_v28, 128 }
 0x96e   : > { %v4751_v53 = vmax.f32 %v5360_v34, 0.0  ;;  %v4688_v31 = vmul.f32 0.00970299, %v4672_v33  ;;  %v10204_v34 = vld [vmem:[#allocation25_spill] sm:$0xff]  ;;  %v10205_v33 = vld [vmem:[#allocation52_spill] sm:$0xff] }
 0x970   : > { %v5376_v2 = vclamps-f32 %v4751_v53, 1.0  ;;  %v4704_v39 = vsub.f32 %v8906_v15, %v4688_v31  ;;  %v4612_v53 = vmul.f32 %v10205_v33, %v10204_v34 }
 0x971   : > { %v4641_v21 = vpop.trf.xlu1 }
 0x972   : > { %v9426_v9 = vmul.f32 %v5376_v2, %v5376_v2  ;;  %v4720_v0 = vand.u32 2147483647, %v4704_v39  ;;  %v4657_v12 = vadd.f32 %v4641_v21, %v9254_v50 }
 0x974   : > { %v5361_v62 = vadd.f32 -0.00960596, %v4720_v0  ;;  %v4673_v32 = vmul.f32 %v4657_v12, %v4609_v61  ;;  %4815 = vxpose.xlu0.b32.cont [5/16] %v9426_v9, 128 }
 0x976   : > { %v4752_v38 = vmax.f32 %v5361_v62, 0.0  ;;  %v4689_v23 = vmul.f32 0.00970299, %v4673_v32 }
 0x978   : > { %v5377_v1 = vclamps-f32 %v4752_v38, 1.0  ;;  %v4705_v18 = vsub.f32 %v8917_v20, %v4689_v23  ;;  %v10206_v38 = vld [vmem:[#allocation31_spill] sm:$0xff] }
 0x979   : > { %v4642_v10 = vpop.trf.xlu1  ;;  %v10207_v23 = vld [vmem:[#allocation55_spill] sm:$0xff] }
 0x97a   : > { %v9433_v15 = vmul.f32 %v5377_v1, %v5377_v1  ;;  %v4721_v13 = vand.u32 2147483647, %v4705_v18  ;;  %v4658_v49 = vadd.f32 %v4642_v10, %v9277_v3  ;;  %v4613_v1 = vmul.f32 %v10207_v23, %v10206_v38 }
 0x97c   : > { %v5362_v4 = vadd.f32 -0.00960596, %v4721_v13  ;;  %v4674_v50 = vmul.f32 %v4658_v49, %v4610_v56  ;;  %4816 = vxpose.xlu0.b32.cont [6/16] %v9433_v15, 128 }
 0x97e   : > { %v4753_v16 = vmax.f32 %v5362_v4, 0.0  ;;  %v4690_v19 = vmul.f32 0.00970299, %v4674_v50 }
 0x980   : > { %v5378_v45 = vclamps-f32 %v4753_v16, 1.0  ;;  %v4706_v35 = vsub.f32 %v8928_v17, %v4690_v19 }
 0x981   : > { %v4643_v26 = vpop.trf.xlu1 }
 0x982   : > { %v9440_v20 = vmul.f32 %v5378_v45, %v5378_v45  ;;  %v4722_v40 = vand.u32 2147483647, %v4706_v35  ;;  %v4659_v60 = vadd.f32 %v4643_v26, %v9300_v7  ;;  %v10208_v45 = vld [vmem:[#allocation16_spill] sm:$0xff]  ;;  %v10209_v35 = vld [vmem:[#allocation58_spill] sm:$0xff] }
 0x983   : > { %v4614_v26 = vmul.f32 %v10209_v35, %v10208_v45 }
 0x984   : > { %v5363_v6 = vadd.f32 -0.00960596, %v4722_v40  ;;  %v4675_v3 = vmul.f32 %v4659_v60, %v4611_v51  ;;  %4817 = vxpose.xlu0.b32.cont [7/16] %v9440_v20, 128 }
 0x986   : > { %v4754_v44 = vmax.f32 %v5363_v6, 0.0  ;;  %v4691_v24 = vmul.f32 0.00970299, %v4675_v3 }
 0x988   : > { %v5379_v54 = vclamps-f32 %v4754_v44, 1.0  ;;  %v4707_v41 = vsub.f32 %v10203_v5, %v4691_v24 }
 0x989   : > { %v4644_v63 = vpop.trf.xlu1 }
 0x98a   : > { %v9447_v17 = vmul.f32 %v5379_v54, %v5379_v54  ;;  %v4723_v11 = vand.u32 2147483647, %v4707_v41  ;;  %v4660_v31 = vadd.f32 %v4644_v63, %v9321_v48  ;;  %v10210_v41 = vld [vmem:[#allocation6_spill] sm:$0xff]  ;;  %v10211_v63 = vld [vmem:[#allocation19_spill] sm:$0xff] }
 0x98c   : > { %v5364_v2 = vadd.f32 -0.00960596, %v4723_v11  ;;  %v4676_v7 = vmul.f32 %v4660_v31, %v4612_v53  ;;  %4818 = vxpose.xlu0.b32.cont [8/16] %v9447_v17, 128  ;;  %v4615_v11 = vmul.f32 %v10211_v63, %v10210_v41 }
 0x98e   : > { %v4755_v39 = vmax.f32 %v5364_v2, 0.0  ;;  %v4692_v21 = vmul.f32 0.00970299, %v4676_v7 }
 0x990   : > { %v5380_v0 = vclamps-f32 %v4755_v39, 1.0  ;;  %v4708_v61 = vsub.f32 %v10205_v33, %v4692_v21 }
 0x991   : > { %v4645_v12 = vpop.trf.xlu1 }
 0x992   : > { %v9454_v62 = vmul.f32 %v5380_v0, %v5380_v0  ;;  %v4724_v32 = vand.u32 2147483647, %v4708_v61  ;;  %v4661_v18 = vadd.f32 %v4645_v12, %v9338_v8  ;;  %v10212_v12 = vld [vmem:[#allocation27_spill] sm:$0xff] }
 0x994   : > { %v5365_v10 = vadd.f32 -0.00960596, %v4724_v32  ;;  %v4677_v48 = vmul.f32 %v4661_v18, %v4613_v1  ;;  %4819 = vxpose.xlu0.b32.cont [9/16] %v9454_v62, 128  ;;  %v10213_v32 = vld [vmem:[#allocation21_spill] sm:$0xff] }
 0x996   : > { %v4756_v13 = vmax.f32 %v5365_v10, 0.0  ;;  %v4693_v56 = vmul.f32 0.00970299, %v4677_v48 }
 0x998   : > { %v5381_v49 = vclamps-f32 %v4756_v13, 1.0  ;;  %v4709_v4 = vsub.f32 %v10207_v23, %v4693_v56  ;;  %v4616_v23 = vmul.f32 %v10213_v32, %v10212_v12 }
 0x999   : > { %v4646_v50 = vpop.trf.xlu1 }
 0x99a   : > { %v9461_v16 = vmul.f32 %v5381_v49, %v5381_v49  ;;  %v4725_v19 = vand.u32 2147483647, %v4709_v4  ;;  %v4662_v40 = vadd.f32 %v4646_v50, %v9354_v25 }
 0x99c   : > { %v5366_v5 = vadd.f32 -0.00960596, %v4725_v19  ;;  %v4678_v8 = vmul.f32 %v4662_v40, %v4614_v26  ;;  %4820 = vxpose.xlu0.b32.cont [10/16] %v9461_v16, 128  ;;  %v10214_v19 = vld [vmem:[#allocation5_spill] sm:$0xff] }
 0x99e   : > { %v4757_v51 = vmax.f32 %v5366_v5, 0.0  ;;  %v4694_v60 = vmul.f32 0.00970299, %v4678_v8 }
 0x9a0   : > { %v5382_v6 = vclamps-f32 %v4757_v51, 1.0  ;;  %v4710_v3 = vsub.f32 %v10209_v35, %v4694_v60  ;;  %v10215_v35 = vld [vmem:[#allocation22_spill] sm:$0xff] }
 0x9a1   : > { %v4647_v44 = vpop.trf.xlu1  ;;  %v4617_v26 = vmul.f32 %v10215_v35, %v10214_v19 }
 0x9a2   : > { %v9468_v24 = vmul.f32 %v5382_v6, %v5382_v6  ;;  %v4726_v54 = vand.u32 2147483647, %v4710_v3  ;;  %v4663_v33 = vadd.f32 %v4647_v44, %v9364_v29 }
 0x9a4   : > { %v5367_v53 = vadd.f32 -0.00960596, %v4726_v54  ;;  %v4679_v25 = vmul.f32 %v4663_v33, %v4615_v11  ;;  %4821 = vxpose.xlu0.b32.cont [11/16] %v9468_v24, 128  ;;  %v10217_v11 = vld [vmem:[#allocation26_spill] sm:$0xff] }
 0x9a6   : > { %v4758_v31 = vmax.f32 %v5367_v53, 0.0  ;;  %v4695_v2 = vmul.f32 0.00970299, %v4679_v25 }
 0x9a8   : > { %v5383_v7 = vclamps-f32 %v4758_v31, 1.0  ;;  %v4711_v39 = vsub.f32 %v10211_v63, %v4695_v2  ;;  %v10216_v63 = vld [vmem:[#allocation17_spill] sm:$0xff] }
 0x9a9   : > { %v4648_v21 = vpop.trf.xlu1  ;;  %v4618_v33 = vmul.f32 %v10217_v11, %v10216_v63 }
 0x9aa   : > { %v9475_v0 = vmul.f32 %v5383_v7, %v5383_v7  ;;  %v4727_v61 = vand.u32 2147483647, %v4711_v39  ;;  %v4664_v1 = vadd.f32 %v4648_v21, %v9373_v36 }
 0x9ac   : > { %v5368_v18 = vadd.f32 -0.00960596, %v4727_v61  ;;  %v4680_v29 = vmul.f32 %v4664_v1, %v4616_v23  ;;  %4822 = vxpose.xlu0.b32.cont [12/16] %v9475_v0, 128 }
 0x9ae   : > { %v4759_v10 = vmax.f32 %v5368_v18, 0.0  ;;  %v4696_v48 = vmul.f32 0.00970299, %v4680_v29 }
 0x9b0   : > { %v5384_v13 = vclamps-f32 %v4759_v10, 1.0  ;;  %v4712_v56 = vsub.f32 %v10213_v32, %v4696_v48 }
 0x9b1   : > { %v4649_v49 = vpop.trf.xlu1 }
 0x9b2   : > { %v9482_v4 = vmul.f32 %v5384_v13, %v5384_v13  ;;  %v4728_v50 = vand.u32 2147483647, %v4712_v56  ;;  %v4665_v40 = vadd.f32 %v4649_v49, %v9382_v58 }
 0x9b4   : > { %v5369_v5 = vadd.f32 -0.00960596, %v4728_v50  ;;  %v4681_v36 = vmul.f32 %v4665_v40, %v4617_v26  ;;  %4823 = vxpose.xlu0.b32.cont [13/16] %v9482_v4, 128 }
 0x9b6   : > { %v4760_v8 = vmax.f32 %v5369_v5, 0.0  ;;  %v4697_v51 = vmul.f32 0.00970299, %v4681_v36 }
 0x9b8   : > { %v5385_v60 = vclamps-f32 %v4760_v8, 1.0  ;;  %v4713_v6 = vsub.f32 %v10215_v35, %v4697_v51 }
 0x9b9   : > { %v4650_v3 = vpop.trf.xlu1 }
 0x9ba   : > { %v9489_v44 = vmul.f32 %v5385_v60, %v5385_v60  ;;  %v4729_v54 = vand.u32 2147483647, %v4713_v6  ;;  %v4666_v53 = vadd.f32 %v4650_v3, %v9387_v46 }
 0x9bc   : > { %v5370_v25 = vadd.f32 -0.00960596, %v4729_v54  ;;  %v4682_v58 = vmul.f32 %v4666_v53, %v4618_v33  ;;  %4824 = vxpose.xlu0.b32.cont [14/16] %v9489_v44, 128 }
 0x9be   : > { %v4761_v31 = vmax.f32 %v5370_v25, 0.0  ;;  %v4698_v2 = vmul.f32 0.00970299, %v4682_v58 }
 0x9c0   : > { %v5386_v7 = vclamps-f32 %v4761_v31, 1.0  ;;  %v4714_v39 = vsub.f32 %v10217_v11, %v4698_v2 }
 0x9c2   : > { %v9496_v21 = vmul.f32 %v5386_v7, %v5386_v7  ;;  %v4730_v61 = vand.u32 2147483647, %v4714_v39 }
 0x9c4   : > { %v5371_v32 = vadd.f32 -0.00960596, %v4730_v61  ;;  %4825 = vxpose.xlu0.b32.cont [15/16] %v9496_v21, 128 }
 0x9c6   : > { %v4762_v23 = vmax.f32 %v5371_v32, 0.0 }
 0x9c8   : > { %v5387_v1 = vclamps-f32 %v4762_v23, 1.0 }
 0x9ca   : > { %v9499_v46 = vmul.f32 %v5387_v1, %v5387_v1 }
 0x9cc   : > { %4826 = vxpose.xlu0.b32.end [16/16] %v9499_v46, 128 }
 0x9f8   : > { %v4827_v18 = vpop.trf.xlu0 }
 0x9f9   : > { %v4843_v29 = vadd.f32 %v4827_v18, %v9398_v57 }
 0x9fb   : > { %v4859_v10 = vmul.f32 0.5, %v4843_v29 }
 0x9fd   : > { %v4875_v48 = vmul.f32 %v4859_v10, %v7377_v47 }
 0x9ff   : > { %5388 = vst [vmem:[%s7988_s11 + $0x180] sm:$0xff] %v4875_v48 }
 0xa00   : > { %v4828_v13 = vpop.trf.xlu0 }
 0xa01   : > { %v4844_v56 = vadd.f32 %v4828_v13, %v9405_v37 }
 0xa03   : > { %v4860_v49 = vmul.f32 0.5, %v4844_v56 }
 0xa05   : > { %v4876_v50 = vmul.f32 %v4860_v49, %v7389_v42 }
 0xa07   : > { %5389 = vst [vmem:[%s7988_s11 + $0x188] sm:$0xff] %v4876_v50 }
 0xa08   : > { %v4829_v35 = vpop.trf.xlu0 }
 0xa09   : > { %v4845_v26 = vadd.f32 %v4829_v35, %v9412_v43 }
 0xa0b   : > { %v4861_v40 = vmul.f32 0.5, %v4845_v26 }
 0xa0d   : > { %v4877_v5 = vmul.f32 %v4861_v40, %v7395_v30 }
 0xa0f   : > { %5390 = vst [vmem:[%s7988_s11 + $0x190] sm:$0xff] %v4877_v5 }
 0xa10   : > { %v4830_v57 = vpop.trf.xlu0 }
 0xa11   : > { %v4846_v47 = vadd.f32 %v4830_v57, %v9419_v28 }
 0xa13   : > { %v4862_v36 = vmul.f32 0.5, %v4846_v47 }
 0xa15   : > { %v4878_v8 = vmul.f32 %v4862_v36, %v7416_v52 }
 0xa17   : > { %5391 = vst [vmem:[%s7988_s11 + $0x198] sm:$0xff] %v4878_v8 }
 0xa18   : > { %v4831_v37 = vpop.trf.xlu0 }
 0xa19   : > { %v4847_v42 = vadd.f32 %v4831_v37, %v9426_v9 }
 0xa1b   : > { %v4863_v51 = vmul.f32 0.5, %v4847_v42 }
 0xa1d   : > { %v4879_v60 = vmul.f32 %v4863_v51, %v7429_v14 }
 0xa1f   : > { %5392 = vst [vmem:[%s7988_s11 + $0x1a0] sm:$0xff] %v4879_v60 }
 0xa20   : > { %v4832_v43 = vpop.trf.xlu0 }
 0xa21   : > { %v4848_v30 = vadd.f32 %v4832_v43, %v9433_v15 }
 0xa23   : > { %v4864_v6 = vmul.f32 0.5, %v4848_v30 }
 0xa25   : > { %v4880_v3 = vmul.f32 %v4864_v6, %v7447_v59 }
 0xa27   : > { %5393 = vst [vmem:[%s7988_s11 + $0x1a8] sm:$0xff] %v4880_v3 }
 0xa28   : > { %v4833_v28 = vpop.trf.xlu0 }
 0xa29   : > { %v4849_v52 = vadd.f32 %v4833_v28, %v9440_v20 }
 0xa2b   : > { %v4865_v54 = vmul.f32 0.5, %v4849_v52 }
 0xa2d   : > { %v4881_v11 = vmul.f32 %v4865_v54, %v7469_v27 }
 0xa2f   : > { %5394 = vst [vmem:[%s7988_s11 + $0x1b0] sm:$0xff] %v4881_v11 }
 0xa30   : > { %v4834_v9 = vpop.trf.xlu0 }
 0xa31   : > { %v4850_v14 = vadd.f32 %v4834_v9, %v9447_v17 }
 0xa33   : > { %v4866_v33 = vmul.f32 0.5, %v4850_v14 }
 0xa35   : > { %v4882_v53 = vmul.f32 %v4866_v33, %v7485_v55 }
 0xa37   : > { %5395 = vst [vmem:[%s7988_s11 + $0x1b8] sm:$0xff] %v4882_v53 }
 0xa38   : > { %v4835_v15 = vpop.trf.xlu0 }
 0xa39   : > { %v4851_v59 = vadd.f32 %v4835_v15, %v9454_v62 }
 0xa3b   : > { %v4867_v25 = vmul.f32 0.5, %v4851_v59 }
 0xa3d   : > { %v4883_v58 = vmul.f32 %v4867_v25, %v7499_v22 }
 0xa3f   : > { %5396 = vst [vmem:[%s7988_s11 + $0x1c0] sm:$0xff] %v4883_v58 }
 0xa40   : > { %v4836_v20 = vpop.trf.xlu0 }
 0xa41   : > { %v4852_v27 = vadd.f32 %v4836_v20, %v9461_v16 }
 0xa43   : > { %v4868_v31 = vmul.f32 0.5, %v4852_v27 }
 0xa45   : > { %v4884_v2 = vmul.f32 %v4868_v31, %v10204_v34 }
 0xa47   : > { %5397 = vst [vmem:[%s7988_s11 + $0x1c8] sm:$0xff] %v4884_v2 }
 0xa48   : > { %v4837_v17 = vpop.trf.xlu0 }
 0xa49   : > { %v4853_v55 = vadd.f32 %v4837_v17, %v9468_v24 }
 0xa4b   : > { %v4869_v7 = vmul.f32 0.5, %v4853_v55 }
 0xa4d   : > { %v4885_v39 = vmul.f32 %v4869_v7, %v10206_v38 }
 0xa4f   : > { %5398 = vst [vmem:[%s7988_s11 + $0x1d0] sm:$0xff] %v4885_v39 }
 0xa50   : > { %v4838_v62 = vpop.trf.xlu0 }
 0xa51   : > { %v4854_v22 = vadd.f32 %v4838_v62, %v9475_v0 }
 0xa53   : > { %v4870_v61 = vmul.f32 0.5, %v4854_v22 }
 0xa55   : > { %v4886_v16 = vmul.f32 %v4870_v61, %v10208_v45 }
 0xa57   : > { %5399 = vst [vmem:[%s7988_s11 + $0x1d8] sm:$0xff] %v4886_v16 }
 0xa58   : > { %v4839_v32 = vpop.trf.xlu0 }
 0xa59   : > { %v4855_v34 = vadd.f32 %v4839_v32, %v9482_v4 }
 0xa5b   : > { %v4871_v23 = vmul.f32 0.5, %v4855_v34 }
 0xa5d   : > { %v4887_v24 = vmul.f32 %v4871_v23, %v10210_v41 }
 0xa5f   : > { %5400 = vst [vmem:[%s7988_s11 + $0x1e0] sm:$0xff] %v4887_v24 }
 0xa60   : > { %v4840_v38 = vpop.trf.xlu0 }
 0xa61   : > { %v4856_v1 = vadd.f32 %v4840_v38, %v9489_v44 }
 0xa63   : > { %v4872_v18 = vmul.f32 0.5, %v4856_v1 }
 0xa65   : > { %v4888_v0 = vmul.f32 %v4872_v18, %v10212_v12 }
 0xa67   : > { %5401 = vst [vmem:[%s7988_s11 + $0x1e8] sm:$0xff] %v4888_v0 }
 0xa68   : > { %v4841_v29 = vpop.trf.xlu0 }
 0xa69   : > { %v4857_v45 = vadd.f32 %v4841_v29, %v9496_v21 }
 0xa6b   : > { %v4873_v10 = vmul.f32 0.5, %v4857_v45 }
 0xa6d   : > { %v4889_v4 = vmul.f32 %v4873_v10, %v10214_v19 }
 0xa6f   : > { %5402 = vst [vmem:[%s7988_s11 + $0x1f0] sm:$0xff] %v4889_v4 }
 0xa70   : > { %v4842_v41 = vpop.trf.xlu0 }
 0xa71   : > { %v4858_v44 = vadd.f32 %v4842_v41, %v9499_v46 }
 0xa73   : > { %v4874_v12 = vmul.f32 0.5, %v4858_v44 }
 0xa75   : > { %v4890_v21 = vmul.f32 %v4874_v12, %v10216_v63 }
 0xa77   : > { %5403 = vst [vmem:[%s7988_s11 + $0x1f8] sm:$0xff] %v4890_v21 }
 0xa78   : > { %5961 = shalt.err (!%p5958_p3)
}
 0xa79   : > { %s6002_s7 = smov 128   ;;  %s6003_s8 = smov 8  }
 0xa7a   : > { %5412 = dma.vmem_to_hbm [thread:$0]  (%p6062_p5), %s4922_s25, 8192, %s4924_s26, %s4909_s16, %s6002_s7, %s6002_s7, %s6003_s8  }
 0xa7b PF: > { %p5418_p4 = scmp.ge.s32.totalorder %s5996_s15, 2  ;;  %s4938_s9 = sand.u32 1, %s5984_s12  }
 0xa7c   : > { %s4939_s10 = scalar_lea.sflag [#allocation3], %s4938_s9 }
 0xa7d   : > { %p5415_p7 = pnand %p5418_p4, %p6066_p6 }
 0xa7f   : > { %p5416_p8 = pneg %p5415_p7 }
 0xa81   : > { %5979 = dma.done.wait (%p5416_p8), %s4939_s10, 8192  }
 0xa82   : > { %5981 = vsyncadd (%p5416_p8), %s4939_s10, 4294959104  ;;  %p13_p9 = scmp.ge.s32.totalorder %s6049_s18, 4   ;;  %s10218_s12 = smov %s5988_s13 }
 0xa83   : > { %s10219_s13 = smov %s5992_s14  ;;  %s10220_s14 = smov %s6060_s21 }
 0xa84   : > { %s10221_s15 = smov %s6049_s18  ;;  %15 = sbr.rel (!%p13_p9) target bundleno = 3 (0x3), region = 76 }
 0xa89   :  { %4945 = vsyncpa [#allocation3], 1 }
 0xa8a   :  { %4947 = vsyncpa [#allocation3 + $0x1], 1 }

</bundles_post_ra>
